<compile_context>
chip_gen: v7x
topology: tpu7x:2x2x1
jax: 0.10.0
libtpu: 0.0.40
codegen_flags: <defaults>
</compile_context>

<pallas_src>
import jax
import jax.numpy as jnp
from jax.experimental import pallas as pl
from jax.experimental.pallas import tpu as pltpu

BATCH = 2
NUM_CLASSES = 10      # args.num_classes for MNIST


# ---------------------------------------------------------------------------
# Fused Pallas kernel: conv1 -> pool -> relu -> conv2 -> pool -> relu ->
#                      fc1 -> relu -> fc2 -> relu -> fc3 -> log_softmax
# ---------------------------------------------------------------------------
def cnn_mnist_kernel(p1_ref, w1_ref, b1_ref, w2_ref, b2_ref,
                     fc1w_ref, fc1b_ref, fc2w_ref, fc2b_ref, fc3w_ref, fc3b_ref,
                     out_ref, a1_scr, c2_scr):
    B = out_ref.shape[0]
    HP, WP = 12, 16                      # pooled conv1 spatial (W padded 12 -> 16)
    R = B * HP * WP                      # rows per pooling-parity block

    # ---- conv1 (im2col matmul) + 2x2 maxpool + ReLU -----------------------
    # p1 rows are ordered (dy, dx, b, ho, wp): the 2x2 max-pool is a max over
    # the four contiguous R-row blocks.  Bias is added after the max (constant).
    m1 = None
    for q in range(4):
        cq = jnp.dot(p1_ref[q * R:(q + 1) * R, :], w1_ref[...],
                     preferred_element_type=jnp.float32)
        m1 = cq if m1 is None else jnp.maximum(m1, cq)
    a1 = jnp.maximum(m1 + b1_ref[...], 0.0)              # (R, 64), rows (b, ho, wp)
    a1_scr[...] = a1.reshape(B, HP, WP, 64)               # tile-aligned reshape

    # ---- conv2: 25 accumulated matmuls over shifted 8x8 windows ------------
    acc = jnp.zeros((B * 64, 64), jnp.float32) + b2_ref[...]
    for k in range(25):
        ky, kx = divmod(k, 5)
        patch = a1_scr[:, ky:ky + 8, kx:kx + 8, :]         # (B, 8, 8, 64)
        acc = acc + jnp.dot(patch.reshape(B * 64, 64), w2_ref[k],
                            preferred_element_type=jnp.float32)
    # TODO(synk): nn.Dropout2d is identity in eval mode; not implemented for training.
    c2_scr[...] = acc.reshape(B, 8, 8, 64)                 # tile-aligned reshape

    # ---- 2x2 maxpool + ReLU + flatten fused into the fc1 matmul ------------
    # fc1 accumulates 16 per-position (B,64)@(64,128) matmuls; the fc1 weights were
    # pre-permuted in the wrapper so block s = ho*4+wo matches this flatten order.
    z1 = jnp.zeros((B, 128), jnp.float32) + fc1b_ref[...]
    for ho in range(4):
        for wo in range(4):
            v = jnp.maximum(
                jnp.maximum(c2_scr[:, 2 * ho, 2 * wo, :],
                            c2_scr[:, 2 * ho, 2 * wo + 1, :]),
                jnp.maximum(c2_scr[:, 2 * ho + 1, 2 * wo, :],
                            c2_scr[:, 2 * ho + 1, 2 * wo + 1, :]))
            v = jnp.maximum(v, 0.0)                        # (B, 64)
            s = ho * 4 + wo
            z1 = z1 + jnp.dot(v, fc1w_ref[s * 64:(s + 1) * 64, :],
                              preferred_element_type=jnp.float32)
    z1 = jnp.maximum(z1, 0.0)                              # (B, 128)

    # ---- fc2 + ReLU, fc3, log_softmax --------------------------------------
    z2 = jnp.maximum(
        jnp.dot(z1, fc2w_ref[...], preferred_element_type=jnp.float32) + fc2b_ref[...],
        0.0)                                               # (B, 64)
    logits = (jnp.dot(z2, fc3w_ref[...], preferred_element_type=jnp.float32)
              + fc3b_ref[...])                             # (B, num_classes)
    m = jnp.max(logits, axis=1, keepdims=True)
    lse = jnp.log(jnp.sum(jnp.exp(logits - m), axis=1, keepdims=True)) + m
    out_ref[...] = (logits - lse).astype(out_ref.dtype)


# ---------------------------------------------------------------------------
# Wrapper: layout plumbing (im2col, weight repacking) + one pallas_call
# ---------------------------------------------------------------------------
def _im2col_pool_ordered(x):
    """conv1 im2col patches, rows ordered (dy, dx, b, ho, wp) with wp padded 12->16.

    Row ((dy*2+dx)*B + b)*192 + ho*16 + wp holds the 5x5 input patch for conv1
    output position (h=2*ho+dy, w=2*wp+dx); wp in [12,16) are zero rows (never read).
    """
    B = x.shape[0]
    xs = x[:, 0]                                           # (B, 28, 28)
    cols = [xs[:, ky:ky + 24, kx:kx + 24]                  # (B, 24, 24)
            for ky in range(5) for kx in range(5)]
    pat = jnp.stack(cols, axis=-1)                         # (B, 24, 24, 25)
    blocks = []
    for dy in range(2):
        for dx in range(2):
            blk = pat[:, dy::2, dx::2, :]                  # (B, 12, 12, 25)
            blk = jnp.pad(blk, ((0, 0), (0, 0), (0, 4), (0, 0)))  # (B, 12, 16, 25)
            blocks.append(blk)
    return jnp.stack(blocks, axis=0).reshape(4 * B * 12 * 16, 25)


@jax.jit
def cnn_mnist_forward(x, params):
    """x: (B, 1, 28, 28) f32; params in PyTorch layouts.  Returns (B, num_classes) log-probs."""
    B = x.shape[0]
    p1 = _im2col_pool_ordered(x.astype(jnp.float32))       # (4*B*192, 25)

    # Repack torch-layout weights into kernel layouts (free layout plumbing).
    w1 = params["conv1_w"].reshape(64, 25).T               # (25, 64)   p = ky*5+kx
    b1 = params["conv1_b"].reshape(1, 64)
    w2 = params["conv2_w"].transpose(2, 3, 1, 0).reshape(25, 64, 64)   # [k][cin,cout]
    b2 = params["conv2_b"].reshape(1, 64)
    # fc1: torch flat index = c*16 + h*4 + w  ->  kernel block s=h*4+w, channel-major rows
    fc1w = params["fc1_w"].reshape(128, 64, 4, 4).transpose(2, 3, 1, 0).reshape(1024, 128)
    fc1b = params["fc1_b"].reshape(1, 128)
    fc2w = params["fc2_w"].T                               # (128, 64)
    fc2b = params["fc2_b"].reshape(1, 64)
    fc3w = params["fc3_w"].T                               # (64, num_classes)
    fc3b = params["fc3_b"].reshape(1, NUM_CLASSES)

    return pl.pallas_call(
        cnn_mnist_kernel,
        out_shape=jax.ShapeDtypeStruct((B, NUM_CLASSES), jnp.float32),
        scratch_shapes=[pltpu.VMEM((B, 12, 16, 64), jnp.float32),
                        pltpu.VMEM((B, 8, 8, 64), jnp.float32)],
    )(p1, w1, b1, w2, b2, fc1w, fc1b, fc2w, fc2b, fc3w, fc3b)


# ---------------------------------------------------------------------------
# Pure-JAX reference (mirrors the PyTorch forward exactly, eval mode)
# ---------------------------------------------------------------------------
def cnn_mnist_ref(x, params):
    hp = jax.lax.Precision.HIGHEST
    B = x.shape[0]
    y = jax.lax.conv_general_dilated(
        x, params["conv1_w"], (1, 1), "VALID",
        dimension_numbers=("NCHW", "OIHW", "NCHW"), precision=hp)
    y = y + params["conv1_b"][None, :, None, None]
    y = y.reshape(B, 64, 12, 2, 12, 2).max(axis=(3, 5))    # max_pool2d(.,2)
    y = jnp.maximum(y, 0.0)
    y = jax.lax.conv_general_dilated(
        y, params["conv2_w"], (1, 1), "VALID",
        dimension_numbers=("NCHW", "OIHW", "NCHW"), precision=hp)
    y = y + params["conv2_b"][None, :, None, None]
    # Dropout2d: identity at inference.
    y = y.reshape(B, 64, 4, 2, 4, 2).max(axis=(3, 5))
    y = jnp.maximum(y, 0.0)
    y = y.reshape(B, 1024)                                 # NCHW flatten (c, h, w)
    y = jnp.maximum(jnp.dot(y, params["fc1_w"].T, precision=hp) + params["fc1_b"], 0.0)
    y = jnp.maximum(jnp.dot(y, params["fc2_w"].T, precision=hp) + params["fc2_b"], 0.0)
    logits = jnp.dot(y, params["fc3_w"].T, precision=hp) + params["fc3_b"]
    return jax.nn.log_softmax(logits, axis=1)


# ---------------------------------------------------------------------------
# Deterministic parameter construction (PyTorch layouts)
# ---------------------------------------------------------------------------
def make_params(key):
    ks = jax.random.split(key, 10)

    def wn(k, shape, fan_in):
        return jax.random.normal(k, shape, jnp.float32) / jnp.sqrt(jnp.float32(fan_in))

    def bn(k, shape):
        return jax.random.uniform(k, shape, jnp.float32, -0.1, 0.1)

    return {
        "conv1_w": wn(ks[0], (64, 1, 5, 5), 25),
        "conv1_b": bn(ks[1], (64,)),
        "conv2_w": wn(ks[2], (64, 64, 5, 5), 64 * 25),
        "conv2_b": bn(ks[3], (64,)),
        "fc1_w": wn(ks[4], (128, 1024), 1024),
        "fc1_b": bn(ks[5], (128,)),
        "fc2_w": wn(ks[6], (64, 128), 128),
        "fc2_b": bn(ks[7], (64,)),
        "fc3_w": wn(ks[8], (NUM_CLASSES, 64), 64),
        "fc3_b": bn(ks[9], (NUM_CLASSES,)),
    }


if __name__ == "__main__":
    key = jax.random.PRNGKey(0)
    kp, kx = jax.random.split(key)
    params = make_params(kp)

    x = jax.random.normal(kx, (BATCH, 1, 28, 28), jnp.float32)

    out = cnn_mnist_forward(x, params)
    out = jax.block_until_ready(out)

    ref = cnn_mnist_ref(x, params)
    assert out.shape == (BATCH, NUM_CLASSES)
    assert bool(jnp.all(jnp.isfinite(out)))
    # log-probs should normalize and match the exact reference closely.
    assert jnp.allclose(jnp.sum(jnp.exp(out), axis=1), 1.0, atol=1e-3)
    assert jnp.allclose(out, ref, rtol=3e-2, atol=3e-2), (out, ref)

    print("KERNEL_OK")
</pallas_src>

<mosaic_0001>
module attributes {stable_mosaic.version = 11 : i64} {
  func.func @cnn_mnist_kernel(%arg0: memref<1536x25xf32, #tpu.memory_space<vmem>>, %arg1: memref<25x64xf32, #tpu.memory_space<vmem>>, %arg2: memref<1x64xf32, #tpu.memory_space<vmem>>, %arg3: memref<25x64x64xf32, #tpu.memory_space<vmem>>, %arg4: memref<1x64xf32, #tpu.memory_space<vmem>>, %arg5: memref<1024x128xf32, #tpu.memory_space<vmem>>, %arg6: memref<1x128xf32, #tpu.memory_space<vmem>>, %arg7: memref<128x64xf32, #tpu.memory_space<vmem>>, %arg8: memref<1x64xf32, #tpu.memory_space<vmem>>, %arg9: memref<64x10xf32, #tpu.memory_space<vmem>>, %arg10: memref<1x10xf32, #tpu.memory_space<vmem>>, %arg11: memref<2x10xf32, #tpu.memory_space<vmem>>, %arg12: memref<2x12x16x64xf32, #tpu.memory_space<vmem>>, %arg13: memref<2x8x8x64xf32, #tpu.memory_space<vmem>>) attributes {dimension_semantics = [], scalar_prefetch = 0 : i64, scratch_operands = 2 : i64, tpu.core_type = #tpu.core_type<tc>} {
    %c0 = arith.constant 0 : index
    %c0_0 = arith.constant 0 : index
    %0 = vector.load %arg0[%c0, %c0_0] : memref<1536x25xf32, #tpu.memory_space<vmem>>, vector<384x25xf32>
    %c0_1 = arith.constant 0 : index
    %c0_2 = arith.constant 0 : index
    %1 = vector.load %arg1[%c0_1, %c0_2] : memref<25x64xf32, #tpu.memory_space<vmem>>, vector<25x64xf32>
    %cst = arith.constant dense<0.000000e+00> : vector<384x64xf32>
    %2 = tpu.matmul %0, %1, %cst {dimension_numbers = #tpu.dot_dimension_numbers<[1], [0], [0], [1], [0, 0, 1, 1], [], []>} : vector<384x25xf32>, vector<25x64xf32>, vector<384x64xf32> -> vector<384x64xf32>
    %c384 = arith.constant 384 : index
    %c0_3 = arith.constant 0 : index
    %3 = vector.load %arg0[%c384, %c0_3] : memref<1536x25xf32, #tpu.memory_space<vmem>>, vector<384x25xf32>
    %c0_4 = arith.constant 0 : index
    %c0_5 = arith.constant 0 : index
    %4 = vector.load %arg1[%c0_4, %c0_5] : memref<25x64xf32, #tpu.memory_space<vmem>>, vector<25x64xf32>
    %cst_6 = arith.constant dense<0.000000e+00> : vector<384x64xf32>
    %5 = tpu.matmul %3, %4, %cst_6 {dimension_numbers = #tpu.dot_dimension_numbers<[1], [0], [0], [1], [0, 0, 1, 1], [], []>} : vector<384x25xf32>, vector<25x64xf32>, vector<384x64xf32> -> vector<384x64xf32>
    %6 = arith.maximumf %2, %5 : vector<384x64xf32>
    %c768 = arith.constant 768 : index
    %c0_7 = arith.constant 0 : index
    %7 = vector.load %arg0[%c768, %c0_7] : memref<1536x25xf32, #tpu.memory_space<vmem>>, vector<384x25xf32>
    %c0_8 = arith.constant 0 : index
    %c0_9 = arith.constant 0 : index
    %8 = vector.load %arg1[%c0_8, %c0_9] : memref<25x64xf32, #tpu.memory_space<vmem>>, vector<25x64xf32>
    %cst_10 = arith.constant dense<0.000000e+00> : vector<384x64xf32>
    %9 = tpu.matmul %7, %8, %cst_10 {dimension_numbers = #tpu.dot_dimension_numbers<[1], [0], [0], [1], [0, 0, 1, 1], [], []>} : vector<384x25xf32>, vector<25x64xf32>, vector<384x64xf32> -> vector<384x64xf32>
    %10 = arith.maximumf %6, %9 : vector<384x64xf32>
    %c1152 = arith.constant 1152 : index
    %c0_11 = arith.constant 0 : index
    %11 = vector.load %arg0[%c1152, %c0_11] : memref<1536x25xf32, #tpu.memory_space<vmem>>, vector<384x25xf32>
    %c0_12 = arith.constant 0 : index
    %c0_13 = arith.constant 0 : index
    %12 = vector.load %arg1[%c0_12, %c0_13] : memref<25x64xf32, #tpu.memory_space<vmem>>, vector<25x64xf32>
    %cst_14 = arith.constant dense<0.000000e+00> : vector<384x64xf32>
    %13 = tpu.matmul %11, %12, %cst_14 {dimension_numbers = #tpu.dot_dimension_numbers<[1], [0], [0], [1], [0, 0, 1, 1], [], []>} : vector<384x25xf32>, vector<25x64xf32>, vector<384x64xf32> -> vector<384x64xf32>
    %14 = arith.maximumf %10, %13 : vector<384x64xf32>
    %c0_15 = arith.constant 0 : index
    %c0_16 = arith.constant 0 : index
    %15 = vector.load %arg2[%c0_15, %c0_16] : memref<1x64xf32, #tpu.memory_space<vmem>>, vector<1x64xf32>
    %16 = vector.broadcast %15 : vector<1x64xf32> to vector<384x64xf32>
    %17 = arith.addf %14, %16 : vector<384x64xf32>
    %cst_17 = arith.constant 0.000000e+00 : f32
    %18 = vector.broadcast %cst_17 : f32 to vector<384x64xf32>
    %19 = arith.maximumf %17, %18 : vector<384x64xf32>
    %20 = vector.shape_cast %19 : vector<384x64xf32> to vector<2x12x16x64xf32>
    %c0_18 = arith.constant 0 : index
    %c0_19 = arith.constant 0 : index
    %c0_20 = arith.constant 0 : index
    %c0_21 = arith.constant 0 : index
    %21 = vector.load %arg12[%c0_18, %c0_19, %c0_20, %c0_21] : memref<2x12x16x64xf32, #tpu.memory_space<vmem>>, vector<2x12x16x64xf32>
    tpu.vector_store %arg12[%c0_18, %c0_19, %c0_20, %c0_21], %20 {strides = array<i32>} : memref<2x12x16x64xf32, #tpu.memory_space<vmem>>, vector<2x12x16x64xf32>,
    %cst_22 = arith.constant 0.000000e+00 : f32
    %22 = vector.broadcast %cst_22 : f32 to vector<128x64xf32>
    %c0_23 = arith.constant 0 : index
    %c0_24 = arith.constant 0 : index
    %23 = vector.load %arg4[%c0_23, %c0_24] : memref<1x64xf32, #tpu.memory_space<vmem>>, vector<1x64xf32>
    %24 = vector.broadcast %23 : vector<1x64xf32> to vector<128x64xf32>
    %25 = arith.addf %22, %24 : vector<128x64xf32>
    %c0_25 = arith.constant 0 : index
    %c0_26 = arith.constant 0 : index
    %c0_27 = arith.constant 0 : index
    %c0_28 = arith.constant 0 : index
    %26 = vector.load %arg12[%c0_25, %c0_26, %c0_27, %c0_28] : memref<2x12x16x64xf32, #tpu.memory_space<vmem>>, vector<2x8x8x64xf32>
    %27 = vector.shape_cast %26 : vector<2x8x8x64xf32> to vector<128x64xf32>
    %c0_29 = arith.constant 0 : index
    %c0_30 = arith.constant 0 : index
    %c0_31 = arith.constant 0 : index
    %28 = vector.load %arg3[%c0_29, %c0_30, %c0_31] : memref<25x64x64xf32, #tpu.memory_space<vmem>>, vector<1x64x64xf32>
    %29 = vector.shape_cast %28 : vector<1x64x64xf32> to vector<64x64xf32>
    %cst_32 = arith.constant dense<0.000000e+00> : vector<128x64xf32>
    %30 = tpu.matmul %27, %29, %cst_32 {dimension_numbers = #tpu.dot_dimension_numbers<[1], [0], [0], [1], [0, 0, 1, 1], [], []>} : vector<128x64xf32>, vector<64x64xf32>, vector<128x64xf32> -> vector<128x64xf32>
    %31 = arith.addf %25, %30 : vector<128x64xf32>
    %c0_33 = arith.constant 0 : index
    %c0_34 = arith.constant 0 : index
    %c1 = arith.constant 1 : index
    %c0_35 = arith.constant 0 : index
    %32 = vector.load %arg12[%c0_33, %c0_34, %c1, %c0_35] : memref<2x12x16x64xf32, #tpu.memory_space<vmem>>, vector<2x8x8x64xf32>
    %33 = vector.shape_cast %32 : vector<2x8x8x64xf32> to vector<128x64xf32>
    %c1_36 = arith.constant 1 : index
    %c0_37 = arith.constant 0 : index
    %c0_38 = arith.constant 0 : index
    %34 = vector.load %arg3[%c1_36, %c0_37, %c0_38] : memref<25x64x64xf32, #tpu.memory_space<vmem>>, vector<1x64x64xf32>
    %35 = vector.shape_cast %34 : vector<1x64x64xf32> to vector<64x64xf32>
    %cst_39 = arith.constant dense<0.000000e+00> : vector<128x64xf32>
    %36 = tpu.matmul %33, %35, %cst_39 {dimension_numbers = #tpu.dot_dimension_numbers<[1], [0], [0], [1], [0, 0, 1, 1], [], []>} : vector<128x64xf32>, vector<64x64xf32>, vector<128x64xf32> -> vector<128x64xf32>
    %37 = arith.addf %31, %36 : vector<128x64xf32>
    %c0_40 = arith.constant 0 : index
    %c0_41 = arith.constant 0 : index
    %c2 = arith.constant 2 : index
    %c0_42 = arith.constant 0 : index
    %38 = vector.load %arg12[%c0_40, %c0_41, %c2, %c0_42] : memref<2x12x16x64xf32, #tpu.memory_space<vmem>>, vector<2x8x8x64xf32>
    %39 = vector.shape_cast %38 : vector<2x8x8x64xf32> to vector<128x64xf32>
    %c2_43 = arith.constant 2 : index
    %c0_44 = arith.constant 0 : index
    %c0_45 = arith.constant 0 : index
    %40 = vector.load %arg3[%c2_43, %c0_44, %c0_45] : memref<25x64x64xf32, #tpu.memory_space<vmem>>, vector<1x64x64xf32>
    %41 = vector.shape_cast %40 : vector<1x64x64xf32> to vector<64x64xf32>
    %cst_46 = arith.constant dense<0.000000e+00> : vector<128x64xf32>
    %42 = tpu.matmul %39, %41, %cst_46 {dimension_numbers = #tpu.dot_dimension_numbers<[1], [0], [0], [1], [0, 0, 1, 1], [], []>} : vector<128x64xf32>, vector<64x64xf32>, vector<128x64xf32> -> vector<128x64xf32>
    %43 = arith.addf %37, %42 : vector<128x64xf32>
    %c0_47 = arith.constant 0 : index
    %c0_48 = arith.constant 0 : index
    %c3 = arith.constant 3 : index
    %c0_49 = arith.constant 0 : index
    %44 = vector.load %arg12[%c0_47, %c0_48, %c3, %c0_49] : memref<2x12x16x64xf32, #tpu.memory_space<vmem>>, vector<2x8x8x64xf32>
    %45 = vector.shape_cast %44 : vector<2x8x8x64xf32> to vector<128x64xf32>
    %c3_50 = arith.constant 3 : index
    %c0_51 = arith.constant 0 : index
    %c0_52 = arith.constant 0 : index
    %46 = vector.load %arg3[%c3_50, %c0_51, %c0_52] : memref<25x64x64xf32, #tpu.memory_space<vmem>>, vector<1x64x64xf32>
    %47 = vector.shape_cast %46 : vector<1x64x64xf32> to vector<64x64xf32>
    %cst_53 = arith.constant dense<0.000000e+00> : vector<128x64xf32>
    %48 = tpu.matmul %45, %47, %cst_53 {dimension_numbers = #tpu.dot_dimension_numbers<[1], [0], [0], [1], [0, 0, 1, 1], [], []>} : vector<128x64xf32>, vector<64x64xf32>, vector<128x64xf32> -> vector<128x64xf32>
    %49 = arith.addf %43, %48 : vector<128x64xf32>
    %c0_54 = arith.constant 0 : index
    %c0_55 = arith.constant 0 : index
    %c4 = arith.constant 4 : index
    %c0_56 = arith.constant 0 : index
    %50 = vector.load %arg12[%c0_54, %c0_55, %c4, %c0_56] : memref<2x12x16x64xf32, #tpu.memory_space<vmem>>, vector<2x8x8x64xf32>
    %51 = vector.shape_cast %50 : vector<2x8x8x64xf32> to vector<128x64xf32>
    %c4_57 = arith.constant 4 : index
    %c0_58 = arith.constant 0 : index
    %c0_59 = arith.constant 0 : index
    %52 = vector.load %arg3[%c4_57, %c0_58, %c0_59] : memref<25x64x64xf32, #tpu.memory_space<vmem>>, vector<1x64x64xf32>
    %53 = vector.shape_cast %52 : vector<1x64x64xf32> to vector<64x64xf32>
    %cst_60 = arith.constant dense<0.000000e+00> : vector<128x64xf32>
    %54 = tpu.matmul %51, %53, %cst_60 {dimension_numbers = #tpu.dot_dimension_numbers<[1], [0], [0], [1], [0, 0, 1, 1], [], []>} : vector<128x64xf32>, vector<64x64xf32>, vector<128x64xf32> -> vector<128x64xf32>
    %55 = arith.addf %49, %54 : vector<128x64xf32>
    %c0_61 = arith.constant 0 : index
    %c1_62 = arith.constant 1 : index
    %c0_63 = arith.constant 0 : index
    %c0_64 = arith.constant 0 : index
    %56 = vector.load %arg12[%c0_61, %c1_62, %c0_63, %c0_64] : memref<2x12x16x64xf32, #tpu.memory_space<vmem>>, vector<2x8x8x64xf32>
    %57 = vector.shape_cast %56 : vector<2x8x8x64xf32> to vector<128x64xf32>
    %c5 = arith.constant 5 : index
    %c0_65 = arith.constant 0 : index
    %c0_66 = arith.constant 0 : index
    %58 = vector.load %arg3[%c5, %c0_65, %c0_66] : memref<25x64x64xf32, #tpu.memory_space<vmem>>, vector<1x64x64xf32>
    %59 = vector.shape_cast %58 : vector<1x64x64xf32> to vector<64x64xf32>
    %cst_67 = arith.constant dense<0.000000e+00> : vector<128x64xf32>
    %60 = tpu.matmul %57, %59, %cst_67 {dimension_numbers = #tpu.dot_dimension_numbers<[1], [0], [0], [1], [0, 0, 1, 1], [], []>} : vector<128x64xf32>, vector<64x64xf32>, vector<128x64xf32> -> vector<128x64xf32>
    %61 = arith.addf %55, %60 : vector<128x64xf32>
    %c0_68 = arith.constant 0 : index
    %c1_69 = arith.constant 1 : index
    %c1_70 = arith.constant 1 : index
    %c0_71 = arith.constant 0 : index
    %62 = vector.load %arg12[%c0_68, %c1_69, %c1_70, %c0_71] : memref<2x12x16x64xf32, #tpu.memory_space<vmem>>, vector<2x8x8x64xf32>
    %63 = vector.shape_cast %62 : vector<2x8x8x64xf32> to vector<128x64xf32>
    %c6 = arith.constant 6 : index
    %c0_72 = arith.constant 0 : index
    %c0_73 = arith.constant 0 : index
    %64 = vector.load %arg3[%c6, %c0_72, %c0_73] : memref<25x64x64xf32, #tpu.memory_space<vmem>>, vector<1x64x64xf32>
    %65 = vector.shape_cast %64 : vector<1x64x64xf32> to vector<64x64xf32>
    %cst_74 = arith.constant dense<0.000000e+00> : vector<128x64xf32>
    %66 = tpu.matmul %63, %65, %cst_74 {dimension_numbers = #tpu.dot_dimension_numbers<[1], [0], [0], [1], [0, 0, 1, 1], [], []>} : vector<128x64xf32>, vector<64x64xf32>, vector<128x64xf32> -> vector<128x64xf32>
    %67 = arith.addf %61, %66 : vector<128x64xf32>
    %c0_75 = arith.constant 0 : index
    %c1_76 = arith.constant 1 : index
    %c2_77 = arith.constant 2 : index
    %c0_78 = arith.constant 0 : index
    %68 = vector.load %arg12[%c0_75, %c1_76, %c2_77, %c0_78] : memref<2x12x16x64xf32, #tpu.memory_space<vmem>>, vector<2x8x8x64xf32>
    %69 = vector.shape_cast %68 : vector<2x8x8x64xf32> to vector<128x64xf32>
    %c7 = arith.constant 7 : index
    %c0_79 = arith.constant 0 : index
    %c0_80 = arith.constant 0 : index
    %70 = vector.load %arg3[%c7, %c0_79, %c0_80] : memref<25x64x64xf32, #tpu.memory_space<vmem>>, vector<1x64x64xf32>
    %71 = vector.shape_cast %70 : vector<1x64x64xf32> to vector<64x64xf32>
    %cst_81 = arith.constant dense<0.000000e+00> : vector<128x64xf32>
    %72 = tpu.matmul %69, %71, %cst_81 {dimension_numbers = #tpu.dot_dimension_numbers<[1], [0], [0], [1], [0, 0, 1, 1], [], []>} : vector<128x64xf32>, vector<64x64xf32>, vector<128x64xf32> -> vector<128x64xf32>
    %73 = arith.addf %67, %72 : vector<128x64xf32>
    %c0_82 = arith.constant 0 : index
    %c1_83 = arith.constant 1 : index
    %c3_84 = arith.constant 3 : index
    %c0_85 = arith.constant 0 : index
    %74 = vector.load %arg12[%c0_82, %c1_83, %c3_84, %c0_85] : memref<2x12x16x64xf32, #tpu.memory_space<vmem>>, vector<2x8x8x64xf32>
    %75 = vector.shape_cast %74 : vector<2x8x8x64xf32> to vector<128x64xf32>
    %c8 = arith.constant 8 : index
    %c0_86 = arith.constant 0 : index
    %c0_87 = arith.constant 0 : index
    %76 = vector.load %arg3[%c8, %c0_86, %c0_87] : memref<25x64x64xf32, #tpu.memory_space<vmem>>, vector<1x64x64xf32>
    %77 = vector.shape_cast %76 : vector<1x64x64xf32> to vector<64x64xf32>
    %cst_88 = arith.constant dense<0.000000e+00> : vector<128x64xf32>
    %78 = tpu.matmul %75, %77, %cst_88 {dimension_numbers = #tpu.dot_dimension_numbers<[1], [0], [0], [1], [0, 0, 1, 1], [], []>} : vector<128x64xf32>, vector<64x64xf32>, vector<128x64xf32> -> vector<128x64xf32>
    %79 = arith.addf %73, %78 : vector<128x64xf32>
    %c0_89 = arith.constant 0 : index
    %c1_90 = arith.constant 1 : index
    %c4_91 = arith.constant 4 : index
    %c0_92 = arith.constant 0 : index
    %80 = vector.load %arg12[%c0_89, %c1_90, %c4_91, %c0_92] : memref<2x12x16x64xf32, #tpu.memory_space<vmem>>, vector<2x8x8x64xf32>
    %81 = vector.shape_cast %80 : vector<2x8x8x64xf32> to vector<128x64xf32>
    %c9 = arith.constant 9 : index
    %c0_93 = arith.constant 0 : index
    %c0_94 = arith.constant 0 : index
    %82 = vector.load %arg3[%c9, %c0_93, %c0_94] : memref<25x64x64xf32, #tpu.memory_space<vmem>>, vector<1x64x64xf32>
    %83 = vector.shape_cast %82 : vector<1x64x64xf32> to vector<64x64xf32>
    %cst_95 = arith.constant dense<0.000000e+00> : vector<128x64xf32>
    %84 = tpu.matmul %81, %83, %cst_95 {dimension_numbers = #tpu.dot_dimension_numbers<[1], [0], [0], [1], [0, 0, 1, 1], [], []>} : vector<128x64xf32>, vector<64x64xf32>, vector<128x64xf32> -> vector<128x64xf32>
    %85 = arith.addf %79, %84 : vector<128x64xf32>
    %c0_96 = arith.constant 0 : index
    %c2_97 = arith.constant 2 : index
    %c0_98 = arith.constant 0 : index
    %c0_99 = arith.constant 0 : index
    %86 = vector.load %arg12[%c0_96, %c2_97, %c0_98, %c0_99] : memref<2x12x16x64xf32, #tpu.memory_space<vmem>>, vector<2x8x8x64xf32>
    %87 = vector.shape_cast %86 : vector<2x8x8x64xf32> to vector<128x64xf32>
    %c10 = arith.constant 10 : index
    %c0_100 = arith.constant 0 : index
    %c0_101 = arith.constant 0 : index
    %88 = vector.load %arg3[%c10, %c0_100, %c0_101] : memref<25x64x64xf32, #tpu.memory_space<vmem>>, vector<1x64x64xf32>
    %89 = vector.shape_cast %88 : vector<1x64x64xf32> to vector<64x64xf32>
    %cst_102 = arith.constant dense<0.000000e+00> : vector<128x64xf32>
    %90 = tpu.matmul %87, %89, %cst_102 {dimension_numbers = #tpu.dot_dimension_numbers<[1], [0], [0], [1], [0, 0, 1, 1], [], []>} : vector<128x64xf32>, vector<64x64xf32>, vector<128x64xf32> -> vector<128x64xf32>
    %91 = arith.addf %85, %90 : vector<128x64xf32>
    %c0_103 = arith.constant 0 : index
    %c2_104 = arith.constant 2 : index
    %c1_105 = arith.constant 1 : index
    %c0_106 = arith.constant 0 : index
    %92 = vector.load %arg12[%c0_103, %c2_104, %c1_105, %c0_106] : memref<2x12x16x64xf32, #tpu.memory_space<vmem>>, vector<2x8x8x64xf32>
    %93 = vector.shape_cast %92 : vector<2x8x8x64xf32> to vector<128x64xf32>
    %c11 = arith.constant 11 : index
    %c0_107 = arith.constant 0 : index
    %c0_108 = arith.constant 0 : index
    %94 = vector.load %arg3[%c11, %c0_107, %c0_108] : memref<25x64x64xf32, #tpu.memory_space<vmem>>, vector<1x64x64xf32>
    %95 = vector.shape_cast %94 : vector<1x64x64xf32> to vector<64x64xf32>
    %cst_109 = arith.constant dense<0.000000e+00> : vector<128x64xf32>
    %96 = tpu.matmul %93, %95, %cst_109 {dimension_numbers = #tpu.dot_dimension_numbers<[1], [0], [0], [1], [0, 0, 1, 1], [], []>} : vector<128x64xf32>, vector<64x64xf32>, vector<128x64xf32> -> vector<128x64xf32>
    %97 = arith.addf %91, %96 : vector<128x64xf32>
    %c0_110 = arith.constant 0 : index
    %c2_111 = arith.constant 2 : index
    %c2_112 = arith.constant 2 : index
    %c0_113 = arith.constant 0 : index
    %98 = vector.load %arg12[%c0_110, %c2_111, %c2_112, %c0_113] : memref<2x12x16x64xf32, #tpu.memory_space<vmem>>, vector<2x8x8x64xf32>
    %99 = vector.shape_cast %98 : vector<2x8x8x64xf32> to vector<128x64xf32>
    %c12 = arith.constant 12 : index
    %c0_114 = arith.constant 0 : index
    %c0_115 = arith.constant 0 : index
    %100 = vector.load %arg3[%c12, %c0_114, %c0_115] : memref<25x64x64xf32, #tpu.memory_space<vmem>>, vector<1x64x64xf32>
    %101 = vector.shape_cast %100 : vector<1x64x64xf32> to vector<64x64xf32>
    %cst_116 = arith.constant dense<0.000000e+00> : vector<128x64xf32>
    %102 = tpu.matmul %99, %101, %cst_116 {dimension_numbers = #tpu.dot_dimension_numbers<[1], [0], [0], [1], [0, 0, 1, 1], [], []>} : vector<128x64xf32>, vector<64x64xf32>, vector<128x64xf32> -> vector<128x64xf32>
    %103 = arith.addf %97, %102 : vector<128x64xf32>
    %c0_117 = arith.constant 0 : index
    %c2_118 = arith.constant 2 : index
    %c3_119 = arith.constant 3 : index
    %c0_120 = arith.constant 0 : index
    %104 = vector.load %arg12[%c0_117, %c2_118, %c3_119, %c0_120] : memref<2x12x16x64xf32, #tpu.memory_space<vmem>>, vector<2x8x8x64xf32>
    %105 = vector.shape_cast %104 : vector<2x8x8x64xf32> to vector<128x64xf32>
    %c13 = arith.constant 13 : index
    %c0_121 = arith.constant 0 : index
    %c0_122 = arith.constant 0 : index
    %106 = vector.load %arg3[%c13, %c0_121, %c0_122] : memref<25x64x64xf32, #tpu.memory_space<vmem>>, vector<1x64x64xf32>
    %107 = vector.shape_cast %106 : vector<1x64x64xf32> to vector<64x64xf32>
    %cst_123 = arith.constant dense<0.000000e+00> : vector<128x64xf32>
    %108 = tpu.matmul %105, %107, %cst_123 {dimension_numbers = #tpu.dot_dimension_numbers<[1], [0], [0], [1], [0, 0, 1, 1], [], []>} : vector<128x64xf32>, vector<64x64xf32>, vector<128x64xf32> -> vector<128x64xf32>
    %109 = arith.addf %103, %108 : vector<128x64xf32>
    %c0_124 = arith.constant 0 : index
    %c2_125 = arith.constant 2 : index
    %c4_126 = arith.constant 4 : index
    %c0_127 = arith.constant 0 : index
    %110 = vector.load %arg12[%c0_124, %c2_125, %c4_126, %c0_127] : memref<2x12x16x64xf32, #tpu.memory_space<vmem>>, vector<2x8x8x64xf32>
    %111 = vector.shape_cast %110 : vector<2x8x8x64xf32> to vector<128x64xf32>
    %c14 = arith.constant 14 : index
    %c0_128 = arith.constant 0 : index
    %c0_129 = arith.constant 0 : index
    %112 = vector.load %arg3[%c14, %c0_128, %c0_129] : memref<25x64x64xf32, #tpu.memory_space<vmem>>, vector<1x64x64xf32>
    %113 = vector.shape_cast %112 : vector<1x64x64xf32> to vector<64x64xf32>
    %cst_130 = arith.constant dense<0.000000e+00> : vector<128x64xf32>
    %114 = tpu.matmul %111, %113, %cst_130 {dimension_numbers = #tpu.dot_dimension_numbers<[1], [0], [0], [1], [0, 0, 1, 1], [], []>} : vector<128x64xf32>, vector<64x64xf32>, vector<128x64xf32> -> vector<128x64xf32>
    %115 = arith.addf %109, %114 : vector<128x64xf32>
    %c0_131 = arith.constant 0 : index
    %c3_132 = arith.constant 3 : index
    %c0_133 = arith.constant 0 : index
    %c0_134 = arith.constant 0 : index
    %116 = vector.load %arg12[%c0_131, %c3_132, %c0_133, %c0_134] : memref<2x12x16x64xf32, #tpu.memory_space<vmem>>, vector<2x8x8x64xf32>
    %117 = vector.shape_cast %116 : vector<2x8x8x64xf32> to vector<128x64xf32>
    %c15 = arith.constant 15 : index
    %c0_135 = arith.constant 0 : index
    %c0_136 = arith.constant 0 : index
    %118 = vector.load %arg3[%c15, %c0_135, %c0_136] : memref<25x64x64xf32, #tpu.memory_space<vmem>>, vector<1x64x64xf32>
    %119 = vector.shape_cast %118 : vector<1x64x64xf32> to vector<64x64xf32>
    %cst_137 = arith.constant dense<0.000000e+00> : vector<128x64xf32>
    %120 = tpu.matmul %117, %119, %cst_137 {dimension_numbers = #tpu.dot_dimension_numbers<[1], [0], [0], [1], [0, 0, 1, 1], [], []>} : vector<128x64xf32>, vector<64x64xf32>, vector<128x64xf32> -> vector<128x64xf32>
    %121 = arith.addf %115, %120 : vector<128x64xf32>
    %c0_138 = arith.constant 0 : index
    %c3_139 = arith.constant 3 : index
    %c1_140 = arith.constant 1 : index
    %c0_141 = arith.constant 0 : index
    %122 = vector.load %arg12[%c0_138, %c3_139, %c1_140, %c0_141] : memref<2x12x16x64xf32, #tpu.memory_space<vmem>>, vector<2x8x8x64xf32>
    %123 = vector.shape_cast %122 : vector<2x8x8x64xf32> to vector<128x64xf32>
    %c16 = arith.constant 16 : index
    %c0_142 = arith.constant 0 : index
    %c0_143 = arith.constant 0 : index
    %124 = vector.load %arg3[%c16, %c0_142, %c0_143] : memref<25x64x64xf32, #tpu.memory_space<vmem>>, vector<1x64x64xf32>
    %125 = vector.shape_cast %124 : vector<1x64x64xf32> to vector<64x64xf32>
    %cst_144 = arith.constant dense<0.000000e+00> : vector<128x64xf32>
    %126 = tpu.matmul %123, %125, %cst_144 {dimension_numbers = #tpu.dot_dimension_numbers<[1], [0], [0], [1], [0, 0, 1, 1], [], []>} : vector<128x64xf32>, vector<64x64xf32>, vector<128x64xf32> -> vector<128x64xf32>
    %127 = arith.addf %121, %126 : vector<128x64xf32>
    %c0_145 = arith.constant 0 : index
    %c3_146 = arith.constant 3 : index
    %c2_147 = arith.constant 2 : index
    %c0_148 = arith.constant 0 : index
    %128 = vector.load %arg12[%c0_145, %c3_146, %c2_147, %c0_148] : memref<2x12x16x64xf32, #tpu.memory_space<vmem>>, vector<2x8x8x64xf32>
    %129 = vector.shape_cast %128 : vector<2x8x8x64xf32> to vector<128x64xf32>
    %c17 = arith.constant 17 : index
    %c0_149 = arith.constant 0 : index
    %c0_150 = arith.constant 0 : index
    %130 = vector.load %arg3[%c17, %c0_149, %c0_150] : memref<25x64x64xf32, #tpu.memory_space<vmem>>, vector<1x64x64xf32>
    %131 = vector.shape_cast %130 : vector<1x64x64xf32> to vector<64x64xf32>
    %cst_151 = arith.constant dense<0.000000e+00> : vector<128x64xf32>
    %132 = tpu.matmul %129, %131, %cst_151 {dimension_numbers = #tpu.dot_dimension_numbers<[1], [0], [0], [1], [0, 0, 1, 1], [], []>} : vector<128x64xf32>, vector<64x64xf32>, vector<128x64xf32> -> vector<128x64xf32>
    %133 = arith.addf %127, %132 : vector<128x64xf32>
    %c0_152 = arith.constant 0 : index
    %c3_153 = arith.constant 3 : index
    %c3_154 = arith.constant 3 : index
    %c0_155 = arith.constant 0 : index
    %134 = vector.load %arg12[%c0_152, %c3_153, %c3_154, %c0_155] : memref<2x12x16x64xf32, #tpu.memory_space<vmem>>, vector<2x8x8x64xf32>
    %135 = vector.shape_cast %134 : vector<2x8x8x64xf32> to vector<128x64xf32>
    %c18 = arith.constant 18 : index
    %c0_156 = arith.constant 0 : index
    %c0_157 = arith.constant 0 : index
    %136 = vector.load %arg3[%c18, %c0_156, %c0_157] : memref<25x64x64xf32, #tpu.memory_space<vmem>>, vector<1x64x64xf32>
    %137 = vector.shape_cast %136 : vector<1x64x64xf32> to vector<64x64xf32>
    %cst_158 = arith.constant dense<0.000000e+00> : vector<128x64xf32>
    %138 = tpu.matmul %135, %137, %cst_158 {dimension_numbers = #tpu.dot_dimension_numbers<[1], [0], [0], [1], [0, 0, 1, 1], [], []>} : vector<128x64xf32>, vector<64x64xf32>, vector<128x64xf32> -> vector<128x64xf32>
    %139 = arith.addf %133, %138 : vector<128x64xf32>
    %c0_159 = arith.constant 0 : index
    %c3_160 = arith.constant 3 : index
    %c4_161 = arith.constant 4 : index
    %c0_162 = arith.constant 0 : index
    %140 = vector.load %arg12[%c0_159, %c3_160, %c4_161, %c0_162] : memref<2x12x16x64xf32, #tpu.memory_space<vmem>>, vector<2x8x8x64xf32>
    %141 = vector.shape_cast %140 : vector<2x8x8x64xf32> to vector<128x64xf32>
    %c19 = arith.constant 19 : index
    %c0_163 = arith.constant 0 : index
    %c0_164 = arith.constant 0 : index
    %142 = vector.load %arg3[%c19, %c0_163, %c0_164] : memref<25x64x64xf32, #tpu.memory_space<vmem>>, vector<1x64x64xf32>
    %143 = vector.shape_cast %142 : vector<1x64x64xf32> to vector<64x64xf32>
    %cst_165 = arith.constant dense<0.000000e+00> : vector<128x64xf32>
    %144 = tpu.matmul %141, %143, %cst_165 {dimension_numbers = #tpu.dot_dimension_numbers<[1], [0], [0], [1], [0, 0, 1, 1], [], []>} : vector<128x64xf32>, vector<64x64xf32>, vector<128x64xf32> -> vector<128x64xf32>
    %145 = arith.addf %139, %144 : vector<128x64xf32>
    %c0_166 = arith.constant 0 : index
    %c4_167 = arith.constant 4 : index
    %c0_168 = arith.constant 0 : index
    %c0_169 = arith.constant 0 : index
    %146 = vector.load %arg12[%c0_166, %c4_167, %c0_168, %c0_169] : memref<2x12x16x64xf32, #tpu.memory_space<vmem>>, vector<2x8x8x64xf32>
    %147 = vector.shape_cast %146 : vector<2x8x8x64xf32> to vector<128x64xf32>
    %c20 = arith.constant 20 : index
    %c0_170 = arith.constant 0 : index
    %c0_171 = arith.constant 0 : index
    %148 = vector.load %arg3[%c20, %c0_170, %c0_171] : memref<25x64x64xf32, #tpu.memory_space<vmem>>, vector<1x64x64xf32>
    %149 = vector.shape_cast %148 : vector<1x64x64xf32> to vector<64x64xf32>
    %cst_172 = arith.constant dense<0.000000e+00> : vector<128x64xf32>
    %150 = tpu.matmul %147, %149, %cst_172 {dimension_numbers = #tpu.dot_dimension_numbers<[1], [0], [0], [1], [0, 0, 1, 1], [], []>} : vector<128x64xf32>, vector<64x64xf32>, vector<128x64xf32> -> vector<128x64xf32>
    %151 = arith.addf %145, %150 : vector<128x64xf32>
    %c0_173 = arith.constant 0 : index
    %c4_174 = arith.constant 4 : index
    %c1_175 = arith.constant 1 : index
    %c0_176 = arith.constant 0 : index
    %152 = vector.load %arg12[%c0_173, %c4_174, %c1_175, %c0_176] : memref<2x12x16x64xf32, #tpu.memory_space<vmem>>, vector<2x8x8x64xf32>
    %153 = vector.shape_cast %152 : vector<2x8x8x64xf32> to vector<128x64xf32>
    %c21 = arith.constant 21 : index
    %c0_177 = arith.constant 0 : index
    %c0_178 = arith.constant 0 : index
    %154 = vector.load %arg3[%c21, %c0_177, %c0_178] : memref<25x64x64xf32, #tpu.memory_space<vmem>>, vector<1x64x64xf32>
    %155 = vector.shape_cast %154 : vector<1x64x64xf32> to vector<64x64xf32>
    %cst_179 = arith.constant dense<0.000000e+00> : vector<128x64xf32>
    %156 = tpu.matmul %153, %155, %cst_179 {dimension_numbers = #tpu.dot_dimension_numbers<[1], [0], [0], [1], [0, 0, 1, 1], [], []>} : vector<128x64xf32>, vector<64x64xf32>, vector<128x64xf32> -> vector<128x64xf32>
    %157 = arith.addf %151, %156 : vector<128x64xf32>
    %c0_180 = arith.constant 0 : index
    %c4_181 = arith.constant 4 : index
    %c2_182 = arith.constant 2 : index
    %c0_183 = arith.constant 0 : index
    %158 = vector.load %arg12[%c0_180, %c4_181, %c2_182, %c0_183] : memref<2x12x16x64xf32, #tpu.memory_space<vmem>>, vector<2x8x8x64xf32>
    %159 = vector.shape_cast %158 : vector<2x8x8x64xf32> to vector<128x64xf32>
    %c22 = arith.constant 22 : index
    %c0_184 = arith.constant 0 : index
    %c0_185 = arith.constant 0 : index
    %160 = vector.load %arg3[%c22, %c0_184, %c0_185] : memref<25x64x64xf32, #tpu.memory_space<vmem>>, vector<1x64x64xf32>
    %161 = vector.shape_cast %160 : vector<1x64x64xf32> to vector<64x64xf32>
    %cst_186 = arith.constant dense<0.000000e+00> : vector<128x64xf32>
    %162 = tpu.matmul %159, %161, %cst_186 {dimension_numbers = #tpu.dot_dimension_numbers<[1], [0], [0], [1], [0, 0, 1, 1], [], []>} : vector<128x64xf32>, vector<64x64xf32>, vector<128x64xf32> -> vector<128x64xf32>
    %163 = arith.addf %157, %162 : vector<128x64xf32>
    %c0_187 = arith.constant 0 : index
    %c4_188 = arith.constant 4 : index
    %c3_189 = arith.constant 3 : index
    %c0_190 = arith.constant 0 : index
    %164 = vector.load %arg12[%c0_187, %c4_188, %c3_189, %c0_190] : memref<2x12x16x64xf32, #tpu.memory_space<vmem>>, vector<2x8x8x64xf32>
    %165 = vector.shape_cast %164 : vector<2x8x8x64xf32> to vector<128x64xf32>
    %c23 = arith.constant 23 : index
    %c0_191 = arith.constant 0 : index
    %c0_192 = arith.constant 0 : index
    %166 = vector.load %arg3[%c23, %c0_191, %c0_192] : memref<25x64x64xf32, #tpu.memory_space<vmem>>, vector<1x64x64xf32>
    %167 = vector.shape_cast %166 : vector<1x64x64xf32> to vector<64x64xf32>
    %cst_193 = arith.constant dense<0.000000e+00> : vector<128x64xf32>
    %168 = tpu.matmul %165, %167, %cst_193 {dimension_numbers = #tpu.dot_dimension_numbers<[1], [0], [0], [1], [0, 0, 1, 1], [], []>} : vector<128x64xf32>, vector<64x64xf32>, vector<128x64xf32> -> vector<128x64xf32>
    %169 = arith.addf %163, %168 : vector<128x64xf32>
    %c0_194 = arith.constant 0 : index
    %c4_195 = arith.constant 4 : index
    %c4_196 = arith.constant 4 : index
    %c0_197 = arith.constant 0 : index
    %170 = vector.load %arg12[%c0_194, %c4_195, %c4_196, %c0_197] : memref<2x12x16x64xf32, #tpu.memory_space<vmem>>, vector<2x8x8x64xf32>
    %171 = vector.shape_cast %170 : vector<2x8x8x64xf32> to vector<128x64xf32>
    %c24 = arith.constant 24 : index
    %c0_198 = arith.constant 0 : index
    %c0_199 = arith.constant 0 : index
    %172 = vector.load %arg3[%c24, %c0_198, %c0_199] : memref<25x64x64xf32, #tpu.memory_space<vmem>>, vector<1x64x64xf32>
    %173 = vector.shape_cast %172 : vector<1x64x64xf32> to vector<64x64xf32>
    %cst_200 = arith.constant dense<0.000000e+00> : vector<128x64xf32>
    %174 = tpu.matmul %171, %173, %cst_200 {dimension_numbers = #tpu.dot_dimension_numbers<[1], [0], [0], [1], [0, 0, 1, 1], [], []>} : vector<128x64xf32>, vector<64x64xf32>, vector<128x64xf32> -> vector<128x64xf32>
    %175 = arith.addf %169, %174 : vector<128x64xf32>
    %176 = vector.shape_cast %175 : vector<128x64xf32> to vector<2x8x8x64xf32>
    %c0_201 = arith.constant 0 : index
    %c0_202 = arith.constant 0 : index
    %c0_203 = arith.constant 0 : index
    %c0_204 = arith.constant 0 : index
    %177 = vector.load %arg13[%c0_201, %c0_202, %c0_203, %c0_204] : memref<2x8x8x64xf32, #tpu.memory_space<vmem>>, vector<2x8x8x64xf32>
    tpu.vector_store %arg13[%c0_201, %c0_202, %c0_203, %c0_204], %176 {strides = array<i32>} : memref<2x8x8x64xf32, #tpu.memory_space<vmem>>, vector<2x8x8x64xf32>,
    %cst_205 = arith.constant 0.000000e+00 : f32
    %178 = vector.broadcast %cst_205 : f32 to vector<2x128xf32>
    %c0_206 = arith.constant 0 : index
    %c0_207 = arith.constant 0 : index
    %179 = vector.load %arg6[%c0_206, %c0_207] : memref<1x128xf32, #tpu.memory_space<vmem>>, vector<1x128xf32>
    %180 = vector.broadcast %179 : vector<1x128xf32> to vector<2x128xf32>
    %181 = arith.addf %178, %180 : vector<2x128xf32>
    %c0_208 = arith.constant 0 : index
    %c0_209 = arith.constant 0 : index
    %c0_210 = arith.constant 0 : index
    %c0_211 = arith.constant 0 : index
    %182 = vector.load %arg13[%c0_208, %c0_209, %c0_210, %c0_211] : memref<2x8x8x64xf32, #tpu.memory_space<vmem>>, vector<2x1x1x64xf32>
    %183 = vector.shape_cast %182 : vector<2x1x1x64xf32> to vector<2x64xf32>
    %c0_212 = arith.constant 0 : index
    %c0_213 = arith.constant 0 : index
    %c1_214 = arith.constant 1 : index
    %c0_215 = arith.constant 0 : index
    %184 = vector.load %arg13[%c0_212, %c0_213, %c1_214, %c0_215] : memref<2x8x8x64xf32, #tpu.memory_space<vmem>>, vector<2x1x1x64xf32>
    %185 = vector.shape_cast %184 : vector<2x1x1x64xf32> to vector<2x64xf32>
    %186 = arith.maximumf %183, %185 : vector<2x64xf32>
    %c0_216 = arith.constant 0 : index
    %c1_217 = arith.constant 1 : index
    %c0_218 = arith.constant 0 : index
    %c0_219 = arith.constant 0 : index
    %187 = vector.load %arg13[%c0_216, %c1_217, %c0_218, %c0_219] : memref<2x8x8x64xf32, #tpu.memory_space<vmem>>, vector<2x1x1x64xf32>
    %188 = vector.shape_cast %187 : vector<2x1x1x64xf32> to vector<2x64xf32>
    %c0_220 = arith.constant 0 : index
    %c1_221 = arith.constant 1 : index
    %c1_222 = arith.constant 1 : index
    %c0_223 = arith.constant 0 : index
    %189 = vector.load %arg13[%c0_220, %c1_221, %c1_222, %c0_223] : memref<2x8x8x64xf32, #tpu.memory_space<vmem>>, vector<2x1x1x64xf32>
    %190 = vector.shape_cast %189 : vector<2x1x1x64xf32> to vector<2x64xf32>
    %191 = arith.maximumf %188, %190 : vector<2x64xf32>
    %192 = arith.maximumf %186, %191 : vector<2x64xf32>
    %cst_224 = arith.constant 0.000000e+00 : f32
    %193 = vector.broadcast %cst_224 : f32 to vector<2x64xf32>
    %194 = arith.maximumf %192, %193 : vector<2x64xf32>
    %c0_225 = arith.constant 0 : index
    %c0_226 = arith.constant 0 : index
    %195 = vector.load %arg5[%c0_225, %c0_226] : memref<1024x128xf32, #tpu.memory_space<vmem>>, vector<64x128xf32>
    %cst_227 = arith.constant dense<0.000000e+00> : vector<2x128xf32>
    %196 = tpu.matmul %194, %195, %cst_227 {dimension_numbers = #tpu.dot_dimension_numbers<[1], [0], [0], [1], [0, 0, 1, 1], [], []>} : vector<2x64xf32>, vector<64x128xf32>, vector<2x128xf32> -> vector<2x128xf32>
    %197 = arith.addf %181, %196 : vector<2x128xf32>
    %c0_228 = arith.constant 0 : index
    %c0_229 = arith.constant 0 : index
    %c2_230 = arith.constant 2 : index
    %c0_231 = arith.constant 0 : index
    %198 = vector.load %arg13[%c0_228, %c0_229, %c2_230, %c0_231] : memref<2x8x8x64xf32, #tpu.memory_space<vmem>>, vector<2x1x1x64xf32>
    %199 = vector.shape_cast %198 : vector<2x1x1x64xf32> to vector<2x64xf32>
    %c0_232 = arith.constant 0 : index
    %c0_233 = arith.constant 0 : index
    %c3_234 = arith.constant 3 : index
    %c0_235 = arith.constant 0 : index
    %200 = vector.load %arg13[%c0_232, %c0_233, %c3_234, %c0_235] : memref<2x8x8x64xf32, #tpu.memory_space<vmem>>, vector<2x1x1x64xf32>
    %201 = vector.shape_cast %200 : vector<2x1x1x64xf32> to vector<2x64xf32>
    %202 = arith.maximumf %199, %201 : vector<2x64xf32>
    %c0_236 = arith.constant 0 : index
    %c1_237 = arith.constant 1 : index
    %c2_238 = arith.constant 2 : index
    %c0_239 = arith.constant 0 : index
    %203 = vector.load %arg13[%c0_236, %c1_237, %c2_238, %c0_239] : memref<2x8x8x64xf32, #tpu.memory_space<vmem>>, vector<2x1x1x64xf32>
    %204 = vector.shape_cast %203 : vector<2x1x1x64xf32> to vector<2x64xf32>
    %c0_240 = arith.constant 0 : index
    %c1_241 = arith.constant 1 : index
    %c3_242 = arith.constant 3 : index
    %c0_243 = arith.constant 0 : index
    %205 = vector.load %arg13[%c0_240, %c1_241, %c3_242, %c0_243] : memref<2x8x8x64xf32, #tpu.memory_space<vmem>>, vector<2x1x1x64xf32>
    %206 = vector.shape_cast %205 : vector<2x1x1x64xf32> to vector<2x64xf32>
    %207 = arith.maximumf %204, %206 : vector<2x64xf32>
    %208 = arith.maximumf %202, %207 : vector<2x64xf32>
    %cst_244 = arith.constant 0.000000e+00 : f32
    %209 = vector.broadcast %cst_244 : f32 to vector<2x64xf32>
    %210 = arith.maximumf %208, %209 : vector<2x64xf32>
    %c64 = arith.constant 64 : index
    %c0_245 = arith.constant 0 : index
    %211 = vector.load %arg5[%c64, %c0_245] : memref<1024x128xf32, #tpu.memory_space<vmem>>, vector<64x128xf32>
    %cst_246 = arith.constant dense<0.000000e+00> : vector<2x128xf32>
    %212 = tpu.matmul %210, %211, %cst_246 {dimension_numbers = #tpu.dot_dimension_numbers<[1], [0], [0], [1], [0, 0, 1, 1], [], []>} : vector<2x64xf32>, vector<64x128xf32>, vector<2x128xf32> -> vector<2x128xf32>
    %213 = arith.addf %197, %212 : vector<2x128xf32>
    %c0_247 = arith.constant 0 : index
    %c0_248 = arith.constant 0 : index
    %c4_249 = arith.constant 4 : index
    %c0_250 = arith.constant 0 : index
    %214 = vector.load %arg13[%c0_247, %c0_248, %c4_249, %c0_250] : memref<2x8x8x64xf32, #tpu.memory_space<vmem>>, vector<2x1x1x64xf32>
    %215 = vector.shape_cast %214 : vector<2x1x1x64xf32> to vector<2x64xf32>
    %c0_251 = arith.constant 0 : index
    %c0_252 = arith.constant 0 : index
    %c5_253 = arith.constant 5 : index
    %c0_254 = arith.constant 0 : index
    %216 = vector.load %arg13[%c0_251, %c0_252, %c5_253, %c0_254] : memref<2x8x8x64xf32, #tpu.memory_space<vmem>>, vector<2x1x1x64xf32>
    %217 = vector.shape_cast %216 : vector<2x1x1x64xf32> to vector<2x64xf32>
    %218 = arith.maximumf %215, %217 : vector<2x64xf32>
    %c0_255 = arith.constant 0 : index
    %c1_256 = arith.constant 1 : index
    %c4_257 = arith.constant 4 : index
    %c0_258 = arith.constant 0 : index
    %219 = vector.load %arg13[%c0_255, %c1_256, %c4_257, %c0_258] : memref<2x8x8x64xf32, #tpu.memory_space<vmem>>, vector<2x1x1x64xf32>
    %220 = vector.shape_cast %219 : vector<2x1x1x64xf32> to vector<2x64xf32>
    %c0_259 = arith.constant 0 : index
    %c1_260 = arith.constant 1 : index
    %c5_261 = arith.constant 5 : index
    %c0_262 = arith.constant 0 : index
    %221 = vector.load %arg13[%c0_259, %c1_260, %c5_261, %c0_262] : memref<2x8x8x64xf32, #tpu.memory_space<vmem>>, vector<2x1x1x64xf32>
    %222 = vector.shape_cast %221 : vector<2x1x1x64xf32> to vector<2x64xf32>
    %223 = arith.maximumf %220, %222 : vector<2x64xf32>
    %224 = arith.maximumf %218, %223 : vector<2x64xf32>
    %cst_263 = arith.constant 0.000000e+00 : f32
    %225 = vector.broadcast %cst_263 : f32 to vector<2x64xf32>
    %226 = arith.maximumf %224, %225 : vector<2x64xf32>
    %c128 = arith.constant 128 : index
    %c0_264 = arith.constant 0 : index
    %227 = vector.load %arg5[%c128, %c0_264] : memref<1024x128xf32, #tpu.memory_space<vmem>>, vector<64x128xf32>
    %cst_265 = arith.constant dense<0.000000e+00> : vector<2x128xf32>
    %228 = tpu.matmul %226, %227, %cst_265 {dimension_numbers = #tpu.dot_dimension_numbers<[1], [0], [0], [1], [0, 0, 1, 1], [], []>} : vector<2x64xf32>, vector<64x128xf32>, vector<2x128xf32> -> vector<2x128xf32>
    %229 = arith.addf %213, %228 : vector<2x128xf32>
    %c0_266 = arith.constant 0 : index
    %c0_267 = arith.constant 0 : index
    %c6_268 = arith.constant 6 : index
    %c0_269 = arith.constant 0 : index
    %230 = vector.load %arg13[%c0_266, %c0_267, %c6_268, %c0_269] : memref<2x8x8x64xf32, #tpu.memory_space<vmem>>, vector<2x1x1x64xf32>
    %231 = vector.shape_cast %230 : vector<2x1x1x64xf32> to vector<2x64xf32>
    %c0_270 = arith.constant 0 : index
    %c0_271 = arith.constant 0 : index
    %c7_272 = arith.constant 7 : index
    %c0_273 = arith.constant 0 : index
    %232 = vector.load %arg13[%c0_270, %c0_271, %c7_272, %c0_273] : memref<2x8x8x64xf32, #tpu.memory_space<vmem>>, vector<2x1x1x64xf32>
    %233 = vector.shape_cast %232 : vector<2x1x1x64xf32> to vector<2x64xf32>
    %234 = arith.maximumf %231, %233 : vector<2x64xf32>
    %c0_274 = arith.constant 0 : index
    %c1_275 = arith.constant 1 : index
    %c6_276 = arith.constant 6 : index
    %c0_277 = arith.constant 0 : index
    %235 = vector.load %arg13[%c0_274, %c1_275, %c6_276, %c0_277] : memref<2x8x8x64xf32, #tpu.memory_space<vmem>>, vector<2x1x1x64xf32>
    %236 = vector.shape_cast %235 : vector<2x1x1x64xf32> to vector<2x64xf32>
    %c0_278 = arith.constant 0 : index
    %c1_279 = arith.constant 1 : index
    %c7_280 = arith.constant 7 : index
    %c0_281 = arith.constant 0 : index
    %237 = vector.load %arg13[%c0_278, %c1_279, %c7_280, %c0_281] : memref<2x8x8x64xf32, #tpu.memory_space<vmem>>, vector<2x1x1x64xf32>
    %238 = vector.shape_cast %237 : vector<2x1x1x64xf32> to vector<2x64xf32>
    %239 = arith.maximumf %236, %238 : vector<2x64xf32>
    %240 = arith.maximumf %234, %239 : vector<2x64xf32>
    %cst_282 = arith.constant 0.000000e+00 : f32
    %241 = vector.broadcast %cst_282 : f32 to vector<2x64xf32>
    %242 = arith.maximumf %240, %241 : vector<2x64xf32>
    %c192 = arith.constant 192 : index
    %c0_283 = arith.constant 0 : index
    %243 = vector.load %arg5[%c192, %c0_283] : memref<1024x128xf32, #tpu.memory_space<vmem>>, vector<64x128xf32>
    %cst_284 = arith.constant dense<0.000000e+00> : vector<2x128xf32>
    %244 = tpu.matmul %242, %243, %cst_284 {dimension_numbers = #tpu.dot_dimension_numbers<[1], [0], [0], [1], [0, 0, 1, 1], [], []>} : vector<2x64xf32>, vector<64x128xf32>, vector<2x128xf32> -> vector<2x128xf32>
    %245 = arith.addf %229, %244 : vector<2x128xf32>
    %c0_285 = arith.constant 0 : index
    %c2_286 = arith.constant 2 : index
    %c0_287 = arith.constant 0 : index
    %c0_288 = arith.constant 0 : index
    %246 = vector.load %arg13[%c0_285, %c2_286, %c0_287, %c0_288] : memref<2x8x8x64xf32, #tpu.memory_space<vmem>>, vector<2x1x1x64xf32>
    %247 = vector.shape_cast %246 : vector<2x1x1x64xf32> to vector<2x64xf32>
    %c0_289 = arith.constant 0 : index
    %c2_290 = arith.constant 2 : index
    %c1_291 = arith.constant 1 : index
    %c0_292 = arith.constant 0 : index
    %248 = vector.load %arg13[%c0_289, %c2_290, %c1_291, %c0_292] : memref<2x8x8x64xf32, #tpu.memory_space<vmem>>, vector<2x1x1x64xf32>
    %249 = vector.shape_cast %248 : vector<2x1x1x64xf32> to vector<2x64xf32>
    %250 = arith.maximumf %247, %249 : vector<2x64xf32>
    %c0_293 = arith.constant 0 : index
    %c3_294 = arith.constant 3 : index
    %c0_295 = arith.constant 0 : index
    %c0_296 = arith.constant 0 : index
    %251 = vector.load %arg13[%c0_293, %c3_294, %c0_295, %c0_296] : memref<2x8x8x64xf32, #tpu.memory_space<vmem>>, vector<2x1x1x64xf32>
    %252 = vector.shape_cast %251 : vector<2x1x1x64xf32> to vector<2x64xf32>
    %c0_297 = arith.constant 0 : index
    %c3_298 = arith.constant 3 : index
    %c1_299 = arith.constant 1 : index
    %c0_300 = arith.constant 0 : index
    %253 = vector.load %arg13[%c0_297, %c3_298, %c1_299, %c0_300] : memref<2x8x8x64xf32, #tpu.memory_space<vmem>>, vector<2x1x1x64xf32>
    %254 = vector.shape_cast %253 : vector<2x1x1x64xf32> to vector<2x64xf32>
    %255 = arith.maximumf %252, %254 : vector<2x64xf32>
    %256 = arith.maximumf %250, %255 : vector<2x64xf32>
    %cst_301 = arith.constant 0.000000e+00 : f32
    %257 = vector.broadcast %cst_301 : f32 to vector<2x64xf32>
    %258 = arith.maximumf %256, %257 : vector<2x64xf32>
    %c256 = arith.constant 256 : index
    %c0_302 = arith.constant 0 : index
    %259 = vector.load %arg5[%c256, %c0_302] : memref<1024x128xf32, #tpu.memory_space<vmem>>, vector<64x128xf32>
    %cst_303 = arith.constant dense<0.000000e+00> : vector<2x128xf32>
    %260 = tpu.matmul %258, %259, %cst_303 {dimension_numbers = #tpu.dot_dimension_numbers<[1], [0], [0], [1], [0, 0, 1, 1], [], []>} : vector<2x64xf32>, vector<64x128xf32>, vector<2x128xf32> -> vector<2x128xf32>
    %261 = arith.addf %245, %260 : vector<2x128xf32>
    %c0_304 = arith.constant 0 : index
    %c2_305 = arith.constant 2 : index
    %c2_306 = arith.constant 2 : index
    %c0_307 = arith.constant 0 : index
    %262 = vector.load %arg13[%c0_304, %c2_305, %c2_306, %c0_307] : memref<2x8x8x64xf32, #tpu.memory_space<vmem>>, vector<2x1x1x64xf32>
    %263 = vector.shape_cast %262 : vector<2x1x1x64xf32> to vector<2x64xf32>
    %c0_308 = arith.constant 0 : index
    %c2_309 = arith.constant 2 : index
    %c3_310 = arith.constant 3 : index
    %c0_311 = arith.constant 0 : index
    %264 = vector.load %arg13[%c0_308, %c2_309, %c3_310, %c0_311] : memref<2x8x8x64xf32, #tpu.memory_space<vmem>>, vector<2x1x1x64xf32>
    %265 = vector.shape_cast %264 : vector<2x1x1x64xf32> to vector<2x64xf32>
    %266 = arith.maximumf %263, %265 : vector<2x64xf32>
    %c0_312 = arith.constant 0 : index
    %c3_313 = arith.constant 3 : index
    %c2_314 = arith.constant 2 : index
    %c0_315 = arith.constant 0 : index
    %267 = vector.load %arg13[%c0_312, %c3_313, %c2_314, %c0_315] : memref<2x8x8x64xf32, #tpu.memory_space<vmem>>, vector<2x1x1x64xf32>
    %268 = vector.shape_cast %267 : vector<2x1x1x64xf32> to vector<2x64xf32>
    %c0_316 = arith.constant 0 : index
    %c3_317 = arith.constant 3 : index
    %c3_318 = arith.constant 3 : index
    %c0_319 = arith.constant 0 : index
    %269 = vector.load %arg13[%c0_316, %c3_317, %c3_318, %c0_319] : memref<2x8x8x64xf32, #tpu.memory_space<vmem>>, vector<2x1x1x64xf32>
    %270 = vector.shape_cast %269 : vector<2x1x1x64xf32> to vector<2x64xf32>
    %271 = arith.maximumf %268, %270 : vector<2x64xf32>
    %272 = arith.maximumf %266, %271 : vector<2x64xf32>
    %cst_320 = arith.constant 0.000000e+00 : f32
    %273 = vector.broadcast %cst_320 : f32 to vector<2x64xf32>
    %274 = arith.maximumf %272, %273 : vector<2x64xf32>
    %c320 = arith.constant 320 : index
    %c0_321 = arith.constant 0 : index
    %275 = vector.load %arg5[%c320, %c0_321] : memref<1024x128xf32, #tpu.memory_space<vmem>>, vector<64x128xf32>
    %cst_322 = arith.constant dense<0.000000e+00> : vector<2x128xf32>
    %276 = tpu.matmul %274, %275, %cst_322 {dimension_numbers = #tpu.dot_dimension_numbers<[1], [0], [0], [1], [0, 0, 1, 1], [], []>} : vector<2x64xf32>, vector<64x128xf32>, vector<2x128xf32> -> vector<2x128xf32>
    %277 = arith.addf %261, %276 : vector<2x128xf32>
    %c0_323 = arith.constant 0 : index
    %c2_324 = arith.constant 2 : index
    %c4_325 = arith.constant 4 : index
    %c0_326 = arith.constant 0 : index
    %278 = vector.load %arg13[%c0_323, %c2_324, %c4_325, %c0_326] : memref<2x8x8x64xf32, #tpu.memory_space<vmem>>, vector<2x1x1x64xf32>
    %279 = vector.shape_cast %278 : vector<2x1x1x64xf32> to vector<2x64xf32>
    %c0_327 = arith.constant 0 : index
    %c2_328 = arith.constant 2 : index
    %c5_329 = arith.constant 5 : index
    %c0_330 = arith.constant 0 : index
    %280 = vector.load %arg13[%c0_327, %c2_328, %c5_329, %c0_330] : memref<2x8x8x64xf32, #tpu.memory_space<vmem>>, vector<2x1x1x64xf32>
    %281 = vector.shape_cast %280 : vector<2x1x1x64xf32> to vector<2x64xf32>
    %282 = arith.maximumf %279, %281 : vector<2x64xf32>
    %c0_331 = arith.constant 0 : index
    %c3_332 = arith.constant 3 : index
    %c4_333 = arith.constant 4 : index
    %c0_334 = arith.constant 0 : index
    %283 = vector.load %arg13[%c0_331, %c3_332, %c4_333, %c0_334] : memref<2x8x8x64xf32, #tpu.memory_space<vmem>>, vector<2x1x1x64xf32>
    %284 = vector.shape_cast %283 : vector<2x1x1x64xf32> to vector<2x64xf32>
    %c0_335 = arith.constant 0 : index
    %c3_336 = arith.constant 3 : index
    %c5_337 = arith.constant 5 : index
    %c0_338 = arith.constant 0 : index
    %285 = vector.load %arg13[%c0_335, %c3_336, %c5_337, %c0_338] : memref<2x8x8x64xf32, #tpu.memory_space<vmem>>, vector<2x1x1x64xf32>
    %286 = vector.shape_cast %285 : vector<2x1x1x64xf32> to vector<2x64xf32>
    %287 = arith.maximumf %284, %286 : vector<2x64xf32>
    %288 = arith.maximumf %282, %287 : vector<2x64xf32>
    %cst_339 = arith.constant 0.000000e+00 : f32
    %289 = vector.broadcast %cst_339 : f32 to vector<2x64xf32>
    %290 = arith.maximumf %288, %289 : vector<2x64xf32>
    %c384_340 = arith.constant 384 : index
    %c0_341 = arith.constant 0 : index
    %291 = vector.load %arg5[%c384_340, %c0_341] : memref<1024x128xf32, #tpu.memory_space<vmem>>, vector<64x128xf32>
    %cst_342 = arith.constant dense<0.000000e+00> : vector<2x128xf32>
    %292 = tpu.matmul %290, %291, %cst_342 {dimension_numbers = #tpu.dot_dimension_numbers<[1], [0], [0], [1], [0, 0, 1, 1], [], []>} : vector<2x64xf32>, vector<64x128xf32>, vector<2x128xf32> -> vector<2x128xf32>
    %293 = arith.addf %277, %292 : vector<2x128xf32>
    %c0_343 = arith.constant 0 : index
    %c2_344 = arith.constant 2 : index
    %c6_345 = arith.constant 6 : index
    %c0_346 = arith.constant 0 : index
    %294 = vector.load %arg13[%c0_343, %c2_344, %c6_345, %c0_346] : memref<2x8x8x64xf32, #tpu.memory_space<vmem>>, vector<2x1x1x64xf32>
    %295 = vector.shape_cast %294 : vector<2x1x1x64xf32> to vector<2x64xf32>
    %c0_347 = arith.constant 0 : index
    %c2_348 = arith.constant 2 : index
    %c7_349 = arith.constant 7 : index
    %c0_350 = arith.constant 0 : index
    %296 = vector.load %arg13[%c0_347, %c2_348, %c7_349, %c0_350] : memref<2x8x8x64xf32, #tpu.memory_space<vmem>>, vector<2x1x1x64xf32>
    %297 = vector.shape_cast %296 : vector<2x1x1x64xf32> to vector<2x64xf32>
    %298 = arith.maximumf %295, %297 : vector<2x64xf32>
    %c0_351 = arith.constant 0 : index
    %c3_352 = arith.constant 3 : index
    %c6_353 = arith.constant 6 : index
    %c0_354 = arith.constant 0 : index
    %299 = vector.load %arg13[%c0_351, %c3_352, %c6_353, %c0_354] : memref<2x8x8x64xf32, #tpu.memory_space<vmem>>, vector<2x1x1x64xf32>
    %300 = vector.shape_cast %299 : vector<2x1x1x64xf32> to vector<2x64xf32>
    %c0_355 = arith.constant 0 : index
    %c3_356 = arith.constant 3 : index
    %c7_357 = arith.constant 7 : index
    %c0_358 = arith.constant 0 : index
    %301 = vector.load %arg13[%c0_355, %c3_356, %c7_357, %c0_358] : memref<2x8x8x64xf32, #tpu.memory_space<vmem>>, vector<2x1x1x64xf32>
    %302 = vector.shape_cast %301 : vector<2x1x1x64xf32> to vector<2x64xf32>
    %303 = arith.maximumf %300, %302 : vector<2x64xf32>
    %304 = arith.maximumf %298, %303 : vector<2x64xf32>
    %cst_359 = arith.constant 0.000000e+00 : f32
    %305 = vector.broadcast %cst_359 : f32 to vector<2x64xf32>
    %306 = arith.maximumf %304, %305 : vector<2x64xf32>
    %c448 = arith.constant 448 : index
    %c0_360 = arith.constant 0 : index
    %307 = vector.load %arg5[%c448, %c0_360] : memref<1024x128xf32, #tpu.memory_space<vmem>>, vector<64x128xf32>
    %cst_361 = arith.constant dense<0.000000e+00> : vector<2x128xf32>
    %308 = tpu.matmul %306, %307, %cst_361 {dimension_numbers = #tpu.dot_dimension_numbers<[1], [0], [0], [1], [0, 0, 1, 1], [], []>} : vector<2x64xf32>, vector<64x128xf32>, vector<2x128xf32> -> vector<2x128xf32>
    %309 = arith.addf %293, %308 : vector<2x128xf32>
    %c0_362 = arith.constant 0 : index
    %c4_363 = arith.constant 4 : index
    %c0_364 = arith.constant 0 : index
    %c0_365 = arith.constant 0 : index
    %310 = vector.load %arg13[%c0_362, %c4_363, %c0_364, %c0_365] : memref<2x8x8x64xf32, #tpu.memory_space<vmem>>, vector<2x1x1x64xf32>
    %311 = vector.shape_cast %310 : vector<2x1x1x64xf32> to vector<2x64xf32>
    %c0_366 = arith.constant 0 : index
    %c4_367 = arith.constant 4 : index
    %c1_368 = arith.constant 1 : index
    %c0_369 = arith.constant 0 : index
    %312 = vector.load %arg13[%c0_366, %c4_367, %c1_368, %c0_369] : memref<2x8x8x64xf32, #tpu.memory_space<vmem>>, vector<2x1x1x64xf32>
    %313 = vector.shape_cast %312 : vector<2x1x1x64xf32> to vector<2x64xf32>
    %314 = arith.maximumf %311, %313 : vector<2x64xf32>
    %c0_370 = arith.constant 0 : index
    %c5_371 = arith.constant 5 : index
    %c0_372 = arith.constant 0 : index
    %c0_373 = arith.constant 0 : index
    %315 = vector.load %arg13[%c0_370, %c5_371, %c0_372, %c0_373] : memref<2x8x8x64xf32, #tpu.memory_space<vmem>>, vector<2x1x1x64xf32>
    %316 = vector.shape_cast %315 : vector<2x1x1x64xf32> to vector<2x64xf32>
    %c0_374 = arith.constant 0 : index
    %c5_375 = arith.constant 5 : index
    %c1_376 = arith.constant 1 : index
    %c0_377 = arith.constant 0 : index
    %317 = vector.load %arg13[%c0_374, %c5_375, %c1_376, %c0_377] : memref<2x8x8x64xf32, #tpu.memory_space<vmem>>, vector<2x1x1x64xf32>
    %318 = vector.shape_cast %317 : vector<2x1x1x64xf32> to vector<2x64xf32>
    %319 = arith.maximumf %316, %318 : vector<2x64xf32>
    %320 = arith.maximumf %314, %319 : vector<2x64xf32>
    %cst_378 = arith.constant 0.000000e+00 : f32
    %321 = vector.broadcast %cst_378 : f32 to vector<2x64xf32>
    %322 = arith.maximumf %320, %321 : vector<2x64xf32>
    %c512 = arith.constant 512 : index
    %c0_379 = arith.constant 0 : index
    %323 = vector.load %arg5[%c512, %c0_379] : memref<1024x128xf32, #tpu.memory_space<vmem>>, vector<64x128xf32>
    %cst_380 = arith.constant dense<0.000000e+00> : vector<2x128xf32>
    %324 = tpu.matmul %322, %323, %cst_380 {dimension_numbers = #tpu.dot_dimension_numbers<[1], [0], [0], [1], [0, 0, 1, 1], [], []>} : vector<2x64xf32>, vector<64x128xf32>, vector<2x128xf32> -> vector<2x128xf32>
    %325 = arith.addf %309, %324 : vector<2x128xf32>
    %c0_381 = arith.constant 0 : index
    %c4_382 = arith.constant 4 : index
    %c2_383 = arith.constant 2 : index
    %c0_384 = arith.constant 0 : index
    %326 = vector.load %arg13[%c0_381, %c4_382, %c2_383, %c0_384] : memref<2x8x8x64xf32, #tpu.memory_space<vmem>>, vector<2x1x1x64xf32>
    %327 = vector.shape_cast %326 : vector<2x1x1x64xf32> to vector<2x64xf32>
    %c0_385 = arith.constant 0 : index
    %c4_386 = arith.constant 4 : index
    %c3_387 = arith.constant 3 : index
    %c0_388 = arith.constant 0 : index
    %328 = vector.load %arg13[%c0_385, %c4_386, %c3_387, %c0_388] : memref<2x8x8x64xf32, #tpu.memory_space<vmem>>, vector<2x1x1x64xf32>
    %329 = vector.shape_cast %328 : vector<2x1x1x64xf32> to vector<2x64xf32>
    %330 = arith.maximumf %327, %329 : vector<2x64xf32>
    %c0_389 = arith.constant 0 : index
    %c5_390 = arith.constant 5 : index
    %c2_391 = arith.constant 2 : index
    %c0_392 = arith.constant 0 : index
    %331 = vector.load %arg13[%c0_389, %c5_390, %c2_391, %c0_392] : memref<2x8x8x64xf32, #tpu.memory_space<vmem>>, vector<2x1x1x64xf32>
    %332 = vector.shape_cast %331 : vector<2x1x1x64xf32> to vector<2x64xf32>
    %c0_393 = arith.constant 0 : index
    %c5_394 = arith.constant 5 : index
    %c3_395 = arith.constant 3 : index
    %c0_396 = arith.constant 0 : index
    %333 = vector.load %arg13[%c0_393, %c5_394, %c3_395, %c0_396] : memref<2x8x8x64xf32, #tpu.memory_space<vmem>>, vector<2x1x1x64xf32>
    %334 = vector.shape_cast %333 : vector<2x1x1x64xf32> to vector<2x64xf32>
    %335 = arith.maximumf %332, %334 : vector<2x64xf32>
    %336 = arith.maximumf %330, %335 : vector<2x64xf32>
    %cst_397 = arith.constant 0.000000e+00 : f32
    %337 = vector.broadcast %cst_397 : f32 to vector<2x64xf32>
    %338 = arith.maximumf %336, %337 : vector<2x64xf32>
    %c576 = arith.constant 576 : index
    %c0_398 = arith.constant 0 : index
    %339 = vector.load %arg5[%c576, %c0_398] : memref<1024x128xf32, #tpu.memory_space<vmem>>, vector<64x128xf32>
    %cst_399 = arith.constant dense<0.000000e+00> : vector<2x128xf32>
    %340 = tpu.matmul %338, %339, %cst_399 {dimension_numbers = #tpu.dot_dimension_numbers<[1], [0], [0], [1], [0, 0, 1, 1], [], []>} : vector<2x64xf32>, vector<64x128xf32>, vector<2x128xf32> -> vector<2x128xf32>
    %341 = arith.addf %325, %340 : vector<2x128xf32>
    %c0_400 = arith.constant 0 : index
    %c4_401 = arith.constant 4 : index
    %c4_402 = arith.constant 4 : index
    %c0_403 = arith.constant 0 : index
    %342 = vector.load %arg13[%c0_400, %c4_401, %c4_402, %c0_403] : memref<2x8x8x64xf32, #tpu.memory_space<vmem>>, vector<2x1x1x64xf32>
    %343 = vector.shape_cast %342 : vector<2x1x1x64xf32> to vector<2x64xf32>
    %c0_404 = arith.constant 0 : index
    %c4_405 = arith.constant 4 : index
    %c5_406 = arith.constant 5 : index
    %c0_407 = arith.constant 0 : index
    %344 = vector.load %arg13[%c0_404, %c4_405, %c5_406, %c0_407] : memref<2x8x8x64xf32, #tpu.memory_space<vmem>>, vector<2x1x1x64xf32>
    %345 = vector.shape_cast %344 : vector<2x1x1x64xf32> to vector<2x64xf32>
    %346 = arith.maximumf %343, %345 : vector<2x64xf32>
    %c0_408 = arith.constant 0 : index
    %c5_409 = arith.constant 5 : index
    %c4_410 = arith.constant 4 : index
    %c0_411 = arith.constant 0 : index
    %347 = vector.load %arg13[%c0_408, %c5_409, %c4_410, %c0_411] : memref<2x8x8x64xf32, #tpu.memory_space<vmem>>, vector<2x1x1x64xf32>
    %348 = vector.shape_cast %347 : vector<2x1x1x64xf32> to vector<2x64xf32>
    %c0_412 = arith.constant 0 : index
    %c5_413 = arith.constant 5 : index
    %c5_414 = arith.constant 5 : index
    %c0_415 = arith.constant 0 : index
    %349 = vector.load %arg13[%c0_412, %c5_413, %c5_414, %c0_415] : memref<2x8x8x64xf32, #tpu.memory_space<vmem>>, vector<2x1x1x64xf32>
    %350 = vector.shape_cast %349 : vector<2x1x1x64xf32> to vector<2x64xf32>
    %351 = arith.maximumf %348, %350 : vector<2x64xf32>
    %352 = arith.maximumf %346, %351 : vector<2x64xf32>
    %cst_416 = arith.constant 0.000000e+00 : f32
    %353 = vector.broadcast %cst_416 : f32 to vector<2x64xf32>
    %354 = arith.maximumf %352, %353 : vector<2x64xf32>
    %c640 = arith.constant 640 : index
    %c0_417 = arith.constant 0 : index
    %355 = vector.load %arg5[%c640, %c0_417] : memref<1024x128xf32, #tpu.memory_space<vmem>>, vector<64x128xf32>
    %cst_418 = arith.constant dense<0.000000e+00> : vector<2x128xf32>
    %356 = tpu.matmul %354, %355, %cst_418 {dimension_numbers = #tpu.dot_dimension_numbers<[1], [0], [0], [1], [0, 0, 1, 1], [], []>} : vector<2x64xf32>, vector<64x128xf32>, vector<2x128xf32> -> vector<2x128xf32>
    %357 = arith.addf %341, %356 : vector<2x128xf32>
    %c0_419 = arith.constant 0 : index
    %c4_420 = arith.constant 4 : index
    %c6_421 = arith.constant 6 : index
    %c0_422 = arith.constant 0 : index
    %358 = vector.load %arg13[%c0_419, %c4_420, %c6_421, %c0_422] : memref<2x8x8x64xf32, #tpu.memory_space<vmem>>, vector<2x1x1x64xf32>
    %359 = vector.shape_cast %358 : vector<2x1x1x64xf32> to vector<2x64xf32>
    %c0_423 = arith.constant 0 : index
    %c4_424 = arith.constant 4 : index
    %c7_425 = arith.constant 7 : index
    %c0_426 = arith.constant 0 : index
    %360 = vector.load %arg13[%c0_423, %c4_424, %c7_425, %c0_426] : memref<2x8x8x64xf32, #tpu.memory_space<vmem>>, vector<2x1x1x64xf32>
    %361 = vector.shape_cast %360 : vector<2x1x1x64xf32> to vector<2x64xf32>
    %362 = arith.maximumf %359, %361 : vector<2x64xf32>
    %c0_427 = arith.constant 0 : index
    %c5_428 = arith.constant 5 : index
    %c6_429 = arith.constant 6 : index
    %c0_430 = arith.constant 0 : index
    %363 = vector.load %arg13[%c0_427, %c5_428, %c6_429, %c0_430] : memref<2x8x8x64xf32, #tpu.memory_space<vmem>>, vector<2x1x1x64xf32>
    %364 = vector.shape_cast %363 : vector<2x1x1x64xf32> to vector<2x64xf32>
    %c0_431 = arith.constant 0 : index
    %c5_432 = arith.constant 5 : index
    %c7_433 = arith.constant 7 : index
    %c0_434 = arith.constant 0 : index
    %365 = vector.load %arg13[%c0_431, %c5_432, %c7_433, %c0_434] : memref<2x8x8x64xf32, #tpu.memory_space<vmem>>, vector<2x1x1x64xf32>
    %366 = vector.shape_cast %365 : vector<2x1x1x64xf32> to vector<2x64xf32>
    %367 = arith.maximumf %364, %366 : vector<2x64xf32>
    %368 = arith.maximumf %362, %367 : vector<2x64xf32>
    %cst_435 = arith.constant 0.000000e+00 : f32
    %369 = vector.broadcast %cst_435 : f32 to vector<2x64xf32>
    %370 = arith.maximumf %368, %369 : vector<2x64xf32>
    %c704 = arith.constant 704 : index
    %c0_436 = arith.constant 0 : index
    %371 = vector.load %arg5[%c704, %c0_436] : memref<1024x128xf32, #tpu.memory_space<vmem>>, vector<64x128xf32>
    %cst_437 = arith.constant dense<0.000000e+00> : vector<2x128xf32>
    %372 = tpu.matmul %370, %371, %cst_437 {dimension_numbers = #tpu.dot_dimension_numbers<[1], [0], [0], [1], [0, 0, 1, 1], [], []>} : vector<2x64xf32>, vector<64x128xf32>, vector<2x128xf32> -> vector<2x128xf32>
    %373 = arith.addf %357, %372 : vector<2x128xf32>
    %c0_438 = arith.constant 0 : index
    %c6_439 = arith.constant 6 : index
    %c0_440 = arith.constant 0 : index
    %c0_441 = arith.constant 0 : index
    %374 = vector.load %arg13[%c0_438, %c6_439, %c0_440, %c0_441] : memref<2x8x8x64xf32, #tpu.memory_space<vmem>>, vector<2x1x1x64xf32>
    %375 = vector.shape_cast %374 : vector<2x1x1x64xf32> to vector<2x64xf32>
    %c0_442 = arith.constant 0 : index
    %c6_443 = arith.constant 6 : index
    %c1_444 = arith.constant 1 : index
    %c0_445 = arith.constant 0 : index
    %376 = vector.load %arg13[%c0_442, %c6_443, %c1_444, %c0_445] : memref<2x8x8x64xf32, #tpu.memory_space<vmem>>, vector<2x1x1x64xf32>
    %377 = vector.shape_cast %376 : vector<2x1x1x64xf32> to vector<2x64xf32>
    %378 = arith.maximumf %375, %377 : vector<2x64xf32>
    %c0_446 = arith.constant 0 : index
    %c7_447 = arith.constant 7 : index
    %c0_448 = arith.constant 0 : index
    %c0_449 = arith.constant 0 : index
    %379 = vector.load %arg13[%c0_446, %c7_447, %c0_448, %c0_449] : memref<2x8x8x64xf32, #tpu.memory_space<vmem>>, vector<2x1x1x64xf32>
    %380 = vector.shape_cast %379 : vector<2x1x1x64xf32> to vector<2x64xf32>
    %c0_450 = arith.constant 0 : index
    %c7_451 = arith.constant 7 : index
    %c1_452 = arith.constant 1 : index
    %c0_453 = arith.constant 0 : index
    %381 = vector.load %arg13[%c0_450, %c7_451, %c1_452, %c0_453] : memref<2x8x8x64xf32, #tpu.memory_space<vmem>>, vector<2x1x1x64xf32>
    %382 = vector.shape_cast %381 : vector<2x1x1x64xf32> to vector<2x64xf32>
    %383 = arith.maximumf %380, %382 : vector<2x64xf32>
    %384 = arith.maximumf %378, %383 : vector<2x64xf32>
    %cst_454 = arith.constant 0.000000e+00 : f32
    %385 = vector.broadcast %cst_454 : f32 to vector<2x64xf32>
    %386 = arith.maximumf %384, %385 : vector<2x64xf32>
    %c768_455 = arith.constant 768 : index
    %c0_456 = arith.constant 0 : index
    %387 = vector.load %arg5[%c768_455, %c0_456] : memref<1024x128xf32, #tpu.memory_space<vmem>>, vector<64x128xf32>
    %cst_457 = arith.constant dense<0.000000e+00> : vector<2x128xf32>
    %388 = tpu.matmul %386, %387, %cst_457 {dimension_numbers = #tpu.dot_dimension_numbers<[1], [0], [0], [1], [0, 0, 1, 1], [], []>} : vector<2x64xf32>, vector<64x128xf32>, vector<2x128xf32> -> vector<2x128xf32>
    %389 = arith.addf %373, %388 : vector<2x128xf32>
    %c0_458 = arith.constant 0 : index
    %c6_459 = arith.constant 6 : index
    %c2_460 = arith.constant 2 : index
    %c0_461 = arith.constant 0 : index
    %390 = vector.load %arg13[%c0_458, %c6_459, %c2_460, %c0_461] : memref<2x8x8x64xf32, #tpu.memory_space<vmem>>, vector<2x1x1x64xf32>
    %391 = vector.shape_cast %390 : vector<2x1x1x64xf32> to vector<2x64xf32>
    %c0_462 = arith.constant 0 : index
    %c6_463 = arith.constant 6 : index
    %c3_464 = arith.constant 3 : index
    %c0_465 = arith.constant 0 : index
    %392 = vector.load %arg13[%c0_462, %c6_463, %c3_464, %c0_465] : memref<2x8x8x64xf32, #tpu.memory_space<vmem>>, vector<2x1x1x64xf32>
    %393 = vector.shape_cast %392 : vector<2x1x1x64xf32> to vector<2x64xf32>
    %394 = arith.maximumf %391, %393 : vector<2x64xf32>
    %c0_466 = arith.constant 0 : index
    %c7_467 = arith.constant 7 : index
    %c2_468 = arith.constant 2 : index
    %c0_469 = arith.constant 0 : index
    %395 = vector.load %arg13[%c0_466, %c7_467, %c2_468, %c0_469] : memref<2x8x8x64xf32, #tpu.memory_space<vmem>>, vector<2x1x1x64xf32>
    %396 = vector.shape_cast %395 : vector<2x1x1x64xf32> to vector<2x64xf32>
    %c0_470 = arith.constant 0 : index
    %c7_471 = arith.constant 7 : index
    %c3_472 = arith.constant 3 : index
    %c0_473 = arith.constant 0 : index
    %397 = vector.load %arg13[%c0_470, %c7_471, %c3_472, %c0_473] : memref<2x8x8x64xf32, #tpu.memory_space<vmem>>, vector<2x1x1x64xf32>
    %398 = vector.shape_cast %397 : vector<2x1x1x64xf32> to vector<2x64xf32>
    %399 = arith.maximumf %396, %398 : vector<2x64xf32>
    %400 = arith.maximumf %394, %399 : vector<2x64xf32>
    %cst_474 = arith.constant 0.000000e+00 : f32
    %401 = vector.broadcast %cst_474 : f32 to vector<2x64xf32>
    %402 = arith.maximumf %400, %401 : vector<2x64xf32>
    %c832 = arith.constant 832 : index
    %c0_475 = arith.constant 0 : index
    %403 = vector.load %arg5[%c832, %c0_475] : memref<1024x128xf32, #tpu.memory_space<vmem>>, vector<64x128xf32>
    %cst_476 = arith.constant dense<0.000000e+00> : vector<2x128xf32>
    %404 = tpu.matmul %402, %403, %cst_476 {dimension_numbers = #tpu.dot_dimension_numbers<[1], [0], [0], [1], [0, 0, 1, 1], [], []>} : vector<2x64xf32>, vector<64x128xf32>, vector<2x128xf32> -> vector<2x128xf32>
    %405 = arith.addf %389, %404 : vector<2x128xf32>
    %c0_477 = arith.constant 0 : index
    %c6_478 = arith.constant 6 : index
    %c4_479 = arith.constant 4 : index
    %c0_480 = arith.constant 0 : index
    %406 = vector.load %arg13[%c0_477, %c6_478, %c4_479, %c0_480] : memref<2x8x8x64xf32, #tpu.memory_space<vmem>>, vector<2x1x1x64xf32>
    %407 = vector.shape_cast %406 : vector<2x1x1x64xf32> to vector<2x64xf32>
    %c0_481 = arith.constant 0 : index
    %c6_482 = arith.constant 6 : index
    %c5_483 = arith.constant 5 : index
    %c0_484 = arith.constant 0 : index
    %408 = vector.load %arg13[%c0_481, %c6_482, %c5_483, %c0_484] : memref<2x8x8x64xf32, #tpu.memory_space<vmem>>, vector<2x1x1x64xf32>
    %409 = vector.shape_cast %408 : vector<2x1x1x64xf32> to vector<2x64xf32>
    %410 = arith.maximumf %407, %409 : vector<2x64xf32>
    %c0_485 = arith.constant 0 : index
    %c7_486 = arith.constant 7 : index
    %c4_487 = arith.constant 4 : index
    %c0_488 = arith.constant 0 : index
    %411 = vector.load %arg13[%c0_485, %c7_486, %c4_487, %c0_488] : memref<2x8x8x64xf32, #tpu.memory_space<vmem>>, vector<2x1x1x64xf32>
    %412 = vector.shape_cast %411 : vector<2x1x1x64xf32> to vector<2x64xf32>
    %c0_489 = arith.constant 0 : index
    %c7_490 = arith.constant 7 : index
    %c5_491 = arith.constant 5 : index
    %c0_492 = arith.constant 0 : index
    %413 = vector.load %arg13[%c0_489, %c7_490, %c5_491, %c0_492] : memref<2x8x8x64xf32, #tpu.memory_space<vmem>>, vector<2x1x1x64xf32>
    %414 = vector.shape_cast %413 : vector<2x1x1x64xf32> to vector<2x64xf32>
    %415 = arith.maximumf %412, %414 : vector<2x64xf32>
    %416 = arith.maximumf %410, %415 : vector<2x64xf32>
    %cst_493 = arith.constant 0.000000e+00 : f32
    %417 = vector.broadcast %cst_493 : f32 to vector<2x64xf32>
    %418 = arith.maximumf %416, %417 : vector<2x64xf32>
    %c896 = arith.constant 896 : index
    %c0_494 = arith.constant 0 : index
    %419 = vector.load %arg5[%c896, %c0_494] : memref<1024x128xf32, #tpu.memory_space<vmem>>, vector<64x128xf32>
    %cst_495 = arith.constant dense<0.000000e+00> : vector<2x128xf32>
    %420 = tpu.matmul %418, %419, %cst_495 {dimension_numbers = #tpu.dot_dimension_numbers<[1], [0], [0], [1], [0, 0, 1, 1], [], []>} : vector<2x64xf32>, vector<64x128xf32>, vector<2x128xf32> -> vector<2x128xf32>
    %421 = arith.addf %405, %420 : vector<2x128xf32>
    %c0_496 = arith.constant 0 : index
    %c6_497 = arith.constant 6 : index
    %c6_498 = arith.constant 6 : index
    %c0_499 = arith.constant 0 : index
    %422 = vector.load %arg13[%c0_496, %c6_497, %c6_498, %c0_499] : memref<2x8x8x64xf32, #tpu.memory_space<vmem>>, vector<2x1x1x64xf32>
    %423 = vector.shape_cast %422 : vector<2x1x1x64xf32> to vector<2x64xf32>
    %c0_500 = arith.constant 0 : index
    %c6_501 = arith.constant 6 : index
    %c7_502 = arith.constant 7 : index
    %c0_503 = arith.constant 0 : index
    %424 = vector.load %arg13[%c0_500, %c6_501, %c7_502, %c0_503] : memref<2x8x8x64xf32, #tpu.memory_space<vmem>>, vector<2x1x1x64xf32>
    %425 = vector.shape_cast %424 : vector<2x1x1x64xf32> to vector<2x64xf32>
    %426 = arith.maximumf %423, %425 : vector<2x64xf32>
    %c0_504 = arith.constant 0 : index
    %c7_505 = arith.constant 7 : index
    %c6_506 = arith.constant 6 : index
    %c0_507 = arith.constant 0 : index
    %427 = vector.load %arg13[%c0_504, %c7_505, %c6_506, %c0_507] : memref<2x8x8x64xf32, #tpu.memory_space<vmem>>, vector<2x1x1x64xf32>
    %428 = vector.shape_cast %427 : vector<2x1x1x64xf32> to vector<2x64xf32>
    %c0_508 = arith.constant 0 : index
    %c7_509 = arith.constant 7 : index
    %c7_510 = arith.constant 7 : index
    %c0_511 = arith.constant 0 : index
    %429 = vector.load %arg13[%c0_508, %c7_509, %c7_510, %c0_511] : memref<2x8x8x64xf32, #tpu.memory_space<vmem>>, vector<2x1x1x64xf32>
    %430 = vector.shape_cast %429 : vector<2x1x1x64xf32> to vector<2x64xf32>
    %431 = arith.maximumf %428, %430 : vector<2x64xf32>
    %432 = arith.maximumf %426, %431 : vector<2x64xf32>
    %cst_512 = arith.constant 0.000000e+00 : f32
    %433 = vector.broadcast %cst_512 : f32 to vector<2x64xf32>
    %434 = arith.maximumf %432, %433 : vector<2x64xf32>
    %c960 = arith.constant 960 : index
    %c0_513 = arith.constant 0 : index
    %435 = vector.load %arg5[%c960, %c0_513] : memref<1024x128xf32, #tpu.memory_space<vmem>>, vector<64x128xf32>
    %cst_514 = arith.constant dense<0.000000e+00> : vector<2x128xf32>
    %436 = tpu.matmul %434, %435, %cst_514 {dimension_numbers = #tpu.dot_dimension_numbers<[1], [0], [0], [1], [0, 0, 1, 1], [], []>} : vector<2x64xf32>, vector<64x128xf32>, vector<2x128xf32> -> vector<2x128xf32>
    %437 = arith.addf %421, %436 : vector<2x128xf32>
    %cst_515 = arith.constant 0.000000e+00 : f32
    %438 = vector.broadcast %cst_515 : f32 to vector<2x128xf32>
    %439 = arith.maximumf %437, %438 : vector<2x128xf32>
    %c0_516 = arith.constant 0 : index
    %c0_517 = arith.constant 0 : index
    %440 = vector.load %arg7[%c0_516, %c0_517] : memref<128x64xf32, #tpu.memory_space<vmem>>, vector<128x64xf32>
    %cst_518 = arith.constant dense<0.000000e+00> : vector<2x64xf32>
    %441 = tpu.matmul %439, %440, %cst_518 {dimension_numbers = #tpu.dot_dimension_numbers<[1], [0], [0], [1], [0, 0, 1, 1], [], []>} : vector<2x128xf32>, vector<128x64xf32>, vector<2x64xf32> -> vector<2x64xf32>
    %c0_519 = arith.constant 0 : index
    %c0_520 = arith.constant 0 : index
    %442 = vector.load %arg8[%c0_519, %c0_520] : memref<1x64xf32, #tpu.memory_space<vmem>>, vector<1x64xf32>
    %443 = vector.broadcast %442 : vector<1x64xf32> to vector<2x64xf32>
    %444 = arith.addf %441, %443 : vector<2x64xf32>
    %cst_521 = arith.constant 0.000000e+00 : f32
    %445 = vector.broadcast %cst_521 : f32 to vector<2x64xf32>
    %446 = arith.maximumf %444, %445 : vector<2x64xf32>
    %c0_522 = arith.constant 0 : index
    %c0_523 = arith.constant 0 : index
    %447 = vector.load %arg9[%c0_522, %c0_523] : memref<64x10xf32, #tpu.memory_space<vmem>>, vector<64x10xf32>
    %cst_524 = arith.constant dense<0.000000e+00> : vector<2x10xf32>
    %448 = tpu.matmul %446, %447, %cst_524 {dimension_numbers = #tpu.dot_dimension_numbers<[1], [0], [0], [1], [0, 0, 1, 1], [], []>} : vector<2x64xf32>, vector<64x10xf32>, vector<2x10xf32> -> vector<2x10xf32>
    %c0_525 = arith.constant 0 : index
    %c0_526 = arith.constant 0 : index
    %449 = vector.load %arg10[%c0_525, %c0_526] : memref<1x10xf32, #tpu.memory_space<vmem>>, vector<1x10xf32>
    %450 = vector.broadcast %449 : vector<1x10xf32> to vector<2x10xf32>
    %451 = arith.addf %448, %450 : vector<2x10xf32>
    %cst_527 = arith.constant dense<0xFF800000> : vector<2xf32>
    %452 = vector.multi_reduction <maximumf>, %451, %cst_527 [1] : vector<2x10xf32> to vector<2xf32>
    %453 = vector.shape_cast %452 : vector<2xf32> to vector<2x1xf32>
    %454 = vector.broadcast %453 : vector<2x1xf32> to vector<2x10xf32>
    %455 = arith.subf %451, %454 : vector<2x10xf32>
    %456 = math.exp %455 : vector<2x10xf32>
    %cst_528 = arith.constant dense<0.000000e+00> : vector<2xf32>
    %457 = vector.multi_reduction <add>, %456, %cst_528 [1] : vector<2x10xf32> to vector<2xf32>
    %458 = vector.shape_cast %457 : vector<2xf32> to vector<2x1xf32>
    %459 = math.log %458 : vector<2x1xf32>
    %460 = arith.addf %459, %453 : vector<2x1xf32>
    %461 = vector.broadcast %460 : vector<2x1xf32> to vector<2x10xf32>
    %462 = arith.subf %451, %461 : vector<2x10xf32>
    %c0_529 = arith.constant 0 : index
    %c0_530 = arith.constant 0 : index
    %463 = vector.load %arg11[%c0_529, %c0_530] : memref<2x10xf32, #tpu.memory_space<vmem>>, vector<2x10xf32>
    tpu.vector_store %arg11[%c0_529, %c0_530], %462 {strides = array<i32>} : memref<2x10xf32, #tpu.memory_space<vmem>>, vector<2x10xf32>,
    return
  }
}

</mosaic_0001>

<bundles_post_ra>
// kernel: cnn_mnist_forward.1
= control target key start
LH: loop header
LB: loop body
LE: loop exit
PB: predicated region body
PF: predicated region fallthrough
CT: control target
= control target key end

     0   :  { %vm236_vm0 = vcmask 1040384   ;;  %vm91_vm1 = vcmask 203776   ;;  %vm14651_vm2 = vmmov 1   ;;  %s18604_s0 = inlined_call_operand.vmem [shape: f32[1536,25], index: 0, kind: input, shape index: {}]   ;;  %s18605_s1 = inlined_call_operand.vmem [shape: f32[25,64], index: 1, kind: input, shape index: {}]   ;;  %s18606_s2 = inlined_call_operand.vmem [shape: f32[1,64], index: 2, kind: input, shape index: {}]   ;;  %s18607_s3 = inlined_call_operand.vmem [shape: f32[25,64,64], index: 3, kind: input, shape index: {}]   ;;  %s18608_s4 = inlined_call_operand.vmem [shape: f32[1,64], index: 4, kind: input, shape index: {}]   ;;  %s18609_s5 = inlined_call_operand.vmem [shape: f32[1024,128], index: 5, kind: input, shape index: {}]   ;;  %s18610_s6 = inlined_call_operand.vmem [shape: f32[1,128], index: 6, kind: input, shape index: {}]   ;;  %s18611_s7 = inlined_call_operand.vmem [shape: f32[128,64], index: 7, kind: input, shape index: {}]   ;;  %s18612_s8 = inlined_call_operand.vmem [shape: f32[1,64], index: 8, kind: input, shape index: {}]   ;;  %s18613_s9 = inlined_call_operand.vmem [shape: f32[64,10], index: 9, kind: input, shape index: {}]   ;;  %s18614_s10 = inlined_call_operand.vmem [shape: f32[1,10], index: 10, kind: input, shape index: {}]   ;;  %s18615_s11 = inlined_call_operand.hbm [shape: f32[2,10], index: 11, kind: output, shape index: {}]  }
   0x1   :  { %v87_v0 = vld [vmem:[%s18605_s1] sm:$0xff]  ;;  %v88_v1 = vld [vmem:[%s18605_s1 + $0x8] sm:$0xff]  ;;  %v89_v2 = vld [vmem:[%s18605_s1 + $0x10] sm:$0xff] }
   0x2   :  { %v14725_v3 = vpack.c.bf16 %v88_v1, %v87_v0  ;;  %v90_v4 = vld [vmem:[%s18605_s1 + $0x18] sm:$0x1]  ;;  %v39_v5 = vld [vmem:[%s18604_s0] sm:$0xff]  ;;  %vm14735_vm3 = vmpackc.low %vm236_vm0, %vm14651_vm2 }
   0x3   :  { %v14733_v6 = vpack.c.bf16 %v90_v4, %v89_v2  ;;  %11849 = vmatprep.mubr.msk.f32.mxu1 %vm91_vm1, %v39_v5  ;;  %v40_v8 = vld [vmem:[%s18604_s0 + $0x8] sm:$0xff]  ;;  %v41_v9 = vld [vmem:[%s18604_s0 + $0x10] sm:$0xff]  ;;  %v42_v10 = vld [vmem:[%s18604_s0 + $0x18] sm:$0xff] }
   0x4   :  { %13520 = vmatprep.subr.bf16.mxu1 %v14725_v3  ;;  %v43_v11 = vld [vmem:[%s18604_s0 + $0x20] sm:$0xff]  ;;  %v44_v12 = vld [vmem:[%s18604_s0 + $0x28] sm:$0xff]  ;;  %v45_v13 = vld [vmem:[%s18604_s0 + $0x30] sm:$0xff] }
   0x5   :  { %13522 = vmatpush3.bf16.msra.mxu1 %v14725_v3  ;;  %v46_v14 = vld [vmem:[%s18604_s0 + $0x38] sm:$0xff]  ;;  %v47_v15 = vld [vmem:[%s18604_s0 + $0x40] sm:$0xff]  ;;  %v48_v16 = vld [vmem:[%s18604_s0 + $0x48] sm:$0xff] }
   0x6   :  { %13525 = vmatprep.subr.msk.bf16.mxu1 %vm14735_vm3, %v14733_v6  ;;  %v49_v17 = vld [vmem:[%s18604_s0 + $0x50] sm:$0xff] }
   0x9   :  { %13528 = vmatpush3.bf16.msk.msra.mxu1 %vm14735_vm3, %v14733_v6 }
   0xa   :  { %13530 = vmatprep.subr.bf16.mxu1 %v14725_v3 }
   0xc   :  { %11850 = vmatmul.mubr.msk.f32.vlgmr.msra.gmra.mrb[0].mxu1 %vm91_vm1, %v40_v8 }
   0xd   :  { %13532 = vmatpush3.bf16.msra.mxu1 %v14725_v3  ;;  %11852 = vmatprep.mubr.msk.f32.mxu1 %vm91_vm1, %v41_v9 }
   0xe   :  { %13535 = vmatprep.subr.msk.bf16.mxu1 %vm14735_vm3, %v14733_v6 }
  0x10   :  { %11853 = vmatmul.mubr.msk.f32.gmra.mrb[2].mxu1 %vm91_vm1, %v42_v10 }
  0x11   :  { %11855 = vmatprep.mubr.msk.f32.mxu1 %vm91_vm1, %v43_v11  ;;  %13538 = vmatpush3.bf16.msk.msra.mxu1 %vm14735_vm3, %v14733_v6 }
  0x12   :  { %13540 = vmatprep.subr.bf16.mxu1 %v14725_v3 }
  0x14   :  { %11856 = vmatmul.mubr.msk.f32.gmra.mrb[4].mxu1 %vm91_vm1, %v44_v12 }
  0x15   :  { %11858 = vmatprep.mubr.msk.f32.mxu1 %vm91_vm1, %v45_v13 }
  0x18   :  { %11859 = vmatmul.mubr.msk.f32.gmra.mrb[6].mxu1 %vm91_vm1, %v46_v14 }
  0x19   :  { %11861 = vmatprep.mubr.msk.f32.mxu1 %vm91_vm1, %v47_v15 }
  0x1a   :  { %16 = vsyncpa [#allocation5], 0  ;;  %v50_v18 = vld [vmem:[%s18604_s0 + $0x58] sm:$0xff]  ;;  %v51_v19 = vld [vmem:[%s18604_s0 + $0x60] sm:$0xff]  ;;  %vm2283_vm4 = vcmask 523264   ;;  %vm14653_vm5 = vmmov 0  }
  0x1b   :  { %v52_v20 = vld [vmem:[%s18604_s0 + $0x68] sm:$0xff]  ;;  %v53_v21 = vld [vmem:[%s18604_s0 + $0x70] sm:$0xff]  ;;  %v54_v22 = vld [vmem:[%s18604_s0 + $0x78] sm:$0xff]  ;;  %vm8245_vm6 = vcmask 1041409   ;;  %vm10024_vm7 = vcmask 74752  }
  0x1c   :  { %11862 = vmatmul.mubr.msk.f32.gmra.mrb[8].mxu1 %vm91_vm1, %v48_v16  ;;  %v55_v23 = vld [vmem:[%s18604_s0 + $0x80] sm:$0xff]  ;;  %v56_v24 = vld [vmem:[%s18604_s0 + $0x88] sm:$0xff]  ;;  %v57_v25 = vld [vmem:[%s18604_s0 + $0x90] sm:$0xff] }
  0x1d   :  { %11864 = vmatprep.mubr.msk.f32.mxu1 %vm91_vm1, %v49_v17  ;;  %v58_v26 = vld [vmem:[%s18604_s0 + $0x98] sm:$0xff]  ;;  %v59_v27 = vld [vmem:[%s18604_s0 + $0xa0] sm:$0xff]  ;;  %v60_v28 = vld [vmem:[%s18604_s0 + $0xa8] sm:$0xff] }
  0x1e   :  { %v61_v29 = vld [vmem:[%s18604_s0 + $0xb0] sm:$0xff]  ;;  %v62_v30 = vld [vmem:[%s18604_s0 + $0xb8] sm:$0xff]  ;;  %v63_v31 = vld [vmem:[%s18604_s0 + $0xc0] sm:$0xff] }
  0x1f   :  { %v64_v32 = vld [vmem:[%s18604_s0 + $0xc8] sm:$0xff]  ;;  %v65_v33 = vld [vmem:[%s18604_s0 + $0xd0] sm:$0xff]  ;;  %v66_v34 = vld [vmem:[%s18604_s0 + $0xd8] sm:$0xff] }
  0x20   :  { %11865 = vmatmul.mubr.msk.f32.gmra.mrb[10].mxu1 %vm91_vm1, %v50_v18  ;;  %v67_v35 = vld [vmem:[%s18604_s0 + $0xe0] sm:$0xff]  ;;  %v68_v36 = vld [vmem:[%s18604_s0 + $0xe8] sm:$0xff]  ;;  %v69_v37 = vld [vmem:[%s18604_s0 + $0xf0] sm:$0xff] }
  0x21   :  { %11867 = vmatprep.mubr.msk.f32.mxu1 %vm91_vm1, %v51_v19  ;;  %v70_v38 = vld [vmem:[%s18604_s0 + $0xf8] sm:$0xff]  ;;  %v71_v39 = vld [vmem:[%s18604_s0 + $0x100] sm:$0xff]  ;;  %v72_v40 = vld [vmem:[%s18604_s0 + $0x108] sm:$0xff] }
  0x22   :  { %v73_v41 = vld [vmem:[%s18604_s0 + $0x110] sm:$0xff]  ;;  %v74_v42 = vld [vmem:[%s18604_s0 + $0x118] sm:$0xff]  ;;  %v75_v43 = vld [vmem:[%s18604_s0 + $0x120] sm:$0xff] }
  0x23   :  { %v76_v44 = vld [vmem:[%s18604_s0 + $0x128] sm:$0xff]  ;;  %v77_v45 = vld [vmem:[%s18604_s0 + $0x130] sm:$0xff]  ;;  %v78_v46 = vld [vmem:[%s18604_s0 + $0x138] sm:$0xff] }
  0x24   :  { %11868 = vmatmul.mubr.msk.f32.gmra.mrb[12].mxu1 %vm91_vm1, %v52_v20  ;;  %v79_v47 = vld [vmem:[%s18604_s0 + $0x140] sm:$0xff]  ;;  %v80_v48 = vld [vmem:[%s18604_s0 + $0x148] sm:$0xff]  ;;  %v81_v49 = vld [vmem:[%s18604_s0 + $0x150] sm:$0xff] }
  0x25   :  { %11870 = vmatprep.mubr.msk.f32.mxu1 %vm91_vm1, %v53_v21  ;;  %v82_v50 = vld [vmem:[%s18604_s0 + $0x158] sm:$0xff]  ;;  %v83_v51 = vld [vmem:[%s18604_s0 + $0x160] sm:$0xff]  ;;  %v84_v52 = vld [vmem:[%s18604_s0 + $0x168] sm:$0xff] }
  0x26   :  { %v85_v53 = vld [vmem:[%s18604_s0 + $0x170] sm:$0xff]  ;;  %v86_v54 = vld [vmem:[%s18604_s0 + $0x178] sm:$0xff]  ;;  %v545_v55 = vld [vmem:[%s18604_s0 + $0x180] sm:$0xff] }
  0x27   :  { %v546_v56 = vld [vmem:[%s18604_s0 + $0x188] sm:$0xff]  ;;  %v547_v57 = vld [vmem:[%s18604_s0 + $0x190] sm:$0xff]  ;;  %v548_v58 = vld [vmem:[%s18604_s0 + $0x198] sm:$0xff] }
  0x28   :  { %11871 = vmatmul.mubr.msk.f32.gmra.mrb[14].mxu1 %vm91_vm1, %v54_v22  ;;  %v549_v59 = vld [vmem:[%s18604_s0 + $0x1a0] sm:$0xff]  ;;  %v550_v60 = vld [vmem:[%s18604_s0 + $0x1a8] sm:$0xff]  ;;  %v551_v61 = vld [vmem:[%s18604_s0 + $0x1b0] sm:$0xff] }
  0x29   :  { %11873 = vmatprep.mubr.msk.f32.mxu1 %vm91_vm1, %v55_v23  ;;  %v552_v62 = vld [vmem:[%s18604_s0 + $0x1b8] sm:$0xff]  ;;  %v553_v63 = vld [vmem:[%s18604_s0 + $0x1c0] sm:$0xff]  ;;  %v554_v0 = vld [vmem:[%s18604_s0 + $0x1c8] sm:$0xff] }
  0x2a   :  { %v555_v1 = vld [vmem:[%s18604_s0 + $0x1d0] sm:$0xff]  ;;  %v556_v2 = vld [vmem:[%s18604_s0 + $0x1d8] sm:$0xff]  ;;  %v557_v4 = vld [vmem:[%s18604_s0 + $0x1e0] sm:$0xff] }
  0x2b   :  { %v558_v5 = vld [vmem:[%s18604_s0 + $0x1e8] sm:$0xff]  ;;  %v559_v8 = vld [vmem:[%s18604_s0 + $0x1f0] sm:$0xff]  ;;  %v560_v9 = vld [vmem:[%s18604_s0 + $0x1f8] sm:$0xff] }
  0x2c   :  { %11874 = vmatmul.mubr.msk.f32.gmra.mrb[16].mxu1 %vm91_vm1, %v56_v24  ;;  %v561_v10 = vld [vmem:[%s18604_s0 + $0x200] sm:$0xff]  ;;  %v562_v11 = vld [vmem:[%s18604_s0 + $0x208] sm:$0xff]  ;;  %v563_v12 = vld [vmem:[%s18604_s0 + $0x210] sm:$0xff] }
  0x2d   :  { %11876 = vmatprep.mubr.msk.f32.mxu1 %vm91_vm1, %v57_v25  ;;  %v564_v13 = vld [vmem:[%s18604_s0 + $0x218] sm:$0xff]  ;;  %v565_v14 = vld [vmem:[%s18604_s0 + $0x220] sm:$0xff]  ;;  %v566_v15 = vld [vmem:[%s18604_s0 + $0x228] sm:$0xff] }
  0x2e   :  { %v567_v16 = vld [vmem:[%s18604_s0 + $0x230] sm:$0xff]  ;;  %v568_v17 = vld [vmem:[%s18604_s0 + $0x238] sm:$0xff]  ;;  %v569_v18 = vld [vmem:[%s18604_s0 + $0x240] sm:$0xff] }
  0x2f   :  { %v570_v19 = vld [vmem:[%s18604_s0 + $0x248] sm:$0xff]  ;;  %v571_v20 = vld [vmem:[%s18604_s0 + $0x250] sm:$0xff]  ;;  %v572_v21 = vld [vmem:[%s18604_s0 + $0x258] sm:$0xff] }
  0x30   :  { %11877 = vmatmul.mubr.msk.f32.gmra.mrb[18].mxu1 %vm91_vm1, %v58_v26  ;;  %v573_v22 = vld [vmem:[%s18604_s0 + $0x260] sm:$0xff]  ;;  %v574_v23 = vld [vmem:[%s18604_s0 + $0x268] sm:$0xff]  ;;  %v575_v24 = vld [vmem:[%s18604_s0 + $0x270] sm:$0xff] }
  0x31   :  { %11879 = vmatprep.mubr.msk.f32.mxu1 %vm91_vm1, %v59_v27  ;;  %v576_v25 = vld [vmem:[%s18604_s0 + $0x278] sm:$0xff]  ;;  %v577_v26 = vld [vmem:[%s18604_s0 + $0x280] sm:$0xff]  ;;  %v578_v27 = vld [vmem:[%s18604_s0 + $0x288] sm:$0xff] }
  0x32   :  { %v1100_v7 = vld [vmem:[%s18604_s0 + $0x350] sm:$0xff] }
  0x34   :  { %11880 = vmatmul.mubr.msk.f32.gmra.mrb[20].mxu1 %vm91_vm1, %v60_v28  ;;  %v579_v28 = vld [vmem:[%s18604_s0 + $0x290] sm:$0xff] }
  0x35   :  { %11882 = vmatprep.mubr.msk.f32.mxu1 %vm91_vm1, %v61_v29  ;;  %v580_v29 = vld [vmem:[%s18604_s0 + $0x298] sm:$0xff] }
  0x38   :  { %11883 = vmatmul.mubr.msk.f32.gmra.mrb[22].mxu1 %vm91_vm1, %v62_v30  ;;  %v581_v30 = vld [vmem:[%s18604_s0 + $0x2a0] sm:$0xff] }
  0x39   :  { %11885 = vmatprep.mubr.msk.f32.mxu1 %vm91_vm1, %v63_v31  ;;  %v582_v31 = vld [vmem:[%s18604_s0 + $0x2a8] sm:$0xff] }
  0x3c   :  { %11886 = vmatmul.mubr.msk.f32.gmra.mrb[24].mxu1 %vm91_vm1, %v64_v32  ;;  %v583_v32 = vld [vmem:[%s18604_s0 + $0x2b0] sm:$0xff] }
  0x3d   :  { %11888 = vmatprep.mubr.msk.f32.mxu1 %vm91_vm1, %v65_v33  ;;  %v584_v33 = vld [vmem:[%s18604_s0 + $0x2b8] sm:$0xff] }
  0x40   :  { %11889 = vmatmul.mubr.msk.f32.gmra.mrb[26].mxu1 %vm91_vm1, %v66_v34  ;;  %v585_v34 = vld [vmem:[%s18604_s0 + $0x2c0] sm:$0xff] }
  0x41   :  { %11891 = vmatprep.mubr.msk.f32.mxu1 %vm91_vm1, %v67_v35  ;;  %v586_v35 = vld [vmem:[%s18604_s0 + $0x2c8] sm:$0xff] }
  0x44   :  { %11892 = vmatmul.mubr.msk.f32.gmra.mrb[28].mxu1 %vm91_vm1, %v68_v36  ;;  %v587_v36 = vld [vmem:[%s18604_s0 + $0x2d0] sm:$0xff] }
  0x45   :  { %11894 = vmatprep.mubr.msk.f32.mxu1 %vm91_vm1, %v69_v37  ;;  %v588_v37 = vld [vmem:[%s18604_s0 + $0x2d8] sm:$0xff] }
  0x48   :  { %11895 = vmatmul.mubr.msk.f32.gmra.mrb[30].mxu1 %vm91_vm1, %v70_v38  ;;  %v589_v38 = vld [vmem:[%s18604_s0 + $0x2e0] sm:$0xff] }
  0x49   :  { %11897 = vmatprep.mubr.msk.f32.mxu1 %vm91_vm1, %v71_v39  ;;  %v590_v39 = vld [vmem:[%s18604_s0 + $0x2e8] sm:$0xff] }
  0x4c   :  { %11898 = vmatmul.mubr.msk.f32.gmra.mrb[32].mxu1 %vm91_vm1, %v72_v40  ;;  %v591_v40 = vld [vmem:[%s18604_s0 + $0x2f0] sm:$0xff] }
  0x4d   :  { %11900 = vmatprep.mubr.msk.f32.mxu1 %vm91_vm1, %v73_v41  ;;  %v592_v41 = vld [vmem:[%s18604_s0 + $0x2f8] sm:$0xff] }
  0x50   :  { %11901 = vmatmul.mubr.msk.f32.gmra.mrb[34].mxu1 %vm91_vm1, %v74_v42  ;;  %v1090_v42 = vld [vmem:[%s18604_s0 + $0x300] sm:$0xff] }
  0x51   :  { %11903 = vmatprep.mubr.msk.f32.mxu1 %vm91_vm1, %v75_v43  ;;  %v1091_v43 = vld [vmem:[%s18604_s0 + $0x308] sm:$0xff] }
  0x54   :  { %11904 = vmatmul.mubr.msk.f32.gmra.mrb[36].mxu1 %vm91_vm1, %v76_v44  ;;  %v1092_v44 = vld [vmem:[%s18604_s0 + $0x310] sm:$0xff] }
  0x55   :  { %11906 = vmatprep.mubr.msk.f32.mxu1 %vm91_vm1, %v77_v45  ;;  %v1093_v45 = vld [vmem:[%s18604_s0 + $0x318] sm:$0xff] }
  0x58   :  { %11907 = vmatmul.mubr.msk.f32.gmra.mrb[38].mxu1 %vm91_vm1, %v78_v46  ;;  %v1094_v46 = vld [vmem:[%s18604_s0 + $0x320] sm:$0xff] }
  0x59   :  { %11909 = vmatprep.mubr.msk.f32.mxu1 %vm91_vm1, %v79_v47  ;;  %v1096_v47 = vld [vmem:[%s18604_s0 + $0x330] sm:$0xff] }
  0x5c   :  { %11910 = vmatmul.mubr.msk.f32.gmra.mrb[40].mxu1 %vm91_vm1, %v80_v48  ;;  %v1097_v48 = vld [vmem:[%s18604_s0 + $0x338] sm:$0xff] }
  0x5d   :  { %11912 = vmatprep.mubr.msk.f32.mxu1 %vm91_vm1, %v81_v49  ;;  %v1098_v49 = vld [vmem:[%s18604_s0 + $0x340] sm:$0xff] }
  0x60   :  { %11913 = vmatmul.mubr.msk.f32.gmra.mrb[42].mxu1 %vm91_vm1, %v82_v50  ;;  %v1101_v50 = vld [vmem:[%s18604_s0 + $0x358] sm:$0xff] }
  0x61   :  { %11915 = vmatprep.mubr.msk.f32.mxu1 %vm91_vm1, %v83_v51  ;;  %v1102_v51 = vld [vmem:[%s18604_s0 + $0x360] sm:$0xff] }
  0x64   :  { %11916 = vmatmul.mubr.msk.f32.gmra.mrb[44].mxu1 %vm91_vm1, %v84_v52 }
  0x65   :  { %11918 = vmatprep.mubr.msk.f32.mxu1 %vm91_vm1, %v85_v53 }
  0x68   :  { %11919 = vmatmul.mubr.msk.f32.gmra.mrb[46].mxu1 %vm91_vm1, %v86_v54  ;;  %v1103_v54 = vld [vmem:[%s18604_s0 + $0x368] sm:$0xff] }
  0x69   :  { %11929 = vmatprep.mubr.msk.f32.mxu1 %vm91_vm1, %v545_v55  ;;  %v1104_v55 = vld [vmem:[%s18604_s0 + $0x370] sm:$0xff] }
  0x6c   :  { %11930 = vmatmul.mubr.msk.f32.vlgmr.msra.gmra.mrb[48].mxu1 %vm91_vm1, %v546_v56 }
  0x6d   :  { %13542 = vmatpush3.bf16.msra.mxu1 %v14725_v3  ;;  %11932 = vmatprep.mubr.msk.f32.mxu1 %vm91_vm1, %v547_v57 }
  0x6e   :  { %13545 = vmatprep.subr.msk.bf16.mxu1 %vm14735_vm3, %v14733_v6 }
  0x70   :  { %11933 = vmatmul.mubr.msk.f32.gmra.mrb[50].mxu1 %vm91_vm1, %v548_v58  ;;  %v1105_v58 = vld [vmem:[%s18604_s0 + $0x378] sm:$0xff] }
  0x71   :  { %11935 = vmatprep.mubr.msk.f32.mxu1 %vm91_vm1, %v549_v59  ;;  %13548 = vmatpush3.bf16.msk.msra.mxu1 %vm14735_vm3, %v14733_v6  ;;  %v1106_v59 = vld [vmem:[%s18604_s0 + $0x380] sm:$0xff] }
  0x72   :  { %13550 = vmatprep.subr.bf16.mxu1 %v14725_v3 }
  0x74   :  { %11936 = vmatmul.mubr.msk.f32.gmra.mrb[52].mxu1 %vm91_vm1, %v550_v60 }
  0x75   :  { %11938 = vmatprep.mubr.msk.f32.mxu1 %vm91_vm1, %v551_v61 }
  0x78   :  { %11939 = vmatmul.mubr.msk.f32.gmra.mrb[54].mxu1 %vm91_vm1, %v552_v62  ;;  %v1107_v62 = vld [vmem:[%s18604_s0 + $0x388] sm:$0xff] }
  0x79   :  { %11941 = vmatprep.mubr.msk.f32.mxu1 %vm91_vm1, %v553_v63  ;;  %v1108_v63 = vld [vmem:[%s18604_s0 + $0x390] sm:$0xff] }
  0x7c   :  { %11942 = vmatmul.mubr.msk.f32.gmra.mrb[56].mxu1 %vm91_vm1, %v554_v0 }
  0x7d   :  { %11944 = vmatprep.mubr.msk.f32.mxu1 %vm91_vm1, %v555_v1 }
  0x80   :  { %11945 = vmatmul.mubr.msk.f32.gmra.mrb[58].mxu1 %vm91_vm1, %v556_v2  ;;  %v1109_v2 = vld [vmem:[%s18604_s0 + $0x398] sm:$0xff] }
  0x81   :  { %11947 = vmatprep.mubr.msk.f32.mxu1 %vm91_vm1, %v557_v4  ;;  %v1110_v4 = vld [vmem:[%s18604_s0 + $0x3a0] sm:$0xff] }
  0x84   :  { %11948 = vmatmul.mubr.msk.f32.gmra.mrb[60].mxu1 %vm91_vm1, %v558_v5 }
  0x85   :  { %11950 = vmatprep.mubr.msk.f32.mxu1 %vm91_vm1, %v559_v8 }
  0x88   :  { %11951 = vmatmul.mubr.msk.f32.gmra.mrb[62].mxu1 %vm91_vm1, %v560_v9  ;;  %v1111_v9 = vld [vmem:[%s18604_s0 + $0x3a8] sm:$0xff] }
  0x89   :  { %11953 = vmatprep.mubr.msk.f32.mxu1 %vm91_vm1, %v561_v10  ;;  %v1112_v10 = vld [vmem:[%s18604_s0 + $0x3b0] sm:$0xff] }
  0x8c   :  { %11954 = vmatmul.mubr.msk.f32.gmra.mrb[64].mxu1 %vm91_vm1, %v562_v11 }
  0x8d   :  { %11956 = vmatprep.mubr.msk.f32.mxu1 %vm91_vm1, %v563_v12 }
  0x90   :  { %11957 = vmatmul.mubr.msk.f32.gmra.mrb[66].mxu1 %vm91_vm1, %v564_v13  ;;  %v1113_v13 = vld [vmem:[%s18604_s0 + $0x3b8] sm:$0xff] }
  0x91   :  { %11959 = vmatprep.mubr.msk.f32.mxu1 %vm91_vm1, %v565_v14  ;;  %v1114_v14 = vld [vmem:[%s18604_s0 + $0x3c0] sm:$0xff] }
  0x94   :  { %11960 = vmatmul.mubr.msk.f32.gmra.mrb[68].mxu1 %vm91_vm1, %v566_v15 }
  0x95   :  { %11962 = vmatprep.mubr.msk.f32.mxu1 %vm91_vm1, %v567_v16 }
  0x98   :  { %11963 = vmatmul.mubr.msk.f32.gmra.mrb[70].mxu1 %vm91_vm1, %v568_v17  ;;  %v1115_v17 = vld [vmem:[%s18604_s0 + $0x3c8] sm:$0xff] }
  0x99   :  { %11965 = vmatprep.mubr.msk.f32.mxu1 %vm91_vm1, %v569_v18  ;;  %v1116_v18 = vld [vmem:[%s18604_s0 + $0x3d0] sm:$0xff] }
  0x9c   :  { %11966 = vmatmul.mubr.msk.f32.gmra.mrb[72].mxu1 %vm91_vm1, %v570_v19 }
  0x9d   :  { %11968 = vmatprep.mubr.msk.f32.mxu1 %vm91_vm1, %v571_v20 }
  0xa0   :  { %11969 = vmatmul.mubr.msk.f32.gmra.mrb[74].mxu1 %vm91_vm1, %v572_v21  ;;  %v1117_v21 = vld [vmem:[%s18604_s0 + $0x3d8] sm:$0xff] }
  0xa1   :  { %11971 = vmatprep.mubr.msk.f32.mxu1 %vm91_vm1, %v573_v22  ;;  %v1118_v22 = vld [vmem:[%s18604_s0 + $0x3e0] sm:$0xff] }
  0xa4   :  { %11972 = vmatmul.mubr.msk.f32.gmra.mrb[76].mxu1 %vm91_vm1, %v574_v23 }
  0xa5   :  { %11974 = vmatprep.mubr.msk.f32.mxu1 %vm91_vm1, %v575_v24 }
  0xa8   :  { %11975 = vmatmul.mubr.msk.f32.gmra.mrb[78].mxu1 %vm91_vm1, %v576_v25  ;;  %v1119_v25 = vld [vmem:[%s18604_s0 + $0x3e8] sm:$0xff] }
  0xa9   :  { %11977 = vmatprep.mubr.msk.f32.mxu1 %vm91_vm1, %v577_v26  ;;  %v1120_v26 = vld [vmem:[%s18604_s0 + $0x3f0] sm:$0xff] }
  0xac   :  { %11978 = vmatmul.mubr.msk.f32.gmra.mrb[80].mxu1 %vm91_vm1, %v578_v27 }
  0xad   :  { %11980 = vmatprep.mubr.msk.f32.mxu1 %vm91_vm1, %v579_v28 }
  0xb0   :  { %11981 = vmatmul.mubr.msk.f32.gmra.mrb[82].mxu1 %vm91_vm1, %v580_v29  ;;  %v1121_v29 = vld [vmem:[%s18604_s0 + $0x3f8] sm:$0xff] }
  0xb1   :  { %11983 = vmatprep.mubr.msk.f32.mxu1 %vm91_vm1, %v581_v30  ;;  %v1122_v30 = vld [vmem:[%s18604_s0 + $0x400] sm:$0xff] }
  0xb4   :  { %11984 = vmatmul.mubr.msk.f32.gmra.mrb[84].mxu1 %vm91_vm1, %v582_v31 }
  0xb5   :  { %11986 = vmatprep.mubr.msk.f32.mxu1 %vm91_vm1, %v583_v32 }
  0xb8   :  { %11987 = vmatmul.mubr.msk.f32.gmra.mrb[86].mxu1 %vm91_vm1, %v584_v33  ;;  %v1123_v33 = vld [vmem:[%s18604_s0 + $0x408] sm:$0xff] }
  0xb9   :  { %11989 = vmatprep.mubr.msk.f32.mxu1 %vm91_vm1, %v585_v34  ;;  %v1124_v34 = vld [vmem:[%s18604_s0 + $0x410] sm:$0xff] }
  0xbc   :  { %11990 = vmatmul.mubr.msk.f32.gmra.mrb[88].mxu1 %vm91_vm1, %v586_v35 }
  0xbd   :  { %11992 = vmatprep.mubr.msk.f32.mxu1 %vm91_vm1, %v587_v36 }
  0xc0   :  { %11993 = vmatmul.mubr.msk.f32.gmra.mrb[90].mxu1 %vm91_vm1, %v588_v37  ;;  %v1125_v37 = vld [vmem:[%s18604_s0 + $0x418] sm:$0xff] }
  0xc1   :  { %11995 = vmatprep.mubr.msk.f32.mxu1 %vm91_vm1, %v589_v38  ;;  %v1126_v38 = vld [vmem:[%s18604_s0 + $0x420] sm:$0xff] }
  0xc4   :  { %11996 = vmatmul.mubr.msk.f32.gmra.mrb[92].mxu1 %vm91_vm1, %v590_v39 }
  0xc5   :  { %11998 = vmatprep.mubr.msk.f32.mxu1 %vm91_vm1, %v591_v40 }
  0xc8   :  { %11999 = vmatmul.mubr.msk.f32.gmra.mrb[94].mxu1 %vm91_vm1, %v592_v41  ;;  %v1127_v41 = vld [vmem:[%s18604_s0 + $0x428] sm:$0xff] }
  0xc9   :  { %12009 = vmatprep.mubr.msk.f32.mxu1 %vm91_vm1, %v1090_v42  ;;  %v1128_v42 = vld [vmem:[%s18604_s0 + $0x430] sm:$0xff] }
  0xcc   :  { %12010 = vmatmul.mubr.msk.f32.vlgmr.msra.gmra.mrb[96].mxu1 %vm91_vm1, %v1091_v43 }
  0xcd   :  { %13552 = vmatpush3.bf16.msra.mxu1 %v14725_v3  ;;  %12012 = vmatprep.mubr.msk.f32.mxu1 %vm91_vm1, %v1092_v44  ;;  %v1095_v3 = vld [vmem:[%s18604_s0 + $0x328] sm:$0xff] }
  0xce   :  { %13555 = vmatprep.subr.msk.bf16.mxu1 %vm14735_vm3, %v14733_v6 }
  0xd0   :  { %12013 = vmatmul.mubr.msk.f32.gmra.mrb[98].mxu1 %vm91_vm1, %v1093_v45  ;;  %v1129_v45 = vld [vmem:[%s18604_s0 + $0x438] sm:$0xff] }
  0xd1   :  { %12015 = vmatprep.mubr.msk.f32.mxu1 %vm91_vm1, %v1094_v46  ;;  %13558 = vmatpush3.bf16.msk.msra.mxu1 %vm14735_vm3, %v14733_v6  ;;  %v1099_v6 = vld [vmem:[%s18604_s0 + $0x348] sm:$0xff]  ;;  %v1130_v46 = vld [vmem:[%s18604_s0 + $0x440] sm:$0xff] }
  0xd4   :  { %12016 = vmatmul.mubr.msk.f32.gmra.mrb[100].mxu1 %vm91_vm1, %v1095_v3 }
  0xd5   :  { %12018 = vmatprep.mubr.msk.f32.mxu1 %vm91_vm1, %v1096_v47 }
  0xd8   :  { %12019 = vmatmul.mubr.msk.f32.gmra.mrb[102].mxu1 %vm91_vm1, %v1097_v48  ;;  %v1131_v48 = vld [vmem:[%s18604_s0 + $0x448] sm:$0xff] }
  0xd9   :  { %12021 = vmatprep.mubr.msk.f32.mxu1 %vm91_vm1, %v1098_v49  ;;  %v1132_v49 = vld [vmem:[%s18604_s0 + $0x450] sm:$0xff] }
  0xdc   :  { %12022 = vmatmul.mubr.msk.f32.gmra.mrb[104].mxu1 %vm91_vm1, %v1099_v6 }
  0xdd   :  { %12024 = vmatprep.mubr.msk.f32.mxu1 %vm91_vm1, %v1100_v7 }
  0xdf   :  { %v15202_v52 = vpop.f32.mrb[0].mxu1 }
  0xe0   :  { %v15204_v53 = vpop.f32.mrb[1].mxu1  ;;  %12025 = vmatmul.mubr.msk.f32.gmra.mrb[106].mxu1 %vm91_vm1, %v1101_v50  ;;  %v1133_v50 = vld [vmem:[%s18604_s0 + $0x458] sm:$0xff] }
  0xe1   :  { %12027 = vmatprep.mubr.msk.f32.mxu1 %vm91_vm1, %v1102_v51  ;;  %v1134_v51 = vld [vmem:[%s18604_s0 + $0x460] sm:$0xff] }
  0xe3   :  { %v15214_v56 = vpop.f32.mrb[2].mxu1 }
  0xe4   :  { %v15216_v57 = vpop.f32.mrb[3].mxu1  ;;  %12028 = vmatmul.mubr.msk.f32.gmra.mrb[108].mxu1 %vm91_vm1, %v1103_v54 }
  0xe5   :  { %12030 = vmatprep.mubr.msk.f32.mxu1 %vm91_vm1, %v1104_v55 }
  0xe7   :  { %v15226_v60 = vpop.f32.mrb[4].mxu1 }
  0xe8   :  { %v15228_v61 = vpop.f32.mrb[5].mxu1  ;;  %12031 = vmatmul.mubr.msk.f32.gmra.mrb[110].mxu1 %vm91_vm1, %v1105_v58  ;;  %v1135_v58 = vld [vmem:[%s18604_s0 + $0x468] sm:$0xff] }
  0xe9   :  { %12033 = vmatprep.mubr.msk.f32.mxu1 %vm91_vm1, %v1106_v59  ;;  %v1136_v59 = vld [vmem:[%s18604_s0 + $0x470] sm:$0xff] }
  0xeb   :  { %v15238_v0 = vpop.f32.mrb[6].mxu1 }
  0xec   :  { %v15240_v1 = vpop.f32.mrb[7].mxu1  ;;  %12034 = vmatmul.mubr.msk.f32.gmra.mrb[112].mxu1 %vm91_vm1, %v1107_v62 }
  0xed   :  { %12036 = vmatprep.mubr.msk.f32.mxu1 %vm91_vm1, %v1108_v63 }
  0xef   :  { %v15250_v5 = vpop.f32.mrb[8].mxu1 }
  0xf0   :  { %v15252_v8 = vpop.f32.mrb[9].mxu1  ;;  %12037 = vmatmul.mubr.msk.f32.gmra.mrb[114].mxu1 %vm91_vm1, %v1109_v2  ;;  %v1137_v2 = vld [vmem:[%s18604_s0 + $0x478] sm:$0xff] }
  0xf1   :  { %12039 = vmatprep.mubr.msk.f32.mxu1 %vm91_vm1, %v1110_v4  ;;  %v1635_v4 = vld [vmem:[%s18604_s0 + $0x480] sm:$0xff] }
  0xf3   :  { %v15262_v11 = vpop.f32.mrb[10].mxu1 }
  0xf4   :  { %v15264_v12 = vpop.f32.mrb[11].mxu1  ;;  %12040 = vmatmul.mubr.msk.f32.gmra.mrb[116].mxu1 %vm91_vm1, %v1111_v9 }
  0xf5   :  { %12042 = vmatprep.mubr.msk.f32.mxu1 %vm91_vm1, %v1112_v10 }
  0xf7   :  { %v15274_v15 = vpop.f32.mrb[12].mxu1 }
  0xf8   :  { %v15276_v16 = vpop.f32.mrb[13].mxu1  ;;  %12043 = vmatmul.mubr.msk.f32.gmra.mrb[118].mxu1 %vm91_vm1, %v1113_v13  ;;  %v1636_v13 = vld [vmem:[%s18604_s0 + $0x488] sm:$0xff] }
  0xf9   :  { %12045 = vmatprep.mubr.msk.f32.mxu1 %vm91_vm1, %v1114_v14  ;;  %v1637_v14 = vld [vmem:[%s18604_s0 + $0x490] sm:$0xff] }
  0xfb   :  { %v15286_v19 = vpop.f32.mrb[14].mxu1 }
  0xfc   :  { %v15288_v20 = vpop.f32.mrb[15].mxu1  ;;  %12046 = vmatmul.mubr.msk.f32.gmra.mrb[120].mxu1 %vm91_vm1, %v1115_v17 }
  0xfd   :  { %12048 = vmatprep.mubr.msk.f32.mxu1 %vm91_vm1, %v1116_v18 }
  0xff   :  { %v15298_v23 = vpop.f32.mrb[16].mxu1 }
 0x100   :  { %v15300_v24 = vpop.f32.mrb[17].mxu1  ;;  %12049 = vmatmul.mubr.msk.f32.gmra.mrb[122].mxu1 %vm91_vm1, %v1117_v21  ;;  %v1638_v21 = vld [vmem:[%s18604_s0 + $0x498] sm:$0xff] }
 0x101   :  { %12051 = vmatprep.mubr.msk.f32.mxu1 %vm91_vm1, %v1118_v22  ;;  %v1639_v22 = vld [vmem:[%s18604_s0 + $0x4a0] sm:$0xff] }
 0x103   :  { %v15310_v27 = vpop.f32.mrb[18].mxu1 }
 0x104   :  { %v15312_v28 = vpop.f32.mrb[19].mxu1  ;;  %12052 = vmatmul.mubr.msk.f32.gmra.mrb[124].mxu1 %vm91_vm1, %v1119_v25 }
 0x105   :  { %12054 = vmatprep.mubr.msk.f32.mxu1 %vm91_vm1, %v1120_v26 }
 0x107   :  { %v15322_v31 = vpop.f32.mrb[20].mxu1 }
 0x108   :  { %v15324_v32 = vpop.f32.mrb[21].mxu1  ;;  %12055 = vmatmul.mubr.msk.f32.gmra.mrb[126].mxu1 %vm91_vm1, %v1121_v29  ;;  %v1640_v29 = vld [vmem:[%s18604_s0 + $0x4a8] sm:$0xff] }
 0x109   :  { %12057 = vmatprep.mubr.msk.f32.mxu1 %vm91_vm1, %v1122_v30  ;;  %v1641_v30 = vld [vmem:[%s18604_s0 + $0x4b0] sm:$0xff] }
 0x10b   :  { %v15334_v35 = vpop.f32.mrb[22].mxu1 }
 0x10c   :  { %v15336_v36 = vpop.f32.mrb[23].mxu1  ;;  %12058 = vmatmul.mubr.msk.f32.gmra.mrb[128].mxu1 %vm91_vm1, %v1123_v33 }
 0x10d   :  { %12060 = vmatprep.mubr.msk.f32.mxu1 %vm91_vm1, %v1124_v34 }
 0x10f   :  { %v15346_v39 = vpop.f32.mrb[24].mxu1 }
 0x110   :  { %v15348_v40 = vpop.f32.mrb[25].mxu1  ;;  %12061 = vmatmul.mubr.msk.f32.gmra.mrb[130].mxu1 %vm91_vm1, %v1125_v37  ;;  %v1642_v37 = vld [vmem:[%s18604_s0 + $0x4b8] sm:$0xff] }
 0x111   :  { %12063 = vmatprep.mubr.msk.f32.mxu1 %vm91_vm1, %v1126_v38  ;;  %v1643_v38 = vld [vmem:[%s18604_s0 + $0x4c0] sm:$0xff] }
 0x113   :  { %v15358_v43 = vpop.f32.mrb[26].mxu1 }
 0x114   :  { %v15360_v44 = vpop.f32.mrb[27].mxu1  ;;  %12064 = vmatmul.mubr.msk.f32.gmra.mrb[132].mxu1 %vm91_vm1, %v1127_v41 }
 0x115   :  { %12066 = vmatprep.mubr.msk.f32.mxu1 %vm91_vm1, %v1128_v42 }
 0x117   :  { %v15370_v3 = vpop.f32.mrb[28].mxu1 }
 0x118   :  { %v15372_v47 = vpop.f32.mrb[29].mxu1  ;;  %12067 = vmatmul.mubr.msk.f32.gmra.mrb[134].mxu1 %vm91_vm1, %v1129_v45  ;;  %v1644_v45 = vld [vmem:[%s18604_s0 + $0x4c8] sm:$0xff] }
 0x119   :  { %12069 = vmatprep.mubr.msk.f32.mxu1 %vm91_vm1, %v1130_v46  ;;  %v1645_v46 = vld [vmem:[%s18604_s0 + $0x4d0] sm:$0xff] }
 0x11b   :  { %v15382_v6 = vpop.f32.mrb[30].mxu1 }
 0x11c   :  { %v15384_v7 = vpop.f32.mrb[31].mxu1  ;;  %12070 = vmatmul.mubr.msk.f32.gmra.mrb[136].mxu1 %vm91_vm1, %v1131_v48 }
 0x11d   :  { %18678 = vst [vmem:[#allocation7_spill] sm:$0xff] %v15384_v7  ;;  %12072 = vmatprep.mubr.msk.f32.mxu1 %vm91_vm1, %v1132_v49 }
 0x11f   :  { %v15394_v54 = vpop.f32.mrb[32].mxu1 }
 0x120   :  { %18679 = vst [vmem:[#allocation8_spill] sm:$0xff] %v15394_v54  ;;  %v15396_v55 = vpop.f32.mrb[33].mxu1  ;;  %12073 = vmatmul.mubr.msk.f32.gmra.mrb[138].mxu1 %vm91_vm1, %v1133_v50  ;;  %v1646_v50 = vld [vmem:[%s18604_s0 + $0x4d8] sm:$0xff]  ;;  %v10292_v54 = vld [vmem:[%s18607_s3 + $0x88] sm:$0xff] }
 0x121   :  { %18680 = vst [vmem:[#allocation9_spill] sm:$0xff] %v15396_v55  ;;  %12075 = vmatprep.mubr.msk.f32.mxu1 %vm91_vm1, %v1134_v51  ;;  %v1647_v51 = vld [vmem:[%s18604_s0 + $0x4e0] sm:$0xff]  ;;  %v2359_v55 = vld [vmem:[%s18607_s3 + $0x18] sm:$0xff] }
 0x123   :  { %v15406_v62 = vpop.f32.mrb[34].mxu1 }
 0x124   :  { %18681 = vst [vmem:[#allocation10_spill] sm:$0xff] %v15406_v62  ;;  %v15408_v63 = vpop.f32.mrb[35].mxu1  ;;  %12076 = vmatmul.mubr.msk.f32.gmra.mrb[140].mxu1 %vm91_vm1, %v1135_v58 }
 0x125   :  { %12078 = vmatprep.mubr.msk.f32.mxu1 %vm91_vm1, %v1136_v59 }
 0x127   :  { %v15418_v9 = vpop.f32.mrb[36].mxu1 }
 0x128   :  { %v15420_v10 = vpop.f32.mrb[37].mxu1  ;;  %12079 = vmatmul.mubr.msk.f32.gmra.mrb[142].mxu1 %vm91_vm1, %v1137_v2 }
 0x129   :  { %12089 = vmatprep.mubr.msk.f32.mxu1 %vm91_vm1, %v1635_v4 }
 0x12b   :  { %v15430_v17 = vpop.f32.mrb[38].mxu1 }
 0x12c   :  { %18682 = vst [vmem:[#allocation11_spill] sm:$0xff] %v15430_v17  ;;  %v15432_v18 = vpop.f32.mrb[39].mxu1  ;;  %12090 = vmatmul.mubr.msk.f32.vlgmr.msra.gmra.mrb[144].mxu1 %vm91_vm1, %v1636_v13  ;;  %v1648_v13 = vld [vmem:[%s18604_s0 + $0x4e8] sm:$0xff] }
 0x12d   :  { %12092 = vmatprep.mubr.msk.f32.mxu1 %vm91_vm1, %v1637_v14  ;;  %v1649_v14 = vld [vmem:[%s18604_s0 + $0x4f0] sm:$0xff] }
 0x12f   :  { %v15442_v25 = vpop.f32.mrb[40].mxu1 }
 0x130   :  { %v15444_v26 = vpop.f32.mrb[41].mxu1  ;;  %12093 = vmatmul.mubr.msk.f32.gmra.mrb[146].mxu1 %vm91_vm1, %v1638_v21 }
 0x131   :  { %12095 = vmatprep.mubr.msk.f32.mxu1 %vm91_vm1, %v1639_v22 }
 0x133   :  { %v15454_v33 = vpop.f32.mrb[42].mxu1 }
 0x134   :  { %v15456_v34 = vpop.f32.mrb[43].mxu1  ;;  %12096 = vmatmul.mubr.msk.f32.gmra.mrb[148].mxu1 %vm91_vm1, %v1640_v29 }
 0x135   :  { %18683 = vst [vmem:[#allocation12_spill] sm:$0xff] %v15456_v34  ;;  %12098 = vmatprep.mubr.msk.f32.mxu1 %vm91_vm1, %v1641_v30 }
 0x137   :  { %v15466_v41 = vpop.f32.mrb[44].mxu1 }
 0x138   :  { %v15468_v42 = vpop.f32.mrb[45].mxu1  ;;  %12099 = vmatmul.mubr.msk.f32.gmra.mrb[150].mxu1 %vm91_vm1, %v1642_v37  ;;  %v1650_v37 = vld [vmem:[%s18604_s0 + $0x4f8] sm:$0xff] }
 0x139   :  { %18684 = vst [vmem:[#allocation13_spill] sm:$0xff] %v15468_v42  ;;  %12101 = vmatprep.mubr.msk.f32.mxu1 %vm91_vm1, %v1643_v38  ;;  %v1651_v38 = vld [vmem:[%s18604_s0 + $0x500] sm:$0xff] }
 0x13b   :  { %v15478_v48 = vpop.f32.mrb[46].mxu1 }
 0x13c   :  { %18685 = vst [vmem:[#allocation14_spill] sm:$0xff] %v15478_v48  ;;  %v15480_v49 = vpop.f32.mrb[47].mxu1  ;;  %12102 = vmatmul.mubr.msk.f32.gmra.mrb[152].mxu1 %vm91_vm1, %v1644_v45 }
 0x13d   :  { %12104 = vmatprep.mubr.msk.f32.mxu1 %vm91_vm1, %v1645_v46  ;;  %v1680_v46 = vld [vmem:[%s18604_s0 + $0x5e8] sm:$0xff] }
 0x13f   :  { %v15490_v58 = vpop.f32.mrb[48].mxu1 }
 0x140   :  { %v15494_v2 = vpop.f32.mrb[49].mxu1  ;;  %12105 = vmatmul.mubr.msk.f32.gmra.mrb[154].mxu1 %vm91_vm1, %v1646_v50  ;;  %v18722_v34 = vmax.f32 %v15202_v52, %v15490_v58 }
 0x141   :  { %12107 = vmatprep.mubr.msk.f32.mxu1 %vm91_vm1, %v1647_v51  ;;  %v1655_v51 = vld [vmem:[%s18604_s0 + $0x520] sm:$0xff] }
 0x143   :  { %v15506_v21 = vpop.f32.mrb[50].mxu1 }
 0x144   :  { %v15510_v29 = vpop.f32.mrb[51].mxu1  ;;  %12108 = vmatmul.mubr.msk.f32.gmra.mrb[156].mxu1 %vm91_vm1, %v1648_v13  ;;  %v1652_v13 = vld [vmem:[%s18604_s0 + $0x508] sm:$0xff] }
 0x145   :  { %12110 = vmatprep.mubr.msk.f32.mxu1 %vm91_vm1, %v1649_v14  ;;  %v1653_v14 = vld [vmem:[%s18604_s0 + $0x510] sm:$0xff] }
 0x147   :  { %v15522_v45 = vpop.f32.mrb[52].mxu1 }
 0x148   :  { %v15526_v50 = vpop.f32.mrb[53].mxu1  ;;  %12111 = vmatmul.mubr.msk.f32.gmra.mrb[158].mxu1 %vm91_vm1, %v1650_v37  ;;  %v1657_v37 = vld [vmem:[%s18604_s0 + $0x530] sm:$0xff] }
 0x149   :  { %12113 = vmatprep.mubr.msk.f32.mxu1 %vm91_vm1, %v1651_v38  ;;  %v1654_v38 = vld [vmem:[%s18604_s0 + $0x518] sm:$0xff] }
 0x14b   :  { %v15538_v30 = vpop.f32.mrb[54].mxu1 }
 0x14c   :  { %v15542_v22 = vpop.f32.mrb[55].mxu1  ;;  %12114 = vmatmul.mubr.msk.f32.gmra.mrb[160].mxu1 %vm91_vm1, %v1652_v13  ;;  %v1659_v13 = vld [vmem:[%s18604_s0 + $0x540] sm:$0xff] }
 0x14d   :  { %18686 = vst [vmem:[#allocation15_spill] sm:$0xff] %v15542_v22  ;;  %12116 = vmatprep.mubr.msk.f32.mxu1 %vm91_vm1, %v1653_v14  ;;  %v1656_v14 = vld [vmem:[%s18604_s0 + $0x528] sm:$0xff] }
 0x14f   :  { %v15554_v4 = vpop.f32.mrb[56].mxu1 }
 0x150   :  { %18687 = vst [vmem:[#allocation16_spill] sm:$0xff] %v15554_v4  ;;  %v15558_v59 = vpop.f32.mrb[57].mxu1  ;;  %12117 = vmatmul.mubr.msk.f32.gmra.mrb[162].mxu1 %vm91_vm1, %v1654_v38  ;;  %v1658_v38 = vld [vmem:[%s18604_s0 + $0x538] sm:$0xff] }
 0x151   :  { %18688 = vst [vmem:[#allocation17_spill] sm:$0xff] %v15558_v59  ;;  %12119 = vmatprep.mubr.msk.f32.mxu1 %vm91_vm1, %v1655_v51  ;;  %v1661_v51 = vld [vmem:[%s18604_s0 + $0x550] sm:$0xff] }
 0x153   :  { %v15570_v22 = vpop.f32.mrb[58].mxu1 }
 0x154   :  { %18689 = vst [vmem:[#allocation18_spill] sm:$0xff] %v15570_v22  ;;  %v15574_v4 = vpop.f32.mrb[59].mxu1  ;;  %12120 = vmatmul.mubr.msk.f32.gmra.mrb[164].mxu1 %vm91_vm1, %v1656_v14  ;;  %v1660_v14 = vld [vmem:[%s18604_s0 + $0x548] sm:$0xff] }
 0x155   :  { %18690 = vst [vmem:[#allocation19_spill] sm:$0xff] %v15574_v4  ;;  %12122 = vmatprep.mubr.msk.f32.mxu1 %vm91_vm1, %v1657_v37  ;;  %v1663_v37 = vld [vmem:[%s18604_s0 + $0x560] sm:$0xff] }
 0x157   :  { %v15586_v59 = vpop.f32.mrb[60].mxu1 }
 0x158   :  { %18691 = vst [vmem:[#allocation20_spill] sm:$0xff] %v15586_v59  ;;  %v15590_v22 = vpop.f32.mrb[61].mxu1  ;;  %12123 = vmatmul.mubr.msk.f32.gmra.mrb[166].mxu1 %vm91_vm1, %v1658_v38  ;;  %v1662_v38 = vld [vmem:[%s18604_s0 + $0x558] sm:$0xff] }
 0x159   :  { %18692 = vst [vmem:[#allocation21_spill] sm:$0xff] %v15590_v22  ;;  %12125 = vmatprep.mubr.msk.f32.mxu1 %vm91_vm1, %v1659_v13  ;;  %v1665_v13 = vld [vmem:[%s18604_s0 + $0x570] sm:$0xff] }
 0x15b   :  { %v15602_v4 = vpop.f32.mrb[62].mxu1 }
 0x15c   :  { %18693 = vst [vmem:[#allocation22_spill] sm:$0xff] %v15602_v4  ;;  %v15606_v59 = vpop.f32.mrb[63].mxu1  ;;  %12126 = vmatmul.mubr.msk.f32.gmra.mrb[168].mxu1 %vm91_vm1, %v1660_v14  ;;  %v1664_v14 = vld [vmem:[%s18604_s0 + $0x568] sm:$0xff] }
 0x15d   :  { %18694 = vst [vmem:[#allocation23_spill] sm:$0xff] %v15606_v59  ;;  %12128 = vmatprep.mubr.msk.f32.mxu1 %vm91_vm1, %v1661_v51  ;;  %v1667_v51 = vld [vmem:[%s18604_s0 + $0x580] sm:$0xff] }
 0x15f   :  { %v15618_v22 = vpop.f32.mrb[64].mxu1 }
 0x160   :  { %18695 = vst [vmem:[#allocation24_spill] sm:$0xff] %v15618_v22  ;;  %v15622_v4 = vpop.f32.mrb[65].mxu1  ;;  %12129 = vmatmul.mubr.msk.f32.gmra.mrb[170].mxu1 %vm91_vm1, %v1662_v38  ;;  %v1666_v38 = vld [vmem:[%s18604_s0 + $0x578] sm:$0xff] }
 0x161   :  { %18696 = vst [vmem:[#allocation25_spill] sm:$0xff] %v15622_v4  ;;  %12131 = vmatprep.mubr.msk.f32.mxu1 %vm91_vm1, %v1663_v37  ;;  %v1669_v37 = vld [vmem:[%s18604_s0 + $0x590] sm:$0xff] }
 0x163   :  { %v15634_v59 = vpop.f32.mrb[66].mxu1 }
 0x164   :  { %18697 = vst [vmem:[#allocation26_spill] sm:$0xff] %v15634_v59  ;;  %v15638_v22 = vpop.f32.mrb[67].mxu1  ;;  %12132 = vmatmul.mubr.msk.f32.gmra.mrb[172].mxu1 %vm91_vm1, %v1664_v14  ;;  %v1668_v14 = vld [vmem:[%s18604_s0 + $0x588] sm:$0xff] }
 0x165   :  { %18698 = vst [vmem:[#allocation27_spill] sm:$0xff] %v15638_v22  ;;  %12134 = vmatprep.mubr.msk.f32.mxu1 %vm91_vm1, %v1665_v13  ;;  %v1671_v13 = vld [vmem:[%s18604_s0 + $0x5a0] sm:$0xff] }
 0x167   :  { %v15650_v4 = vpop.f32.mrb[68].mxu1 }
 0x168   :  { %18699 = vst [vmem:[#allocation28_spill] sm:$0xff] %v15650_v4  ;;  %v15654_v59 = vpop.f32.mrb[69].mxu1  ;;  %12135 = vmatmul.mubr.msk.f32.gmra.mrb[174].mxu1 %vm91_vm1, %v1666_v38  ;;  %v1670_v38 = vld [vmem:[%s18604_s0 + $0x598] sm:$0xff] }
 0x169   :  { %18700 = vst [vmem:[#allocation29_spill] sm:$0xff] %v15654_v59  ;;  %12137 = vmatprep.mubr.msk.f32.mxu1 %vm91_vm1, %v1667_v51  ;;  %v1673_v51 = vld [vmem:[%s18604_s0 + $0x5b0] sm:$0xff] }
 0x16b   :  { %v15666_v22 = vpop.f32.mrb[70].mxu1 }
 0x16c   :  { %18701 = vst [vmem:[#allocation30_spill] sm:$0xff] %v15666_v22  ;;  %v15670_v4 = vpop.f32.mrb[71].mxu1  ;;  %12138 = vmatmul.mubr.msk.f32.gmra.mrb[176].mxu1 %vm91_vm1, %v1668_v14  ;;  %v1672_v14 = vld [vmem:[%s18604_s0 + $0x5a8] sm:$0xff] }
 0x16d   :  { %18702 = vst [vmem:[#allocation31_spill] sm:$0xff] %v15670_v4  ;;  %12140 = vmatprep.mubr.msk.f32.mxu1 %vm91_vm1, %v1669_v37  ;;  %v1675_v37 = vld [vmem:[%s18604_s0 + $0x5c0] sm:$0xff] }
 0x16f   :  { %v15682_v59 = vpop.f32.mrb[72].mxu1 }
 0x170   :  { %18703 = vst [vmem:[#allocation32_spill] sm:$0xff] %v15682_v59  ;;  %v15686_v22 = vpop.f32.mrb[73].mxu1  ;;  %12141 = vmatmul.mubr.msk.f32.gmra.mrb[178].mxu1 %vm91_vm1, %v1670_v38  ;;  %v1674_v38 = vld [vmem:[%s18604_s0 + $0x5b8] sm:$0xff] }
 0x171   :  { %18704 = vst [vmem:[#allocation33_spill] sm:$0xff] %v15686_v22  ;;  %12143 = vmatprep.mubr.msk.f32.mxu1 %vm91_vm1, %v1671_v13  ;;  %v1677_v13 = vld [vmem:[%s18604_s0 + $0x5d0] sm:$0xff] }
 0x173   :  { %v15698_v4 = vpop.f32.mrb[74].mxu1 }
 0x174   :  { %18705 = vst [vmem:[#allocation34_spill] sm:$0xff] %v15698_v4  ;;  %v15702_v59 = vpop.f32.mrb[75].mxu1  ;;  %12144 = vmatmul.mubr.msk.f32.gmra.mrb[180].mxu1 %vm91_vm1, %v1672_v14  ;;  %v1676_v14 = vld [vmem:[%s18604_s0 + $0x5c8] sm:$0xff] }
 0x175   :  { %18706 = vst [vmem:[#allocation35_spill] sm:$0xff] %v15702_v59  ;;  %12146 = vmatprep.mubr.msk.f32.mxu1 %vm91_vm1, %v1673_v51  ;;  %v1679_v51 = vld [vmem:[%s18604_s0 + $0x5e0] sm:$0xff] }
 0x177   :  { %v15714_v22 = vpop.f32.mrb[76].mxu1 }
 0x178   :  { %18707 = vst [vmem:[#allocation36_spill] sm:$0xff] %v15714_v22  ;;  %v15718_v4 = vpop.f32.mrb[77].mxu1  ;;  %12147 = vmatmul.mubr.msk.f32.gmra.mrb[182].mxu1 %vm91_vm1, %v1674_v38  ;;  %v1678_v38 = vld [vmem:[%s18604_s0 + $0x5d8] sm:$0xff] }
 0x179   :  { %18708 = vst [vmem:[#allocation37_spill] sm:$0xff] %v15718_v4  ;;  %12149 = vmatprep.mubr.msk.f32.mxu1 %vm91_vm1, %v1675_v37 }
 0x17b   :  { %v15730_v59 = vpop.f32.mrb[78].mxu1 }
 0x17c   :  { %18709 = vst [vmem:[#allocation38_spill] sm:$0xff] %v15730_v59  ;;  %v15734_v22 = vpop.f32.mrb[79].mxu1  ;;  %12150 = vmatmul.mubr.msk.f32.gmra.mrb[184].mxu1 %vm91_vm1, %v1676_v14  ;;  %v2357_v14 = vld [vmem:[%s18607_s3 + $0x8] sm:$0xff] }
 0x17d   :  { %18710 = vst [vmem:[#allocation39_spill] sm:$0xff] %v15734_v22  ;;  %12152 = vmatprep.mubr.msk.f32.mxu1 %vm91_vm1, %v1677_v13  ;;  %v2356_v13 = vld [vmem:[%s18607_s3] sm:$0xff]  ;;  %v1681_v22 = vld [vmem:[%s18604_s0 + $0x5f0] sm:$0xff] }
 0x17f   :  { %v15746_v4 = vpop.f32.mrb[80].mxu1 }
 0x180   :  { %18711 = vst [vmem:[#allocation40_spill] sm:$0xff] %v15746_v4  ;;  %v15750_v59 = vpop.f32.mrb[81].mxu1  ;;  %12153 = vmatmul.mubr.msk.f32.gmra.mrb[186].mxu1 %vm91_vm1, %v1678_v38  ;;  %v13559_v4 = vpack.c.bf16 %v2357_v14, %v2356_v13  ;;  %v10291_v38 = vld [vmem:[%s18607_s3 + $0x80] sm:$0xff]  ;;  %v2358_v14 = vld [vmem:[%s18607_s3 + $0x10] sm:$0xff] }
 0x181   :  { %18712 = vst [vmem:[#allocation41_spill] sm:$0xff] %v15750_v59  ;;  %12155 = vmatprep.mubr.msk.f32.mxu1 %vm91_vm1, %v1679_v51  ;;  %v13591_v37 = vpack.c.bf16 %v10292_v54, %v10291_v38  ;;  %v10293_v54 = vld [vmem:[%s18607_s3 + $0x90] sm:$0xff]  ;;  %v13563_v51 = vpack.c.bf16 %v2359_v55, %v2358_v14  ;;  %v2360_v55 = vld [vmem:[%s18607_s3 + $0x20] sm:$0xff]  ;;  %v10296_v14 = vld [vmem:[%s18607_s3 + $0xa8] sm:$0xff] }
 0x182   :  { %13560 = vmatprep.subr.bf16.mxu1 %v13559_v4 }
 0x183   :  { %v15774_v59 = vpop.f32.mrb[82].mxu1  ;;  %13592 = vmatprep.subr.bf16.mxu0 %v13591_v37  ;;  %13562 = vmatpush3.bf16.msra.mxu1 %v13559_v4  ;;  %v2361_v4 = vld [vmem:[%s18607_s3 + $0x28] sm:$0xff] }
 0x184   :  { %18713 = vst [vmem:[#allocation42_spill] sm:$0xff] %v15774_v59  ;;  %v15778_v13 = vpop.f32.mrb[83].mxu1  ;;  %12156 = vmatmul.mubr.msk.f32.gmra.mrb[188].mxu1 %vm91_vm1, %v1680_v46  ;;  %v1682_v46 = vld [vmem:[%s18604_s0 + $0x5f8] sm:$0xff]  ;;  %13594 = vmatpush3.bf16.msra.mxu0 %v13591_v37  ;;  %v13567_v37 = vpack.c.bf16 %v2361_v4, %v2360_v55 }
 0x185   :  { %18714 = vst [vmem:[#allocation43_spill] sm:$0xff] %v15778_v13  ;;  %12158 = vmatprep.mubr.msk.f32.mxu1 %vm91_vm1, %v1681_v22  ;;  %v10294_v59 = vld [vmem:[%s18607_s3 + $0x98] sm:$0xff]  ;;  %13564 = vmatprep.subr.bf16.mxu1 %v13563_v51 }
 0x186   :  { %v13595_v62 = vpack.c.bf16 %v10294_v59, %v10293_v54  ;;  %v10295_v59 = vld [vmem:[%s18607_s3 + $0xa0] sm:$0xff]  ;;  %v2363_v55 = vld [vmem:[%s18607_s3 + $0x38] sm:$0xff] }
 0x187   :  { %v15799_v7 = vpop.f32.mrb[84].mxu1  ;;  %13566 = vmatpush3.bf16.msra.mxu1 %v13563_v51  ;;  %v13599_v54 = vpack.c.bf16 %v10296_v14, %v10295_v59  ;;  %v2362_v51 = vld [vmem:[%s18607_s3 + $0x30] sm:$0xff]  ;;  %v10298_v14 = vld [vmem:[%s18607_s3 + $0xb8] sm:$0xff] }
 0x188   :  { %18715 = vst [vmem:[#allocation44_spill] sm:$0xff] %v15799_v7  ;;  %v15803_v13 = vpop.f32.mrb[85].mxu1  ;;  %12159 = vmatmul.mubr.msk.f32.gmra.mrb[190].mxu1 %vm91_vm1, %v1682_v46  ;;  %13596 = vmatprep.subr.bf16.mxu0 %v13595_v62  ;;  %v13571_v59 = vpack.c.bf16 %v2363_v55, %v2362_v51  ;;  %v18725_v55 = vmax.f32 %v15216_v57, %v15510_v29 }
 0x189   :  { %13598 = vmatpush3.bf16.msra.mxu0 %v13595_v62  ;;  %13568 = vmatprep.subr.bf16.mxu1 %v13567_v37  ;;  %v10297_v62 = vld [vmem:[%s18607_s3 + $0xb0] sm:$0xff] }
 0x18a   :  { %13600 = vmatprep.subr.bf16.mxu0 %v13599_v54  ;;  %v13603_v38 = vpack.c.bf16 %v10298_v14, %v10297_v62 }
 0x18b   :  { %v15820_v46 = vpop.f32.mrb[86].mxu1  ;;  %13570 = vmatpush3.bf16.msra.mxu1 %v13567_v37 }
 0x18c   :  { %18716 = vst [vmem:[#allocation45_spill] sm:$0xff] %v15820_v46  ;;  %v15824_v7 = vpop.f32.mrb[87].mxu1  ;;  %13572 = vmatprep.subr.bf16.mxu1 %v13571_v59 }
 0x18d   :  { %13602 = vmatpush3.bf16.msra.mxu0 %v13599_v54  ;;  %v18724_v54 = vmax.f32 %v15214_v56, %v15506_v21 }
 0x18e   :  { %13604 = vmatprep.subr.bf16.mxu0 %v13603_v38 }
 0x18f   :  { %v15840_v22 = vpop.f32.mrb[88].mxu1  ;;  %13574 = vmatpush3.bf16.msra.mxu1 %v13571_v59 }
 0x190   :  { %v15844_v17 = vpop.f32.mrb[89].mxu1 }
 0x191   :  { %13606 = vmatpush3.bf16.msra.mxu0 %v13603_v38  ;;  %v18723_v38 = vmax.f32 %v15204_v53, %v15494_v2  ;;  %v18727_v2 = vmax.f32 %v15228_v61, %v15526_v50  ;;  %v18733_v50 = vld [vmem:[#allocation17_spill] sm:$0xff] }
 0x193   :  { %v15848_v37 = vpop.f32.mrb[90].mxu1 }
 0x194   :  { %v15852_v51 = vpop.f32.mrb[91].mxu1 }
 0x195   :  { %18717 = vst [vmem:[#allocation46_spill] sm:$0xff] %v15852_v51 }
 0x197   :  { %v15856_v62 = vpop.f32.mrb[92].mxu1 }
 0x198   :  { %18718 = vst [vmem:[#allocation47_spill] sm:$0xff] %v15856_v62  ;;  %v15860_v46 = vpop.f32.mrb[93].mxu1 }
 0x199   :  { %18719 = vst [vmem:[#allocation48_spill] sm:$0xff] %v15860_v46 }
 0x19b   :  { %v15864_v59 = vpop.f32.mrb[94].mxu1 }
 0x19c   :  { %18720 = vst [vmem:[#allocation49_spill] sm:$0xff] %v15864_v59  ;;  %v15868_v4 = vpop.f32.mrb[95].mxu1 }
 0x19d   :  { %18721 = vst [vmem:[#allocation50_spill] sm:$0xff] %v15868_v4 }
 0x19f   :  { %v12011_v51 = vpop.f32.mrb[96].mxu1 }
 0x1a0   :  { %v15875_v14 = vmax.f32 %v18722_v34, %v12011_v51  ;;  %v1348_v62 = vpop.f32.mrb[97].mxu1  ;;  %v18726_v34 = vmax.f32 %v15226_v60, %v15522_v45  ;;  %v18731_v45 = vld [vmem:[#allocation16_spill] sm:$0xff] }
 0x1a1   :  { %v15880_v46 = vmax.f32 %v18723_v38, %v1348_v62  ;;  %v18734_v38 = vmax.f32 %v15252_v8, %v18733_v50 }
 0x1a3   :  { %v12014_v42 = vpop.f32.mrb[98].mxu1 }
 0x1a4   :  { %v15885_v59 = vmax.f32 %v18724_v54, %v12014_v42  ;;  %v1358_v48 = vpop.f32.mrb[99].mxu1  ;;  %v18728_v42 = vmax.f32 %v15238_v0, %v15538_v30  ;;  %v18735_v30 = vld [vmem:[#allocation18_spill] sm:$0xff] }
 0x1a5   :  { %v15890_v4 = vmax.f32 %v18725_v55, %v1358_v48  ;;  %v18729_v48 = vld [vmem:[#allocation15_spill] sm:$0xff]  ;;  %v18732_v55 = vmax.f32 %v15250_v5, %v18731_v45 }
 0x1a6   :  { %v18730_v29 = vmax.f32 %v15240_v1, %v18729_v48 }
 0x1a7   :  { %v12017_v52 = vpop.f32.mrb[100].mxu1 }
 0x1a8   :  { %v15895_v58 = vmax.f32 %v18726_v34, %v12017_v52  ;;  %v1368_v53 = vpop.f32.mrb[101].mxu1  ;;  %v18736_v34 = vmax.f32 %v15262_v11, %v18735_v30 }
 0x1a9   :  { %v15900_v51 = vmax.f32 %v18727_v2, %v1368_v53  ;;  %v18737_v2 = vld [vmem:[#allocation19_spill] sm:$0xff] }
 0x1ab   :  { %v12020_v56 = vpop.f32.mrb[102].mxu1 }
 0x1ac   :  { %v15905_v21 = vmax.f32 %v18728_v42, %v12020_v56  ;;  %v1378_v57 = vpop.f32.mrb[103].mxu1  ;;  %v18738_v56 = vmax.f32 %v15264_v12, %v18737_v2 }
 0x1ad   :  { %v15910_v54 = vmax.f32 %v18730_v29, %v1378_v57  ;;  %v18739_v57 = vld [vmem:[#allocation20_spill] sm:$0xff] }
 0x1ae   :  { %v18740_v48 = vmax.f32 %v15274_v15, %v18739_v57 }
 0x1af   :  { %v12023_v60 = vpop.f32.mrb[104].mxu1 }
 0x1b0   :  { %v15915_v62 = vmax.f32 %v18732_v55, %v12023_v60  ;;  %v1388_v61 = vpop.f32.mrb[105].mxu1  ;;  %v18741_v60 = vld [vmem:[#allocation21_spill] sm:$0xff] }
 0x1b1   :  { %v15920_v52 = vmax.f32 %v18734_v38, %v1388_v61  ;;  %v18742_v45 = vmax.f32 %v15276_v16, %v18741_v60  ;;  %v18743_v61 = vld [vmem:[#allocation22_spill] sm:$0xff] }
 0x1b2   :  { %v18744_v50 = vmax.f32 %v15286_v19, %v18743_v61 }
 0x1b3   :  { %v12026_v0 = vpop.f32.mrb[106].mxu1 }
 0x1b4   :  { %v15925_v53 = vmax.f32 %v18736_v34, %v12026_v0  ;;  %v1398_v1 = vpop.f32.mrb[107].mxu1  ;;  %v18745_v0 = vld [vmem:[#allocation23_spill] sm:$0xff] }
 0x1b5   :  { %v15930_v42 = vmax.f32 %v18738_v56, %v1398_v1  ;;  %v18746_v30 = vmax.f32 %v15288_v20, %v18745_v0  ;;  %v18747_v1 = vld [vmem:[#allocation24_spill] sm:$0xff] }
 0x1b6   :  { %v18748_v2 = vmax.f32 %v15298_v23, %v18747_v1  ;;  %v10315_v23 = vld [vmem:[%s18607_s3 + $0xc0] sm:$0xff] }
 0x1b7   :  { %v12029_v5 = vpop.f32.mrb[108].mxu1 }
 0x1b8   :  { %v15935_v29 = vmax.f32 %v18740_v48, %v12029_v5  ;;  %v1408_v8 = vpop.f32.mrb[109].mxu1  ;;  %v18749_v5 = vld [vmem:[#allocation25_spill] sm:$0xff] }
 0x1b9   :  { %v15940_v55 = vmax.f32 %v18742_v45, %v1408_v8  ;;  %v18750_v57 = vmax.f32 %v15300_v24, %v18749_v5  ;;  %v18751_v8 = vld [vmem:[#allocation26_spill] sm:$0xff]  ;;  %v10316_v24 = vld [vmem:[%s18607_s3 + $0xc8] sm:$0xff] }
 0x1ba   :  { %v18752_v60 = vmax.f32 %v15310_v27, %v18751_v8  ;;  %v15978_v0 = vpack.c.bf16 %v10316_v24, %v10315_v23  ;;  %v18755_v27 = vld [vmem:[#allocation28_spill] sm:$0xff] }
 0x1bb   :  { %v12032_v11 = vpop.f32.mrb[110].mxu1 }
 0x1bc   :  { %v15945_v38 = vmax.f32 %v18744_v50, %v12032_v11  ;;  %v1418_v12 = vpop.f32.mrb[111].mxu1  ;;  %v18753_v11 = vld [vmem:[#allocation27_spill] sm:$0xff]  ;;  %13608 = vmatprep.subr.bf16.mxu0 %v15978_v0 }
 0x1bd   :  { %v15950_v34 = vmax.f32 %v18746_v30, %v1418_v12  ;;  %v18754_v61 = vmax.f32 %v15312_v28, %v18753_v11  ;;  %v18756_v30 = vmax.f32 %v15322_v31, %v18755_v27  ;;  %v18757_v28 = vld [vmem:[#allocation29_spill] sm:$0xff]  ;;  %v10267_v31 = vld [vmem:[%s18607_s3 + $0x40] sm:$0xff] }
 0x1bf   :  { %v12035_v15 = vpop.f32.mrb[112].mxu1 }
 0x1c0   :  { %v15955_v56 = vmax.f32 %v18748_v2, %v12035_v15  ;;  %v1428_v16 = vpop.f32.mrb[113].mxu1  ;;  %v18758_v2 = vmax.f32 %v15324_v32, %v18757_v28  ;;  %v18761_v32 = vld [vmem:[#allocation31_spill] sm:$0xff] }
 0x1c1   :  { %v15960_v48 = vmax.f32 %v18750_v57, %v1428_v16  ;;  %v18759_v57 = vld [vmem:[#allocation30_spill] sm:$0xff]  ;;  %v18762_v11 = vmax.f32 %v15336_v36, %v18761_v32 }
 0x1c2   :  { %v18767_v36 = vld [vmem:[#allocation34_spill] sm:$0xff] }
 0x1c3   :  { %v12038_v19 = vpop.f32.mrb[114].mxu1 }
 0x1c4   :  { %v15965_v45 = vmax.f32 %v18752_v60, %v12038_v19  ;;  %v1438_v20 = vpop.f32.mrb[115].mxu1  ;;  %v18760_v19 = vmax.f32 %v15334_v35, %v18759_v57  ;;  %v18763_v35 = vld [vmem:[#allocation32_spill] sm:$0xff]  ;;  %v18768_v57 = vmax.f32 %v15358_v43, %v18767_v36 }
 0x1c5   :  { %v15970_v50 = vmax.f32 %v18754_v61, %v1438_v20  ;;  %v10268_v20 = vld [vmem:[%s18607_s3 + $0x48] sm:$0xff] }
 0x1c6   :  { %v16007_v23 = vpack.c.bf16 %v10268_v20, %v10267_v31  ;;  %v18769_v31 = vld [vmem:[#allocation35_spill] sm:$0xff] }
 0x1c7   :  { %v12041_v12 = vpop.f32.mrb[116].mxu1  ;;  %v18770_v20 = vmax.f32 %v15360_v44, %v18769_v31 }
 0x1c8   :  { %v15983_v15 = vmax.f32 %v18756_v30, %v12041_v12  ;;  %v1448_v1 = vpop.f32.mrb[117].mxu1  ;;  %13576 = vmatprep.subr.bf16.mxu1 %v16007_v23  ;;  %v18764_v12 = vmax.f32 %v15346_v39, %v18763_v35 }
 0x1c9   :  { %v15988_v16 = vmax.f32 %v18758_v2, %v1448_v1  ;;  %v18765_v1 = vld [vmem:[#allocation33_spill] sm:$0xff] }
 0x1ca   :  { %v18766_v28 = vmax.f32 %v15348_v40, %v18765_v1 }
 0x1cb   :  { %v12044_v5 = vpop.f32.mrb[118].mxu1 }
 0x1cc   :  { %v15994_v8 = vmax.f32 %v18760_v19, %v12044_v5  ;;  %v1458_v60 = vpop.f32.mrb[119].mxu1 }
 0x1cd   :  { %v16005_v61 = vmax.f32 %v18762_v11, %v1458_v60  ;;  %v18771_v11 = vld [vmem:[#allocation36_spill] sm:$0xff] }
 0x1cf   :  { %v12047_v24 = vpop.f32.mrb[120].mxu1 }
 0x1d0   :  { %v16013_v27 = vmax.f32 %v18764_v12, %v12047_v24  ;;  %v1468_v30 = vpop.f32.mrb[121].mxu1  ;;  %v18772_v24 = vmax.f32 %v15370_v3, %v18771_v11  ;;  %v18774_v12 = vld [vmem:[#allocation37_spill] sm:$0xff]  ;;  %v18784_v11 = vld [vmem:[#allocation40_spill] sm:$0xff] }
 0x1d1   :  { %v16018_v2 = vmax.f32 %v18766_v28, %v1468_v30  ;;  %v18775_v30 = vmax.f32 %v15372_v47, %v18774_v12  ;;  %v18777_v28 = vld [vmem:[#allocation38_spill] sm:$0xff]  ;;  %v18787_v12 = vld [vmem:[#allocation41_spill] sm:$0xff] }
 0x1d3   :  { %v12050_v5 = vpop.f32.mrb[122].mxu1 }
 0x1d4   :  { %v16023_v19 = vmax.f32 %v18768_v57, %v12050_v5  ;;  %v1478_v60 = vpop.f32.mrb[123].mxu1  ;;  %v18778_v5 = vmax.f32 %v15382_v6, %v18777_v28  ;;  %v18780_v57 = vld [vmem:[#allocation7_spill] sm:$0xff]  ;;  %v18790_v28 = vld [vmem:[#allocation42_spill] sm:$0xff] }
 0x1d5   :  { %v16028_v32 = vmax.f32 %v18770_v20, %v1478_v60  ;;  %v18781_v60 = vld [vmem:[#allocation39_spill] sm:$0xff] }
 0x1d6   :  { %v18782_v31 = vmax.f32 %v18780_v57, %v18781_v60  ;;  %v18792_v57 = vld [vmem:[#allocation43_spill] sm:$0xff] }
 0x1d7   :  { %v12053_v39 = vpop.f32.mrb[124].mxu1  ;;  %v18793_v60 = vmax.f32 %v15408_v63, %v18792_v57 }
 0x1d8   :  { %v16033_v35 = vmax.f32 %v18772_v24, %v12053_v39  ;;  %v1488_v40 = vpop.f32.mrb[125].mxu1  ;;  %v18783_v39 = vld [vmem:[#allocation8_spill] sm:$0xff] }
 0x1d9   :  { %v16038_v1 = vmax.f32 %v18775_v30, %v1488_v40  ;;  %v18785_v24 = vmax.f32 %v18783_v39, %v18784_v11  ;;  %v18786_v40 = vld [vmem:[#allocation9_spill] sm:$0xff]  ;;  %v18794_v39 = vld [vmem:[#allocation44_spill] sm:$0xff] }
 0x1da   :  { %18773 = vst [vmem:[#allocation15_spill] sm:$0xff] %v16033_v35  ;;  %v18788_v30 = vmax.f32 %v18786_v40, %v18787_v12  ;;  %v18795_v11 = vmax.f32 %v15418_v9, %v18794_v39  ;;  %v18796_v40 = vmax.f32 %v15420_v10, %v15803_v13  ;;  %v18802_v13 = vmax.f32 %v15444_v26, %v15844_v17  ;;  %v18809_v26 = vld [vmem:[#allocation13_spill] sm:$0xff] }
 0x1db   :  { %18776 = vst [vmem:[#allocation16_spill] sm:$0xff] %v16038_v1  ;;  %v12056_v43 = vpop.f32.mrb[126].mxu1 }
 0x1dc   :  { %v16043_v36 = vmax.f32 %v18778_v5, %v12056_v43  ;;  %v1498_v44 = vpop.f32.mrb[127].mxu1  ;;  %v18789_v43 = vld [vmem:[#allocation10_spill] sm:$0xff] }
 0x1dd   :  { %v16048_v20 = vmax.f32 %v18782_v31, %v1498_v44  ;;  %v18791_v5 = vmax.f32 %v18789_v43, %v18790_v28  ;;  %v18798_v43 = vld [vmem:[#allocation45_spill] sm:$0xff] }
 0x1de   :  { %18779 = vst [vmem:[#allocation17_spill] sm:$0xff] %v16043_v36 }
 0x1df   :  { %v12059_v3 = vpop.f32.mrb[128].mxu1 }
 0x1e0   :  { %v16053_v35 = vmax.f32 %v18785_v24, %v12059_v3  ;;  %v1508_v47 = vpop.f32.mrb[129].mxu1 }
 0x1e1   :  { %v16058_v1 = vmax.f32 %v18788_v30, %v1508_v47 }
 0x1e3   :  { %v12062_v6 = vpop.f32.mrb[130].mxu1 }
 0x1e4   :  { %v16063_v36 = vmax.f32 %v18791_v5, %v12062_v6  ;;  %v1518_v44 = vpop.f32.mrb[131].mxu1  ;;  %v18797_v6 = vld [vmem:[#allocation11_spill] sm:$0xff] }
 0x1e5   :  { %v16068_v31 = vmax.f32 %v18793_v60, %v1518_v44  ;;  %v18799_v28 = vmax.f32 %v18797_v6, %v18798_v43  ;;  %v18800_v44 = vmax.f32 %v15432_v18, %v15824_v7  ;;  %v18801_v60 = vmax.f32 %v15442_v25, %v15840_v22  ;;  %v18804_v18 = vld [vmem:[#allocation12_spill] sm:$0xff]  ;;  %v18807_v22 = vld [vmem:[#allocation47_spill] sm:$0xff] }
 0x1e7   :  { %v12065_v3 = vpop.f32.mrb[132].mxu1 }
 0x1e8   :  { %v16073_v24 = vmax.f32 %v18795_v11, %v12065_v3  ;;  %v1528_v47 = vpop.f32.mrb[133].mxu1 }
 0x1e9   :  { %v16078_v12 = vmax.f32 %v18796_v40, %v1528_v47  ;;  %v18803_v47 = vmax.f32 %v15454_v33, %v15848_v37  ;;  %v18812_v37 = vld [vmem:[#allocation14_spill] sm:$0xff] }
 0x1eb   :  { %v12068_v30 = vpop.f32.mrb[134].mxu1 }
 0x1ec   :  { %v16083_v5 = vmax.f32 %v18799_v28, %v12068_v30  ;;  %v1538_v63 = vpop.f32.mrb[135].mxu1  ;;  %v18805_v30 = vld [vmem:[#allocation46_spill] sm:$0xff]  ;;  %v18808_v28 = vmax.f32 %v15466_v41, %v18807_v22 }
 0x1ed   :  { %v16088_v57 = vmax.f32 %v18800_v44, %v1538_v63  ;;  %v18806_v6 = vmax.f32 %v18804_v18, %v18805_v30  ;;  %v18810_v44 = vld [vmem:[#allocation48_spill] sm:$0xff] }
 0x1ef   :  { %v12071_v9 = vpop.f32.mrb[136].mxu1 }
 0x1f0   :  { %v16093_v3 = vmax.f32 %v18801_v60, %v12071_v9  ;;  %v1548_v10 = vpop.f32.mrb[137].mxu1  ;;  %v18811_v9 = vmax.f32 %v18809_v26, %v18810_v44 }
 0x1f1   :  { %v16098_v39 = vmax.f32 %v18802_v13, %v1548_v10  ;;  %v18813_v10 = vld [vmem:[#allocation49_spill] sm:$0xff] }
 0x1f2   :  { %v18814_v13 = vmax.f32 %v18812_v37, %v18813_v10 }
 0x1f3   :  { %v12074_v11 = vpop.f32.mrb[138].mxu1 }
 0x1f4   :  { %v16103_v40 = vmax.f32 %v18803_v47, %v12074_v11  ;;  %v1558_v7 = vpop.f32.mrb[139].mxu1 }
 0x1f5   :  { %v16108_v43 = vmax.f32 %v18806_v6, %v1558_v7  ;;  %v18815_v7 = vld [vmem:[#allocation50_spill] sm:$0xff] }
 0x1f6   :  { %v18816_v18 = vmax.f32 %v15480_v49, %v18815_v7  ;;  %v16133_v6 = vld [vmem:[%s18606_s2] ss:$0 sm:$0xff] }
 0x1f7   :  { %v12077_v25 = vpop.f32.mrb[140].mxu1 }
 0x1f8   :  { %v16113_v63 = vmax.f32 %v18808_v28, %v12077_v25  ;;  %v1568_v17 = vpop.f32.mrb[141].mxu1 }
 0x1f9   :  { %v16118_v60 = vmax.f32 %v18811_v9, %v1568_v17 }
 0x1fb   :  { %v12080_v33 = vpop.f32.mrb[142].mxu1 }
 0x1fc   :  { %v16123_v11 = vmax.f32 %v18814_v13, %v12080_v33  ;;  %v1578_v47 = vpop.f32.mrb[143].mxu1 }
 0x1fd   :  { %v16128_v30 = vmax.f32 %v18816_v18, %v1578_v47 }
 0x1ff   :  { %v12091_v41 = vpop.f32.mrb[144].mxu1 }
 0x200   :  { %v2133_v25 = vmax.f32 %v15875_v14, %v12091_v41  ;;  %v1893_v22 = vpop.f32.mrb[145].mxu1 }
 0x201   :  { %v2132_v28 = vmax.f32 %v15880_v46, %v1893_v22 }
 0x202   :  { %v2188_v17 = vadd.f32 %v16133_v6, %v2133_v25 }
 0x203   :  { %v2187_v26 = vadd.f32 %v16133_v6, %v2132_v28  ;;  %v12094_v44 = vpop.f32.mrb[146].mxu1 }
 0x204   :  { %v2236_v49 = vmax.f32 %v2188_v17, 0.0  ;;  %v2135_v9 = vmax.f32 %v15885_v59, %v12094_v44  ;;  %v1903_v33 = vpop.f32.mrb[147].mxu1 }
 0x205   :  { %v2235_v37 = vmax.f32 %v2187_v26, 0.0  ;;  %v2134_v10 = vmax.f32 %v15890_v4, %v1903_v33 }
 0x206   :  { %2285 = vst.msk [vmem:[#allocation2 + $0x8] sm:$0xff] %vm2283_vm4, %v2236_v49  ;;  %v2190_v14 = vadd.f32 %v16133_v6, %v2135_v9  ;;  %v10318_v49 = vld [vmem:[%s18607_s3 + $0xd8] sm:$0xff]  ;;  %v10269_v9 = vld [vmem:[%s18607_s3 + $0x50] sm:$0xff] }
 0x207   :  { %2284 = vst.msk [vmem:[#allocation2] sm:$0xff] %vm2283_vm4, %v2235_v37  ;;  %v2189_v46 = vadd.f32 %v16133_v6, %v2134_v10  ;;  %v12097_v13 = vpop.f32.mrb[148].mxu1 }
 0x208   :  { %v2238_v47 = vmax.f32 %v2190_v14, 0.0  ;;  %v2137_v7 = vmax.f32 %v15895_v58, %v12097_v13  ;;  %v1913_v18 = vpop.f32.mrb[149].mxu1 }
 0x209   :  { %v2237_v41 = vmax.f32 %v2189_v46, 0.0  ;;  %v2136_v59 = vmax.f32 %v15900_v51, %v1913_v18  ;;  %v10317_v51 = vld [vmem:[%s18607_s3 + $0xd0] sm:$0xff] }
 0x20a   :  { %2287 = vst.msk [vmem:[#allocation2 + $0x18] sm:$0xff] %vm2283_vm4, %v2238_v47  ;;  %v2192_v4 = vadd.f32 %v16133_v6, %v2137_v7 }
 0x20b   :  { %2286 = vst.msk [vmem:[#allocation2 + $0x10] sm:$0xff] %vm2283_vm4, %v2237_v41  ;;  %v2191_v25 = vadd.f32 %v16133_v6, %v2136_v59  ;;  %v12100_v22 = vpop.f32.mrb[150].mxu1  ;;  %v13611_v41 = vpack.c.bf16 %v10318_v49, %v10317_v51  ;;  %v10319_v59 = vld [vmem:[%s18607_s3 + $0xe0] sm:$0xff] }
 0x20c   :  { %v2240_v28 = vmax.f32 %v2192_v4, 0.0  ;;  %v2139_v17 = vmax.f32 %v15905_v21, %v12100_v22  ;;  %v1923_v26 = vpop.f32.mrb[151].mxu1  ;;  %v10320_v4 = vld [vmem:[%s18607_s3 + $0xe8] sm:$0xff]  ;;  %v10271_v22 = vld [vmem:[%s18607_s3 + $0x60] sm:$0xff] }
 0x20d   :  { %v2239_v44 = vmax.f32 %v2191_v25, 0.0  ;;  %v2138_v58 = vmax.f32 %v15910_v54, %v1923_v26  ;;  %v10270_v54 = vld [vmem:[%s18607_s3 + $0x58] sm:$0xff] }
 0x20e   :  { %2289 = vst.msk [vmem:[#allocation2 + $0x28] sm:$0xff] %vm2283_vm4, %v2240_v28  ;;  %v2194_v21 = vadd.f32 %v16133_v6, %v2139_v17  ;;  %v2340_v33 = vld [vmem:[#allocation2] sm:$0xff]  ;;  %v13579_v25 = vpack.c.bf16 %v10270_v54, %v10269_v9  ;;  %v10272_v17 = vld [vmem:[%s18607_s3 + $0x68] sm:$0xff]  ;;  %v10321_v54 = vld [vmem:[%s18607_s3 + $0xf0] sm:$0xff] }
 0x20f   :  { %v2807_v37 = vld [vmem:[#allocation2 + $0x2] sm:$0xff]  ;;  %2288 = vst.msk [vmem:[#allocation2 + $0x20] sm:$0xff] %vm2283_vm4, %v2239_v44  ;;  %v2193_v10 = vadd.f32 %v16133_v6, %v2138_v58  ;;  %v12103_v14 = vpop.f32.mrb[152].mxu1  ;;  %12177 = vmatprep.mubr.msk.f32.mxu1 %vm2283_vm4, %v2340_v33  ;;  %v13615_v33 = vpack.c.bf16 %v10320_v4, %v10319_v59 }
 0x210   :  { %12257 = vmatprep.mubr.msk.f32.mxu0 %vm2283_vm4, %v2807_v37  ;;  %v2242_v46 = vmax.f32 %v2194_v21, 0.0  ;;  %v2141_v13 = vmax.f32 %v15915_v62, %v12103_v14  ;;  %v1933_v47 = vpop.f32.mrb[153].mxu1  ;;  %v13583_v37 = vpack.c.bf16 %v10272_v17, %v10271_v22  ;;  %v10274_v14 = vld [vmem:[%s18607_s3 + $0x78] sm:$0xff] }
 0x211   :  { %v2241_v7 = vmax.f32 %v2193_v10, 0.0  ;;  %v2140_v18 = vmax.f32 %v15920_v52, %v1933_v47 }
 0x212   :  { %2291 = vst.msk [vmem:[#allocation2 + $0x38] sm:$0xff] %vm2283_vm4, %v2242_v46  ;;  %v2196_v62 = vadd.f32 %v16133_v6, %v2141_v13  ;;  %v16184_v28 = vld [vmem:[#allocation2 + $0x10] sm:$0xff] }
 0x213   :  { %v2808_v52 = vld [vmem:[#allocation2 + $0x12] sm:$0xff]  ;;  %2290 = vst.msk [vmem:[#allocation2 + $0x30] sm:$0xff] %vm2283_vm4, %v2241_v7  ;;  %v2195_v26 = vadd.f32 %v16133_v6, %v2140_v18  ;;  %v12106_v44 = vpop.f32.mrb[154].mxu1  ;;  %12178 = vmatmul.mubr.msk.f32.vlgmr.msra.gmra.mrb[192].mxu1 %vm2283_vm4, %v16184_v28 }
 0x214   :  { %12258 = vmatmul.mubr.msk.f32.vlgmr.msra.gmra.mrb[0].mxu0 %vm2283_vm4, %v2808_v52  ;;  %v2244_v58 = vmax.f32 %v2196_v62, 0.0  ;;  %v2143_v51 = vmax.f32 %v15925_v53, %v12106_v44  ;;  %v1943_v49 = vpop.f32.mrb[155].mxu1  ;;  %13578 = vmatpush3.bf16.msra.mxu1 %v16007_v23  ;;  %v10322_v53 = vld [vmem:[%s18607_s3 + $0xf8] sm:$0xff]  ;;  %v10339_v52 = vld [vmem:[%s18607_s3 + $0x100] sm:$0xff] }
 0x215   :  { %13610 = vmatpush3.bf16.msra.mxu0 %v15978_v0  ;;  %v2243_v9 = vmax.f32 %v2195_v26, 0.0  ;;  %v2142_v21 = vmax.f32 %v15930_v42, %v1943_v49  ;;  %13580 = vmatprep.subr.bf16.mxu1 %v13579_v25  ;;  %v10273_v0 = vld [vmem:[%s18607_s3 + $0x70] sm:$0xff]  ;;  %v13619_v22 = vpack.c.bf16 %v10322_v53, %v10321_v54 }
 0x216   :  { %13612 = vmatprep.subr.bf16.mxu0 %v13611_v41  ;;  %2293 = vst.msk [vmem:[#allocation2 + $0x48] sm:$0xff] %vm2283_vm4, %v2244_v58  ;;  %v2198_v42 = vadd.f32 %v16133_v6, %v2143_v51  ;;  %v16209_v23 = vld [vmem:[#allocation2 + $0x20] sm:$0xff]  ;;  %v13587_v62 = vpack.c.bf16 %v10274_v14, %v10273_v0 }
 0x217   :  { %v16211_v10 = vld [vmem:[#allocation2 + $0x22] sm:$0xff]  ;;  %2292 = vst.msk [vmem:[#allocation2 + $0x40] sm:$0xff] %vm2283_vm4, %v2243_v9  ;;  %v2197_v46 = vadd.f32 %v16133_v6, %v2142_v21  ;;  %v12109_v13 = vpop.f32.mrb[156].mxu1  ;;  %12180 = vmatprep.mubr.msk.f32.mxu1 %vm2283_vm4, %v16209_v23 }
 0x218   :  { %12260 = vmatprep.mubr.msk.f32.mxu0 %vm2283_vm4, %v16211_v10  ;;  %v2246_v47 = vmax.f32 %v2198_v42, 0.0  ;;  %v2145_v7 = vmax.f32 %v15935_v29, %v12109_v13  ;;  %v1953_v18 = vpop.f32.mrb[157].mxu1  ;;  %13582 = vmatpush3.bf16.msra.mxu1 %v13579_v25 }
 0x219   :  { %13614 = vmatpush3.bf16.msra.mxu0 %v13611_v41  ;;  %v2245_v59 = vmax.f32 %v2197_v46, 0.0  ;;  %v2144_v4 = vmax.f32 %v15940_v55, %v1953_v18  ;;  %13584 = vmatprep.subr.bf16.mxu1 %v13583_v37  ;;  %v10340_v55 = vld [vmem:[%s18607_s3 + $0x108] sm:$0xff] }
 0x21a   :  { %13616 = vmatprep.subr.bf16.mxu0 %v13615_v33  ;;  %2295 = vst.msk [vmem:[#allocation2 + $0x58] sm:$0xff] %vm2283_vm4, %v2246_v47  ;;  %v2200_v17 = vadd.f32 %v16133_v6, %v2145_v7  ;;  %v16229_v26 = vld [vmem:[#allocation2 + $0x30] sm:$0xff]  ;;  %v16244_v21 = vpack.c.bf16 %v10340_v55, %v10339_v52 }
 0x21b   :  { %v16231_v29 = vld [vmem:[#allocation2 + $0x32] sm:$0xff]  ;;  %2294 = vst.msk [vmem:[#allocation2 + $0x50] sm:$0xff] %vm2283_vm4, %v2245_v59  ;;  %v2199_v41 = vadd.f32 %v16133_v6, %v2144_v4  ;;  %v12112_v25 = vpop.f32.mrb[158].mxu1  ;;  %12181 = vmatmul.mubr.msk.f32.gmra.mrb[194].mxu1 %vm2283_vm4, %v16229_v26 }
 0x21c   :  { %12261 = vmatmul.mubr.msk.f32.gmra.mrb[2].mxu0 %vm2283_vm4, %v16231_v29  ;;  %v2248_v44 = vmax.f32 %v2200_v17, 0.0  ;;  %v2147_v58 = vmax.f32 %v15945_v38, %v12112_v25  ;;  %v1963_v51 = vpop.f32.mrb[159].mxu1  ;;  %13586 = vmatpush3.bf16.msra.mxu1 %v13583_v37 }
 0x21d   :  { %13618 = vmatpush3.bf16.msra.mxu0 %v13615_v33  ;;  %v2247_v49 = vmax.f32 %v2199_v41, 0.0  ;;  %v2146_v9 = vmax.f32 %v15950_v34, %v1963_v51  ;;  %13588 = vmatprep.subr.bf16.mxu1 %v13587_v62 }
 0x21e   :  { %13620 = vmatprep.subr.bf16.mxu0 %v13619_v22  ;;  %2297 = vst.msk [vmem:[#allocation2 + $0x68] sm:$0xff] %vm2283_vm4, %v2248_v44  ;;  %v2202_v54 = vadd.f32 %v16133_v6, %v2147_v58  ;;  %v16248_v53 = vld [vmem:[#allocation2 + $0x40] sm:$0xff] }
 0x21f   :  { %v16250_v0 = vld [vmem:[#allocation2 + $0x42] sm:$0xff]  ;;  %2296 = vst.msk [vmem:[#allocation2 + $0x60] sm:$0xff] %vm2283_vm4, %v2247_v49  ;;  %v2201_v38 = vadd.f32 %v16133_v6, %v2146_v9  ;;  %v12115_v33 = vpop.f32.mrb[160].mxu1  ;;  %12183 = vmatprep.mubr.msk.f32.mxu1 %vm2283_vm4, %v16248_v53 }
 0x220   :  { %12263 = vmatprep.mubr.msk.f32.mxu0 %vm2283_vm4, %v16250_v0  ;;  %v2250_v34 = vmax.f32 %v2202_v54, 0.0  ;;  %v2149_v37 = vmax.f32 %v15955_v56, %v12115_v33  ;;  %v1973_v42 = vpop.f32.mrb[161].mxu1  ;;  %13590 = vmatpush3.bf16.msra.mxu1 %v13587_v62 }
 0x221   :  { %13622 = vmatpush3.bf16.msra.mxu0 %v13619_v22  ;;  %v2249_v14 = vmax.f32 %v2201_v38, 0.0  ;;  %v2148_v46 = vmax.f32 %v15960_v48, %v1973_v42 }
 0x222   :  { %13624 = vmatprep.subr.bf16.mxu0 %v16244_v21  ;;  %2299 = vst.msk [vmem:[#allocation2 + $0x78] sm:$0xff] %vm2283_vm4, %v2250_v34  ;;  %v2204_v13 = vadd.f32 %v16133_v6, %v2149_v37  ;;  %v16263_v47 = vld [vmem:[#allocation2 + $0x50] sm:$0xff] }
 0x223   :  { %v16265_v7 = vld [vmem:[#allocation2 + $0x52] sm:$0xff]  ;;  %2298 = vst.msk [vmem:[#allocation2 + $0x70] sm:$0xff] %vm2283_vm4, %v2249_v14  ;;  %v2203_v56 = vadd.f32 %v16133_v6, %v2148_v46  ;;  %v12118_v18 = vpop.f32.mrb[162].mxu1  ;;  %12184 = vmatmul.mubr.msk.f32.gmra.mrb[196].mxu1 %vm2283_vm4, %v16263_v47 }
 0x224   :  { %12264 = vmatmul.mubr.msk.f32.gmra.mrb[4].mxu0 %vm2283_vm4, %v16265_v7  ;;  %v2252_v48 = vmax.f32 %v2204_v13, 0.0  ;;  %v2151_v59 = vmax.f32 %v15965_v45, %v12118_v18  ;;  %v1983_v4 = vpop.f32.mrb[163].mxu1 }
 0x225   :  { %v2251_v22 = vmax.f32 %v2203_v56, 0.0  ;;  %v2150_v62 = vmax.f32 %v15970_v50, %v1983_v4 }
 0x226   :  { %2301 = vst.msk [vmem:[#allocation2 + $0x88] sm:$0xff] %vm2283_vm4, %v2252_v48  ;;  %v2206_v52 = vadd.f32 %v16133_v6, %v2151_v59  ;;  %v16277_v17 = vld [vmem:[#allocation2 + $0x60] sm:$0xff] }
 0x227   :  { %v16279_v55 = vld [vmem:[#allocation2 + $0x62] sm:$0xff]  ;;  %2300 = vst.msk [vmem:[#allocation2 + $0x80] sm:$0xff] %vm2283_vm4, %v2251_v22  ;;  %v2205_v41 = vadd.f32 %v16133_v6, %v2150_v62  ;;  %v12121_v25 = vpop.f32.mrb[164].mxu1  ;;  %12186 = vmatprep.mubr.msk.f32.mxu1 %vm2283_vm4, %v16277_v17 }
 0x228   :  { %12266 = vmatprep.mubr.msk.f32.mxu0 %vm2283_vm4, %v16279_v55  ;;  %v2254_v45 = vmax.f32 %v2206_v52, 0.0  ;;  %v2153_v50 = vmax.f32 %v15983_v15, %v12121_v25  ;;  %v1993_v44 = vpop.f32.mrb[165].mxu1 }
 0x229   :  { %v2253_v58 = vmax.f32 %v2205_v41, 0.0  ;;  %v2152_v51 = vmax.f32 %v15988_v16, %v1993_v44 }
 0x22a   :  { %2303 = vst.msk [vmem:[#allocation2 + $0x98] sm:$0xff] %vm2283_vm4, %v2254_v45  ;;  %v2208_v49 = vadd.f32 %v16133_v6, %v2153_v50  ;;  %v16291_v9 = vld [vmem:[#allocation2 + $0x70] sm:$0xff] }
 0x22b   :  { %v16293_v54 = vld [vmem:[#allocation2 + $0x72] sm:$0xff]  ;;  %2302 = vst.msk [vmem:[#allocation2 + $0x90] sm:$0xff] %vm2283_vm4, %v2253_v58  ;;  %v2207_v38 = vadd.f32 %v16133_v6, %v2152_v51  ;;  %v12124_v33 = vpop.f32.mrb[166].mxu1  ;;  %12187 = vmatmul.mubr.msk.f32.gmra.mrb[198].mxu1 %vm2283_vm4, %v16291_v9  ;;  %v18817_v58 = vld [vmem:[#allocation15_spill] sm:$0xff] }
 0x22c   :  { %12267 = vmatmul.mubr.msk.f32.gmra.mrb[6].mxu0 %vm2283_vm4, %v16293_v54  ;;  %v2256_v15 = vmax.f32 %v2208_v49, 0.0  ;;  %v2155_v16 = vmax.f32 %v15994_v8, %v12124_v33  ;;  %v2003_v34 = vpop.f32.mrb[167].mxu1  ;;  %v18818_v33 = vld [vmem:[#allocation16_spill] sm:$0xff] }
 0x22d   :  { %v2255_v37 = vmax.f32 %v2207_v38, 0.0  ;;  %v2154_v42 = vmax.f32 %v16005_v61, %v2003_v34 }
 0x22e   :  { %2305 = vst.msk [vmem:[#allocation2 + $0xa8] sm:$0xff] %vm2283_vm4, %v2256_v15  ;;  %v2210_v14 = vadd.f32 %v16133_v6, %v2155_v16 }
 0x22f   :  { %2304 = vst.msk [vmem:[#allocation2 + $0xa0] sm:$0xff] %vm2283_vm4, %v2255_v37  ;;  %v2209_v46 = vadd.f32 %v16133_v6, %v2154_v42  ;;  %v12127_v13 = vpop.f32.mrb[168].mxu1  ;;  %v18819_v37 = vld [vmem:[#allocation17_spill] sm:$0xff] }
 0x230   :  { %v2258_v56 = vmax.f32 %v2210_v14, 0.0  ;;  %v2157_v18 = vmax.f32 %v16013_v27, %v12127_v13  ;;  %v2013_v48 = vpop.f32.mrb[169].mxu1 }
 0x231   :  { %v2257_v59 = vmax.f32 %v2209_v46, 0.0  ;;  %v2156_v8 = vmax.f32 %v16018_v2, %v2013_v48 }
 0x232   :  { %2307 = vst.msk [vmem:[#allocation2 + $0xb8] sm:$0xff] %vm2283_vm4, %v2258_v56  ;;  %v2212_v61 = vadd.f32 %v16133_v6, %v2157_v18 }
 0x233   :  { %2306 = vst.msk [vmem:[#allocation2 + $0xb0] sm:$0xff] %vm2283_vm4, %v2257_v59  ;;  %v2211_v4 = vadd.f32 %v16133_v6, %v2156_v8  ;;  %v12130_v22 = vpop.f32.mrb[170].mxu1 }
 0x234   :  { %v2260_v62 = vmax.f32 %v2212_v61, 0.0  ;;  %v2159_v52 = vmax.f32 %v16023_v19, %v12130_v22  ;;  %v2023_v41 = vpop.f32.mrb[171].mxu1 }
 0x235   :  { %v2259_v25 = vmax.f32 %v2211_v4, 0.0  ;;  %v2158_v27 = vmax.f32 %v16028_v32, %v2023_v41 }
 0x236   :  { %2309 = vst.msk [vmem:[#allocation2 + $0xc8] sm:$0xff] %vm2283_vm4, %v2260_v62  ;;  %v2214_v2 = vadd.f32 %v16133_v6, %v2159_v52 }
 0x237   :  { %2308 = vst.msk [vmem:[#allocation2 + $0xc0] sm:$0xff] %vm2283_vm4, %v2259_v25  ;;  %v2213_v45 = vadd.f32 %v16133_v6, %v2158_v27  ;;  %v12133_v50 = vpop.f32.mrb[172].mxu1 }
 0x238   :  { %v2262_v44 = vmax.f32 %v2214_v2, 0.0  ;;  %v2161_v51 = vmax.f32 %v18817_v58, %v12133_v50  ;;  %v2033_v49 = vpop.f32.mrb[173].mxu1 }
 0x239   :  { %v2261_v38 = vmax.f32 %v2213_v45, 0.0  ;;  %v2160_v19 = vmax.f32 %v18818_v33, %v2033_v49 }
 0x23a   :  { %2311 = vst.msk [vmem:[#allocation2 + $0xd8] sm:$0xff] %vm2283_vm4, %v2262_v44  ;;  %v2216_v32 = vadd.f32 %v16133_v6, %v2161_v51 }
 0x23b   :  { %2310 = vst.msk [vmem:[#allocation2 + $0xd0] sm:$0xff] %vm2283_vm4, %v2261_v38  ;;  %v2215_v15 = vadd.f32 %v16133_v6, %v2160_v19  ;;  %v12136_v16 = vpop.f32.mrb[174].mxu1 }
 0x23c   :  { %v2264_v34 = vmax.f32 %v2216_v32, 0.0  ;;  %v2163_v42 = vmax.f32 %v18819_v37, %v12136_v16  ;;  %v2043_v14 = vpop.f32.mrb[175].mxu1 }
 0x23d   :  { %v2263_v46 = vmax.f32 %v2215_v15, 0.0  ;;  %v2162_v13 = vmax.f32 %v16048_v20, %v2043_v14 }
 0x23e   :  { %2313 = vst.msk [vmem:[#allocation2 + $0xe8] sm:$0xff] %vm2283_vm4, %v2264_v34  ;;  %v2218_v56 = vadd.f32 %v16133_v6, %v2163_v42  ;;  %v2348_v18 = vld [vmem:[#allocation2 + $0xc0] sm:$0xff] }
 0x23f   :  { %v2815_v48 = vld [vmem:[#allocation2 + $0xc2] sm:$0xff]  ;;  %2312 = vst.msk [vmem:[#allocation2 + $0xe0] sm:$0xff] %vm2283_vm4, %v2263_v46  ;;  %v2217_v59 = vadd.f32 %v16133_v6, %v2162_v13  ;;  %v12139_v8 = vpop.f32.mrb[176].mxu1  ;;  %12189 = vmatprep.mubr.msk.f32.mxu1 %vm2283_vm4, %v2348_v18 }
 0x240   :  { %12269 = vmatprep.mubr.msk.f32.mxu0 %vm2283_vm4, %v2815_v48  ;;  %v2266_v61 = vmax.f32 %v2218_v56, 0.0  ;;  %v2165_v4 = vmax.f32 %v16053_v35, %v12139_v8  ;;  %v2053_v22 = vpop.f32.mrb[177].mxu1 }
 0x241   :  { %v2265_v20 = vmax.f32 %v2217_v59, 0.0  ;;  %v2164_v62 = vmax.f32 %v16058_v1, %v2053_v22 }
 0x242   :  { %2315 = vst.msk [vmem:[#allocation2 + $0xf8] sm:$0xff] %vm2283_vm4, %v2266_v61  ;;  %v2220_v52 = vadd.f32 %v16133_v6, %v2165_v4  ;;  %v16337_v41 = vld [vmem:[#allocation2 + $0xd0] sm:$0xff] }
 0x243   :  { %v16339_v25 = vld [vmem:[#allocation2 + $0xd2] sm:$0xff]  ;;  %2314 = vst.msk [vmem:[#allocation2 + $0xf0] sm:$0xff] %vm2283_vm4, %v2265_v20  ;;  %v2219_v27 = vadd.f32 %v16133_v6, %v2164_v62  ;;  %v12142_v2 = vpop.f32.mrb[178].mxu1  ;;  %12190 = vmatmul.mubr.msk.f32.gmra.mrb[200].mxu1 %vm2283_vm4, %v16337_v41 }
 0x244   :  { %12270 = vmatmul.mubr.msk.f32.gmra.mrb[8].mxu0 %vm2283_vm4, %v16339_v25  ;;  %v2268_v35 = vmax.f32 %v2220_v52, 0.0  ;;  %v2167_v1 = vmax.f32 %v16063_v36, %v12142_v2  ;;  %v2063_v45 = vpop.f32.mrb[179].mxu1 }
 0x245   :  { %v2267_v50 = vmax.f32 %v2219_v27, 0.0  ;;  %v2166_v44 = vmax.f32 %v16068_v31, %v2063_v45 }
 0x246   :  { %2317 = vst.msk [vmem:[#allocation2 + $0x108] sm:$0xff] %vm2283_vm4, %v2268_v35  ;;  %v2222_v58 = vadd.f32 %v16133_v6, %v2167_v1  ;;  %v16351_v51 = vld [vmem:[#allocation2 + $0xe0] sm:$0xff] }
 0x247   :  { %v16353_v49 = vld [vmem:[#allocation2 + $0xe2] sm:$0xff]  ;;  %2316 = vst.msk [vmem:[#allocation2 + $0x100] sm:$0xff] %vm2283_vm4, %v2267_v50  ;;  %v2221_v38 = vadd.f32 %v16133_v6, %v2166_v44  ;;  %v12145_v33 = vpop.f32.mrb[180].mxu1  ;;  %12192 = vmatprep.mubr.msk.f32.mxu1 %vm2283_vm4, %v16351_v51 }
 0x248   :  { %12272 = vmatprep.mubr.msk.f32.mxu0 %vm2283_vm4, %v16353_v49  ;;  %v2270_v36 = vmax.f32 %v2222_v58, 0.0  ;;  %v2169_v31 = vmax.f32 %v16073_v24, %v12145_v33  ;;  %v2073_v19 = vpop.f32.mrb[181].mxu1 }
 0x249   :  { %v2269_v32 = vmax.f32 %v2221_v38, 0.0  ;;  %v2168_v15 = vmax.f32 %v16078_v12, %v2073_v19 }
 0x24a   :  { %2319 = vst.msk [vmem:[#allocation2 + $0x118] sm:$0xff] %vm2283_vm4, %v2270_v36  ;;  %v2224_v16 = vadd.f32 %v16133_v6, %v2169_v31  ;;  %v16365_v34 = vld [vmem:[#allocation2 + $0xf0] sm:$0xff] }
 0x24b   :  { %v16367_v37 = vld [vmem:[#allocation2 + $0xf2] sm:$0xff]  ;;  %2318 = vst.msk [vmem:[#allocation2 + $0x110] sm:$0xff] %vm2283_vm4, %v2269_v32  ;;  %v2223_v42 = vadd.f32 %v16133_v6, %v2168_v15  ;;  %v12148_v14 = vpop.f32.mrb[182].mxu1  ;;  %12193 = vmatmul.mubr.msk.f32.gmra.mrb[202].mxu1 %vm2283_vm4, %v16365_v34 }
 0x24c   :  { %12273 = vmatmul.mubr.msk.f32.gmra.mrb[10].mxu0 %vm2283_vm4, %v16367_v37  ;;  %v2272_v24 = vmax.f32 %v2224_v16, 0.0  ;;  %v2171_v12 = vmax.f32 %v16083_v5, %v12148_v14  ;;  %v2083_v46 = vpop.f32.mrb[183].mxu1  ;;  %v10341_v14 = vld [vmem:[%s18607_s3 + $0x110] sm:$0xff] }
 0x24d   :  { %v2271_v13 = vmax.f32 %v2223_v42, 0.0  ;;  %v2170_v56 = vmax.f32 %v16088_v57, %v2083_v46  ;;  %v10342_v46 = vld [vmem:[%s18607_s3 + $0x118] sm:$0xff] }
 0x24e   :  { %2321 = vst.msk [vmem:[#allocation2 + $0x128] sm:$0xff] %vm2283_vm4, %v2272_v24  ;;  %v2226_v18 = vadd.f32 %v16133_v6, %v2171_v12  ;;  %v16379_v48 = vld [vmem:[#allocation2 + $0x100] sm:$0xff] }
 0x24f   :  { %v16381_v59 = vld [vmem:[#allocation2 + $0x102] sm:$0xff]  ;;  %2320 = vst.msk [vmem:[#allocation2 + $0x120] sm:$0xff] %vm2283_vm4, %v2271_v13  ;;  %v2225_v8 = vadd.f32 %v16133_v6, %v2170_v56  ;;  %v12151_v61 = vpop.f32.mrb[184].mxu1  ;;  %12195 = vmatprep.mubr.msk.f32.mxu1 %vm2283_vm4, %v16379_v48 }
 0x250   :  { %12275 = vmatprep.mubr.msk.f32.mxu0 %vm2283_vm4, %v16381_v59  ;;  %v2274_v5 = vmax.f32 %v2226_v18, 0.0  ;;  %v2173_v57 = vmax.f32 %v16093_v3, %v12151_v61  ;;  %v2093_v4 = vpop.f32.mrb[185].mxu1  ;;  %v3041_v12 = vld [vmem:[#allocation2 + $0x3] sm:$0xff] }
 0x251   :  { %v2273_v22 = vmax.f32 %v2225_v8, 0.0  ;;  %v2172_v20 = vmax.f32 %v16098_v39, %v2093_v4  ;;  %v16445_v4 = vld [vmem:[#allocation2 + $0x13] sm:$0xff] }
 0x252   :  { %2323 = vst.msk [vmem:[#allocation2 + $0x138] sm:$0xff] %vm2283_vm4, %v2274_v5  ;;  %v2228_v62 = vadd.f32 %v16133_v6, %v2173_v57  ;;  %v16393_v52 = vld [vmem:[#allocation2 + $0x110] sm:$0xff] }
 0x253   :  { %v16395_v27 = vld [vmem:[#allocation2 + $0x112] sm:$0xff]  ;;  %2322 = vst.msk [vmem:[#allocation2 + $0x130] sm:$0xff] %vm2283_vm4, %v2273_v22  ;;  %v2227_v2 = vadd.f32 %v16133_v6, %v2172_v20  ;;  %v12154_v35 = vpop.f32.mrb[186].mxu1  ;;  %12196 = vmatmul.mubr.msk.f32.gmra.mrb[204].mxu1 %vm2283_vm4, %v16393_v52  ;;  %v13627_v22 = vpack.c.bf16 %v10342_v46, %v10341_v14 }
 0x254   :  { %12276 = vmatmul.mubr.msk.f32.gmra.mrb[12].mxu0 %vm2283_vm4, %v16395_v27  ;;  %v2276_v3 = vmax.f32 %v2228_v62, 0.0  ;;  %v2175_v39 = vmax.f32 %v16103_v40, %v12154_v35  ;;  %v2103_v1 = vpop.f32.mrb[187].mxu1  ;;  %v16443_v57 = vld [vmem:[#allocation2 + $0x11] sm:$0xff]  ;;  %v16458_v62 = vld [vmem:[#allocation2 + $0x23] sm:$0xff] }
 0x255   :  { %v2275_v45 = vmax.f32 %v2227_v2, 0.0  ;;  %v2174_v50 = vmax.f32 %v16108_v43, %v2103_v1  ;;  %v10344_v2 = vld [vmem:[%s18607_s3 + $0x128] sm:$0xff]  ;;  %v16516_v14 = vld [vmem:[#allocation2 + $0x73] sm:$0xff] }
 0x256   :  { %2325 = vst.msk [vmem:[#allocation2 + $0x148] sm:$0xff] %vm2283_vm4, %v2276_v3  ;;  %v2230_v44 = vadd.f32 %v16133_v6, %v2175_v39  ;;  %v16407_v58 = vld [vmem:[#allocation2 + $0x120] sm:$0xff]  ;;  %v16469_v3 = vld [vmem:[#allocation2 + $0x31] sm:$0xff] }
 0x257   :  { %v16409_v38 = vld [vmem:[#allocation2 + $0x122] sm:$0xff]  ;;  %2324 = vst.msk [vmem:[#allocation2 + $0x140] sm:$0xff] %vm2283_vm4, %v2275_v45  ;;  %v2229_v33 = vadd.f32 %v16133_v6, %v2174_v50  ;;  %v12157_v36 = vpop.f32.mrb[188].mxu1  ;;  %12198 = vmatprep.mubr.msk.f32.mxu1 %vm2283_vm4, %v16407_v58  ;;  %v16471_v39 = vld [vmem:[#allocation2 + $0x33] sm:$0xff] }
 0x258   :  { %12278 = vmatprep.mubr.msk.f32.mxu0 %vm2283_vm4, %v16409_v38  ;;  %v2278_v40 = vmax.f32 %v2230_v44, 0.0  ;;  %v2177_v43 = vmax.f32 %v16113_v63, %v12157_v36  ;;  %v2113_v31 = vpop.f32.mrb[189].mxu1  ;;  %v10345_v45 = vld [vmem:[%s18607_s3 + $0x130] sm:$0xff]  ;;  %v16483_v50 = vld [vmem:[#allocation2 + $0x43] sm:$0xff]  ;;  %v10346_v44 = vld [vmem:[%s18607_s3 + $0x138] sm:$0xff] }
 0x259   :  { %v2277_v19 = vmax.f32 %v2229_v33, 0.0  ;;  %v2176_v32 = vmax.f32 %v16118_v60, %v2113_v31  ;;  %v2573_v60 = vld [vmem:[#allocation2 + $0x1] sm:$0xff]  ;;  %v16492_v33 = vld [vmem:[#allocation2 + $0x51] sm:$0xff] }
 0x25a   :  { %2327 = vst.msk [vmem:[#allocation2 + $0x158] sm:$0xff] %vm2283_vm4, %v2278_v40  ;;  %v2232_v15 = vadd.f32 %v16133_v6, %v2177_v43  ;;  %v16421_v16 = vld [vmem:[#allocation2 + $0x130] sm:$0xff]  ;;  %v13635_v40 = vpack.c.bf16 %v10346_v44, %v10345_v45  ;;  %v10363_v43 = vld [vmem:[%s18607_s3 + $0x140] sm:$0xff]  ;;  %v10366_v45 = vld [vmem:[%s18607_s3 + $0x158] sm:$0xff] }
 0x25b   :  { %v16423_v42 = vld [vmem:[#allocation2 + $0x132] sm:$0xff]  ;;  %2326 = vst.msk [vmem:[#allocation2 + $0x150] sm:$0xff] %vm2283_vm4, %v2277_v19  ;;  %v2231_v63 = vadd.f32 %v16133_v6, %v2176_v32  ;;  %v12160_v24 = vpop.f32.mrb[190].mxu1  ;;  %12199 = vmatmul.mubr.msk.f32.gmra.mrb[206].mxu1 %vm2283_vm4, %v16421_v16  ;;  %v16503_v31 = vld [vmem:[#allocation2 + $0x61] sm:$0xff] }
 0x25c   :  { %12279 = vmatmul.mubr.msk.f32.gmra.mrb[14].mxu0 %vm2283_vm4, %v16423_v42  ;;  %v2280_v13 = vmax.f32 %v2232_v15, 0.0  ;;  %v2179_v56 = vmax.f32 %v16123_v11, %v12160_v24  ;;  %v2123_v18 = vpop.f32.mrb[191].mxu1  ;;  %12217 = vmatprep.mubr.msk.f32.mxu1 %vm2283_vm4, %v2573_v60  ;;  %v10343_v11 = vld [vmem:[%s18607_s3 + $0x120] sm:$0xff]  ;;  %v16494_v36 = vld [vmem:[#allocation2 + $0x53] sm:$0xff]  ;;  %v10364_v32 = vld [vmem:[%s18607_s3 + $0x148] sm:$0xff] }
 0x25d   :  { %12297 = vmatprep.mubr.msk.f32.mxu0 %vm2283_vm4, %v3041_v12  ;;  %v2279_v8 = vmax.f32 %v2231_v63, 0.0  ;;  %v2178_v61 = vmax.f32 %v16128_v30, %v2123_v18  ;;  %v16456_v30 = vld [vmem:[#allocation2 + $0x21] sm:$0xff]  ;;  %v13631_v1 = vpack.c.bf16 %v10344_v2, %v10343_v11  ;;  %v16514_v15 = vld [vmem:[#allocation2 + $0x71] sm:$0xff]  ;;  %v13639_v63 = vpack.c.bf16 %v10364_v32, %v10363_v43 }
 0x25e   :  { %2329 = vst.msk [vmem:[#allocation2 + $0x168] sm:$0xff] %vm2283_vm4, %v2280_v13  ;;  %v2234_v5 = vadd.f32 %v16133_v6, %v2179_v56  ;;  %v16505_v19 = vld [vmem:[#allocation2 + $0x63] sm:$0xff]  ;;  %v16524_v12 = vld [vmem:[#allocation2 + $0xd1] sm:$0xff] }
 0x25f   :  { %2328 = vst.msk [vmem:[#allocation2 + $0x160] sm:$0xff] %vm2283_vm4, %v2279_v8  ;;  %v2233_v20 = vadd.f32 %v16133_v6, %v2178_v61  ;;  %12218 = vmatmul.mubr.msk.f32.vlgmr.msra.gmra.mrb[192].mxu1 %vm2283_vm4, %v16443_v57  ;;  %v2581_v24 = vld [vmem:[#allocation2 + $0xc1] sm:$0xff]  ;;  %v16526_v46 = vld [vmem:[#allocation2 + $0xd3] sm:$0xff] }
 0x260   :  { %12298 = vmatmul.mubr.msk.f32.vlgmr.msra.gmra.mrb[0].mxu0 %vm2283_vm4, %v16445_v4  ;;  %v2282_v35 = vmax.f32 %v2234_v5, 0.0  ;;  %12220 = vmatprep.mubr.msk.f32.mxu1 %vm2283_vm4, %v16456_v30  ;;  %v3049_v60 = vld [vmem:[#allocation2 + $0xc3] sm:$0xff]  ;;  %v16540_v18 = vld [vmem:[#allocation2 + $0xf1] sm:$0xff] }
 0x261   :  { %12300 = vmatprep.mubr.msk.f32.mxu0 %vm2283_vm4, %v16458_v62  ;;  %v2281_v6 = vmax.f32 %v2233_v20, 0.0  ;;  %13626 = vmatpush3.bf16.msra.mxu0 %v16244_v21  ;;  %v16481_v21 = vld [vmem:[#allocation2 + $0x41] sm:$0xff]  ;;  %v16542_v8 = vld [vmem:[#allocation2 + $0xf3] sm:$0xff] }
 0x262   :  { %2331 = vst.msk [vmem:[#allocation2 + $0x178] sm:$0xff] %vm2283_vm4, %v2282_v35  ;;  %13628 = vmatprep.subr.bf16.mxu0 %v13627_v22  ;;  %v16532_v13 = vld [vmem:[#allocation2 + $0xe1] sm:$0xff]  ;;  %v16558_v11 = vld [vmem:[#allocation2 + $0x113] sm:$0xff] }
 0x263   :  { %2330 = vst.msk [vmem:[#allocation2 + $0x170] sm:$0xff] %vm2283_vm4, %v2281_v6  ;;  %12221 = vmatmul.mubr.msk.f32.gmra.mrb[194].mxu1 %vm2283_vm4, %v16469_v3  ;;  %v16534_v56 = vld [vmem:[#allocation2 + $0xe3] sm:$0xff]  ;;  %v10365_v35 = vld [vmem:[%s18607_s3 + $0x150] sm:$0xff] }
 0x264   :  { %12301 = vmatmul.mubr.msk.f32.gmra.mrb[2].mxu0 %vm2283_vm4, %v16471_v39  ;;  %12223 = vmatprep.mubr.msk.f32.mxu1 %vm2283_vm4, %v16481_v21  ;;  %v16548_v61 = vld [vmem:[#allocation2 + $0x101] sm:$0xff]  ;;  %v16575_v6 = vld [vmem:[#allocation2 + $0x131] sm:$0xff] }
 0x265   :  { %12303 = vmatprep.mubr.msk.f32.mxu0 %vm2283_vm4, %v16483_v50  ;;  %13630 = vmatpush3.bf16.msra.mxu0 %v13627_v22  ;;  %v16550_v5 = vld [vmem:[#allocation2 + $0x103] sm:$0xff]  ;;  %v16556_v22 = vld [vmem:[#allocation2 + $0x111] sm:$0xff] }
 0x266   :  { %13632 = vmatprep.subr.bf16.mxu0 %v13631_v1  ;;  %v16564_v20 = vld [vmem:[#allocation2 + $0x121] sm:$0xff]  ;;  %v16587_v43 = vld [vmem:[#allocation2 + $0x14] sm:$0xff] }
 0x267   :  { %12224 = vmatmul.mubr.msk.f32.gmra.mrb[196].mxu1 %vm2283_vm4, %v16492_v33  ;;  %v16566_v2 = vld [vmem:[#allocation2 + $0x123] sm:$0xff]  ;;  %18821 = vst [vmem:[#allocation19_spill] sm:$0xff] %v16587_v43 }
 0x268   :  { %12304 = vmatmul.mubr.msk.f32.gmra.mrb[4].mxu0 %vm2283_vm4, %v16494_v36  ;;  %12226 = vmatprep.mubr.msk.f32.mxu1 %vm2283_vm4, %v16503_v31  ;;  %v3275_v44 = vld [vmem:[#allocation2 + $0x4] sm:$0xff] }
 0x269   :  { %12306 = vmatprep.mubr.msk.f32.mxu0 %vm2283_vm4, %v16505_v19  ;;  %13634 = vmatpush3.bf16.msra.mxu0 %v13631_v1  ;;  %v16577_v1 = vld [vmem:[#allocation2 + $0x133] sm:$0xff]  ;;  %v10367_v32 = vld [vmem:[%s18607_s3 + $0x160] sm:$0xff] }
 0x26a   :  { %13636 = vmatprep.subr.bf16.mxu0 %v13635_v40  ;;  %18820 = vst [vmem:[#allocation18_spill] sm:$0xff] %v16577_v1 }
 0x26b   :  { %12227 = vmatmul.mubr.msk.f32.gmra.mrb[198].mxu1 %vm2283_vm4, %v16514_v15 }
 0x26c   :  { %12307 = vmatmul.mubr.msk.f32.gmra.mrb[6].mxu0 %vm2283_vm4, %v16516_v14  ;;  %12229 = vmatprep.mubr.msk.f32.mxu1 %vm2283_vm4, %v2581_v24  ;;  %v10368_v24 = vld [vmem:[%s18607_s3 + $0x168] sm:$0xff] }
 0x26d   :  { %12309 = vmatprep.mubr.msk.f32.mxu0 %vm2283_vm4, %v3049_v60  ;;  %13638 = vmatpush3.bf16.msra.mxu0 %v13635_v40  ;;  %v13643_v40 = vpack.c.bf16 %v10366_v45, %v10365_v35  ;;  %v16597_v60 = vld [vmem:[#allocation2 + $0x24] sm:$0xff]  ;;  %v13647_v35 = vpack.c.bf16 %v10368_v24, %v10367_v32  ;;  %v16601_v45 = vld [vmem:[#allocation2 + $0x34] sm:$0xff] }
 0x26e   :  { %13640 = vmatprep.subr.bf16.mxu0 %v13639_v63  ;;  %18822 = vst [vmem:[#allocation20_spill] sm:$0xff] %v16597_v60  ;;  %18823 = vst [vmem:[#allocation21_spill] sm:$0xff] %v16601_v45  ;;  %v16615_v32 = vld [vmem:[#allocation2 + $0x54] sm:$0xff]  ;;  %v10387_v24 = vld [vmem:[%s18607_s3 + $0x180] sm:$0xff] }
 0x26f   :  { %12230 = vmatmul.mubr.msk.f32.gmra.mrb[200].mxu1 %vm2283_vm4, %v16524_v12  ;;  %18825 = vst [vmem:[#allocation23_spill] sm:$0xff] %v16615_v32 }
 0x270   :  { %12310 = vmatmul.mubr.msk.f32.gmra.mrb[8].mxu0 %vm2283_vm4, %v16526_v46  ;;  %12232 = vmatprep.mubr.msk.f32.mxu1 %vm2283_vm4, %v16532_v13 }
 0x271   :  { %12312 = vmatprep.mubr.msk.f32.mxu0 %vm2283_vm4, %v16534_v56 }
 0x273   :  { %12233 = vmatmul.mubr.msk.f32.gmra.mrb[202].mxu1 %vm2283_vm4, %v16540_v18 }
 0x274   :  { %12313 = vmatmul.mubr.msk.f32.gmra.mrb[10].mxu0 %vm2283_vm4, %v16542_v8  ;;  %12235 = vmatprep.mubr.msk.f32.mxu1 %vm2283_vm4, %v16548_v61 }
 0x275   :  { %12315 = vmatprep.mubr.msk.f32.mxu0 %vm2283_vm4, %v16550_v5 }
 0x277   :  { %12236 = vmatmul.mubr.msk.f32.gmra.mrb[204].mxu1 %vm2283_vm4, %v16556_v22 }
 0x278   :  { %12316 = vmatmul.mubr.msk.f32.gmra.mrb[12].mxu0 %vm2283_vm4, %v16558_v11  ;;  %12238 = vmatprep.mubr.msk.f32.mxu1 %vm2283_vm4, %v16564_v20 }
 0x279   :  { %12318 = vmatprep.mubr.msk.f32.mxu0 %vm2283_vm4, %v16566_v2 }
 0x27b   :  { %12239 = vmatmul.mubr.msk.f32.gmra.mrb[206].mxu1 %vm2283_vm4, %v16575_v6 }
 0x27c   :  { %12319 = vmatmul.mubr.msk.f32.gmra.mrb[14].mxu0 %vm2283_vm4, %v16577_v1  ;;  %v10370_v1 = vld [vmem:[%s18607_s3 + $0x178] sm:$0xff] }
 0x27d   :  { %12337 = vmatprep.mubr.msk.f32.mxu0 %vm2283_vm4, %v3275_v44  ;;  %v10369_v44 = vld [vmem:[%s18607_s3 + $0x170] sm:$0xff] }
 0x280   :  { %12338 = vmatmul.mubr.msk.f32.vlgmr.msra.gmra.mrb[0].mxu0 %vm2283_vm4, %v16587_v43  ;;  %v16611_v43 = vld [vmem:[#allocation2 + $0x44] sm:$0xff] }
 0x281   :  { %12340 = vmatprep.mubr.msk.f32.mxu0 %vm2283_vm4, %v16597_v60  ;;  %13642 = vmatpush3.bf16.msra.mxu0 %v13639_v63  ;;  %18824 = vst [vmem:[#allocation22_spill] sm:$0xff] %v16611_v43  ;;  %v13651_v63 = vpack.c.bf16 %v10370_v1, %v10369_v44  ;;  %v10388_v60 = vld [vmem:[%s18607_s3 + $0x188] sm:$0xff] }
 0x282   :  { %13644 = vmatprep.subr.bf16.mxu0 %v13643_v40  ;;  %v13655_v1 = vpack.c.bf16 %v10388_v60, %v10387_v24  ;;  %v3283_v44 = vld [vmem:[#allocation2 + $0xc4] sm:$0xff]  ;;  %v16642_v60 = vld [vmem:[#allocation2 + $0xf4] sm:$0xff] }
 0x283   :  { %18827 = vst [vmem:[#allocation25_spill] sm:$0xff] %v16642_v60  ;;  %v16654_v24 = vld [vmem:[#allocation2 + $0x124] sm:$0xff] }
 0x284   :  { %12341 = vmatmul.mubr.msk.f32.gmra.mrb[2].mxu0 %vm2283_vm4, %v16601_v45  ;;  %v16625_v45 = vld [vmem:[#allocation2 + $0x64] sm:$0xff]  ;;  %18830 = vst [vmem:[#allocation28_spill] sm:$0xff] %v16654_v24 }
 0x285   :  { %12343 = vmatprep.mubr.msk.f32.mxu0 %vm2283_vm4, %v16611_v43  ;;  %13646 = vmatpush3.bf16.msra.mxu0 %v13643_v40  ;;  %v16629_v40 = vld [vmem:[#allocation2 + $0x74] sm:$0xff] }
 0x286   :  { %13648 = vmatprep.subr.bf16.mxu0 %v13647_v35  ;;  %v16634_v43 = vld [vmem:[#allocation2 + $0xd4] sm:$0xff] }
 0x288   :  { %12344 = vmatmul.mubr.msk.f32.gmra.mrb[4].mxu0 %vm2283_vm4, %v16615_v32  ;;  %v16638_v32 = vld [vmem:[#allocation2 + $0xe4] sm:$0xff] }
 0x289   :  { %12346 = vmatprep.mubr.msk.f32.mxu0 %vm2283_vm4, %v16625_v45  ;;  %13650 = vmatpush3.bf16.msra.mxu0 %v13647_v35  ;;  %18826 = vst [vmem:[#allocation24_spill] sm:$0xff] %v16638_v32  ;;  %v16646_v35 = vld [vmem:[#allocation2 + $0x104] sm:$0xff] }
 0x28a   :  { %13652 = vmatprep.subr.bf16.mxu0 %v13651_v63  ;;  %18828 = vst [vmem:[#allocation26_spill] sm:$0xff] %v16646_v35 }
 0x28c   :  { %12347 = vmatmul.mubr.msk.f32.gmra.mrb[6].mxu0 %vm2283_vm4, %v16629_v40 }
 0x28d   :  { %12349 = vmatprep.mubr.msk.f32.mxu0 %vm2283_vm4, %v3283_v44  ;;  %13654 = vmatpush3.bf16.msra.mxu0 %v13651_v63  ;;  %v16650_v63 = vld [vmem:[#allocation2 + $0x114] sm:$0xff] }
 0x28e   :  { %13656 = vmatprep.subr.bf16.mxu0 %v13655_v1  ;;  %18829 = vst [vmem:[#allocation27_spill] sm:$0xff] %v16650_v63  ;;  %v16658_v44 = vld [vmem:[#allocation2 + $0x134] sm:$0xff] }
 0x28f   :  { %18831 = vst [vmem:[#allocation29_spill] sm:$0xff] %v16658_v44 }
 0x290   :  { %12350 = vmatmul.mubr.msk.f32.gmra.mrb[8].mxu0 %vm2283_vm4, %v16634_v43 }
 0x291   :  { %12352 = vmatprep.mubr.msk.f32.mxu0 %vm2283_vm4, %v16638_v32  ;;  %v10392_v32 = vld [vmem:[%s18607_s3 + $0x1a8] sm:$0xff] }
 0x294   :  { %12353 = vmatmul.mubr.msk.f32.gmra.mrb[10].mxu0 %vm2283_vm4, %v16642_v60  ;;  %v10389_v60 = vld [vmem:[%s18607_s3 + $0x190] sm:$0xff] }
 0x295   :  { %12355 = vmatprep.mubr.msk.f32.mxu0 %vm2283_vm4, %v16646_v35  ;;  %v10390_v35 = vld [vmem:[%s18607_s3 + $0x198] sm:$0xff] }
 0x298   :  { %12356 = vmatmul.mubr.msk.f32.gmra.mrb[12].mxu0 %vm2283_vm4, %v16650_v63  ;;  %v13659_v63 = vpack.c.bf16 %v10390_v35, %v10389_v60  ;;  %v10394_v60 = vld [vmem:[%s18607_s3 + $0x1b8] sm:$0xff] }
 0x299   :  { %12358 = vmatprep.mubr.msk.f32.mxu0 %vm2283_vm4, %v16654_v24  ;;  %v10391_v24 = vld [vmem:[%s18607_s3 + $0x1a0] sm:$0xff] }
 0x29c   :  { %12359 = vmatmul.mubr.msk.f32.gmra.mrb[14].mxu0 %vm2283_vm4, %v16658_v44  ;;  %v13663_v44 = vpack.c.bf16 %v10392_v32, %v10391_v24  ;;  %v10412_v32 = vld [vmem:[%s18607_s3 + $0x1c8] sm:$0xff] }
 0x29d   :  { %12377 = vmatprep.mubr.msk.f32.mxu0 %vm2283_vm4, %v16184_v28  ;;  %v10393_v28 = vld [vmem:[%s18607_s3 + $0x1b0] sm:$0xff]  ;;  %v10436_v24 = vld [vmem:[%s18607_s3 + $0x208] sm:$0xff] }
 0x2a0   :  { %12378 = vmatmul.mubr.msk.f32.vlgmr.msra.gmra.mrb[0].mxu0 %vm2283_vm4, %v16209_v23  ;;  %v13667_v23 = vpack.c.bf16 %v10394_v60, %v10393_v28  ;;  %v16760_v28 = vld [vmem:[#allocation2 + $0x81] sm:$0xff]  ;;  %v10437_v60 = vld [vmem:[%s18607_s3 + $0x210] sm:$0xff] }
 0x2a1   :  { %12380 = vmatprep.mubr.msk.f32.mxu0 %vm2283_vm4, %v16229_v26  ;;  %13658 = vmatpush3.bf16.msra.mxu0 %v13655_v1  ;;  %v10411_v26 = vld [vmem:[%s18607_s3 + $0x1c0] sm:$0xff]  ;;  %v10418_v1 = vld [vmem:[%s18607_s3 + $0x1f8] sm:$0xff] }
 0x2a2   :  { %13660 = vmatprep.subr.bf16.mxu0 %v13659_v63 }
 0x2a4   :  { %12381 = vmatmul.mubr.msk.f32.gmra.mrb[2].mxu0 %vm2283_vm4, %v16248_v53  ;;  %v13671_v53 = vpack.c.bf16 %v10412_v32, %v10411_v26  ;;  %v3978_v26 = vld [vmem:[#allocation2 + $0x12] sm:$0xff] }
 0x2a5   :  { %12383 = vmatprep.mubr.msk.f32.mxu0 %vm2283_vm4, %v16263_v47  ;;  %13662 = vmatpush3.bf16.msra.mxu0 %v13659_v63  ;;  %v16700_v47 = vld [vmem:[#allocation2 + $0x80] sm:$0xff] }
 0x2a6   :  { %13664 = vmatprep.subr.bf16.mxu0 %v13663_v44  ;;  %v10435_v63 = vld [vmem:[%s18607_s3 + $0x200] sm:$0xff] }
 0x2a8   :  { %12384 = vmatmul.mubr.msk.f32.gmra.mrb[4].mxu0 %vm2283_vm4, %v16277_v17  ;;  %v16718_v17 = vld [vmem:[#allocation2 + $0x140] sm:$0xff] }
 0x2a9   :  { %12386 = vmatprep.mubr.msk.f32.mxu0 %vm2283_vm4, %v16291_v9  ;;  %13666 = vmatpush3.bf16.msra.mxu0 %v13663_v44  ;;  %v10413_v9 = vld [vmem:[%s18607_s3 + $0x1d0] sm:$0xff]  ;;  %v13687_v44 = vpack.c.bf16 %v10436_v24, %v10435_v63  ;;  %v10490_v63 = vld [vmem:[%s18607_s3 + $0x2b8] sm:$0xff] }
 0x2aa   :  { %13668 = vmatprep.subr.bf16.mxu0 %v13667_v23  ;;  %v18836_v24 = vld [vmem:[#allocation22_spill] sm:$0xff] }
 0x2ac   :  { %12387 = vmatmul.mubr.msk.f32.gmra.mrb[6].mxu0 %vm2283_vm4, %v16700_v47 }
 0x2ad   :  { %12389 = vmatprep.mubr.msk.f32.mxu0 %vm2283_vm4, %v16337_v41  ;;  %13670 = vmatpush3.bf16.msra.mxu0 %v13667_v23  ;;  %v10414_v41 = vld [vmem:[%s18607_s3 + $0x1d8] sm:$0xff] }
 0x2ae   :  { %13672 = vmatprep.subr.bf16.mxu0 %v13671_v53  ;;  %v10438_v23 = vld [vmem:[%s18607_s3 + $0x218] sm:$0xff] }
 0x2af   :  { %v13691_v32 = vpack.c.bf16 %v10438_v23, %v10437_v60  ;;  %v10507_v23 = vld [vmem:[%s18607_s3 + $0x2c0] sm:$0xff] }
 0x2b0   :  { %12390 = vmatmul.mubr.msk.f32.gmra.mrb[8].mxu0 %vm2283_vm4, %v16351_v51  ;;  %v13675_v51 = vpack.c.bf16 %v10414_v41, %v10413_v9  ;;  %v10440_v9 = vld [vmem:[%s18607_s3 + $0x228] sm:$0xff] }
 0x2b1   :  { %12392 = vmatprep.mubr.msk.f32.mxu0 %vm2283_vm4, %v16365_v34  ;;  %v10415_v34 = vld [vmem:[%s18607_s3 + $0x1e0] sm:$0xff] }
 0x2b4   :  { %12393 = vmatmul.mubr.msk.f32.gmra.mrb[10].mxu0 %vm2283_vm4, %v16379_v48  ;;  %v10416_v48 = vld [vmem:[%s18607_s3 + $0x1e8] sm:$0xff] }
 0x2b5   :  { %12395 = vmatprep.mubr.msk.f32.mxu0 %vm2283_vm4, %v16393_v52  ;;  %v13679_v52 = vpack.c.bf16 %v10416_v48, %v10415_v34  ;;  %v10442_v34 = vld [vmem:[%s18607_s3 + $0x238] sm:$0xff]  ;;  %v10460_v48 = vld [vmem:[%s18607_s3 + $0x248] sm:$0xff] }
 0x2b8   :  { %12396 = vmatmul.mubr.msk.f32.gmra.mrb[12].mxu0 %vm2283_vm4, %v16407_v58 }
 0x2b9   :  { %12398 = vmatprep.mubr.msk.f32.mxu0 %vm2283_vm4, %v16421_v16 }
 0x2bc   :  { %12399 = vmatmul.mubr.msk.f32.gmra.mrb[14].mxu0 %vm2283_vm4, %v16718_v17 }
 0x2bd   :  { %12417 = vmatprep.mubr.msk.f32.mxu0 %vm2283_vm4, %v16443_v57  ;;  %v10417_v57 = vld [vmem:[%s18607_s3 + $0x1f0] sm:$0xff] }
 0x2be   :  { %v13683_v35 = vpack.c.bf16 %v10418_v1, %v10417_v57  ;;  %v18835_v57 = vld [vmem:[#allocation21_spill] sm:$0xff] }
 0x2c0   :  { %12418 = vmatmul.mubr.msk.f32.vlgmr.msra.gmra.mrb[0].mxu0 %vm2283_vm4, %v16456_v30 }
 0x2c1   :  { %12420 = vmatprep.mubr.msk.f32.mxu0 %vm2283_vm4, %v16469_v3  ;;  %13674 = vmatpush3.bf16.msra.mxu0 %v13671_v53  ;;  %v10439_v53 = vld [vmem:[%s18607_s3 + $0x220] sm:$0xff] }
 0x2c2   :  { %13676 = vmatprep.subr.bf16.mxu0 %v13675_v51  ;;  %v13695_v41 = vpack.c.bf16 %v10440_v9, %v10439_v53  ;;  %v16939_v53 = vld [vmem:[#allocation2 + $0x84] sm:$0xff] }
 0x2c3   :  { %v18838_v9 = vld [vmem:[#allocation24_spill] sm:$0xff] }
 0x2c4   :  { %12421 = vmatmul.mubr.msk.f32.gmra.mrb[2].mxu0 %vm2283_vm4, %v16481_v21 }
 0x2c5   :  { %12423 = vmatprep.mubr.msk.f32.mxu0 %vm2283_vm4, %v16492_v33  ;;  %13678 = vmatpush3.bf16.msra.mxu0 %v13675_v51  ;;  %v10441_v51 = vld [vmem:[%s18607_s3 + $0x230] sm:$0xff] }
 0x2c6   :  { %13680 = vmatprep.subr.bf16.mxu0 %v13679_v52 }
 0x2c8   :  { %12424 = vmatmul.mubr.msk.f32.gmra.mrb[4].mxu0 %vm2283_vm4, %v16503_v31 }
 0x2c9   :  { %12426 = vmatprep.mubr.msk.f32.mxu0 %vm2283_vm4, %v16514_v15  ;;  %13682 = vmatpush3.bf16.msra.mxu0 %v13679_v52  ;;  %v18834_v52 = vld [vmem:[#allocation20_spill] sm:$0xff] }
 0x2ca   :  { %13684 = vmatprep.subr.bf16.mxu0 %v13683_v35 }
 0x2cc   :  { %12427 = vmatmul.mubr.msk.f32.gmra.mrb[6].mxu0 %vm2283_vm4, %v16760_v28 }
 0x2cd   :  { %12429 = vmatprep.mubr.msk.f32.mxu0 %vm2283_vm4, %v16524_v12  ;;  %13686 = vmatpush3.bf16.msra.mxu0 %v13683_v35  ;;  %v16778_v12 = vld [vmem:[#allocation2 + $0x141] sm:$0xff]  ;;  %v10489_v35 = vld [vmem:[%s18607_s3 + $0x2b0] sm:$0xff] }
 0x2ce   :  { %13688 = vmatprep.subr.bf16.mxu0 %v13687_v44  ;;  %v13731_v60 = vpack.c.bf16 %v10490_v63, %v10489_v35  ;;  %v10531_v35 = vld [vmem:[%s18607_s3 + $0x300] sm:$0xff]  ;;  %v10532_v63 = vld [vmem:[%s18607_s3 + $0x308] sm:$0xff] }
 0x2d0   :  { %12430 = vmatmul.mubr.msk.f32.gmra.mrb[8].mxu0 %vm2283_vm4, %v16532_v13 }
 0x2d1   :  { %12432 = vmatprep.mubr.msk.f32.mxu0 %vm2283_vm4, %v16540_v18 }
 0x2d4   :  { %12433 = vmatmul.mubr.msk.f32.gmra.mrb[10].mxu0 %vm2283_vm4, %v16548_v61 }
 0x2d5   :  { %12435 = vmatprep.mubr.msk.f32.mxu0 %vm2283_vm4, %v16556_v22 }
 0x2d8   :  { %12436 = vmatmul.mubr.msk.f32.gmra.mrb[12].mxu0 %vm2283_vm4, %v16564_v20 }
 0x2d9   :  { %12438 = vmatprep.mubr.msk.f32.mxu0 %vm2283_vm4, %v16575_v6 }
 0x2dc   :  { %12439 = vmatmul.mubr.msk.f32.gmra.mrb[14].mxu0 %vm2283_vm4, %v16778_v12 }
 0x2dd   :  { %12457 = vmatprep.mubr.msk.f32.mxu0 %vm2283_vm4, %v3978_v26  ;;  %v10508_v26 = vld [vmem:[%s18607_s3 + $0x2c8] sm:$0xff] }
 0x2e0   :  { %12458 = vmatmul.mubr.msk.f32.vlgmr.msra.gmra.mrb[0].mxu0 %vm2283_vm4, %v16211_v10  ;;  %v13699_v10 = vpack.c.bf16 %v10442_v34, %v10441_v51  ;;  %v18842_v51 = vld [vmem:[#allocation26_spill] sm:$0xff]  ;;  %v18843_v34 = vld [vmem:[#allocation27_spill] sm:$0xff] }
 0x2e1   :  { %12460 = vmatprep.mubr.msk.f32.mxu0 %vm2283_vm4, %v16231_v29  ;;  %13690 = vmatpush3.bf16.msra.mxu0 %v13687_v44  ;;  %v10459_v29 = vld [vmem:[%s18607_s3 + $0x240] sm:$0xff] }
 0x2e2   :  { %13692 = vmatprep.subr.bf16.mxu0 %v13691_v32  ;;  %v18837_v44 = vld [vmem:[#allocation23_spill] sm:$0xff] }
 0x2e4   :  { %12461 = vmatmul.mubr.msk.f32.gmra.mrb[2].mxu0 %vm2283_vm4, %v16250_v0  ;;  %v13703_v0 = vpack.c.bf16 %v10460_v48, %v10459_v29  ;;  %v18846_v29 = vld [vmem:[#allocation28_spill] sm:$0xff]  ;;  %v18847_v48 = vld [vmem:[#allocation29_spill] sm:$0xff] }
 0x2e5   :  { %12463 = vmatprep.mubr.msk.f32.mxu0 %vm2283_vm4, %v16265_v7  ;;  %13694 = vmatpush3.bf16.msra.mxu0 %v13691_v32  ;;  %v16819_v7 = vld [vmem:[#allocation2 + $0x82] sm:$0xff]  ;;  %v13735_v32 = vpack.c.bf16 %v10508_v26, %v10507_v23  ;;  %v17034_v23 = vld [vmem:[#allocation2 + $0x90] sm:$0xff] }
 0x2e6   :  { %13696 = vmatprep.subr.bf16.mxu0 %v13695_v41 }
 0x2e8   :  { %12464 = vmatmul.mubr.msk.f32.gmra.mrb[4].mxu0 %vm2283_vm4, %v16279_v55  ;;  %v16837_v55 = vld [vmem:[#allocation2 + $0x142] sm:$0xff] }
 0x2e9   :  { %12466 = vmatprep.mubr.msk.f32.mxu0 %vm2283_vm4, %v16293_v54  ;;  %13698 = vmatpush3.bf16.msra.mxu0 %v13695_v41  ;;  %v10461_v54 = vld [vmem:[%s18607_s3 + $0x250] sm:$0xff] }
 0x2ea   :  { %13700 = vmatprep.subr.bf16.mxu0 %v13699_v10 }
 0x2ec   :  { %12467 = vmatmul.mubr.msk.f32.gmra.mrb[6].mxu0 %vm2283_vm4, %v16819_v7 }
 0x2ed   :  { %12469 = vmatprep.mubr.msk.f32.mxu0 %vm2283_vm4, %v16339_v25  ;;  %13702 = vmatpush3.bf16.msra.mxu0 %v13699_v10  ;;  %v10462_v25 = vld [vmem:[%s18607_s3 + $0x258] sm:$0xff] }
 0x2ee   :  { %13704 = vmatprep.subr.bf16.mxu0 %v13703_v0 }
 0x2f0   :  { %12470 = vmatmul.mubr.msk.f32.gmra.mrb[8].mxu0 %vm2283_vm4, %v16353_v49  ;;  %v13707_v49 = vpack.c.bf16 %v10462_v25, %v10461_v54  ;;  %v16967_v54 = vld [vmem:[#allocation2 + $0x144] sm:$0xff]  ;;  %v10509_v25 = vld [vmem:[%s18607_s3 + $0x2d0] sm:$0xff] }
 0x2f1   :  { %12472 = vmatprep.mubr.msk.f32.mxu0 %vm2283_vm4, %v16367_v37  ;;  %v10463_v37 = vld [vmem:[%s18607_s3 + $0x260] sm:$0xff] }
 0x2f4   :  { %12473 = vmatmul.mubr.msk.f32.gmra.mrb[10].mxu0 %vm2283_vm4, %v16381_v59  ;;  %v10464_v59 = vld [vmem:[%s18607_s3 + $0x268] sm:$0xff] }
 0x2f5   :  { %12475 = vmatprep.mubr.msk.f32.mxu0 %vm2283_vm4, %v16395_v27  ;;  %v13711_v27 = vpack.c.bf16 %v10464_v59, %v10463_v37  ;;  %v4681_v59 = vld [vmem:[#allocation2 + $0x20] sm:$0xff] }
 0x2f8   :  { %12476 = vmatmul.mubr.msk.f32.gmra.mrb[12].mxu0 %vm2283_vm4, %v16409_v38  ;;  %v10465_v38 = vld [vmem:[%s18607_s3 + $0x270] sm:$0xff] }
 0x2f9   :  { %12478 = vmatprep.mubr.msk.f32.mxu0 %vm2283_vm4, %v16423_v42  ;;  %v10466_v42 = vld [vmem:[%s18607_s3 + $0x278] sm:$0xff] }
 0x2fc   :  { %12479 = vmatmul.mubr.msk.f32.gmra.mrb[14].mxu0 %vm2283_vm4, %v16837_v55 }
 0x2fd   :  { %12497 = vmatprep.mubr.msk.f32.mxu0 %vm2283_vm4, %v16445_v4  ;;  %v13715_v4 = vpack.c.bf16 %v10466_v42, %v10465_v38  ;;  %v16982_v42 = vld [vmem:[#allocation2 + $0x30] sm:$0xff] }
 0x300   :  { %12498 = vmatmul.mubr.msk.f32.vlgmr.msra.gmra.mrb[0].mxu0 %vm2283_vm4, %v16458_v62  ;;  %v10483_v62 = vld [vmem:[%s18607_s3 + $0x280] sm:$0xff] }
 0x301   :  { %12500 = vmatprep.mubr.msk.f32.mxu0 %vm2283_vm4, %v16471_v39  ;;  %13706 = vmatpush3.bf16.msra.mxu0 %v13703_v0  ;;  %v10484_v39 = vld [vmem:[%s18607_s3 + $0x288] sm:$0xff] }
 0x302   :  { %13708 = vmatprep.subr.bf16.mxu0 %v13707_v49 }
 0x304   :  { %12501 = vmatmul.mubr.msk.f32.gmra.mrb[2].mxu0 %vm2283_vm4, %v16483_v50  ;;  %v13719_v50 = vpack.c.bf16 %v10484_v39, %v10483_v62  ;;  %v10512_v62 = vld [vmem:[%s18607_s3 + $0x2e8] sm:$0xff] }
 0x305   :  { %12503 = vmatprep.mubr.msk.f32.mxu0 %vm2283_vm4, %v16494_v36  ;;  %13710 = vmatpush3.bf16.msra.mxu0 %v13707_v49  ;;  %v16879_v36 = vld [vmem:[#allocation2 + $0x83] sm:$0xff]  ;;  %v10510_v49 = vld [vmem:[%s18607_s3 + $0x2d8] sm:$0xff] }
 0x306   :  { %13712 = vmatprep.subr.bf16.mxu0 %v13711_v27 }
 0x308   :  { %12504 = vmatmul.mubr.msk.f32.gmra.mrb[4].mxu0 %vm2283_vm4, %v16505_v19  ;;  %v18832_v19 = vld [vmem:[#allocation18_spill] sm:$0xff] }
 0x309   :  { %12506 = vmatprep.mubr.msk.f32.mxu0 %vm2283_vm4, %v16516_v14  ;;  %13714 = vmatpush3.bf16.msra.mxu0 %v13711_v27  ;;  %v16897_v14 = vld [vmem:[#allocation2 + $0x143] sm:$0xff]  ;;  %v13739_v27 = vpack.c.bf16 %v10510_v49, %v10509_v25  ;;  %v10534_v25 = vld [vmem:[%s18607_s3 + $0x318] sm:$0xff] }
 0x30a   :  { %13716 = vmatprep.subr.bf16.mxu0 %v13715_v4 }
 0x30c   :  { %12507 = vmatmul.mubr.msk.f32.gmra.mrb[6].mxu0 %vm2283_vm4, %v16879_v36 }
 0x30d   :  { %12509 = vmatprep.mubr.msk.f32.mxu0 %vm2283_vm4, %v16526_v46  ;;  %13718 = vmatpush3.bf16.msra.mxu0 %v13715_v4  ;;  %v10485_v46 = vld [vmem:[%s18607_s3 + $0x290] sm:$0xff]  ;;  %v10511_v4 = vld [vmem:[%s18607_s3 + $0x2e0] sm:$0xff] }
 0x30e   :  { %13720 = vmatprep.subr.bf16.mxu0 %v13719_v50 }
 0x310   :  { %12510 = vmatmul.mubr.msk.f32.gmra.mrb[8].mxu0 %vm2283_vm4, %v16534_v56  ;;  %v10486_v56 = vld [vmem:[%s18607_s3 + $0x298] sm:$0xff] }
 0x311   :  { %12512 = vmatprep.mubr.msk.f32.mxu0 %vm2283_vm4, %v16542_v8  ;;  %v18833_v8 = vld [vmem:[#allocation19_spill] sm:$0xff] }
 0x314   :  { %12513 = vmatmul.mubr.msk.f32.gmra.mrb[10].mxu0 %vm2283_vm4, %v16550_v5  ;;  %v13723_v5 = vpack.c.bf16 %v10486_v56, %v10485_v46  ;;  %v17000_v56 = vld [vmem:[#allocation2 + $0x50] sm:$0xff] }
 0x315   :  { %12515 = vmatprep.mubr.msk.f32.mxu0 %vm2283_vm4, %v16558_v11  ;;  %v10487_v11 = vld [vmem:[%s18607_s3 + $0x2a0] sm:$0xff] }
 0x318   :  { %12516 = vmatmul.mubr.msk.f32.gmra.mrb[12].mxu0 %vm2283_vm4, %v16566_v2  ;;  %v10488_v2 = vld [vmem:[%s18607_s3 + $0x2a8] sm:$0xff] }
 0x319   :  { %12518 = vmatprep.mubr.msk.f32.mxu0 %vm2283_vm4, %v18832_v19  ;;  %v13727_v1 = vpack.c.bf16 %v10488_v2, %v10487_v11  ;;  %v13743_v19 = vpack.c.bf16 %v10512_v62, %v10511_v4  ;;  %v17012_v2 = vld [vmem:[#allocation2 + $0x60] sm:$0xff]  ;;  %v17148_v62 = vld [vmem:[#allocation2 + $0x52] sm:$0xff] }
 0x31c   :  { %12519 = vmatmul.mubr.msk.f32.gmra.mrb[14].mxu0 %vm2283_vm4, %v16897_v14 }
 0x31d   :  { %12537 = vmatprep.mubr.msk.f32.mxu0 %vm2283_vm4, %v18833_v8  ;;  %v10513_v8 = vld [vmem:[%s18607_s3 + $0x2f0] sm:$0xff] }
 0x320   :  { %12538 = vmatmul.mubr.msk.f32.vlgmr.msra.gmra.mrb[0].mxu0 %vm2283_vm4, %v18834_v52 }
 0x321   :  { %12540 = vmatprep.mubr.msk.f32.mxu0 %vm2283_vm4, %v18835_v57  ;;  %13722 = vmatpush3.bf16.msra.mxu0 %v13719_v50  ;;  %v16994_v50 = vld [vmem:[#allocation2 + $0x40] sm:$0xff] }
 0x322   :  { %13724 = vmatprep.subr.bf16.mxu0 %v13723_v5 }
 0x324   :  { %12541 = vmatmul.mubr.msk.f32.gmra.mrb[2].mxu0 %vm2283_vm4, %v18836_v24 }
 0x325   :  { %12543 = vmatprep.mubr.msk.f32.mxu0 %vm2283_vm4, %v18837_v44  ;;  %13726 = vmatpush3.bf16.msra.mxu0 %v13723_v5  ;;  %v10514_v5 = vld [vmem:[%s18607_s3 + $0x2f8] sm:$0xff]  ;;  %v13751_v44 = vpack.c.bf16 %v10532_v63, %v10531_v35  ;;  %v10579_v63 = vld [vmem:[%s18607_s3 + $0x380] sm:$0xff] }
 0x326   :  { %13728 = vmatprep.subr.bf16.mxu0 %v13727_v1  ;;  %v13747_v52 = vpack.c.bf16 %v10514_v5, %v10513_v8  ;;  %v10562_v8 = vld [vmem:[%s18607_s3 + $0x378] sm:$0xff]  ;;  %v17158_v5 = vld [vmem:[#allocation2 + $0x62] sm:$0xff] }
 0x327   :  { %v17162_v35 = vld [vmem:[#allocation2 + $0x72] sm:$0xff] }
 0x328   :  { %12544 = vmatmul.mubr.msk.f32.gmra.mrb[4].mxu0 %vm2283_vm4, %v16625_v45  ;;  %v18839_v45 = vld [vmem:[#allocation25_spill] sm:$0xff] }
 0x329   :  { %12546 = vmatprep.mubr.msk.f32.mxu0 %vm2283_vm4, %v16629_v40  ;;  %13730 = vmatpush3.bf16.msra.mxu0 %v13727_v1  ;;  %v17018_v1 = vld [vmem:[#allocation2 + $0x70] sm:$0xff] }
 0x32a   :  { %13732 = vmatprep.subr.bf16.mxu0 %v13731_v60 }
 0x32c   :  { %12547 = vmatmul.mubr.msk.f32.gmra.mrb[6].mxu0 %vm2283_vm4, %v16939_v53 }
 0x32d   :  { %12549 = vmatprep.mubr.msk.f32.mxu0 %vm2283_vm4, %v16634_v43  ;;  %13734 = vmatpush3.bf16.msra.mxu0 %v13731_v60 }
 0x32e   :  { %13736 = vmatprep.subr.bf16.mxu0 %v13735_v32 }
 0x330   :  { %12550 = vmatmul.mubr.msk.f32.gmra.mrb[8].mxu0 %vm2283_vm4, %v18838_v9 }
 0x331   :  { %12552 = vmatprep.mubr.msk.f32.mxu0 %vm2283_vm4, %v18839_v45 }
 0x332   :  { %v16949_v40 = vpop.f32.mrb[192].mxu1 }
 0x333   :  { %18840 = vst [vmem:[#allocation30_spill] sm:$0xff] %v16949_v40  ;;  %v16951_v41 = vpop.f32.mrb[193].mxu1  ;;  %v10679_v40 = vld [vmem:[%s18607_s3 + $0x4a0] sm:$0xff] }
 0x334   :  { %18841 = vst [vmem:[#allocation31_spill] sm:$0xff] %v16951_v41  ;;  %12553 = vmatmul.mubr.msk.f32.gmra.mrb[10].mxu0 %vm2283_vm4, %v18842_v51  ;;  %v17049_v51 = vld [vmem:[#allocation2 + $0x100] sm:$0xff] }
 0x335   :  { %12555 = vmatprep.mubr.msk.f32.mxu0 %vm2283_vm4, %v18843_v34  ;;  %v17053_v34 = vld [vmem:[#allocation2 + $0x110] sm:$0xff] }
 0x336   :  { %v16957_v10 = vpop.f32.mrb[194].mxu1 }
 0x337   :  { %18844 = vst [vmem:[#allocation32_spill] sm:$0xff] %v16957_v10  ;;  %v16959_v43 = vpop.f32.mrb[195].mxu1  ;;  %v10678_v10 = vld [vmem:[%s18607_s3 + $0x498] sm:$0xff] }
 0x338   :  { %18845 = vst [vmem:[#allocation33_spill] sm:$0xff] %v16959_v43  ;;  %12556 = vmatmul.mubr.msk.f32.gmra.mrb[12].mxu0 %vm2283_vm4, %v18846_v29  ;;  %v17063_v29 = vld [vmem:[#allocation2 + $0x150] sm:$0xff] }
 0x339   :  { %12558 = vmatprep.mubr.msk.f32.mxu0 %vm2283_vm4, %v18847_v48  ;;  %v10533_v48 = vld [vmem:[%s18607_s3 + $0x310] sm:$0xff] }
 0x33a   :  { %v16965_v0 = vpop.f32.mrb[196].mxu1  ;;  %v17485_v43 = vld [vmem:[#allocation2 + $0x111] sm:$0xff] }
 0x33b   :  { %18848 = vst [vmem:[#allocation34_spill] sm:$0xff] %v16965_v0  ;;  %v16975_v37 = vpop.f32.mrb[197].mxu1  ;;  %v17481_v0 = vld [vmem:[#allocation2 + $0x101] sm:$0xff] }
 0x33c   :  { %18849 = vst [vmem:[#allocation35_spill] sm:$0xff] %v16975_v37  ;;  %12559 = vmatmul.mubr.msk.f32.gmra.mrb[14].mxu0 %vm2283_vm4, %v16967_v54  ;;  %v10676_v37 = vld [vmem:[%s18607_s3 + $0x488] sm:$0xff] }
 0x33d   :  { %12577 = vmatprep.mubr.msk.f32.mxu0 %vm2283_vm4, %v4681_v59  ;;  %v10538_v59 = vld [vmem:[%s18607_s3 + $0x338] sm:$0xff] }
 0x33e   :  { %v16980_v38 = vpop.f32.mrb[198].mxu1 }
 0x33f   :  { %18850 = vst [vmem:[#allocation36_spill] sm:$0xff] %v16980_v38  ;;  %v16990_v39 = vpop.f32.mrb[199].mxu1  ;;  %v17460_v38 = vld [vmem:[#allocation2 + $0x71] sm:$0xff] }
 0x340   :  { %18851 = vst [vmem:[#allocation37_spill] sm:$0xff] %v16990_v39  ;;  %12578 = vmatmul.mubr.msk.f32.vlgmr.msra.gmra.mrb[0].mxu0 %vm2283_vm4, %v16982_v42  ;;  %v10658_v39 = vld [vmem:[%s18607_s3 + $0x478] sm:$0xff] }
 0x341   :  { %12580 = vmatprep.mubr.msk.f32.mxu0 %vm2283_vm4, %v16994_v50  ;;  %13738 = vmatpush3.bf16.msra.mxu0 %v13735_v32  ;;  %v4689_v32 = vld [vmem:[#allocation2 + $0xe0] sm:$0xff] }
 0x342   :  { %13740 = vmatprep.subr.bf16.mxu0 %v13739_v27  ;;  %v16998_v46 = vpop.f32.mrb[200].mxu1 }
 0x343   :  { %18852 = vst [vmem:[#allocation38_spill] sm:$0xff] %v16998_v46  ;;  %v17008_v11 = vpop.f32.mrb[201].mxu1  ;;  %v17446_v46 = vld [vmem:[#allocation2 + $0x51] sm:$0xff] }
 0x344   :  { %18853 = vst [vmem:[#allocation7_spill] sm:$0xff] %v17008_v11  ;;  %12581 = vmatmul.mubr.msk.f32.gmra.mrb[2].mxu0 %vm2283_vm4, %v17000_v56 }
 0x345   :  { %12583 = vmatprep.mubr.msk.f32.mxu0 %vm2283_vm4, %v17012_v2  ;;  %13742 = vmatpush3.bf16.msra.mxu0 %v13739_v27  ;;  %v10556_v27 = vld [vmem:[%s18607_s3 + $0x348] sm:$0xff] }
 0x346   :  { %13744 = vmatprep.subr.bf16.mxu0 %v13743_v19  ;;  %v17016_v57 = vpop.f32.mrb[202].mxu1 }
 0x347   :  { %18854 = vst [vmem:[#allocation39_spill] sm:$0xff] %v17016_v57  ;;  %v17026_v24 = vpop.f32.mrb[203].mxu1  ;;  %v10632_v57 = vld [vmem:[%s18607_s3 + $0x428] sm:$0xff] }
 0x348   :  { %18855 = vst [vmem:[#allocation8_spill] sm:$0xff] %v17026_v24  ;;  %12584 = vmatmul.mubr.msk.f32.gmra.mrb[4].mxu0 %vm2283_vm4, %v17018_v1 }
 0x349   :  { %12586 = vmatprep.mubr.msk.f32.mxu0 %vm2283_vm4, %v16700_v47  ;;  %13746 = vmatpush3.bf16.msra.mxu0 %v13743_v19  ;;  %v17043_v47 = vld [vmem:[#allocation2 + $0xf0] sm:$0xff] }
 0x34a   :  { %13748 = vmatprep.subr.bf16.mxu0 %v13747_v52  ;;  %v17032_v60 = vpop.f32.mrb[204].mxu1  ;;  %v10561_v19 = vld [vmem:[%s18607_s3 + $0x370] sm:$0xff] }
 0x34b   :  { %18856 = vst [vmem:[#allocation40_spill] sm:$0xff] %v17032_v60  ;;  %v17036_v26 = vpop.f32.mrb[205].mxu1  ;;  %v17339_v60 = vld [vmem:[#allocation2 + $0x104] sm:$0xff] }
 0x34c   :  { %18857 = vst [vmem:[#allocation9_spill] sm:$0xff] %v17036_v26  ;;  %12587 = vmatmul.mubr.msk.f32.gmra.mrb[6].mxu0 %vm2283_vm4, %v17034_v23  ;;  %v17335_v26 = vld [vmem:[#allocation2 + $0xf4] sm:$0xff] }
 0x34d   :  { %12589 = vmatprep.mubr.msk.f32.mxu0 %vm2283_vm4, %v4689_v32  ;;  %13750 = vmatpush3.bf16.msra.mxu0 %v13747_v52  ;;  %v13779_v52 = vpack.c.bf16 %v10562_v8, %v10561_v19  ;;  %v17240_v8 = vld [vmem:[#allocation2 + $0x73] sm:$0xff] }
 0x34e   :  { %13752 = vmatprep.subr.bf16.mxu0 %v13751_v44  ;;  %v17041_v9 = vpop.f32.mrb[206].mxu1 }
 0x34f   :  { %18858 = vst [vmem:[#allocation41_spill] sm:$0xff] %v17041_v9  ;;  %v17045_v45 = vpop.f32.mrb[207].mxu1  ;;  %v10628_v9 = vld [vmem:[%s18607_s3 + $0x408] sm:$0xff] }
 0x350   :  { %18859 = vst [vmem:[#allocation10_spill] sm:$0xff] %v17045_v45  ;;  %12590 = vmatmul.mubr.msk.f32.gmra.mrb[8].mxu0 %vm2283_vm4, %v17043_v47  ;;  %v17314_v45 = vld [vmem:[#allocation2 + $0x64] sm:$0xff] }
 0x351   :  { %12592 = vmatprep.mubr.msk.f32.mxu0 %vm2283_vm4, %v17049_v51 }
 0x354   :  { %12593 = vmatmul.mubr.msk.f32.gmra.mrb[10].mxu0 %vm2283_vm4, %v17053_v34 }
 0x355   :  { %12595 = vmatprep.mubr.msk.f32.mxu0 %vm2283_vm4, %v16407_v58  ;;  %v13755_v58 = vpack.c.bf16 %v10534_v25, %v10533_v48  ;;  %v17174_v48 = vld [vmem:[#allocation2 + $0x92] sm:$0xff]  ;;  %v5157_v25 = vld [vmem:[#allocation2 + $0xe2] sm:$0xff] }
 0x358   :  { %12596 = vmatmul.mubr.msk.f32.gmra.mrb[12].mxu0 %vm2283_vm4, %v16421_v16  ;;  %v10535_v16 = vld [vmem:[%s18607_s3 + $0x320] sm:$0xff] }
 0x359   :  { %12598 = vmatprep.mubr.msk.f32.mxu0 %vm2283_vm4, %v16718_v17  ;;  %v10536_v17 = vld [vmem:[%s18607_s3 + $0x328] sm:$0xff] }
 0x35a   :  { %v13759_v49 = vpack.c.bf16 %v10536_v17, %v10535_v16  ;;  %v17183_v16 = vld [vmem:[#allocation2 + $0x102] sm:$0xff] }
 0x35b   :  { %v17191_v17 = vld [vmem:[#allocation2 + $0x122] sm:$0xff] }
 0x35c   :  { %12599 = vmatmul.mubr.msk.f32.gmra.mrb[14].mxu0 %vm2283_vm4, %v17063_v29 }
 0x35d   :  { %12617 = vmatprep.mubr.msk.f32.mxu0 %vm2283_vm4, %v16456_v30  ;;  %v10537_v30 = vld [vmem:[%s18607_s3 + $0x330] sm:$0xff] }
 0x360   :  { %12618 = vmatmul.mubr.msk.f32.vlgmr.msra.gmra.mrb[0].mxu0 %vm2283_vm4, %v16469_v3  ;;  %v13763_v3 = vpack.c.bf16 %v10538_v59, %v10537_v30  ;;  %v17201_v30 = vld [vmem:[#allocation2 + $0x152] sm:$0xff] }
 0x361   :  { %12620 = vmatprep.mubr.msk.f32.mxu0 %vm2283_vm4, %v16481_v21  ;;  %13754 = vmatpush3.bf16.msra.mxu0 %v13751_v44  ;;  %v10555_v21 = vld [vmem:[%s18607_s3 + $0x340] sm:$0xff]  ;;  %v10580_v44 = vld [vmem:[%s18607_s3 + $0x388] sm:$0xff]  ;;  %v10581_v59 = vld [vmem:[%s18607_s3 + $0x390] sm:$0xff] }
 0x362   :  { %13756 = vmatprep.subr.bf16.mxu0 %v13755_v58  ;;  %v13783_v32 = vpack.c.bf16 %v10580_v44, %v10579_v63  ;;  %v10604_v63 = vld [vmem:[%s18607_s3 + $0x3c8] sm:$0xff] }
 0x364   :  { %12621 = vmatmul.mubr.msk.f32.gmra.mrb[2].mxu0 %vm2283_vm4, %v16492_v33  ;;  %v13767_v33 = vpack.c.bf16 %v10556_v27, %v10555_v21  ;;  %v5383_v21 = vld [vmem:[#allocation2 + $0x23] sm:$0xff] }
 0x365   :  { %12623 = vmatprep.mubr.msk.f32.mxu0 %vm2283_vm4, %v16503_v31  ;;  %13758 = vmatpush3.bf16.msra.mxu0 %v13755_v58  ;;  %v17105_v31 = vld [vmem:[#allocation2 + $0x91] sm:$0xff] }
 0x366   :  { %13760 = vmatprep.subr.bf16.mxu0 %v13759_v49  ;;  %v17179_v58 = vld [vmem:[#allocation2 + $0xf2] sm:$0xff] }
 0x368   :  { %12624 = vmatmul.mubr.msk.f32.gmra.mrb[4].mxu0 %vm2283_vm4, %v16514_v15  ;;  %v17123_v15 = vld [vmem:[#allocation2 + $0x151] sm:$0xff] }
 0x369   :  { %12626 = vmatprep.mubr.msk.f32.mxu0 %vm2283_vm4, %v16760_v28  ;;  %13762 = vmatpush3.bf16.msra.mxu0 %v13759_v49  ;;  %18860 = vst [vmem:[#allocation42_spill] sm:$0xff] %v17123_v15  ;;  %v10560_v28 = vld [vmem:[%s18607_s3 + $0x368] sm:$0xff]  ;;  %v17195_v49 = vld [vmem:[#allocation2 + $0x132] sm:$0xff] }
 0x36a   :  { %13764 = vmatprep.subr.bf16.mxu0 %v13763_v3 }
 0x36c   :  { %12627 = vmatmul.mubr.msk.f32.gmra.mrb[6].mxu0 %vm2283_vm4, %v17105_v31 }
 0x36d   :  { %12629 = vmatprep.mubr.msk.f32.mxu0 %vm2283_vm4, %v16532_v13  ;;  %13766 = vmatpush3.bf16.msra.mxu0 %v13763_v3  ;;  %v10557_v13 = vld [vmem:[%s18607_s3 + $0x350] sm:$0xff]  ;;  %v10582_v3 = vld [vmem:[%s18607_s3 + $0x398] sm:$0xff] }
 0x36e   :  { %13768 = vmatprep.subr.bf16.mxu0 %v13767_v33  ;;  %v13787_v27 = vpack.c.bf16 %v10582_v3, %v10581_v59  ;;  %v17257_v59 = vld [vmem:[#allocation2 + $0xf3] sm:$0xff]  ;;  %v17261_v3 = vld [vmem:[#allocation2 + $0x103] sm:$0xff] }
 0x370   :  { %12630 = vmatmul.mubr.msk.f32.gmra.mrb[8].mxu0 %vm2283_vm4, %v16540_v18  ;;  %v10558_v18 = vld [vmem:[%s18607_s3 + $0x358] sm:$0xff] }
 0x371   :  { %12632 = vmatprep.mubr.msk.f32.mxu0 %vm2283_vm4, %v16548_v61  ;;  %v5149_v61 = vld [vmem:[#allocation2 + $0x22] sm:$0xff] }
 0x374   :  { %12633 = vmatmul.mubr.msk.f32.gmra.mrb[10].mxu0 %vm2283_vm4, %v16556_v22  ;;  %v13771_v22 = vpack.c.bf16 %v10558_v18, %v10557_v13  ;;  %v10584_v13 = vld [vmem:[%s18607_s3 + $0x3a8] sm:$0xff] }
 0x375   :  { %12635 = vmatprep.mubr.msk.f32.mxu0 %vm2283_vm4, %v16564_v20  ;;  %v17134_v20 = vld [vmem:[#allocation2 + $0x32] sm:$0xff]  ;;  %v17222_v18 = vld [vmem:[#allocation2 + $0x43] sm:$0xff] }
 0x378   :  { %12636 = vmatmul.mubr.msk.f32.gmra.mrb[12].mxu0 %vm2283_vm4, %v16575_v6  ;;  %v10559_v6 = vld [vmem:[%s18607_s3 + $0x360] sm:$0xff] }
 0x379   :  { %12638 = vmatprep.mubr.msk.f32.mxu0 %vm2283_vm4, %v16778_v12  ;;  %v17144_v12 = vld [vmem:[#allocation2 + $0x42] sm:$0xff]  ;;  %v13775_v4 = vpack.c.bf16 %v10560_v28, %v10559_v6  ;;  %v10585_v6 = vld [vmem:[%s18607_s3 + $0x3b0] sm:$0xff]  ;;  %v10586_v28 = vld [vmem:[%s18607_s3 + $0x3b8] sm:$0xff] }
 0x37a   :  { %v13795_v19 = vpack.c.bf16 %v10586_v28, %v10585_v6  ;;  %v5617_v6 = vld [vmem:[#allocation2 + $0x24] sm:$0xff] }
 0x37c   :  { %12639 = vmatmul.mubr.msk.f32.gmra.mrb[14].mxu0 %vm2283_vm4, %v17123_v15 }
 0x37d   :  { %12657 = vmatprep.mubr.msk.f32.mxu0 %vm2283_vm4, %v5149_v61 }
 0x380   :  { %12658 = vmatmul.mubr.msk.f32.vlgmr.msra.gmra.mrb[0].mxu0 %vm2283_vm4, %v17134_v20 }
 0x381   :  { %12660 = vmatprep.mubr.msk.f32.mxu0 %vm2283_vm4, %v17144_v12  ;;  %13770 = vmatpush3.bf16.msra.mxu0 %v13767_v33  ;;  %v17212_v33 = vld [vmem:[#allocation2 + $0x33] sm:$0xff] }
 0x382   :  { %13772 = vmatprep.subr.bf16.mxu0 %v13771_v22 }
 0x384   :  { %12661 = vmatmul.mubr.msk.f32.gmra.mrb[2].mxu0 %vm2283_vm4, %v17148_v62 }
 0x385   :  { %12663 = vmatprep.mubr.msk.f32.mxu0 %vm2283_vm4, %v17158_v5  ;;  %13774 = vmatpush3.bf16.msra.mxu0 %v13771_v22  ;;  %v17226_v22 = vld [vmem:[#allocation2 + $0x53] sm:$0xff] }
 0x386   :  { %13776 = vmatprep.subr.bf16.mxu0 %v13775_v4 }
 0x388   :  { %12664 = vmatmul.mubr.msk.f32.gmra.mrb[4].mxu0 %vm2283_vm4, %v17162_v35 }
 0x389   :  { %12666 = vmatprep.mubr.msk.f32.mxu0 %vm2283_vm4, %v16819_v7  ;;  %13778 = vmatpush3.bf16.msra.mxu0 %v13775_v4  ;;  %v17187_v7 = vld [vmem:[#allocation2 + $0x112] sm:$0xff]  ;;  %v17236_v4 = vld [vmem:[#allocation2 + $0x63] sm:$0xff] }
 0x38a   :  { %13780 = vmatprep.subr.bf16.mxu0 %v13779_v52 }
 0x38c   :  { %12667 = vmatmul.mubr.msk.f32.gmra.mrb[6].mxu0 %vm2283_vm4, %v17174_v48 }
 0x38d   :  { %12669 = vmatprep.mubr.msk.f32.mxu0 %vm2283_vm4, %v5157_v25  ;;  %13782 = vmatpush3.bf16.msra.mxu0 %v13779_v52  ;;  %v10603_v52 = vld [vmem:[%s18607_s3 + $0x3c0] sm:$0xff] }
 0x38e   :  { %13784 = vmatprep.subr.bf16.mxu0 %v13783_v32  ;;  %v13799_v44 = vpack.c.bf16 %v10604_v63, %v10603_v52  ;;  %v5391_v25 = vld [vmem:[#allocation2 + $0xe3] sm:$0xff] }
 0x38f   :  { %v10608_v52 = vld [vmem:[%s18607_s3 + $0x3e8] sm:$0xff] }
 0x390   :  { %12670 = vmatmul.mubr.msk.f32.gmra.mrb[8].mxu0 %vm2283_vm4, %v17179_v58  ;;  %v17300_v63 = vld [vmem:[#allocation2 + $0x44] sm:$0xff] }
 0x391   :  { %12672 = vmatprep.mubr.msk.f32.mxu0 %vm2283_vm4, %v17183_v16 }
 0x394   :  { %12673 = vmatmul.mubr.msk.f32.gmra.mrb[10].mxu0 %vm2283_vm4, %v17187_v7 }
 0x395   :  { %12675 = vmatprep.mubr.msk.f32.mxu0 %vm2283_vm4, %v17191_v17 }
 0x398   :  { %12676 = vmatmul.mubr.msk.f32.gmra.mrb[12].mxu0 %vm2283_vm4, %v17195_v49 }
 0x399   :  { %12678 = vmatprep.mubr.msk.f32.mxu0 %vm2283_vm4, %v16837_v55  ;;  %v10583_v55 = vld [vmem:[%s18607_s3 + $0x3a0] sm:$0xff] }
 0x39a   :  { %v13791_v61 = vpack.c.bf16 %v10584_v13, %v10583_v55  ;;  %v17279_v55 = vld [vmem:[#allocation2 + $0x153] sm:$0xff] }
 0x39b   :  { %v10605_v13 = vld [vmem:[%s18607_s3 + $0x3d0] sm:$0xff] }
 0x39c   :  { %12679 = vmatmul.mubr.msk.f32.gmra.mrb[14].mxu0 %vm2283_vm4, %v17201_v30 }
 0x39d   :  { %12697 = vmatprep.mubr.msk.f32.mxu0 %vm2283_vm4, %v5383_v21  ;;  %v17269_v21 = vld [vmem:[#allocation2 + $0x123] sm:$0xff] }
 0x3a0   :  { %12698 = vmatmul.mubr.msk.f32.vlgmr.msra.gmra.mrb[0].mxu0 %vm2283_vm4, %v17212_v33 }
 0x3a1   :  { %12700 = vmatprep.mubr.msk.f32.mxu0 %vm2283_vm4, %v17222_v18  ;;  %13786 = vmatpush3.bf16.msra.mxu0 %v13783_v32  ;;  %v17252_v32 = vld [vmem:[#allocation2 + $0x93] sm:$0xff] }
 0x3a2   :  { %13788 = vmatprep.subr.bf16.mxu0 %v13787_v27 }
 0x3a4   :  { %12701 = vmatmul.mubr.msk.f32.gmra.mrb[2].mxu0 %vm2283_vm4, %v17226_v22 }
 0x3a5   :  { %12703 = vmatprep.mubr.msk.f32.mxu0 %vm2283_vm4, %v17236_v4  ;;  %13790 = vmatpush3.bf16.msra.mxu0 %v13787_v27  ;;  %v17273_v27 = vld [vmem:[#allocation2 + $0x133] sm:$0xff] }
 0x3a6   :  { %13792 = vmatprep.subr.bf16.mxu0 %v13791_v61 }
 0x3a8   :  { %12704 = vmatmul.mubr.msk.f32.gmra.mrb[4].mxu0 %vm2283_vm4, %v17240_v8 }
 0x3a9   :  { %12706 = vmatprep.mubr.msk.f32.mxu0 %vm2283_vm4, %v16879_v36  ;;  %13794 = vmatpush3.bf16.msra.mxu0 %v13791_v61  ;;  %v17265_v36 = vld [vmem:[#allocation2 + $0x113] sm:$0xff] }
 0x3aa   :  { %13796 = vmatprep.subr.bf16.mxu0 %v13795_v19  ;;  %v10606_v61 = vld [vmem:[%s18607_s3 + $0x3d8] sm:$0xff] }
 0x3ab   :  { %v13803_v28 = vpack.c.bf16 %v10606_v61, %v10605_v13  ;;  %v17304_v13 = vld [vmem:[#allocation2 + $0x54] sm:$0xff] }
 0x3ac   :  { %12707 = vmatmul.mubr.msk.f32.gmra.mrb[6].mxu0 %vm2283_vm4, %v17252_v32  ;;  %v10609_v61 = vld [vmem:[%s18607_s3 + $0x3f0] sm:$0xff] }
 0x3ad   :  { %12709 = vmatprep.mubr.msk.f32.mxu0 %vm2283_vm4, %v5391_v25  ;;  %13798 = vmatpush3.bf16.msra.mxu0 %v13795_v19  ;;  %v17290_v19 = vld [vmem:[#allocation2 + $0x34] sm:$0xff] }
 0x3ae   :  { %13800 = vmatprep.subr.bf16.mxu0 %v13799_v44 }
 0x3b0   :  { %12710 = vmatmul.mubr.msk.f32.gmra.mrb[8].mxu0 %vm2283_vm4, %v17257_v59 }
 0x3b1   :  { %12712 = vmatprep.mubr.msk.f32.mxu0 %vm2283_vm4, %v17261_v3 }
 0x3b4   :  { %12713 = vmatmul.mubr.msk.f32.gmra.mrb[10].mxu0 %vm2283_vm4, %v17265_v36 }
 0x3b5   :  { %12715 = vmatprep.mubr.msk.f32.mxu0 %vm2283_vm4, %v17269_v21 }
 0x3b8   :  { %12716 = vmatmul.mubr.msk.f32.gmra.mrb[12].mxu0 %vm2283_vm4, %v17273_v27 }
 0x3b9   :  { %12718 = vmatprep.mubr.msk.f32.mxu0 %vm2283_vm4, %v16897_v14  ;;  %v10607_v14 = vld [vmem:[%s18607_s3 + $0x3e0] sm:$0xff] }
 0x3ba   :  { %v13807_v25 = vpack.c.bf16 %v10608_v52, %v10607_v14  ;;  %v17318_v14 = vld [vmem:[#allocation2 + $0x74] sm:$0xff]  ;;  %v10627_v52 = vld [vmem:[%s18607_s3 + $0x400] sm:$0xff] }
 0x3bc   :  { %12719 = vmatmul.mubr.msk.f32.gmra.mrb[14].mxu0 %vm2283_vm4, %v17279_v55 }
 0x3bd   :  { %12737 = vmatprep.mubr.msk.f32.mxu0 %vm2283_vm4, %v5617_v6  ;;  %v10610_v6 = vld [vmem:[%s18607_s3 + $0x3f8] sm:$0xff] }
 0x3c0   :  { %12738 = vmatmul.mubr.msk.f32.vlgmr.msra.gmra.mrb[0].mxu0 %vm2283_vm4, %v17290_v19 }
 0x3c1   :  { %12740 = vmatprep.mubr.msk.f32.mxu0 %vm2283_vm4, %v17300_v63  ;;  %13802 = vmatpush3.bf16.msra.mxu0 %v13799_v44  ;;  %v13811_v44 = vpack.c.bf16 %v10610_v6, %v10609_v61  ;;  %v17330_v61 = vld [vmem:[#allocation2 + $0x94] sm:$0xff]  ;;  %v5625_v6 = vld [vmem:[#allocation2 + $0xe4] sm:$0xff] }
 0x3c2   :  { %13804 = vmatprep.subr.bf16.mxu0 %v13803_v28 }
 0x3c4   :  { %12741 = vmatmul.mubr.msk.f32.gmra.mrb[2].mxu0 %vm2283_vm4, %v17304_v13 }
 0x3c5   :  { %12743 = vmatprep.mubr.msk.f32.mxu0 %vm2283_vm4, %v17314_v45  ;;  %13806 = vmatpush3.bf16.msra.mxu0 %v13803_v28  ;;  %v13815_v28 = vpack.c.bf16 %v10628_v9, %v10627_v52  ;;  %v17347_v9 = vld [vmem:[#allocation2 + $0x124] sm:$0xff]  ;;  %v10629_v52 = vld [vmem:[%s18607_s3 + $0x410] sm:$0xff] }
 0x3c6   :  { %13808 = vmatprep.subr.bf16.mxu0 %v13807_v25 }
 0x3c8   :  { %12744 = vmatmul.mubr.msk.f32.gmra.mrb[4].mxu0 %vm2283_vm4, %v17318_v14 }
 0x3c9   :  { %12746 = vmatprep.mubr.msk.f32.mxu0 %vm2283_vm4, %v16939_v53  ;;  %13810 = vmatpush3.bf16.msra.mxu0 %v13807_v25  ;;  %v17343_v53 = vld [vmem:[#allocation2 + $0x114] sm:$0xff] }
 0x3ca   :  { %13812 = vmatprep.subr.bf16.mxu0 %v13811_v44  ;;  %v17351_v25 = vld [vmem:[#allocation2 + $0x134] sm:$0xff] }
 0x3cc   :  { %12747 = vmatmul.mubr.msk.f32.gmra.mrb[6].mxu0 %vm2283_vm4, %v17330_v61 }
 0x3cd   :  { %12749 = vmatprep.mubr.msk.f32.mxu0 %vm2283_vm4, %v5625_v6  ;;  %13814 = vmatpush3.bf16.msra.mxu0 %v13811_v44  ;;  %v17357_v44 = vld [vmem:[#allocation2 + $0x154] sm:$0xff] }
 0x3ce   :  { %13816 = vmatprep.subr.bf16.mxu0 %v13815_v28  ;;  %18861 = vst [vmem:[#allocation43_spill] sm:$0xff] %v17357_v44  ;;  %v10630_v6 = vld [vmem:[%s18607_s3 + $0x418] sm:$0xff] }
 0x3cf   :  { %v13819_v24 = vpack.c.bf16 %v10630_v6, %v10629_v52  ;;  %v10634_v52 = vld [vmem:[%s18607_s3 + $0x438] sm:$0xff]  ;;  %v10653_v6 = vld [vmem:[%s18607_s3 + $0x450] sm:$0xff] }
 0x3d0   :  { %12750 = vmatmul.mubr.msk.f32.gmra.mrb[8].mxu0 %vm2283_vm4, %v17335_v26 }
 0x3d1   :  { %12752 = vmatprep.mubr.msk.f32.mxu0 %vm2283_vm4, %v17339_v60 }
 0x3d4   :  { %12753 = vmatmul.mubr.msk.f32.gmra.mrb[10].mxu0 %vm2283_vm4, %v17343_v53 }
 0x3d5   :  { %12755 = vmatprep.mubr.msk.f32.mxu0 %vm2283_vm4, %v17347_v9 }
 0x3d8   :  { %12756 = vmatmul.mubr.msk.f32.gmra.mrb[12].mxu0 %vm2283_vm4, %v17351_v25 }
 0x3d9   :  { %12758 = vmatprep.mubr.msk.f32.mxu0 %vm2283_vm4, %v16967_v54  ;;  %v10631_v54 = vld [vmem:[%s18607_s3 + $0x420] sm:$0xff] }
 0x3da   :  { %v13823_v11 = vpack.c.bf16 %v10632_v57, %v10631_v54  ;;  %v10651_v57 = vld [vmem:[%s18607_s3 + $0x440] sm:$0xff]  ;;  %v10654_v54 = vld [vmem:[%s18607_s3 + $0x458] sm:$0xff] }
 0x3dc   :  { %12759 = vmatmul.mubr.msk.f32.gmra.mrb[14].mxu0 %vm2283_vm4, %v17357_v44 }
 0x3dd   :  { %12777 = vmatprep.mubr.msk.f32.mxu0 %vm2283_vm4, %v16982_v42  ;;  %v10633_v42 = vld [vmem:[%s18607_s3 + $0x430] sm:$0xff] }
 0x3e0   :  { %12778 = vmatmul.mubr.msk.f32.vlgmr.msra.gmra.mrb[0].mxu0 %vm2283_vm4, %v16994_v50  ;;  %v13827_v50 = vpack.c.bf16 %v10634_v52, %v10633_v42  ;;  %v6086_v42 = vld [vmem:[#allocation2 + $0x31] sm:$0xff]  ;;  %v13835_v52 = vpack.c.bf16 %v10654_v54, %v10653_v6  ;;  %v17450_v54 = vld [vmem:[#allocation2 + $0x61] sm:$0xff] }
 0x3e1   :  { %12780 = vmatprep.mubr.msk.f32.mxu0 %vm2283_vm4, %v17000_v56  ;;  %13818 = vmatpush3.bf16.msra.mxu0 %v13815_v28  ;;  %v17389_v56 = vld [vmem:[#allocation2 + $0x80] sm:$0xff]  ;;  %v10652_v28 = vld [vmem:[%s18607_s3 + $0x448] sm:$0xff] }
 0x3e2   :  { %13820 = vmatprep.subr.bf16.mxu0 %v13819_v24 }
 0x3e4   :  { %12781 = vmatmul.mubr.msk.f32.gmra.mrb[2].mxu0 %vm2283_vm4, %v17012_v2  ;;  %v13831_v2 = vpack.c.bf16 %v10652_v28, %v10651_v57  ;;  %v10655_v57 = vld [vmem:[%s18607_s3 + $0x460] sm:$0xff]  ;;  %v10656_v28 = vld [vmem:[%s18607_s3 + $0x468] sm:$0xff] }
 0x3e5   :  { %12783 = vmatprep.mubr.msk.f32.mxu0 %vm2283_vm4, %v17018_v1  ;;  %13822 = vmatpush3.bf16.msra.mxu0 %v13819_v24  ;;  %v17401_v1 = vld [vmem:[#allocation2 + $0xa0] sm:$0xff]  ;;  %v13839_v6 = vpack.c.bf16 %v10656_v28, %v10655_v57 }
 0x3e6   :  { %13824 = vmatprep.subr.bf16.mxu0 %v13823_v11  ;;  %v17411_v24 = vld [vmem:[#allocation2 + $0x120] sm:$0xff] }
 0x3e7   :  { %v17464_v57 = vld [vmem:[#allocation2 + $0x81] sm:$0xff] }
 0x3e8   :  { %12784 = vmatmul.mubr.msk.f32.gmra.mrb[4].mxu0 %vm2283_vm4, %v17389_v56  ;;  %v10675_v28 = vld [vmem:[%s18607_s3 + $0x480] sm:$0xff] }
 0x3e9   :  { %12786 = vmatprep.mubr.msk.f32.mxu0 %vm2283_vm4, %v17034_v23  ;;  %13826 = vmatpush3.bf16.msra.mxu0 %v13823_v11  ;;  %v17415_v11 = vld [vmem:[#allocation2 + $0x130] sm:$0xff]  ;;  %v17419_v23 = vld [vmem:[#allocation2 + $0x140] sm:$0xff] }
 0x3ea   :  { %13828 = vmatprep.subr.bf16.mxu0 %v13827_v50 }
 0x3ec   :  { %12787 = vmatmul.mubr.msk.f32.gmra.mrb[6].mxu0 %vm2283_vm4, %v17401_v1 }
 0x3ed   :  { %12789 = vmatprep.mubr.msk.f32.mxu0 %vm2283_vm4, %v17043_v47  ;;  %13830 = vmatpush3.bf16.msra.mxu0 %v13827_v50  ;;  %v17425_v47 = vld [vmem:[#allocation2 + $0x160] sm:$0xff] }
 0x3ee   :  { %13832 = vmatprep.subr.bf16.mxu0 %v13831_v2  ;;  %v17436_v50 = vld [vmem:[#allocation2 + $0x41] sm:$0xff] }
 0x3f0   :  { %12790 = vmatmul.mubr.msk.f32.gmra.mrb[8].mxu0 %vm2283_vm4, %v17049_v51 }
 0x3f1   :  { %12792 = vmatprep.mubr.msk.f32.mxu0 %vm2283_vm4, %v17053_v34 }
 0x3f4   :  { %12793 = vmatmul.mubr.msk.f32.gmra.mrb[10].mxu0 %vm2283_vm4, %v17411_v24 }
 0x3f5   :  { %12795 = vmatprep.mubr.msk.f32.mxu0 %vm2283_vm4, %v17415_v11 }
 0x3f8   :  { %12796 = vmatmul.mubr.msk.f32.gmra.mrb[12].mxu0 %vm2283_vm4, %v17419_v23 }
 0x3f9   :  { %12798 = vmatprep.mubr.msk.f32.mxu0 %vm2283_vm4, %v17063_v29 }
 0x3fc   :  { %12799 = vmatmul.mubr.msk.f32.gmra.mrb[14].mxu0 %vm2283_vm4, %v17425_v47 }
 0x3fd   :  { %12817 = vmatprep.mubr.msk.f32.mxu0 %vm2283_vm4, %v6086_v42  ;;  %v10657_v42 = vld [vmem:[%s18607_s3 + $0x470] sm:$0xff] }
 0x400   :  { %12818 = vmatmul.mubr.msk.f32.vlgmr.msra.gmra.mrb[0].mxu0 %vm2283_vm4, %v17436_v50 }
 0x401   :  { %12820 = vmatprep.mubr.msk.f32.mxu0 %vm2283_vm4, %v17446_v46  ;;  %13834 = vmatpush3.bf16.msra.mxu0 %v13831_v2  ;;  %v13843_v2 = vpack.c.bf16 %v10658_v39, %v10657_v42  ;;  %v17476_v39 = vld [vmem:[#allocation2 + $0xa1] sm:$0xff]  ;;  %v6094_v42 = vld [vmem:[#allocation2 + $0xf1] sm:$0xff] }
 0x402   :  { %13836 = vmatprep.subr.bf16.mxu0 %v13835_v52 }
 0x404   :  { %12821 = vmatmul.mubr.msk.f32.gmra.mrb[2].mxu0 %vm2283_vm4, %v17450_v54 }
 0x405   :  { %12823 = vmatprep.mubr.msk.f32.mxu0 %vm2283_vm4, %v17460_v38  ;;  %13838 = vmatpush3.bf16.msra.mxu0 %v13835_v52  ;;  %v13847_v52 = vpack.c.bf16 %v10676_v37, %v10675_v28  ;;  %v17489_v37 = vld [vmem:[#allocation2 + $0x121] sm:$0xff] }
 0x406   :  { %13840 = vmatprep.subr.bf16.mxu0 %v13839_v6  ;;  %v17503_v28 = vld [vmem:[#allocation2 + $0x161] sm:$0xff] }
 0x407   :  { %18862 = vst [vmem:[#allocation44_spill] sm:$0xff] %v17503_v28 }
 0x408   :  { %12824 = vmatmul.mubr.msk.f32.gmra.mrb[4].mxu0 %vm2283_vm4, %v17464_v57 }
 0x409   :  { %12826 = vmatprep.mubr.msk.f32.mxu0 %vm2283_vm4, %v17105_v31  ;;  %13842 = vmatpush3.bf16.msra.mxu0 %v13839_v6  ;;  %v17493_v6 = vld [vmem:[#allocation2 + $0x131] sm:$0xff] }
 0x40a   :  { %13844 = vmatprep.subr.bf16.mxu0 %v13843_v2 }
 0x40c   :  { %12827 = vmatmul.mubr.msk.f32.gmra.mrb[6].mxu0 %vm2283_vm4, %v17476_v39 }
 0x40d   :  { %12829 = vmatprep.mubr.msk.f32.mxu0 %vm2283_vm4, %v6094_v42  ;;  %13846 = vmatpush3.bf16.msra.mxu0 %v13843_v2  ;;  %v17497_v2 = vld [vmem:[#allocation2 + $0x141] sm:$0xff]  ;;  %v10677_v42 = vld [vmem:[%s18607_s3 + $0x490] sm:$0xff] }
 0x40e   :  { %13848 = vmatprep.subr.bf16.mxu0 %v13847_v52  ;;  %v13851_v41 = vpack.c.bf16 %v10678_v10, %v10677_v42  ;;  %v10681_v10 = vld [vmem:[%s18607_s3 + $0x4b0] sm:$0xff] }
 0x410   :  { %12830 = vmatmul.mubr.msk.f32.gmra.mrb[8].mxu0 %vm2283_vm4, %v17481_v0 }
 0x411   :  { %12832 = vmatprep.mubr.msk.f32.mxu0 %vm2283_vm4, %v17485_v43 }
 0x414   :  { %12833 = vmatmul.mubr.msk.f32.gmra.mrb[10].mxu0 %vm2283_vm4, %v17489_v37 }
 0x415   :  { %12835 = vmatprep.mubr.msk.f32.mxu0 %vm2283_vm4, %v17493_v6 }
 0x418   :  { %12836 = vmatmul.mubr.msk.f32.gmra.mrb[12].mxu0 %vm2283_vm4, %v17497_v2 }
 0x419   :  { %12838 = vmatprep.mubr.msk.f32.mxu0 %vm2283_vm4, %v17123_v15  ;;  %v10680_v15 = vld [vmem:[%s18607_s3 + $0x4a8] sm:$0xff] }
 0x41c   :  { %12839 = vmatmul.mubr.msk.f32.gmra.mrb[14].mxu0 %vm2283_vm4, %v17503_v28  ;;  %v13855_v28 = vpack.c.bf16 %v10680_v15, %v10679_v40  ;;  %v10699_v40 = vld [vmem:[%s18607_s3 + $0x4c0] sm:$0xff]  ;;  %v10700_v15 = vld [vmem:[%s18607_s3 + $0x4c8] sm:$0xff] }
 0x41d   :  { %12857 = vmatprep.mubr.msk.f32.mxu0 %vm2283_vm4, %v17134_v20  ;;  %v10682_v20 = vld [vmem:[%s18607_s3 + $0x4b8] sm:$0xff] }
 0x41e   :  { %v13859_v42 = vpack.c.bf16 %v10682_v20, %v10681_v10  ;;  %v10703_v10 = vld [vmem:[%s18607_s3 + $0x4e0] sm:$0xff]  ;;  %v10704_v20 = vld [vmem:[%s18607_s3 + $0x4e8] sm:$0xff] }
 0x420   :  { %12858 = vmatmul.mubr.msk.f32.vlgmr.msra.gmra.mrb[0].mxu0 %vm2283_vm4, %v17144_v12 }
 0x421   :  { %12860 = vmatprep.mubr.msk.f32.mxu0 %vm2283_vm4, %v17148_v62  ;;  %13850 = vmatpush3.bf16.msra.mxu0 %v13847_v52  ;;  %v17535_v52 = vld [vmem:[#allocation2 + $0x82] sm:$0xff] }
 0x422   :  { %13852 = vmatprep.subr.bf16.mxu0 %v13851_v41 }
 0x424   :  { %12861 = vmatmul.mubr.msk.f32.gmra.mrb[2].mxu0 %vm2283_vm4, %v17158_v5  ;;  %v17547_v5 = vld [vmem:[#allocation2 + $0xa2] sm:$0xff] }
 0x425   :  { %12863 = vmatprep.mubr.msk.f32.mxu0 %vm2283_vm4, %v17162_v35  ;;  %13854 = vmatpush3.bf16.msra.mxu0 %v13851_v41  ;;  %v13863_v41 = vpack.c.bf16 %v10700_v15, %v10699_v40  ;;  %v17561_v35 = vld [vmem:[#allocation2 + $0x142] sm:$0xff]  ;;  %v10706_v40 = vld [vmem:[%s18607_s3 + $0x4f8] sm:$0xff] }
 0x426   :  { %13856 = vmatprep.subr.bf16.mxu0 %v13855_v28 }
 0x428   :  { %12864 = vmatmul.mubr.msk.f32.gmra.mrb[4].mxu0 %vm2283_vm4, %v17535_v52 }
 0x429   :  { %12866 = vmatprep.mubr.msk.f32.mxu0 %vm2283_vm4, %v17174_v48  ;;  %13858 = vmatpush3.bf16.msra.mxu0 %v13855_v28  ;;  %v10701_v28 = vld [vmem:[%s18607_s3 + $0x4d0] sm:$0xff] }
 0x42a   :  { %13860 = vmatprep.subr.bf16.mxu0 %v13859_v42 }
 0x42c   :  { %12867 = vmatmul.mubr.msk.f32.gmra.mrb[6].mxu0 %vm2283_vm4, %v17547_v5 }
 0x42d   :  { %12869 = vmatprep.mubr.msk.f32.mxu0 %vm2283_vm4, %v17179_v58  ;;  %13862 = vmatpush3.bf16.msra.mxu0 %v13859_v42  ;;  %v17567_v58 = vld [vmem:[#allocation2 + $0x162] sm:$0xff]  ;;  %v13871_v42 = vpack.c.bf16 %v10704_v20, %v10703_v10  ;;  %v10725_v10 = vld [vmem:[%s18607_s3 + $0x510] sm:$0xff] }
 0x42e   :  { %13864 = vmatprep.subr.bf16.mxu0 %v13863_v41  ;;  %v10727_v20 = vld [vmem:[%s18607_s3 + $0x520] sm:$0xff] }
 0x430   :  { %12870 = vmatmul.mubr.msk.f32.gmra.mrb[8].mxu0 %vm2283_vm4, %v17183_v16 }
 0x431   :  { %12872 = vmatprep.mubr.msk.f32.mxu0 %vm2283_vm4, %v17187_v7 }
 0x434   :  { %12873 = vmatmul.mubr.msk.f32.gmra.mrb[10].mxu0 %vm2283_vm4, %v17191_v17  ;;  %v10702_v17 = vld [vmem:[%s18607_s3 + $0x4d8] sm:$0xff] }
 0x435   :  { %12875 = vmatprep.mubr.msk.f32.mxu0 %vm2283_vm4, %v17195_v49  ;;  %v13867_v49 = vpack.c.bf16 %v10702_v17, %v10701_v28  ;;  %v10723_v28 = vld [vmem:[%s18607_s3 + $0x500] sm:$0xff]  ;;  %v10724_v17 = vld [vmem:[%s18607_s3 + $0x508] sm:$0xff] }
 0x438   :  { %12876 = vmatmul.mubr.msk.f32.gmra.mrb[12].mxu0 %vm2283_vm4, %v17561_v35 }
 0x439   :  { %12878 = vmatprep.mubr.msk.f32.mxu0 %vm2283_vm4, %v17201_v30 }
 0x43c   :  { %12879 = vmatmul.mubr.msk.f32.gmra.mrb[14].mxu0 %vm2283_vm4, %v17567_v58 }
 0x43d   :  { %12897 = vmatprep.mubr.msk.f32.mxu0 %vm2283_vm4, %v17212_v33  ;;  %v10705_v33 = vld [vmem:[%s18607_s3 + $0x4f0] sm:$0xff] }
 0x43e   :  { %v13875_v15 = vpack.c.bf16 %v10706_v40, %v10705_v33  ;;  %v10730_v40 = vld [vmem:[%s18607_s3 + $0x538] sm:$0xff] }
 0x440   :  { %12898 = vmatmul.mubr.msk.f32.vlgmr.msra.gmra.mrb[0].mxu0 %vm2283_vm4, %v17222_v18 }
 0x441   :  { %12900 = vmatprep.mubr.msk.f32.mxu0 %vm2283_vm4, %v17226_v22  ;;  %13866 = vmatpush3.bf16.msra.mxu0 %v13863_v41  ;;  %v17599_v41 = vld [vmem:[#allocation2 + $0x83] sm:$0xff] }
 0x442   :  { %13868 = vmatprep.subr.bf16.mxu0 %v13867_v49 }
 0x444   :  { %12901 = vmatmul.mubr.msk.f32.gmra.mrb[2].mxu0 %vm2283_vm4, %v17236_v4  ;;  %v13879_v4 = vpack.c.bf16 %v10724_v17, %v10723_v28  ;;  %v17663_v28 = vld [vmem:[#allocation2 + $0x84] sm:$0xff] }
 0x445   :  { %12903 = vmatprep.mubr.msk.f32.mxu0 %vm2283_vm4, %v17240_v8  ;;  %13870 = vmatpush3.bf16.msra.mxu0 %v13867_v49  ;;  %v17611_v8 = vld [vmem:[#allocation2 + $0xa3] sm:$0xff] }
 0x446   :  { %13872 = vmatprep.subr.bf16.mxu0 %v13871_v42  ;;  %v17625_v49 = vld [vmem:[#allocation2 + $0x143] sm:$0xff] }
 0x447   :  { %v10747_v17 = vld [vmem:[%s18607_s3 + $0x540] sm:$0xff] }
 0x448   :  { %12904 = vmatmul.mubr.msk.f32.gmra.mrb[4].mxu0 %vm2283_vm4, %v17599_v41 }
 0x449   :  { %12906 = vmatprep.mubr.msk.f32.mxu0 %vm2283_vm4, %v17252_v32  ;;  %13874 = vmatpush3.bf16.msra.mxu0 %v13871_v42  ;;  %v10728_v42 = vld [vmem:[%s18607_s3 + $0x528] sm:$0xff] }
 0x44a   :  { %13876 = vmatprep.subr.bf16.mxu0 %v13875_v15  ;;  %v13887_v33 = vpack.c.bf16 %v10728_v42, %v10727_v20  ;;  %v10749_v20 = vld [vmem:[%s18607_s3 + $0x550] sm:$0xff]  ;;  %v10750_v42 = vld [vmem:[%s18607_s3 + $0x558] sm:$0xff] }
 0x44c   :  { %12907 = vmatmul.mubr.msk.f32.gmra.mrb[6].mxu0 %vm2283_vm4, %v17611_v8 }
 0x44d   :  { %12909 = vmatprep.mubr.msk.f32.mxu0 %vm2283_vm4, %v17257_v59  ;;  %13878 = vmatpush3.bf16.msra.mxu0 %v13875_v15  ;;  %v17631_v59 = vld [vmem:[#allocation2 + $0x163] sm:$0xff] }
 0x44e   :  { %13880 = vmatprep.subr.bf16.mxu0 %v13879_v4 }
 0x450   :  { %12910 = vmatmul.mubr.msk.f32.gmra.mrb[8].mxu0 %vm2283_vm4, %v17261_v3 }
 0x451   :  { %12912 = vmatprep.mubr.msk.f32.mxu0 %vm2283_vm4, %v17265_v36 }
 0x454   :  { %12913 = vmatmul.mubr.msk.f32.gmra.mrb[10].mxu0 %vm2283_vm4, %v17269_v21  ;;  %v10726_v21 = vld [vmem:[%s18607_s3 + $0x518] sm:$0xff] }
 0x455   :  { %12915 = vmatprep.mubr.msk.f32.mxu0 %vm2283_vm4, %v17273_v27  ;;  %v13883_v27 = vpack.c.bf16 %v10726_v21, %v10725_v10  ;;  %v17675_v21 = vld [vmem:[#allocation2 + $0xa4] sm:$0xff] }
 0x458   :  { %12916 = vmatmul.mubr.msk.f32.gmra.mrb[12].mxu0 %vm2283_vm4, %v17625_v49 }
 0x459   :  { %12918 = vmatprep.mubr.msk.f32.mxu0 %vm2283_vm4, %v17279_v55 }
 0x45c   :  { %12919 = vmatmul.mubr.msk.f32.gmra.mrb[14].mxu0 %vm2283_vm4, %v17631_v59 }
 0x45d   :  { %12937 = vmatprep.mubr.msk.f32.mxu0 %vm2283_vm4, %v17290_v19  ;;  %v10729_v19 = vld [vmem:[%s18607_s3 + $0x530] sm:$0xff] }
 0x45e   :  { %v13891_v15 = vpack.c.bf16 %v10730_v40, %v10729_v19  ;;  %v13899_v19 = vpack.c.bf16 %v10750_v42, %v10749_v20  ;;  %v7024_v40 = vld [vmem:[#allocation2 + $0x50] sm:$0xff]  ;;  %v10754_v42 = vld [vmem:[%s18607_s3 + $0x578] sm:$0xff] }
 0x45f   :  { %v10753_v20 = vld [vmem:[%s18607_s3 + $0x570] sm:$0xff] }
 0x460   :  { %12938 = vmatmul.mubr.msk.f32.vlgmr.msra.gmra.mrb[0].mxu0 %vm2283_vm4, %v17300_v63 }
 0x461   :  { %12940 = vmatprep.mubr.msk.f32.mxu0 %vm2283_vm4, %v17304_v13  ;;  %13882 = vmatpush3.bf16.msra.mxu0 %v13879_v4  ;;  %v10748_v4 = vld [vmem:[%s18607_s3 + $0x548] sm:$0xff] }
 0x462   :  { %13884 = vmatprep.subr.bf16.mxu0 %v13883_v27  ;;  %v13895_v10 = vpack.c.bf16 %v10748_v4, %v10747_v17  ;;  %v10752_v17 = vld [vmem:[%s18607_s3 + $0x568] sm:$0xff]  ;;  %v7025_v4 = vld [vmem:[#allocation2 + $0x60] sm:$0xff] }
 0x464   :  { %12941 = vmatmul.mubr.msk.f32.gmra.mrb[2].mxu0 %vm2283_vm4, %v17314_v45 }
 0x465   :  { %12943 = vmatprep.mubr.msk.f32.mxu0 %vm2283_vm4, %v17318_v14  ;;  %13886 = vmatpush3.bf16.msra.mxu0 %v13883_v27  ;;  %v17689_v27 = vld [vmem:[#allocation2 + $0x144] sm:$0xff] }
 0x466   :  { %13888 = vmatprep.subr.bf16.mxu0 %v13887_v33 }
 0x468   :  { %12944 = vmatmul.mubr.msk.f32.gmra.mrb[4].mxu0 %vm2283_vm4, %v17663_v28 }
 0x469   :  { %12946 = vmatprep.mubr.msk.f32.mxu0 %vm2283_vm4, %v17330_v61  ;;  %13890 = vmatpush3.bf16.msra.mxu0 %v13887_v33  ;;  %v7023_v33 = vld [vmem:[#allocation2 + $0x40] sm:$0xff] }
 0x46a   :  { %13892 = vmatprep.subr.bf16.mxu0 %v13891_v15 }
 0x46c   :  { %12947 = vmatmul.mubr.msk.f32.gmra.mrb[6].mxu0 %vm2283_vm4, %v17675_v21 }
 0x46d   :  { %12949 = vmatprep.mubr.msk.f32.mxu0 %vm2283_vm4, %v17335_v26  ;;  %13894 = vmatpush3.bf16.msra.mxu0 %v13891_v15  ;;  %v17695_v26 = vld [vmem:[#allocation2 + $0x164] sm:$0xff] }
 0x46e   :  { %13896 = vmatprep.subr.bf16.mxu0 %v13895_v10  ;;  %18863 = vst [vmem:[#allocation11_spill] sm:$0xff] %v17695_v26  ;;  %v10751_v15 = vld [vmem:[%s18607_s3 + $0x560] sm:$0xff] }
 0x470   :  { %12950 = vmatmul.mubr.msk.f32.gmra.mrb[8].mxu0 %vm2283_vm4, %v17339_v60 }
 0x471   :  { %12952 = vmatprep.mubr.msk.f32.mxu0 %vm2283_vm4, %v17343_v53 }
 0x474   :  { %12953 = vmatmul.mubr.msk.f32.gmra.mrb[10].mxu0 %vm2283_vm4, %v17347_v9 }
 0x475   :  { %12955 = vmatprep.mubr.msk.f32.mxu0 %vm2283_vm4, %v17351_v25 }
 0x478   :  { %12956 = vmatmul.mubr.msk.f32.gmra.mrb[12].mxu0 %vm2283_vm4, %v17689_v27 }
 0x479   :  { %12958 = vmatprep.mubr.msk.f32.mxu0 %vm2283_vm4, %v17357_v44  ;;  %v7026_v44 = vld [vmem:[#allocation2 + $0x70] sm:$0xff] }
 0x47c   :  { %12959 = vmatmul.mubr.msk.f32.gmra.mrb[14].mxu0 %vm2283_vm4, %v17695_v26  ;;  %v13903_v26 = vpack.c.bf16 %v10752_v17, %v10751_v15  ;;  %v10772_v15 = vld [vmem:[%s18607_s3 + $0x588] sm:$0xff] }
 0x47d   :  { %12977 = vmatprep.mubr.msk.f32.mxu0 %vm2283_vm4, %v7023_v33  ;;  %v13907_v33 = vpack.c.bf16 %v10754_v42, %v10753_v20  ;;  %v7493_v17 = vld [vmem:[#allocation2 + $0x62] sm:$0xff]  ;;  %v7494_v20 = vld [vmem:[#allocation2 + $0x72] sm:$0xff] }
 0x47e   :  { %v10802_v42 = vld [vmem:[%s18607_s3 + $0x5f8] sm:$0xff] }
 0x480   :  { %12978 = vmatmul.mubr.msk.f32.vlgmr.msra.gmra.mrb[0].mxu0 %vm2283_vm4, %v7024_v40  ;;  %v10771_v40 = vld [vmem:[%s18607_s3 + $0x580] sm:$0xff] }
 0x481   :  { %12980 = vmatprep.mubr.msk.f32.mxu0 %vm2283_vm4, %v7025_v4  ;;  %13898 = vmatpush3.bf16.msra.mxu0 %v13895_v10  ;;  %v7028_v10 = vld [vmem:[#allocation2 + $0x90] sm:$0xff] }
 0x482   :  { %13900 = vmatprep.subr.bf16.mxu0 %v13899_v19 }
 0x484   :  { %12981 = vmatmul.mubr.msk.f32.gmra.mrb[2].mxu0 %vm2283_vm4, %v7026_v44  ;;  %v13911_v44 = vpack.c.bf16 %v10772_v15, %v10771_v40  ;;  %v7498_v40 = vld [vmem:[#allocation2 + $0xb2] sm:$0xff]  ;;  %v7501_v15 = vld [vmem:[#allocation2 + $0x122] sm:$0xff] }
 0x485   :  { %12983 = vmatprep.mubr.msk.f32.mxu0 %vm2283_vm4, %v17389_v56  ;;  %13902 = vmatpush3.bf16.msra.mxu0 %v13899_v19  ;;  %v7030_v56 = vld [vmem:[#allocation2 + $0xb0] sm:$0xff]  ;;  %v10800_v19 = vld [vmem:[%s18607_s3 + $0x5e8] sm:$0xff] }
 0x486   :  { %13904 = vmatprep.subr.bf16.mxu0 %v13903_v26 }
 0x488   :  { %12984 = vmatmul.mubr.msk.f32.gmra.mrb[4].mxu0 %vm2283_vm4, %v7028_v10  ;;  %v10820_v10 = vld [vmem:[%s18607_s3 + $0x608] sm:$0xff] }
 0x489   :  { %12986 = vmatprep.mubr.msk.f32.mxu0 %vm2283_vm4, %v17401_v1  ;;  %13906 = vmatpush3.bf16.msra.mxu0 %v13903_v26  ;;  %v10774_v1 = vld [vmem:[%s18607_s3 + $0x598] sm:$0xff]  ;;  %v10796_v26 = vld [vmem:[%s18607_s3 + $0x5c8] sm:$0xff] }
 0x48a   :  { %13908 = vmatprep.subr.bf16.mxu0 %v13907_v33 }
 0x48c   :  { %12987 = vmatmul.mubr.msk.f32.gmra.mrb[6].mxu0 %vm2283_vm4, %v7030_v56 }
 0x48d   :  { %12989 = vmatprep.mubr.msk.f32.mxu0 %vm2283_vm4, %v17049_v51  ;;  %13910 = vmatpush3.bf16.msra.mxu0 %v13907_v33  ;;  %v7038_v51 = vld [vmem:[#allocation2 + $0x170] sm:$0xff]  ;;  %v10819_v33 = vld [vmem:[%s18607_s3 + $0x600] sm:$0xff] }
 0x48e   :  { %13912 = vmatprep.subr.bf16.mxu0 %v13911_v44 }
 0x490   :  { %12990 = vmatmul.mubr.msk.f32.gmra.mrb[8].mxu0 %vm2283_vm4, %v17053_v34  ;;  %v10773_v34 = vld [vmem:[%s18607_s3 + $0x590] sm:$0xff] }
 0x491   :  { %12992 = vmatprep.mubr.msk.f32.mxu0 %vm2283_vm4, %v17411_v24  ;;  %v13915_v24 = vpack.c.bf16 %v10774_v1, %v10773_v34  ;;  %v10826_v34 = vld [vmem:[%s18607_s3 + $0x638] sm:$0xff] }
 0x492   :  { %v7732_v1 = vld [vmem:[#allocation2 + $0xb3] sm:$0xff] }
 0x494   :  { %12993 = vmatmul.mubr.msk.f32.gmra.mrb[10].mxu0 %vm2283_vm4, %v17415_v11  ;;  %v10776_v11 = vld [vmem:[%s18607_s3 + $0x5a8] sm:$0xff] }
 0x495   :  { %12995 = vmatprep.mubr.msk.f32.mxu0 %vm2283_vm4, %v17419_v23 }
 0x498   :  { %12996 = vmatmul.mubr.msk.f32.gmra.mrb[12].mxu0 %vm2283_vm4, %v17063_v29  ;;  %v10775_v29 = vld [vmem:[%s18607_s3 + $0x5a0] sm:$0xff] }
 0x499   :  { %12998 = vmatprep.mubr.msk.f32.mxu0 %vm2283_vm4, %v17425_v47  ;;  %v13919_v23 = vpack.c.bf16 %v10776_v11, %v10775_v29  ;;  %v10777_v47 = vld [vmem:[%s18607_s3 + $0x5b0] sm:$0xff]  ;;  %v17960_v29 = vld [vmem:[%s18608_s4] ss:$0 sm:$0xff] }
 0x49a   :  { %v18868_v11 = vld [vmem:[#allocation30_spill] sm:$0xff] }
 0x49c   :  { %12999 = vmatmul.mubr.msk.f32.gmra.mrb[14].mxu0 %vm2283_vm4, %v7038_v51  ;;  %v7728_v51 = vld [vmem:[#allocation2 + $0x73] sm:$0xff] }
 0x49d   :  { %13017 = vmatprep.mubr.msk.f32.mxu0 %vm2283_vm4, %v17436_v50  ;;  %v10778_v50 = vld [vmem:[%s18607_s3 + $0x5b8] sm:$0xff] }
 0x4a0   :  { %13018 = vmatmul.mubr.msk.f32.vlgmr.msra.gmra.mrb[0].mxu0 %vm2283_vm4, %v17446_v46  ;;  %v13923_v46 = vpack.c.bf16 %v10778_v50, %v10777_v47  ;;  %v18869_v47 = vld [vmem:[#allocation31_spill] sm:$0xff] }
 0x4a1   :  { %13020 = vmatprep.mubr.msk.f32.mxu0 %vm2283_vm4, %v17450_v54  ;;  %13914 = vmatpush3.bf16.msra.mxu0 %v13911_v44  ;;  %v10795_v54 = vld [vmem:[%s18607_s3 + $0x5c0] sm:$0xff]  ;;  %v14189_v50 = vadd.f32 %v17960_v29, %v18869_v47 }
 0x4a2   :  { %13916 = vmatprep.subr.bf16.mxu0 %v13915_v24  ;;  %v7727_v44 = vld [vmem:[#allocation2 + $0x63] sm:$0xff] }
 0x4a4   :  { %13021 = vmatmul.mubr.msk.f32.gmra.mrb[2].mxu0 %vm2283_vm4, %v17460_v38  ;;  %v13927_v38 = vpack.c.bf16 %v10796_v26, %v10795_v54 }
 0x4a5   :  { %13023 = vmatprep.mubr.msk.f32.mxu0 %vm2283_vm4, %v17464_v57  ;;  %13918 = vmatpush3.bf16.msra.mxu0 %v13915_v24  ;;  %v7264_v57 = vld [vmem:[#allocation2 + $0xb1] sm:$0xff] }
 0x4a6   :  { %13920 = vmatprep.subr.bf16.mxu0 %v13919_v23  ;;  %v7736_v24 = vld [vmem:[#allocation2 + $0x133] sm:$0xff] }
 0x4a8   :  { %13024 = vmatmul.mubr.msk.f32.gmra.mrb[4].mxu0 %vm2283_vm4, %v17105_v31  ;;  %v18864_v31 = vld [vmem:[#allocation42_spill] sm:$0xff] }
 0x4a9   :  { %13026 = vmatprep.mubr.msk.f32.mxu0 %vm2283_vm4, %v17476_v39  ;;  %13922 = vmatpush3.bf16.msra.mxu0 %v13919_v23  ;;  %v18865_v39 = vld [vmem:[#allocation44_spill] sm:$0xff]  ;;  %v14187_v23 = vadd.f32 %v18868_v11, %v17960_v29 }
 0x4aa   :  { %13924 = vmatprep.subr.bf16.mxu0 %v13923_v46 }
 0x4ac   :  { %13027 = vmatmul.mubr.msk.f32.gmra.mrb[6].mxu0 %vm2283_vm4, %v7264_v57  ;;  %v18870_v57 = vld [vmem:[#allocation32_spill] sm:$0xff] }
 0x4ad   :  { %13029 = vmatprep.mubr.msk.f32.mxu0 %vm2283_vm4, %v17481_v0  ;;  %13926 = vmatpush3.bf16.msra.mxu0 %v13923_v46  ;;  %v7272_v0 = vld [vmem:[#allocation2 + $0x171] sm:$0xff] }
 0x4ae   :  { %13928 = vmatprep.subr.bf16.mxu0 %v13927_v38 }
 0x4b0   :  { %13030 = vmatmul.mubr.msk.f32.gmra.mrb[8].mxu0 %vm2283_vm4, %v17485_v43  ;;  %v10797_v43 = vld [vmem:[%s18607_s3 + $0x5d0] sm:$0xff] }
 0x4b1   :  { %13032 = vmatprep.mubr.msk.f32.mxu0 %vm2283_vm4, %v17489_v37  ;;  %v10798_v37 = vld [vmem:[%s18607_s3 + $0x5d8] sm:$0xff] }
 0x4b4   :  { %13033 = vmatmul.mubr.msk.f32.gmra.mrb[10].mxu0 %vm2283_vm4, %v17493_v6  ;;  %v13931_v6 = vpack.c.bf16 %v10798_v37, %v10797_v43 }
 0x4b5   :  { %13035 = vmatprep.mubr.msk.f32.mxu0 %vm2283_vm4, %v17497_v2  ;;  %v10799_v2 = vld [vmem:[%s18607_s3 + $0x5e0] sm:$0xff] }
 0x4b6   :  { %v13935_v4 = vpack.c.bf16 %v10800_v19, %v10799_v2  ;;  %v18872_v19 = vld [vmem:[#allocation34_spill] sm:$0xff] }
 0x4b8   :  { %13036 = vmatmul.mubr.msk.f32.gmra.mrb[12].mxu0 %vm2283_vm4, %v18864_v31  ;;  %v14191_v31 = vadd.f32 %v18870_v57, %v17960_v29  ;;  %v18883_v57 = vld [vmem:[#allocation10_spill] sm:$0xff] }
 0x4b9   :  { %13038 = vmatprep.mubr.msk.f32.mxu0 %vm2283_vm4, %v18865_v39  ;;  %v18871_v39 = vld [vmem:[#allocation33_spill] sm:$0xff] }
 0x4bc   :  { %13039 = vmatmul.mubr.msk.f32.gmra.mrb[14].mxu0 %vm2283_vm4, %v7272_v0  ;;  %v14193_v0 = vadd.f32 %v17960_v29, %v18871_v39 }
 0x4bd   :  { %13057 = vmatprep.mubr.msk.f32.mxu0 %vm2283_vm4, %v17144_v12  ;;  %v10801_v12 = vld [vmem:[%s18607_s3 + $0x5f0] sm:$0xff] }
 0x4c0   :  { %13058 = vmatmul.mubr.msk.f32.vlgmr.msra.gmra.mrb[0].mxu0 %vm2283_vm4, %v17148_v62  ;;  %v13939_v62 = vpack.c.bf16 %v10802_v42, %v10801_v12 }
 0x4c1   :  { %13060 = vmatprep.mubr.msk.f32.mxu0 %vm2283_vm4, %v7493_v17  ;;  %13930 = vmatpush3.bf16.msra.mxu0 %v13927_v38  ;;  %v14195_v17 = vadd.f32 %v18872_v19, %v17960_v29 }
 0x4c2   :  { %13932 = vmatprep.subr.bf16.mxu0 %v13931_v6 }
 0x4c4   :  { %13061 = vmatmul.mubr.msk.f32.gmra.mrb[2].mxu0 %vm2283_vm4, %v7494_v20 }
 0x4c5   :  { %13063 = vmatprep.mubr.msk.f32.mxu0 %vm2283_vm4, %v17535_v52  ;;  %13934 = vmatpush3.bf16.msra.mxu0 %v13931_v6  ;;  %v13943_v52 = vpack.c.bf16 %v10820_v10, %v10819_v33  ;;  %v18874_v10 = vld [vmem:[#allocation36_spill] sm:$0xff] }
 0x4c6   :  { %13936 = vmatprep.subr.bf16.mxu0 %v13935_v4 }
 0x4c8   :  { %13064 = vmatmul.mubr.msk.f32.gmra.mrb[4].mxu0 %vm2283_vm4, %v17174_v48  ;;  %v7502_v48 = vld [vmem:[#allocation2 + $0x132] sm:$0xff] }
 0x4c9   :  { %13066 = vmatprep.mubr.msk.f32.mxu0 %vm2283_vm4, %v17547_v5  ;;  %13938 = vmatpush3.bf16.msra.mxu0 %v13935_v4  ;;  %v10822_v5 = vld [vmem:[%s18607_s3 + $0x618] sm:$0xff]  ;;  %v18873_v4 = vld [vmem:[#allocation35_spill] sm:$0xff] }
 0x4ca   :  { %13940 = vmatprep.subr.bf16.mxu0 %v13939_v62  ;;  %v14197_v20 = vadd.f32 %v17960_v29, %v18873_v4  ;;  %v8337_v4 = vld [vmem:[%s18609_s5 + $0x48] sm:$0xff] }
 0x4cc   :  { %13067 = vmatmul.mubr.msk.f32.gmra.mrb[6].mxu0 %vm2283_vm4, %v7498_v40  ;;  %v18875_v40 = vld [vmem:[#allocation37_spill] sm:$0xff] }
 0x4cd   :  { %13069 = vmatprep.mubr.msk.f32.mxu0 %vm2283_vm4, %v17183_v16  ;;  %13942 = vmatpush3.bf16.msra.mxu0 %v13939_v62  ;;  %v7506_v16 = vld [vmem:[#allocation2 + $0x172] sm:$0xff] }
 0x4ce   :  { %13944 = vmatprep.subr.bf16.mxu0 %v13943_v52 }
 0x4d0   :  { %13070 = vmatmul.mubr.msk.f32.gmra.mrb[8].mxu0 %vm2283_vm4, %v17187_v7  ;;  %v10821_v7 = vld [vmem:[%s18607_s3 + $0x610] sm:$0xff] }
 0x4d1   :  { %13072 = vmatprep.mubr.msk.f32.mxu0 %vm2283_vm4, %v7501_v15  ;;  %v14201_v15 = vadd.f32 %v17960_v29, %v18875_v40  ;;  %v8338_v40 = vld [vmem:[%s18609_s5 + $0x50] sm:$0xff] }
 0x4d4   :  { %13073 = vmatmul.mubr.msk.f32.gmra.mrb[10].mxu0 %vm2283_vm4, %v7502_v48 }
 0x4d5   :  { %13075 = vmatprep.mubr.msk.f32.mxu0 %vm2283_vm4, %v17561_v35  ;;  %v13947_v35 = vpack.c.bf16 %v10822_v5, %v10821_v7 }
 0x4d8   :  { %13076 = vmatmul.mubr.msk.f32.gmra.mrb[12].mxu0 %vm2283_vm4, %v17201_v30  ;;  %v10823_v30 = vld [vmem:[%s18607_s3 + $0x620] sm:$0xff] }
 0x4d9   :  { %13078 = vmatprep.mubr.msk.f32.mxu0 %vm2283_vm4, %v17567_v58  ;;  %v10824_v58 = vld [vmem:[%s18607_s3 + $0x628] sm:$0xff] }
 0x4da   :  { %v13951_v56 = vpack.c.bf16 %v10824_v58, %v10823_v30  ;;  %v18877_v58 = vld [vmem:[#allocation7_spill] sm:$0xff] }
 0x4dc   :  { %13079 = vmatmul.mubr.msk.f32.gmra.mrb[14].mxu0 %vm2283_vm4, %v7506_v16 }
 0x4dd   :  { %13097 = vmatprep.mubr.msk.f32.mxu0 %vm2283_vm4, %v17222_v18  ;;  %v10825_v18 = vld [vmem:[%s18607_s3 + $0x630] sm:$0xff] }
 0x4e0   :  { %13098 = vmatmul.mubr.msk.f32.vlgmr.msra.gmra.mrb[0].mxu0 %vm2283_vm4, %v17226_v22  ;;  %v13955_v22 = vpack.c.bf16 %v10826_v34, %v10825_v18 }
 0x4e1   :  { %13100 = vmatprep.mubr.msk.f32.mxu0 %vm2283_vm4, %v7727_v44  ;;  %13946 = vmatpush3.bf16.msra.mxu0 %v13943_v52  ;;  %v14199_v52 = vadd.f32 %v18874_v10, %v17960_v29  ;;  %v14205_v44 = vadd.f32 %v17960_v29, %v18877_v58 }
 0x4e2   :  { %13948 = vmatprep.subr.bf16.mxu0 %v13947_v35 }
 0x4e4   :  { %13101 = vmatmul.mubr.msk.f32.gmra.mrb[2].mxu0 %vm2283_vm4, %v7728_v51 }
 0x4e5   :  { %13103 = vmatprep.mubr.msk.f32.mxu0 %vm2283_vm4, %v17599_v41  ;;  %13950 = vmatpush3.bf16.msra.mxu0 %v13947_v35  ;;  %v7735_v41 = vld [vmem:[#allocation2 + $0x123] sm:$0xff]  ;;  %v18876_v35 = vld [vmem:[#allocation38_spill] sm:$0xff] }
 0x4e6   :  { %13952 = vmatprep.subr.bf16.mxu0 %v13951_v56  ;;  %v14203_v30 = vadd.f32 %v18876_v35, %v17960_v29  ;;  %v8340_v35 = vld [vmem:[%s18609_s5 + $0x60] sm:$0xff] }
 0x4e8   :  { %13104 = vmatmul.mubr.msk.f32.gmra.mrb[4].mxu0 %vm2283_vm4, %v17252_v32  ;;  %v7740_v32 = vld [vmem:[#allocation2 + $0x173] sm:$0xff] }
 0x4e9   :  { %13106 = vmatprep.mubr.msk.f32.mxu0 %vm2283_vm4, %v17611_v8  ;;  %13954 = vmatpush3.bf16.msra.mxu0 %v13951_v56  ;;  %v8239_v8 = vld [vmem:[%s18609_s5 + $0x28] sm:$0xff] }
 0x4ea   :  { %13956 = vmatprep.subr.bf16.mxu0 %v13955_v22 }
 0x4ec   :  { %13107 = vmatmul.mubr.msk.f32.gmra.mrb[6].mxu0 %vm2283_vm4, %v7732_v1 }
 0x4ed   :  { %13109 = vmatprep.mubr.msk.f32.mxu0 %vm2283_vm4, %v17261_v3  ;;  %13958 = vmatpush3.bf16.msra.mxu0 %v13955_v22  ;;  %v7966_v3 = vld [vmem:[#allocation2 + $0xb4] sm:$0xff]  ;;  %v18878_v22 = vld [vmem:[#allocation39_spill] sm:$0xff] }
 0x4ee   :  { %v14207_v1 = vadd.f32 %v18878_v22, %v17960_v29 }
 0x4f0   :  { %13110 = vmatmul.mubr.msk.f32.gmra.mrb[8].mxu0 %vm2283_vm4, %v17265_v36  ;;  %v18867_v36 = vld [vmem:[#allocation11_spill] sm:$0xff] }
 0x4f1   :  { %13112 = vmatprep.mubr.msk.f32.mxu0 %vm2283_vm4, %v7735_v41  ;;  %v18879_v41 = vld [vmem:[#allocation8_spill] sm:$0xff] }
 0x4f4   :  { %13113 = vmatmul.mubr.msk.f32.gmra.mrb[10].mxu0 %vm2283_vm4, %v7736_v24  ;;  %v14209_v24 = vadd.f32 %v17960_v29, %v18879_v41  ;;  %v8342_v41 = vld [vmem:[%s18609_s5 + $0x70] sm:$0xff] }
 0x4f5   :  { %13115 = vmatprep.mubr.msk.f32.mxu0 %vm2283_vm4, %v17625_v49 }
 0x4f8   :  { %13116 = vmatmul.mubr.msk.f32.gmra.mrb[12].mxu0 %vm2283_vm4, %v17279_v55  ;;  %v7974_v55 = vld [vmem:[#allocation2 + $0x174] sm:$0xff] }
 0x4f9   :  { %13118 = vmatprep.mubr.msk.f32.mxu0 %vm2283_vm4, %v17631_v59  ;;  %v8240_v59 = vld [vmem:[%s18609_s5 + $0x30] sm:$0xff] }
 0x4fc   :  { %13119 = vmatmul.mubr.msk.f32.gmra.mrb[14].mxu0 %vm2283_vm4, %v7740_v32 }
 0x4fd   :  { %13137 = vmatprep.mubr.msk.f32.mxu0 %vm2283_vm4, %v17300_v63  ;;  %v8235_v63 = vld [vmem:[%s18609_s5 + $0x8] sm:$0xff] }
 0x500   :  { %13138 = vmatmul.mubr.msk.f32.vlgmr.msra.gmra.mrb[0].mxu0 %vm2283_vm4, %v17304_v13  ;;  %v14652_v13 = vmov 0.0|0.0  }
 0x501   :  { %13140 = vmatprep.mubr.msk.f32.mxu0 %vm2283_vm4, %v17314_v45  ;;  %v18866_v45 = vld [vmem:[#allocation43_spill] sm:$0xff]  ;;  %13959 = vmatprep.subr.bf16.mxu1 %v14652_v13 }
 0x504   :  { %13141 = vmatmul.mubr.msk.f32.gmra.mrb[2].mxu0 %vm2283_vm4, %v17318_v14 }
 0x505   :  { %13143 = vmatprep.mubr.msk.f32.mxu0 %vm2283_vm4, %v17663_v28  ;;  %v8241_v28 = vld [vmem:[%s18609_s5 + $0x38] sm:$0xff] }
 0x508   :  { %13144 = vmatmul.mubr.msk.f32.gmra.mrb[4].mxu0 %vm2283_vm4, %v17330_v61  ;;  %v8236_v61 = vld [vmem:[%s18609_s5 + $0x10] sm:$0xff] }
 0x509   :  { %13146 = vmatprep.mubr.msk.f32.mxu0 %vm2283_vm4, %v17675_v21  ;;  %v13969_v21 = vpack.c.bf16 %v8241_v28, %v8240_v59 }
 0x50c   :  { %13147 = vmatmul.mubr.msk.f32.gmra.mrb[6].mxu0 %vm2283_vm4, %v7966_v3 }
 0x50d   :  { %13149 = vmatprep.mubr.msk.f32.mxu0 %vm2283_vm4, %v17339_v60  ;;  %v8234_v60 = vld [vmem:[%s18609_s5] sm:$0xff] }
 0x50e   :  { %v13960_v14 = vpack.c.bf16 %v8235_v63, %v8234_v60  ;;  %v18880_v60 = vld [vmem:[#allocation40_spill] sm:$0xff] }
 0x50f   :  { %v14211_v63 = vadd.f32 %v18880_v60, %v17960_v29 }
 0x510   :  { %13150 = vmatmul.mubr.msk.f32.gmra.mrb[8].mxu0 %vm2283_vm4, %v17343_v53  ;;  %13961 = vmatpush3.bf16.msra.mxu1 %v13960_v14  ;;  %v8237_v53 = vld [vmem:[%s18609_s5 + $0x18] sm:$0xff] }
 0x511   :  { %13152 = vmatprep.mubr.msk.f32.mxu0 %vm2283_vm4, %v17347_v9  ;;  %13962 = vmatprep.subr.bf16.mxu1 %v14652_v13  ;;  %v13963_v9 = vpack.c.bf16 %v8237_v53, %v8236_v61 }
 0x514   :  { %13153 = vmatmul.mubr.msk.f32.gmra.mrb[10].mxu0 %vm2283_vm4, %v17351_v25  ;;  %13964 = vmatpush3.bf16.msra.mxu1 %v13963_v9  ;;  %v8238_v25 = vld [vmem:[%s18609_s5 + $0x20] sm:$0xff]  ;;  %v18881_v9 = vld [vmem:[#allocation9_spill] sm:$0xff] }
 0x515   :  { %13155 = vmatprep.mubr.msk.f32.mxu0 %vm2283_vm4, %v17689_v27  ;;  %13965 = vmatprep.subr.bf16.mxu1 %v14652_v13  ;;  %v13966_v49 = vpack.c.bf16 %v8239_v8, %v8238_v25  ;;  %v14654_v27 = vmov 0.0   ;;  %v14213_v25 = vadd.f32 %v17960_v29, %v18881_v9 }
 0x516   :  { %13177 = vmatprep.mubr.msk.f32.mxu1 %vm14653_vm5, %v14654_v27 }
 0x518   :  { %13156 = vmatmul.mubr.msk.f32.gmra.mrb[12].mxu0 %vm2283_vm4, %v18866_v45  ;;  %13967 = vmatpush3.bf16.msra.mxu1 %v13966_v49 }
 0x519   :  { %13158 = vmatprep.mubr.msk.f32.mxu0 %vm2283_vm4, %v18867_v36  ;;  %13968 = vmatprep.subr.bf16.mxu1 %v14652_v13 }
 0x51c   :  { %13159 = vmatmul.mubr.msk.f32.gmra.mrb[14].mxu0 %vm2283_vm4, %v7974_v55  ;;  %13970 = vmatpush3.bf16.msra.mxu1 %v13969_v21 }
 0x51d   :  { %13971 = vmatprep.subr.bf16.mxu1 %v14652_v13 }
 0x5d3   :  { %v13139_v46 = vpop.f32.mrb[0].mxu0 }
 0x5d4   :  { %v14188_v54 = vadd.f32 %v14187_v23, %v13139_v46  ;;  %v8098_v26 = vpop.f32.mrb[1].mxu0 }
 0x5d5   :  { %v14190_v38 = vadd.f32 %v14189_v50, %v8098_v26  ;;  %v18882_v50 = vld [vmem:[#allocation41_spill] sm:$0xff] }
 0x5d6   :  { %8194 = vst.msk [vmem:[#allocation3 + $0x8] sm:$0xff] %vm2283_vm4, %v14188_v54  ;;  %v14215_v46 = vadd.f32 %v18882_v50, %v17960_v29 }
 0x5d7   :  { %8193 = vst.msk [vmem:[#allocation3] sm:$0xff] %vm2283_vm4, %v14190_v38  ;;  %v13142_v43 = vpop.f32.mrb[2].mxu0 }
 0x5d8   :  { %v14192_v37 = vadd.f32 %v14191_v31, %v13142_v43  ;;  %v8108_v6 = vpop.f32.mrb[3].mxu0  ;;  %v14217_v31 = vadd.f32 %v17960_v29, %v18883_v57 }
 0x5d9   :  { %v14194_v2 = vadd.f32 %v14193_v0, %v8108_v6 }
 0x5da   :  { %8196 = vst.msk [vmem:[#allocation3 + $0x18] sm:$0xff] %vm2283_vm4, %v14192_v37 }
 0x5db   :  { %8195 = vst.msk [vmem:[#allocation3 + $0x10] sm:$0xff] %vm2283_vm4, %v14194_v2  ;;  %v13145_v12 = vpop.f32.mrb[4].mxu0 }
 0x5dc   :  { %v14196_v42 = vadd.f32 %v14195_v17, %v13145_v12  ;;  %v8118_v62 = vpop.f32.mrb[5].mxu0  ;;  %v8336_v17 = vld [vmem:[%s18609_s5 + $0x40] sm:$0xff] }
 0x5dd   :  { %v14198_v33 = vadd.f32 %v14197_v20, %v8118_v62  ;;  %v8224_v55 = vld [vmem:[#allocation3 + $0x8] sm:$0x1]  ;;  %v8226_v53 = vld [vmem:[#allocation3 + $0x9] sm:$0x1]  ;;  %v8326_v58 = vld [vmem:[#allocation3 + $0xa] sm:$0x1] }
 0x5de   :  { %8198 = vst.msk [vmem:[#allocation3 + $0x28] sm:$0xff] %vm2283_vm4, %v14196_v42  ;;  %v8217_v14 = vld [vmem:[#allocation3] sm:$0x1]  ;;  %v8219_v61 = vld [vmem:[#allocation3 + $0x1] sm:$0x1]  ;;  %v8228_v47 = vmax.f32 %v8224_v55, %v8226_v53  ;;  %v8438_v55 = vld [vmem:[%s18609_s5 + $0x88] sm:$0xff] }
 0x5df   :  { %8197 = vst.msk [vmem:[#allocation3 + $0x20] sm:$0xff] %vm2283_vm4, %v14198_v33  ;;  %v13148_v48 = vpop.f32.mrb[6].mxu0  ;;  %v8221_v21 = vmax.f32 %v8217_v14, %v8219_v61  ;;  %v8421_v50 = vld [vmem:[#allocation3 + $0x4] sm:$0x1] }
 0x5e0   :  { %v14200_v16 = vadd.f32 %v14199_v52, %v13148_v48  ;;  %v8128_v7 = vpop.f32.mrb[7].mxu0  ;;  %v13972_v52 = vpack.c.bf16 %v8337_v4, %v8336_v17  ;;  %v8539_v17 = vld [vmem:[%s18609_s5 + $0xc8] sm:$0xff] }
 0x5e1   :  { %v14202_v5 = vadd.f32 %v14201_v15, %v8128_v7  ;;  %v8230_v2 = vmax.f32 %v8221_v21, %v8228_v47  ;;  %v8339_v15 = vld [vmem:[%s18609_s5 + $0x58] sm:$0xff]  ;;  %v8442_v47 = vld [vmem:[%s18609_s5 + $0xa8] sm:$0xff] }
 0x5e2   :  { %8200 = vst.msk [vmem:[#allocation3 + $0x38] sm:$0xff] %vm2283_vm4, %v14200_v16 }
 0x5e3   :  { %8199 = vst.msk [vmem:[#allocation3 + $0x30] sm:$0xff] %vm2283_vm4, %v14202_v5  ;;  %v13151_v56 = vpop.f32.mrb[8].mxu0  ;;  %v8232_v33 = vmax.f32 %v8230_v2, 0.0  ;;  %v13975_v5 = vpack.c.bf16 %v8339_v15, %v8338_v40 }
 0x5e4   :  { %v14204_v51 = vadd.f32 %v14203_v30, %v13151_v56  ;;  %v8138_v18 = vpop.f32.mrb[9].mxu0  ;;  %v8341_v30 = vld [vmem:[%s18609_s5 + $0x68] sm:$0xff]  ;;  %v8322_v56 = vld [vmem:[#allocation3 + $0x3] sm:$0x1] }
 0x5e5   :  { %v14206_v34 = vadd.f32 %v14205_v44, %v8138_v18  ;;  %v8320_v44 = vld [vmem:[#allocation3 + $0x2] sm:$0x1] }
 0x5e6   :  { %8202 = vst.msk [vmem:[#allocation3 + $0x48] sm:$0xff] %vm2283_vm4, %v14204_v51  ;;  %v8328_v51 = vld [vmem:[#allocation3 + $0xb] sm:$0x1]  ;;  %v8324_v22 = vmax.f32 %v8320_v44, %v8322_v56  ;;  %v8530_v44 = vld [vmem:[#allocation3 + $0xf] sm:$0x1] }
 0x5e7   :  { %8201 = vst.msk [vmem:[#allocation3 + $0x40] sm:$0xff] %vm2283_vm4, %v14206_v34  ;;  %v13154_v32 = vpop.f32.mrb[10].mxu0  ;;  %v13978_v34 = vpack.c.bf16 %v8341_v30, %v8340_v35  ;;  %v8522_v35 = vld [vmem:[#allocation3 + $0x6] sm:$0x1]  ;;  %v8524_v30 = vld [vmem:[#allocation3 + $0x7] sm:$0x1] }
 0x5e8   :  { %v14208_v3 = vadd.f32 %v14207_v1, %v13154_v32  ;;  %v8148_v45 = vpop.f32.mrb[11].mxu0  ;;  %v8330_v1 = vmax.f32 %v8326_v58, %v8328_v51  ;;  %v8528_v58 = vld [vmem:[#allocation3 + $0xe] sm:$0x1] }
 0x5e9   :  { %v14210_v36 = vadd.f32 %v14209_v24, %v8148_v45  ;;  %v8343_v24 = vld [vmem:[%s18609_s5 + $0x78] sm:$0xff] }
 0x5ea   :  { %8204 = vst.msk [vmem:[#allocation3 + $0x58] sm:$0xff] %vm2283_vm4, %v14208_v3  ;;  %v13981_v3 = vpack.c.bf16 %v8343_v24, %v8342_v41  ;;  %v8332_v45 = vmax.f32 %v8324_v22, %v8330_v1  ;;  %v8544_v22 = vld [vmem:[%s18609_s5 + $0xf0] sm:$0xff]  ;;  %v8545_v1 = vld [vmem:[%s18609_s5 + $0xf8] sm:$0xff] }
 0x5eb   :  { %8203 = vst.msk [vmem:[#allocation3 + $0x50] sm:$0xff] %vm2283_vm4, %v14210_v36  ;;  %v13157_v8 = vpop.f32.mrb[12].mxu0  ;;  %v8437_v36 = vld [vmem:[%s18609_s5 + $0x80] sm:$0xff]  ;;  %v14005_v24 = vpack.c.bf16 %v8545_v1, %v8544_v22 }
 0x5ec   :  { %v14212_v49 = vadd.f32 %v14211_v63, %v13157_v8  ;;  %v8158_v59 = vpop.f32.mrb[13].mxu0  ;;  %v8334_v9 = vmax.f32 %v8332_v45, 0.0  ;;  %v8439_v8 = vld [vmem:[%s18609_s5 + $0x90] sm:$0xff]  ;;  %v8642_v45 = vld [vmem:[%s18609_s5 + $0x108] sm:$0xff] }
 0x5ed   :  { %v14214_v28 = vadd.f32 %v14213_v25, %v8158_v59  ;;  %v8225_v11 = vld [vmem:[#allocation3 + $0x48] sm:$0x1]  ;;  %v8227_v23 = vld [vmem:[#allocation3 + $0x49] sm:$0x1]  ;;  %v8327_v20 = vld [vmem:[#allocation3 + $0x4a] sm:$0x1]  ;;  %v13984_v25 = vpack.c.bf16 %v8438_v55, %v8437_v36 }
 0x5ee   :  { %8206 = vst.msk [vmem:[#allocation3 + $0x68] sm:$0xff] %vm2283_vm4, %v14212_v49  ;;  %v8218_v54 = vld [vmem:[#allocation3 + $0x40] sm:$0x1]  ;;  %v8220_v26 = vld [vmem:[#allocation3 + $0x41] sm:$0x1]  ;;  %v8229_v38 = vmax.f32 %v8225_v11, %v8227_v23  ;;  %v8440_v49 = vld [vmem:[%s18609_s5 + $0x98] sm:$0xff] }
 0x5ef   :  { %8205 = vst.msk [vmem:[#allocation3 + $0x60] sm:$0xff] %vm2283_vm4, %v14214_v28  ;;  %v13160_v39 = vpop.f32.mrb[14].mxu0  ;;  %v8222_v0 = vmax.f32 %v8218_v54, %v8220_v26  ;;  %v8321_v12 = vld [vmem:[#allocation3 + $0x42] sm:$0x1]  ;;  %v8323_v42 = vld [vmem:[#allocation3 + $0x43] sm:$0x1]  ;;  %v13987_v11 = vpack.c.bf16 %v8440_v49, %v8439_v8 }
 0x5f0   :  { %v14216_v43 = vadd.f32 %v14215_v46, %v13160_v39  ;;  %v8168_v37 = vpop.f32.mrb[15].mxu0  ;;  %v8329_v62 = vld [vmem:[#allocation3 + $0x4b] sm:$0x1]  ;;  %v8325_v16 = vmax.f32 %v8321_v12, %v8323_v42  ;;  %v8422_v63 = vld [vmem:[#allocation3 + $0x44] sm:$0x1] }
 0x5f1   :  { %v14218_v6 = vadd.f32 %v14217_v31, %v8168_v37  ;;  %v8231_v19 = vmax.f32 %v8222_v0, %v8229_v38  ;;  %v8331_v7 = vmax.f32 %v8327_v20, %v8329_v62  ;;  %v8424_v14 = vld [vmem:[#allocation3 + $0x45] sm:$0x1]  ;;  %v8428_v61 = vld [vmem:[#allocation3 + $0x4c] sm:$0x1]  ;;  %v8430_v53 = vld [vmem:[#allocation3 + $0x4d] sm:$0x1] }
 0x5f2   :  { %8208 = vst.msk [vmem:[#allocation3 + $0x78] sm:$0xff] %vm2283_vm4, %v14216_v43  ;;  %v8426_v28 = vmax.f32 %v8422_v63, %v8424_v14  ;;  %v8432_v21 = vmax.f32 %v8428_v61, %v8430_v53  ;;  %v8441_v23 = vld [vmem:[%s18609_s5 + $0xa0] sm:$0xff]  ;;  %v8427_v54 = vld [vmem:[#allocation3 + $0xc] sm:$0x1]  ;;  %v8429_v26 = vld [vmem:[#allocation3 + $0xd] sm:$0x1] }
 0x5f3   :  { %8207 = vst.msk [vmem:[#allocation3 + $0x70] sm:$0xff] %vm2283_vm4, %v14218_v6  ;;  %v8233_v29 = vmax.f32 %v8231_v19, 0.0  ;;  %v8333_v18 = vmax.f32 %v8325_v16, %v8331_v7  ;;  %v8423_v46 = vld [vmem:[#allocation3 + $0x5] sm:$0x1]  ;;  %v13990_v57 = vpack.c.bf16 %v8442_v47, %v8441_v23  ;;  %v8431_v39 = vmax.f32 %v8427_v54, %v8429_v26  ;;  %v8443_v0 = vld [vmem:[%s18609_s5 + $0xb0] sm:$0xff]  ;;  %v8444_v43 = vld [vmem:[%s18609_s5 + $0xb8] sm:$0xff] }
 0x5f4   :  { %v8434_v38 = vmax.f32 %v8426_v28, %v8432_v21  ;;  %v8425_v31 = vmax.f32 %v8421_v50, %v8423_v46  ;;  %v13993_v6 = vpack.c.bf16 %v8444_v43, %v8443_v0  ;;  %v8538_v19 = vld [vmem:[%s18609_s5 + $0xc0] sm:$0xff]  ;;  %v8529_v12 = vld [vmem:[#allocation3 + $0x4e] sm:$0x1]  ;;  %v8531_v42 = vld [vmem:[#allocation3 + $0x4f] sm:$0x1] }
 0x5f5   :  { %v8244_v10 = vrot.slane %v8233_v29, 7  ;;  %v8335_v32 = vmax.f32 %v8333_v18, 0.0  ;;  %v8523_v29 = vld [vmem:[#allocation3 + $0x46] sm:$0x1]  ;;  %v8525_v20 = vld [vmem:[#allocation3 + $0x47] sm:$0x1]  ;;  %v8526_v18 = vmax.f32 %v8522_v35, %v8524_v30 }
 0x5f6   :  { %v8436_v37 = vmax.f32 %v8434_v38, 0.0  ;;  %v8433_v2 = vmax.f32 %v8425_v31, %v8431_v39  ;;  %v8527_v15 = vmax.f32 %v8523_v29, %v8525_v20  ;;  %v8542_v7 = vld [vmem:[%s18609_s5 + $0xe0] sm:$0xff]  ;;  %v8625_v55 = vld [vmem:[#allocation3 + $0x50] sm:$0x1]  ;;  %v8632_v63 = vld [vmem:[#allocation3 + $0x58] sm:$0x1] }
 0x5f7   :  { %v8246_v48 = vsel %vm8245_vm6, %v8244_v10, %v8232_v33  ;;  %v8346_v60 = vrot.slane %v8335_v32, 7  ;;  %v13996_v33 = vpack.c.bf16 %v8539_v17, %v8538_v19  ;;  %v8540_v10 = vld [vmem:[%s18609_s5 + $0xd0] sm:$0xff]  ;;  %v8634_v14 = vld [vmem:[#allocation3 + $0x59] sm:$0x1]  ;;  %v8645_v21 = vld [vmem:[%s18609_s5 + $0x120] sm:$0xff] }
 0x5f8   :  { %13178 = vmatmul.mubr.msk.f32.vlgmr.msra.gmra.mrb[208].mxu1 %vm2283_vm4, %v8246_v48  ;;  %v8447_v4 = vrot.slane %v8436_v37, 7  ;;  %v8435_v62 = vmax.f32 %v8433_v2, 0.0  ;;  %v8533_v48 = vmax.f32 %v8529_v12, %v8531_v42  ;;  %v8624_v23 = vld [vmem:[#allocation3 + $0x10] sm:$0x1]  ;;  %v8626_v47 = vld [vmem:[#allocation3 + $0x11] sm:$0x1] }
 0x5f9   :  { %13973 = vmatpush3.bf16.msra.mxu1 %v13972_v52  ;;  %13196 = vmatprep.mubr.msk.f32.mxu1 %vm14653_vm5, %v14654_v27  ;;  %v8347_v59 = vsel %vm8245_vm6, %v8346_v60, %v8334_v9  ;;  %v8541_v52 = vld [vmem:[%s18609_s5 + $0xd8] sm:$0xff]  ;;  %v8627_v60 = vld [vmem:[#allocation3 + $0x51] sm:$0x1]  ;;  %v8628_v38 = vmax.f32 %v8624_v23, %v8626_v47  ;;  %v8743_v2 = vld [vmem:[%s18609_s5 + $0x148] sm:$0xff] }
 0x5fa   :  { %13974 = vmatprep.subr.bf16.mxu1 %v14652_v13  ;;  %v8448_v40 = vsel %vm8245_vm6, %v8447_v4, %v8435_v62  ;;  %v13999_v16 = vpack.c.bf16 %v8541_v52, %v8540_v10  ;;  %v8535_v56 = vmax.f32 %v8527_v15, %v8533_v48  ;;  %v8643_v9 = vld [vmem:[%s18609_s5 + $0x110] sm:$0xff]  ;;  %v8629_v49 = vmax.f32 %v8625_v55, %v8627_v60  ;;  %v8631_v50 = vld [vmem:[#allocation3 + $0x18] sm:$0x1]  ;;  %v8633_v46 = vld [vmem:[#allocation3 + $0x19] sm:$0x1] }
 0x5fb   :  { %v8647_v31 = vld [vmem:[%s18609_s5 + $0x130] sm:$0xff]  ;;  %v8648_v39 = vld [vmem:[%s18609_s5 + $0x138] sm:$0xff]  ;;  %v8746_v48 = vld [vmem:[%s18609_s5 + $0x160] sm:$0xff] }
 0x5fc   :  { %v8537_v41 = vmax.f32 %v8535_v56, 0.0  ;;  %v14017_v43 = vpack.c.bf16 %v8648_v39, %v8647_v31  ;;  %v8727_v17 = vld [vmem:[#allocation3 + $0x52] sm:$0x1]  ;;  %v8729_v4 = vld [vmem:[#allocation3 + $0x53] sm:$0x1] }
 0x5fd   :  { %13976 = vmatpush3.bf16.msra.mxu1 %v13975_v5  ;;  %v8543_v5 = vld [vmem:[%s18609_s5 + $0xe8] sm:$0xff]  ;;  %v8733_v29 = vld [vmem:[#allocation3 + $0x5a] sm:$0x1]  ;;  %v8735_v20 = vld [vmem:[#allocation3 + $0x5b] sm:$0x1]  ;;  %v8731_v52 = vmax.f32 %v8727_v17, %v8729_v4 }
 0x5fe   :  { %13977 = vmatprep.subr.bf16.mxu1 %v14652_v13  ;;  %v14002_v51 = vpack.c.bf16 %v8543_v5, %v8542_v7  ;;  %v8548_v36 = vrot.slane %v8537_v41, 7  ;;  %v8744_v62 = vld [vmem:[%s18609_s5 + $0x150] sm:$0xff]  ;;  %v8732_v35 = vld [vmem:[#allocation3 + $0x1a] sm:$0x1]  ;;  %v8734_v30 = vld [vmem:[#allocation3 + $0x1b] sm:$0x1] }
 0x5ff   :  { %v8726_v7 = vld [vmem:[#allocation3 + $0x12] sm:$0x1]  ;;  %v8728_v5 = vld [vmem:[#allocation3 + $0x13] sm:$0x1]  ;;  %v8834_v55 = vld [vmem:[#allocation3 + $0x5c] sm:$0x1] }
 0x600   :  { %v8730_v56 = vmax.f32 %v8726_v7, %v8728_v5  ;;  %v8836_v60 = vld [vmem:[#allocation3 + $0x5d] sm:$0x1]  ;;  %v8833_v23 = vld [vmem:[#allocation3 + $0x1c] sm:$0x1]  ;;  %v8935_v17 = vld [vmem:[#allocation3 + $0x5e] sm:$0x1] }
 0x601   :  { %13979 = vmatpush3.bf16.msra.mxu1 %v13978_v34  ;;  %v8532_v34 = vmax.f32 %v8528_v58, %v8530_v44  ;;  %v8835_v47 = vld [vmem:[#allocation3 + $0x1d] sm:$0x1]  ;;  %v8937_v4 = vld [vmem:[#allocation3 + $0x5f] sm:$0x1]  ;;  %v8934_v7 = vld [vmem:[#allocation3 + $0x1e] sm:$0x1] }
 0x602   :  { %13980 = vmatprep.subr.bf16.mxu1 %v14652_v13  ;;  %v8936_v5 = vld [vmem:[#allocation3 + $0x1f] sm:$0x1] }
 0x603   :  { %v8534_v32 = vmax.f32 %v8526_v18, %v8532_v34  ;;  %v8748_v18 = vld [vmem:[%s18609_s5 + $0x170] sm:$0xff]  ;;  %v8749_v34 = vld [vmem:[%s18609_s5 + $0x178] sm:$0xff] }
 0x604   :  { %v14029_v1 = vpack.c.bf16 %v8749_v34, %v8748_v18 }
 0x605   :  { %13982 = vmatpush3.bf16.msra.mxu1 %v13981_v3  ;;  %v8641_v3 = vld [vmem:[%s18609_s5 + $0x100] sm:$0xff]  ;;  %v8536_v61 = vmax.f32 %v8534_v32, 0.0  ;;  %v8844_v32 = vld [vmem:[%s18609_s5 + $0x188] sm:$0xff] }
 0x606   :  { %13983 = vmatprep.subr.bf16.mxu1 %v14652_v13  ;;  %v14008_v53 = vpack.c.bf16 %v8642_v45, %v8641_v3  ;;  %v8828_v45 = vld [vmem:[#allocation3 + $0x54] sm:$0x1] }
 0x607   :  { %v8549_v8 = vsel %vm8245_vm6, %v8548_v36, %v8536_v61  ;;  %v8830_v36 = vld [vmem:[#allocation3 + $0x55] sm:$0x1] }
 0x608   :  { %13197 = vmatmul.mubr.msk.f32.vlgmr.msra.gmra.mrb[208].mxu1 %vm2283_vm4, %v8347_v59  ;;  %v8636_v59 = vmax.f32 %v8632_v63, %v8634_v14  ;;  %v8845_v61 = vld [vmem:[%s18609_s5 + $0x190] sm:$0xff] }
 0x609   :  { %13985 = vmatpush3.bf16.msra.mxu1 %v13984_v25  ;;  %13215 = vmatprep.mubr.msk.f32.mxu1 %vm14653_vm5, %v14654_v27  ;;  %v8644_v25 = vld [vmem:[%s18609_s5 + $0x118] sm:$0xff] }
 0x60a   :  { %13986 = vmatprep.subr.bf16.mxu1 %v14652_v13  ;;  %v14011_v28 = vpack.c.bf16 %v8644_v25, %v8643_v9  ;;  %v8638_v54 = vmax.f32 %v8629_v49, %v8636_v59  ;;  %v8832_v25 = vmax.f32 %v8828_v45, %v8830_v36  ;;  %v8847_v59 = vld [vmem:[%s18609_s5 + $0x1a0] sm:$0xff]  ;;  %v9038_v45 = vld [vmem:[#allocation3 + $0x68] sm:$0x1]  ;;  %v9040_v36 = vld [vmem:[#allocation3 + $0x69] sm:$0x1] }
 0x60c   :  { %v8640_v0 = vmax.f32 %v8638_v54, 0.0 }
 0x60d   :  { %13988 = vmatpush3.bf16.msra.mxu1 %v13987_v11  ;;  %v8646_v11 = vld [vmem:[%s18609_s5 + $0x128] sm:$0xff] }
 0x60e   :  { %13989 = vmatprep.subr.bf16.mxu1 %v14652_v13  ;;  %v14014_v26 = vpack.c.bf16 %v8646_v11, %v8645_v21  ;;  %v8651_v19 = vrot.slane %v8640_v0, 7  ;;  %v8827_v21 = vld [vmem:[#allocation3 + $0x14] sm:$0x1]  ;;  %v8829_v11 = vld [vmem:[#allocation3 + $0x15] sm:$0x1] }
 0x60f   :  { %v8831_v54 = vmax.f32 %v8827_v21, %v8829_v11  ;;  %v9052_v21 = vld [vmem:[%s18609_s5 + $0x228] sm:$0xff] }
 0x610   :  { %v9039_v11 = vld [vmem:[#allocation3 + $0x29] sm:$0x1] }
 0x611   :  { %13991 = vmatpush3.bf16.msra.mxu1 %v13990_v57  ;;  %v8635_v57 = vmax.f32 %v8631_v50, %v8633_v46 }
 0x612   :  { %13992 = vmatprep.subr.bf16.mxu1 %v14652_v13 }
 0x613   :  { %v8637_v37 = vmax.f32 %v8628_v38, %v8635_v57  ;;  %v8849_v38 = vld [vmem:[%s18609_s5 + $0x1b0] sm:$0xff]  ;;  %v8850_v57 = vld [vmem:[%s18609_s5 + $0x1b8] sm:$0xff] }
 0x614   :  { %v14041_v39 = vpack.c.bf16 %v8850_v57, %v8849_v38 }
 0x615   :  { %13994 = vmatpush3.bf16.msra.mxu1 %v13993_v6  ;;  %v8742_v6 = vld [vmem:[%s18609_s5 + $0x140] sm:$0xff]  ;;  %v8639_v12 = vmax.f32 %v8637_v37, 0.0  ;;  %v8945_v37 = vld [vmem:[%s18609_s5 + $0x1c8] sm:$0xff] }
 0x616   :  { %13995 = vmatprep.subr.bf16.mxu1 %v14652_v13  ;;  %v14020_v42 = vpack.c.bf16 %v8743_v2, %v8742_v6  ;;  %v8929_v2 = vld [vmem:[#allocation3 + $0x56] sm:$0x1] }
 0x617   :  { %v8652_v10 = vsel %vm8245_vm6, %v8651_v19, %v8639_v12  ;;  %v8931_v19 = vld [vmem:[#allocation3 + $0x57] sm:$0x1] }
 0x618   :  { %13216 = vmatmul.mubr.msk.f32.vlgmr.msra.gmra.mrb[208].mxu1 %vm2283_vm4, %v8448_v40  ;;  %v8737_v40 = vmax.f32 %v8733_v29, %v8735_v20  ;;  %v8946_v12 = vld [vmem:[%s18609_s5 + $0x1d0] sm:$0xff] }
 0x619   :  { %13997 = vmatpush3.bf16.msra.mxu1 %v13996_v33  ;;  %13234 = vmatprep.mubr.msk.f32.mxu1 %vm14653_vm5, %v14654_v27  ;;  %v8745_v33 = vld [vmem:[%s18609_s5 + $0x158] sm:$0xff] }
 0x61a   :  { %13998 = vmatprep.subr.bf16.mxu1 %v14652_v13  ;;  %v14023_v15 = vpack.c.bf16 %v8745_v33, %v8744_v62  ;;  %v8739_v58 = vmax.f32 %v8731_v52, %v8737_v40  ;;  %v8933_v33 = vmax.f32 %v8929_v2, %v8931_v19  ;;  %v8948_v40 = vld [vmem:[%s18609_s5 + $0x1e0] sm:$0xff]  ;;  %v9139_v2 = vld [vmem:[#allocation3 + $0x6a] sm:$0x1]  ;;  %v9141_v19 = vld [vmem:[#allocation3 + $0x6b] sm:$0x1] }
 0x61c   :  { %v8741_v22 = vmax.f32 %v8739_v58, 0.0 }
 0x61d   :  { %14000 = vmatpush3.bf16.msra.mxu1 %v13999_v16  ;;  %v8747_v16 = vld [vmem:[%s18609_s5 + $0x168] sm:$0xff] }
 0x61e   :  { %14001 = vmatprep.subr.bf16.mxu1 %v14652_v13  ;;  %v14026_v44 = vpack.c.bf16 %v8747_v16, %v8746_v48  ;;  %v8752_v3 = vrot.slane %v8741_v22, 7  ;;  %v8928_v48 = vld [vmem:[#allocation3 + $0x16] sm:$0x1]  ;;  %v8930_v16 = vld [vmem:[#allocation3 + $0x17] sm:$0x1] }
 0x61f   :  { %v8932_v58 = vmax.f32 %v8928_v48, %v8930_v16  ;;  %v9138_v48 = vld [vmem:[#allocation3 + $0x2a] sm:$0x1]  ;;  %v9140_v16 = vld [vmem:[#allocation3 + $0x2b] sm:$0x1] }
 0x621   :  { %14003 = vmatpush3.bf16.msra.mxu1 %v14002_v51  ;;  %v8736_v51 = vmax.f32 %v8732_v35, %v8734_v30 }
 0x622   :  { %14004 = vmatprep.subr.bf16.mxu1 %v14652_v13 }
 0x623   :  { %v8738_v41 = vmax.f32 %v8730_v56, %v8736_v51  ;;  %v8950_v56 = vld [vmem:[%s18609_s5 + $0x1f0] sm:$0xff]  ;;  %v8951_v51 = vld [vmem:[%s18609_s5 + $0x1f8] sm:$0xff] }
 0x624   :  { %v14053_v34 = vpack.c.bf16 %v8951_v51, %v8950_v56 }
 0x625   :  { %14006 = vmatpush3.bf16.msra.mxu1 %v14005_v24  ;;  %v8843_v24 = vld [vmem:[%s18609_s5 + $0x180] sm:$0xff]  ;;  %v8740_v63 = vmax.f32 %v8738_v41, 0.0  ;;  %v9048_v41 = vld [vmem:[%s18609_s5 + $0x208] sm:$0xff] }
 0x626   :  { %14007 = vmatprep.subr.bf16.mxu1 %v14652_v13  ;;  %v14032_v14 = vpack.c.bf16 %v8844_v32, %v8843_v24  ;;  %v9031_v32 = vld [vmem:[#allocation3 + $0x60] sm:$0x1] }
 0x627   :  { %v8753_v9 = vsel %vm8245_vm6, %v8752_v3, %v8740_v63  ;;  %v9033_v3 = vld [vmem:[#allocation3 + $0x61] sm:$0x1]  ;;  %v9049_v63 = vld [vmem:[%s18609_s5 + $0x210] sm:$0xff] }
 0x628   :  { %13235 = vmatmul.mubr.msk.f32.vlgmr.msra.gmra.mrb[208].mxu1 %vm2283_vm4, %v8549_v8  ;;  %v8838_v8 = vmax.f32 %v8834_v55, %v8836_v60 }
 0x629   :  { %14009 = vmatpush3.bf16.msra.mxu1 %v14008_v53  ;;  %13253 = vmatprep.mubr.msk.f32.mxu1 %vm14653_vm5, %v14654_v27  ;;  %v8846_v53 = vld [vmem:[%s18609_s5 + $0x198] sm:$0xff] }
 0x62a   :  { %14010 = vmatprep.subr.bf16.mxu1 %v14652_v13  ;;  %v14035_v49 = vpack.c.bf16 %v8846_v53, %v8845_v61  ;;  %v8840_v50 = vmax.f32 %v8832_v25, %v8838_v8  ;;  %v9035_v53 = vmax.f32 %v9031_v32, %v9033_v3  ;;  %v9030_v8 = vld [vmem:[#allocation3 + $0x20] sm:$0x1]  ;;  %v9240_v32 = vld [vmem:[#allocation3 + $0x6c] sm:$0x1]  ;;  %v9242_v3 = vld [vmem:[#allocation3 + $0x6d] sm:$0x1] }
 0x62c   :  { %v8842_v31 = vmax.f32 %v8840_v50, 0.0 }
 0x62d   :  { %14012 = vmatpush3.bf16.msra.mxu1 %v14011_v28  ;;  %v8848_v28 = vld [vmem:[%s18609_s5 + $0x1a8] sm:$0xff] }
 0x62e   :  { %14013 = vmatprep.subr.bf16.mxu1 %v14652_v13  ;;  %v14038_v46 = vpack.c.bf16 %v8848_v28, %v8847_v59  ;;  %v8853_v6 = vrot.slane %v8842_v31, 7  ;;  %v9037_v59 = vld [vmem:[#allocation3 + $0x28] sm:$0x1]  ;;  %v9051_v28 = vld [vmem:[%s18609_s5 + $0x220] sm:$0xff] }
 0x631   :  { %14015 = vmatpush3.bf16.msra.mxu1 %v14014_v26  ;;  %v8837_v26 = vmax.f32 %v8833_v23, %v8835_v47  ;;  %v14062_v47 = vpack.c.bf16 %v9052_v21, %v9051_v28  ;;  %v9241_v28 = vld [vmem:[#allocation3 + $0x2d] sm:$0x1] }
 0x632   :  { %14016 = vmatprep.subr.bf16.mxu1 %v14652_v13 }
 0x633   :  { %v8839_v0 = vmax.f32 %v8831_v54, %v8837_v26  ;;  %v9053_v54 = vld [vmem:[%s18609_s5 + $0x230] sm:$0xff]  ;;  %v9054_v26 = vld [vmem:[%s18609_s5 + $0x238] sm:$0xff] }
 0x634   :  { %v14065_v57 = vpack.c.bf16 %v9054_v26, %v9053_v54 }
 0x635   :  { %14018 = vmatpush3.bf16.msra.mxu1 %v14017_v43  ;;  %v8944_v43 = vld [vmem:[%s18609_s5 + $0x1c0] sm:$0xff]  ;;  %v8841_v29 = vmax.f32 %v8839_v0, 0.0  ;;  %v9149_v0 = vld [vmem:[%s18609_s5 + $0x248] sm:$0xff] }
 0x636   :  { %14019 = vmatprep.subr.bf16.mxu1 %v14652_v13  ;;  %v14044_v20 = vpack.c.bf16 %v8945_v37, %v8944_v43  ;;  %v9133_v37 = vld [vmem:[#allocation3 + $0x62] sm:$0x1] }
 0x637   :  { %v8854_v62 = vsel %vm8245_vm6, %v8853_v6, %v8841_v29  ;;  %v9135_v6 = vld [vmem:[#allocation3 + $0x63] sm:$0x1]  ;;  %v9150_v29 = vld [vmem:[%s18609_s5 + $0x250] sm:$0xff] }
 0x638   :  { %13254 = vmatmul.mubr.msk.f32.vlgmr.msra.gmra.mrb[208].mxu1 %vm2283_vm4, %v8652_v10  ;;  %v8939_v10 = vmax.f32 %v8935_v17, %v8937_v4 }
 0x639   :  { %14021 = vmatpush3.bf16.msra.mxu1 %v14020_v42  ;;  %13272 = vmatprep.mubr.msk.f32.mxu1 %vm14653_vm5, %v14654_v27  ;;  %v8947_v42 = vld [vmem:[%s18609_s5 + $0x1d8] sm:$0xff] }
 0x63a   :  { %14022 = vmatprep.subr.bf16.mxu1 %v14652_v13  ;;  %v14047_v52 = vpack.c.bf16 %v8947_v42, %v8946_v12  ;;  %v8941_v35 = vmax.f32 %v8933_v33, %v8939_v10  ;;  %v9137_v42 = vmax.f32 %v9133_v37, %v9135_v6  ;;  %v9152_v10 = vld [vmem:[%s18609_s5 + $0x260] sm:$0xff]  ;;  %v9341_v37 = vld [vmem:[#allocation3 + $0x6e] sm:$0x1]  ;;  %v9343_v6 = vld [vmem:[#allocation3 + $0x6f] sm:$0x1] }
 0x63c   :  { %v8943_v18 = vmax.f32 %v8941_v35, 0.0 }
 0x63d   :  { %14024 = vmatpush3.bf16.msra.mxu1 %v14023_v15  ;;  %v8949_v15 = vld [vmem:[%s18609_s5 + $0x1e8] sm:$0xff] }
 0x63e   :  { %14025 = vmatprep.subr.bf16.mxu1 %v14652_v13  ;;  %v14050_v30 = vpack.c.bf16 %v8949_v15, %v8948_v40  ;;  %v8954_v24 = vrot.slane %v8943_v18, 7  ;;  %v9132_v40 = vld [vmem:[#allocation3 + $0x22] sm:$0x1]  ;;  %v9134_v15 = vld [vmem:[#allocation3 + $0x23] sm:$0x1] }
 0x63f   :  { %v9136_v35 = vmax.f32 %v9132_v40, %v9134_v15  ;;  %v9355_v40 = vld [vmem:[%s18609_s5 + $0x2e8] sm:$0xff] }
 0x640   :  { %v9342_v15 = vld [vmem:[#allocation3 + $0x2f] sm:$0x1] }
 0x641   :  { %14027 = vmatpush3.bf16.msra.mxu1 %v14026_v44  ;;  %v8938_v44 = vmax.f32 %v8934_v7, %v8936_v5 }
 0x642   :  { %14028 = vmatprep.subr.bf16.mxu1 %v14652_v13 }
 0x643   :  { %v8940_v22 = vmax.f32 %v8932_v58, %v8938_v44  ;;  %v9154_v58 = vld [vmem:[%s18609_s5 + $0x270] sm:$0xff]  ;;  %v9155_v44 = vld [vmem:[%s18609_s5 + $0x278] sm:$0xff] }
 0x644   :  { %v14077_v51 = vpack.c.bf16 %v9155_v44, %v9154_v58 }
 0x645   :  { %14030 = vmatpush3.bf16.msra.mxu1 %v14029_v1  ;;  %v9047_v1 = vld [vmem:[%s18609_s5 + $0x200] sm:$0xff]  ;;  %v8942_v55 = vmax.f32 %v8940_v22, 0.0  ;;  %v9250_v22 = vld [vmem:[%s18609_s5 + $0x288] sm:$0xff] }
 0x646   :  { %14031 = vmatprep.subr.bf16.mxu1 %v14652_v13  ;;  %v14056_v60 = vpack.c.bf16 %v9048_v41, %v9047_v1  ;;  %v9234_v41 = vld [vmem:[#allocation3 + $0x64] sm:$0x1] }
 0x647   :  { %v8955_v61 = vsel %vm8245_vm6, %v8954_v24, %v8942_v55  ;;  %v9236_v24 = vld [vmem:[#allocation3 + $0x65] sm:$0x1]  ;;  %v9251_v55 = vld [vmem:[%s18609_s5 + $0x290] sm:$0xff] }
 0x648   :  { %13273 = vmatmul.mubr.msk.f32.vlgmr.msra.gmra.mrb[208].mxu1 %vm2283_vm4, %v8753_v9  ;;  %v9042_v9 = vmax.f32 %v9038_v45, %v9040_v36 }
 0x649   :  { %14033 = vmatpush3.bf16.msra.mxu1 %v14032_v14  ;;  %13291 = vmatprep.mubr.msk.f32.mxu1 %vm14653_vm5, %v14654_v27  ;;  %v9050_v14 = vld [vmem:[%s18609_s5 + $0x218] sm:$0xff] }
 0x64a   :  { %14034 = vmatprep.subr.bf16.mxu1 %v14652_v13  ;;  %v14059_v25 = vpack.c.bf16 %v9050_v14, %v9049_v63  ;;  %v9044_v23 = vmax.f32 %v9035_v53, %v9042_v9  ;;  %v9238_v14 = vmax.f32 %v9234_v41, %v9236_v24  ;;  %v9233_v9 = vld [vmem:[#allocation3 + $0x24] sm:$0x1]  ;;  %v9444_v41 = vld [vmem:[#allocation3 + $0x78] sm:$0x1]  ;;  %v9446_v24 = vld [vmem:[#allocation3 + $0x79] sm:$0x1] }
 0x64c   :  { %v9046_v38 = vmax.f32 %v9044_v23, 0.0 }
 0x64d   :  { %14036 = vmatpush3.bf16.msra.mxu1 %v14035_v49  ;;  %v9032_v49 = vld [vmem:[#allocation3 + $0x21] sm:$0x1] }
 0x64e   :  { %14037 = vmatprep.subr.bf16.mxu1 %v14652_v13  ;;  %v9034_v50 = vmax.f32 %v9030_v8, %v9032_v49  ;;  %v9057_v43 = vrot.slane %v9046_v38, 7  ;;  %v9239_v8 = vld [vmem:[#allocation3 + $0x2c] sm:$0x1]  ;;  %v9253_v49 = vld [vmem:[%s18609_s5 + $0x2a0] sm:$0xff] }
 0x651   :  { %14039 = vmatpush3.bf16.msra.mxu1 %v14038_v46  ;;  %v9041_v46 = vmax.f32 %v9037_v59, %v9039_v11  ;;  %v9254_v59 = vld [vmem:[%s18609_s5 + $0x2a8] sm:$0xff] }
 0x652   :  { %14040 = vmatprep.subr.bf16.mxu1 %v14652_v13  ;;  %v14086_v11 = vpack.c.bf16 %v9254_v59, %v9253_v49  ;;  %v9445_v49 = vld [vmem:[#allocation3 + $0x39] sm:$0x1] }
 0x653   :  { %v9043_v31 = vmax.f32 %v9034_v50, %v9041_v46  ;;  %v9255_v50 = vld [vmem:[%s18609_s5 + $0x2b0] sm:$0xff]  ;;  %v9256_v46 = vld [vmem:[%s18609_s5 + $0x2b8] sm:$0xff] }
 0x654   :  { %v14089_v26 = vpack.c.bf16 %v9256_v46, %v9255_v50 }
 0x655   :  { %14042 = vmatpush3.bf16.msra.mxu1 %v14041_v39  ;;  %v9148_v39 = vld [vmem:[%s18609_s5 + $0x240] sm:$0xff]  ;;  %v9045_v17 = vmax.f32 %v9043_v31, 0.0  ;;  %v9351_v31 = vld [vmem:[%s18609_s5 + $0x2c8] sm:$0xff] }
 0x656   :  { %14043 = vmatprep.subr.bf16.mxu1 %v14652_v13  ;;  %v14068_v4 = vpack.c.bf16 %v9149_v0, %v9148_v39  ;;  %v9335_v0 = vld [vmem:[#allocation3 + $0x66] sm:$0x1] }
 0x657   :  { %v9058_v12 = vsel %vm8245_vm6, %v9057_v43, %v9045_v17  ;;  %v9337_v43 = vld [vmem:[#allocation3 + $0x67] sm:$0x1]  ;;  %v9352_v17 = vld [vmem:[%s18609_s5 + $0x2d0] sm:$0xff] }
 0x658   :  { %13292 = vmatmul.mubr.msk.f32.vlgmr.msra.gmra.mrb[208].mxu1 %vm2283_vm4, %v8854_v62  ;;  %v9143_v62 = vmax.f32 %v9139_v2, %v9141_v19 }
 0x659   :  { %14045 = vmatpush3.bf16.msra.mxu1 %v14044_v20  ;;  %13310 = vmatprep.mubr.msk.f32.mxu1 %vm14653_vm5, %v14654_v27  ;;  %v9151_v20 = vld [vmem:[%s18609_s5 + $0x258] sm:$0xff] }
 0x65a   :  { %14046 = vmatprep.subr.bf16.mxu1 %v14652_v13  ;;  %v14071_v33 = vpack.c.bf16 %v9151_v20, %v9150_v29  ;;  %v9145_v7 = vmax.f32 %v9137_v42, %v9143_v62  ;;  %v9339_v20 = vmax.f32 %v9335_v0, %v9337_v43  ;;  %v9334_v62 = vld [vmem:[#allocation3 + $0x26] sm:$0x1]  ;;  %v9545_v0 = vld [vmem:[#allocation3 + $0x7a] sm:$0x1]  ;;  %v9547_v43 = vld [vmem:[#allocation3 + $0x7b] sm:$0x1] }
 0x65c   :  { %v9147_v56 = vmax.f32 %v9145_v7, 0.0 }
 0x65d   :  { %14048 = vmatpush3.bf16.msra.mxu1 %v14047_v52  ;;  %v9153_v52 = vld [vmem:[%s18609_s5 + $0x268] sm:$0xff] }
 0x65e   :  { %14049 = vmatprep.subr.bf16.mxu1 %v14652_v13  ;;  %v14074_v5 = vpack.c.bf16 %v9153_v52, %v9152_v10  ;;  %v9158_v1 = vrot.slane %v9147_v56, 7  ;;  %v9340_v10 = vld [vmem:[#allocation3 + $0x2e] sm:$0x1]  ;;  %v9354_v52 = vld [vmem:[%s18609_s5 + $0x2e0] sm:$0xff] }
 0x661   :  { %14051 = vmatpush3.bf16.msra.mxu1 %v14050_v30  ;;  %v9142_v30 = vmax.f32 %v9138_v48, %v9140_v16  ;;  %v14098_v16 = vpack.c.bf16 %v9355_v40, %v9354_v52  ;;  %v9546_v52 = vld [vmem:[#allocation3 + $0x3b] sm:$0x1] }
 0x662   :  { %14052 = vmatprep.subr.bf16.mxu1 %v14652_v13 }
 0x663   :  { %v9144_v18 = vmax.f32 %v9136_v35, %v9142_v30  ;;  %v9356_v35 = vld [vmem:[%s18609_s5 + $0x2f0] sm:$0xff]  ;;  %v9357_v30 = vld [vmem:[%s18609_s5 + $0x2f8] sm:$0xff] }
 0x664   :  { %v14101_v44 = vpack.c.bf16 %v9357_v30, %v9356_v35 }
 0x665   :  { %14054 = vmatpush3.bf16.msra.mxu1 %v14053_v34  ;;  %v9249_v34 = vld [vmem:[%s18609_s5 + $0x280] sm:$0xff]  ;;  %v9146_v45 = vmax.f32 %v9144_v18, 0.0  ;;  %v9454_v18 = vld [vmem:[%s18609_s5 + $0x308] sm:$0xff] }
 0x666   :  { %14055 = vmatprep.subr.bf16.mxu1 %v14652_v13  ;;  %v14080_v36 = vpack.c.bf16 %v9250_v22, %v9249_v34  ;;  %v9437_v22 = vld [vmem:[#allocation3 + $0x70] sm:$0x1] }
 0x667   :  { %v9159_v63 = vsel %vm8245_vm6, %v9158_v1, %v9146_v45  ;;  %v9439_v1 = vld [vmem:[#allocation3 + $0x71] sm:$0x1] }
 0x668   :  { %13311 = vmatmul.mubr.msk.f32.vlgmr.msra.gmra.mrb[208].mxu1 %vm2283_vm4, %v8955_v61  ;;  %v9244_v61 = vmax.f32 %v9240_v32, %v9242_v3  ;;  %v9455_v45 = vld [vmem:[%s18609_s5 + $0x310] sm:$0xff] }
 0x669   :  { %14057 = vmatpush3.bf16.msra.mxu1 %v14056_v60  ;;  %13329 = vmatprep.mubr.msk.f32.mxu1 %vm14653_vm5, %v14654_v27  ;;  %v9252_v60 = vld [vmem:[%s18609_s5 + $0x298] sm:$0xff] }
 0x66a   :  { %14058 = vmatprep.subr.bf16.mxu1 %v14652_v13  ;;  %v14083_v53 = vpack.c.bf16 %v9252_v60, %v9251_v55  ;;  %v9246_v21 = vmax.f32 %v9238_v14, %v9244_v61  ;;  %v9441_v60 = vmax.f32 %v9437_v22, %v9439_v1  ;;  %v9436_v61 = vld [vmem:[#allocation3 + $0x30] sm:$0x1]  ;;  %v9646_v22 = vld [vmem:[#allocation3 + $0x7c] sm:$0x1]  ;;  %v9648_v1 = vld [vmem:[#allocation3 + $0x7d] sm:$0x1] }
 0x66c   :  { %v9248_v54 = vmax.f32 %v9246_v21, 0.0 }
 0x66d   :  { %14060 = vmatpush3.bf16.msra.mxu1 %v14059_v25  ;;  %v9235_v25 = vld [vmem:[#allocation3 + $0x25] sm:$0x1] }
 0x66e   :  { %14061 = vmatprep.subr.bf16.mxu1 %v14652_v13  ;;  %v9237_v23 = vmax.f32 %v9233_v9, %v9235_v25  ;;  %v9259_v39 = vrot.slane %v9248_v54, 7  ;;  %v9443_v9 = vld [vmem:[#allocation3 + $0x38] sm:$0x1]  ;;  %v9457_v25 = vld [vmem:[%s18609_s5 + $0x320] sm:$0xff] }
 0x671   :  { %14063 = vmatpush3.bf16.msra.mxu1 %v14062_v47  ;;  %v9243_v47 = vmax.f32 %v9239_v8, %v9241_v28  ;;  %v9458_v8 = vld [vmem:[%s18609_s5 + $0x328] sm:$0xff] }
 0x672   :  { %14064 = vmatprep.subr.bf16.mxu1 %v14652_v13  ;;  %v14110_v28 = vpack.c.bf16 %v9458_v8, %v9457_v25  ;;  %v9647_v25 = vld [vmem:[#allocation3 + $0x3d] sm:$0x1] }
 0x673   :  { %v9245_v38 = vmax.f32 %v9237_v23, %v9243_v47  ;;  %v9459_v23 = vld [vmem:[%s18609_s5 + $0x330] sm:$0xff]  ;;  %v9460_v47 = vld [vmem:[%s18609_s5 + $0x338] sm:$0xff] }
 0x674   :  { %v14113_v46 = vpack.c.bf16 %v9460_v47, %v9459_v23 }
 0x675   :  { %14066 = vmatpush3.bf16.msra.mxu1 %v14065_v57  ;;  %v9350_v57 = vld [vmem:[%s18609_s5 + $0x2c0] sm:$0xff]  ;;  %v9247_v2 = vmax.f32 %v9245_v38, 0.0  ;;  %v9555_v38 = vld [vmem:[%s18609_s5 + $0x348] sm:$0xff] }
 0x676   :  { %14067 = vmatprep.subr.bf16.mxu1 %v14652_v13  ;;  %v14092_v19 = vpack.c.bf16 %v9351_v31, %v9350_v57  ;;  %v9539_v31 = vld [vmem:[#allocation3 + $0x72] sm:$0x1] }
 0x677   :  { %v9260_v29 = vsel %vm8245_vm6, %v9259_v39, %v9247_v2  ;;  %v9541_v39 = vld [vmem:[#allocation3 + $0x73] sm:$0x1] }
 0x678   :  { %13330 = vmatmul.mubr.msk.f32.vlgmr.msra.gmra.mrb[208].mxu1 %vm2283_vm4, %v9058_v12  ;;  %v9345_v12 = vmax.f32 %v9341_v37, %v9343_v6  ;;  %v9556_v2 = vld [vmem:[%s18609_s5 + $0x350] sm:$0xff] }
 0x679   :  { %14069 = vmatpush3.bf16.msra.mxu1 %v14068_v4  ;;  %13348 = vmatprep.mubr.msk.f32.mxu1 %vm14653_vm5, %v14654_v27  ;;  %v9353_v4 = vld [vmem:[%s18609_s5 + $0x2d8] sm:$0xff] }
 0x67a   :  { %14070 = vmatprep.subr.bf16.mxu1 %v14652_v13  ;;  %v14095_v42 = vpack.c.bf16 %v9353_v4, %v9352_v17  ;;  %v9347_v48 = vmax.f32 %v9339_v20, %v9345_v12  ;;  %v9543_v4 = vmax.f32 %v9539_v31, %v9541_v39  ;;  %v9538_v12 = vld [vmem:[#allocation3 + $0x32] sm:$0x1]  ;;  %v9747_v31 = vld [vmem:[#allocation3 + $0x7e] sm:$0x1]  ;;  %v9749_v39 = vld [vmem:[#allocation3 + $0x7f] sm:$0x1] }
 0x67c   :  { %v9349_v58 = vmax.f32 %v9347_v48, 0.0 }
 0x67d   :  { %14072 = vmatpush3.bf16.msra.mxu1 %v14071_v33  ;;  %v9336_v33 = vld [vmem:[#allocation3 + $0x27] sm:$0x1] }
 0x67e   :  { %14073 = vmatprep.subr.bf16.mxu1 %v14652_v13  ;;  %v9338_v7 = vmax.f32 %v9334_v62, %v9336_v33  ;;  %v9360_v34 = vrot.slane %v9349_v58, 7  ;;  %v9544_v62 = vld [vmem:[#allocation3 + $0x3a] sm:$0x1]  ;;  %v9558_v33 = vld [vmem:[%s18609_s5 + $0x360] sm:$0xff] }
 0x681   :  { %14075 = vmatpush3.bf16.msra.mxu1 %v14074_v5  ;;  %v9344_v5 = vmax.f32 %v9340_v10, %v9342_v15  ;;  %v9559_v10 = vld [vmem:[%s18609_s5 + $0x368] sm:$0xff] }
 0x682   :  { %14076 = vmatprep.subr.bf16.mxu1 %v14652_v13  ;;  %v14122_v15 = vpack.c.bf16 %v9559_v10, %v9558_v33  ;;  %v9748_v33 = vld [vmem:[#allocation3 + $0x3f] sm:$0x1] }
 0x683   :  { %v9346_v56 = vmax.f32 %v9338_v7, %v9344_v5  ;;  %v9560_v7 = vld [vmem:[%s18609_s5 + $0x370] sm:$0xff]  ;;  %v9561_v5 = vld [vmem:[%s18609_s5 + $0x378] sm:$0xff] }
 0x684   :  { %v14125_v30 = vpack.c.bf16 %v9561_v5, %v9560_v7 }
 0x685   :  { %14078 = vmatpush3.bf16.msra.mxu1 %v14077_v51  ;;  %v9453_v51 = vld [vmem:[%s18609_s5 + $0x300] sm:$0xff]  ;;  %v9348_v32 = vmax.f32 %v9346_v56, 0.0  ;;  %v9656_v56 = vld [vmem:[%s18609_s5 + $0x388] sm:$0xff] }
 0x686   :  { %14079 = vmatprep.subr.bf16.mxu1 %v14652_v13  ;;  %v14104_v3 = vpack.c.bf16 %v9454_v18, %v9453_v51  ;;  %v9640_v18 = vld [vmem:[#allocation3 + $0x74] sm:$0x1] }
 0x687   :  { %v9361_v55 = vsel %vm8245_vm6, %v9360_v34, %v9348_v32  ;;  %v9642_v34 = vld [vmem:[#allocation3 + $0x75] sm:$0x1] }
 0x688   :  { %13349 = vmatmul.mubr.msk.f32.vlgmr.msra.gmra.mrb[208].mxu1 %vm2283_vm4, %v9159_v63  ;;  %v9448_v63 = vmax.f32 %v9444_v41, %v9446_v24  ;;  %v9657_v32 = vld [vmem:[%s18609_s5 + $0x390] sm:$0xff] }
 0x689   :  { %14081 = vmatpush3.bf16.msra.mxu1 %v14080_v36  ;;  %13367 = vmatprep.mubr.msk.f32.mxu1 %vm14653_vm5, %v14654_v27  ;;  %v9456_v36 = vld [vmem:[%s18609_s5 + $0x318] sm:$0xff] }
 0x68a   :  { %14082 = vmatprep.subr.bf16.mxu1 %v14652_v13  ;;  %v14107_v14 = vpack.c.bf16 %v9456_v36, %v9455_v45  ;;  %v9450_v59 = vmax.f32 %v9441_v60, %v9448_v63  ;;  %v9644_v36 = vmax.f32 %v9640_v18, %v9642_v34  ;;  %v9639_v63 = vld [vmem:[#allocation3 + $0x34] sm:$0x1]  ;;  %v9845_v34 = vld [vmem:[%s18611_s7 + $0x18] sm:$0xff] }
 0x68b   :  { %v9844_v18 = vld [vmem:[%s18611_s7 + $0x10] sm:$0xff] }
 0x68c   :  { %v9452_v50 = vmax.f32 %v9450_v59, 0.0 }
 0x68d   :  { %14084 = vmatpush3.bf16.msra.mxu1 %v14083_v53  ;;  %v9438_v53 = vld [vmem:[#allocation3 + $0x31] sm:$0x1] }
 0x68e   :  { %14085 = vmatprep.subr.bf16.mxu1 %v14652_v13  ;;  %v9440_v21 = vmax.f32 %v9436_v61, %v9438_v53  ;;  %v9463_v57 = vrot.slane %v9452_v50, 7  ;;  %v9645_v61 = vld [vmem:[#allocation3 + $0x3c] sm:$0x1]  ;;  %v9659_v53 = vld [vmem:[%s18609_s5 + $0x3a0] sm:$0xff] }
 0x691   :  { %14087 = vmatpush3.bf16.msra.mxu1 %v14086_v11  ;;  %v9447_v11 = vmax.f32 %v9443_v9, %v9445_v49  ;;  %v9660_v9 = vld [vmem:[%s18609_s5 + $0x3a8] sm:$0xff] }
 0x692   :  { %14088 = vmatprep.subr.bf16.mxu1 %v14652_v13  ;;  %v14134_v49 = vpack.c.bf16 %v9660_v9, %v9659_v53  ;;  %v9854_v9 = vld [vmem:[%s18611_s7 + $0x60] sm:$0xff] }
 0x693   :  { %v9449_v54 = vmax.f32 %v9440_v21, %v9447_v11  ;;  %v9661_v21 = vld [vmem:[%s18609_s5 + $0x3b0] sm:$0xff]  ;;  %v9662_v11 = vld [vmem:[%s18609_s5 + $0x3b8] sm:$0xff] }
 0x694   :  { %v14137_v47 = vpack.c.bf16 %v9662_v11, %v9661_v21  ;;  %v10843_v21 = vld [vmem:[%s18610_s6] ss:$0 sm:$0xff] }
 0x695   :  { %14090 = vmatpush3.bf16.msra.mxu1 %v14089_v26  ;;  %v9554_v26 = vld [vmem:[%s18609_s5 + $0x340] sm:$0xff]  ;;  %v9451_v37 = vmax.f32 %v9449_v54, 0.0  ;;  %v9757_v54 = vld [vmem:[%s18609_s5 + $0x3c8] sm:$0xff] }
 0x696   :  { %14091 = vmatprep.subr.bf16.mxu1 %v14652_v13  ;;  %v14116_v6 = vpack.c.bf16 %v9555_v38, %v9554_v26  ;;  %v9741_v38 = vld [vmem:[#allocation3 + $0x76] sm:$0x1]  ;;  %v9936_v11 = vld [vmem:[%s18613_s9] sm:$0xff] }
 0x697   :  { %v9464_v17 = vsel %vm8245_vm6, %v9463_v57, %v9451_v37  ;;  %v9743_v57 = vld [vmem:[#allocation3 + $0x77] sm:$0x1] }
 0x698   :  { %13368 = vmatmul.mubr.msk.f32.vlgmr.msra.gmra.mrb[208].mxu1 %vm2283_vm4, %v9260_v29  ;;  %v9549_v29 = vmax.f32 %v9545_v0, %v9547_v43  ;;  %v9758_v37 = vld [vmem:[%s18609_s5 + $0x3d0] sm:$0xff] }
 0x699   :  { %14093 = vmatpush3.bf16.msra.mxu1 %v14092_v19  ;;  %13386 = vmatprep.mubr.msk.f32.mxu1 %vm14653_vm5, %v14654_v27  ;;  %v9557_v19 = vld [vmem:[%s18609_s5 + $0x358] sm:$0xff] }
 0x69a   :  { %14094 = vmatprep.subr.bf16.mxu1 %v14652_v13  ;;  %v14119_v20 = vpack.c.bf16 %v9557_v19, %v9556_v2  ;;  %v9551_v40 = vmax.f32 %v9543_v4, %v9549_v29  ;;  %v9745_v19 = vmax.f32 %v9741_v38, %v9743_v57  ;;  %v9740_v29 = vld [vmem:[#allocation3 + $0x36] sm:$0x1]  ;;  %v9939_v57 = vld [vmem:[%s18613_s9 + $0x18] sm:$0xff] }
 0x69b   :  { %v9938_v38 = vld [vmem:[%s18613_s9 + $0x10] sm:$0xff] }
 0x69c   :  { %v9553_v35 = vmax.f32 %v9551_v40, 0.0 }
 0x69d   :  { %14096 = vmatpush3.bf16.msra.mxu1 %v14095_v42  ;;  %v9540_v42 = vld [vmem:[#allocation3 + $0x33] sm:$0x1] }
 0x69e   :  { %14097 = vmatprep.subr.bf16.mxu1 %v14652_v13  ;;  %v9542_v48 = vmax.f32 %v9538_v12, %v9540_v42  ;;  %v9564_v51 = vrot.slane %v9553_v35, 7  ;;  %v9746_v12 = vld [vmem:[#allocation3 + $0x3e] sm:$0x1]  ;;  %v9760_v42 = vld [vmem:[%s18609_s5 + $0x3e0] sm:$0xff] }
 0x6a1   :  { %14099 = vmatpush3.bf16.msra.mxu1 %v14098_v16  ;;  %v9548_v16 = vmax.f32 %v9544_v62, %v9546_v52  ;;  %v9761_v62 = vld [vmem:[%s18609_s5 + $0x3e8] sm:$0xff] }
 0x6a2   :  { %14100 = vmatprep.subr.bf16.mxu1 %v14652_v13  ;;  %v14146_v52 = vpack.c.bf16 %v9761_v62, %v9760_v42 }
 0x6a3   :  { %v9550_v58 = vmax.f32 %v9542_v48, %v9548_v16  ;;  %v9762_v48 = vld [vmem:[%s18609_s5 + $0x3f0] sm:$0xff]  ;;  %v9763_v16 = vld [vmem:[%s18609_s5 + $0x3f8] sm:$0xff] }
 0x6a4   :  { %v14149_v5 = vpack.c.bf16 %v9763_v16, %v9762_v48 }
 0x6a5   :  { %14102 = vmatpush3.bf16.msra.mxu1 %v14101_v44  ;;  %v9655_v44 = vld [vmem:[%s18609_s5 + $0x380] sm:$0xff]  ;;  %v9552_v41 = vmax.f32 %v9550_v58, 0.0  ;;  %v9843_v58 = vld [vmem:[%s18611_s7 + $0x8] sm:$0xff] }
 0x6a6   :  { %14103 = vmatprep.subr.bf16.mxu1 %v14652_v13  ;;  %v14128_v24 = vpack.c.bf16 %v9656_v56, %v9655_v44 }
 0x6a7   :  { %v9565_v45 = vsel %vm8245_vm6, %v9564_v51, %v9552_v41  ;;  %v9846_v41 = vld [vmem:[%s18611_s7 + $0x20] sm:$0xff] }
 0x6a8   :  { %13387 = vmatmul.mubr.msk.f32.vlgmr.msra.gmra.mrb[208].mxu1 %vm2283_vm4, %v9361_v55  ;;  %v9650_v55 = vmax.f32 %v9646_v22, %v9648_v1  ;;  %v14155_v1 = vpack.c.bf16 %v9845_v34, %v9844_v18 }
 0x6a9   :  { %14105 = vmatpush3.bf16.msra.mxu1 %v14104_v3  ;;  %13405 = vmatprep.mubr.msk.f32.mxu1 %vm14653_vm5, %v14654_v27  ;;  %v9658_v3 = vld [vmem:[%s18609_s5 + $0x398] sm:$0xff] }
 0x6aa   :  { %14106 = vmatprep.subr.bf16.mxu1 %v14652_v13  ;;  %v14131_v60 = vpack.c.bf16 %v9658_v3, %v9657_v32  ;;  %v9652_v8 = vmax.f32 %v9644_v36, %v9650_v55  ;;  %v9848_v3 = vld [vmem:[%s18611_s7 + $0x30] sm:$0xff]  ;;  %v9850_v55 = vld [vmem:[%s18611_s7 + $0x40] sm:$0xff] }
 0x6ac   :  { %v9654_v23 = vmax.f32 %v9652_v8, 0.0 }
 0x6ad   :  { %14108 = vmatpush3.bf16.msra.mxu1 %v14107_v14  ;;  %v9641_v14 = vld [vmem:[#allocation3 + $0x35] sm:$0x1] }
 0x6ae   :  { %14109 = vmatprep.subr.bf16.mxu1 %v14652_v13  ;;  %v9643_v59 = vmax.f32 %v9639_v63, %v9641_v14  ;;  %v9665_v26 = vrot.slane %v9654_v23, 7  ;;  %v9852_v14 = vld [vmem:[%s18611_s7 + $0x50] sm:$0xff]  ;;  %v9937_v23 = vld [vmem:[%s18613_s9 + $0x8] sm:$0xff] }
 0x6b1   :  { %14111 = vmatpush3.bf16.msra.mxu1 %v14110_v28  ;;  %v9649_v28 = vmax.f32 %v9645_v61, %v9647_v25  ;;  %v9853_v61 = vld [vmem:[%s18611_s7 + $0x58] sm:$0xff]  ;;  %v9855_v25 = vld [vmem:[%s18611_s7 + $0x68] sm:$0xff] }
 0x6b2   :  { %14112 = vmatprep.subr.bf16.mxu1 %v14652_v13  ;;  %v14167_v53 = vpack.c.bf16 %v9853_v61, %v9852_v14  ;;  %v14170_v8 = vpack.c.bf16 %v9855_v25, %v9854_v9 }
 0x6b3   :  { %v9651_v50 = vmax.f32 %v9643_v59, %v9649_v28  ;;  %v9857_v59 = vld [vmem:[%s18611_s7 + $0x78] sm:$0xff] }
 0x6b5   :  { %14114 = vmatpush3.bf16.msra.mxu1 %v14113_v46  ;;  %v9756_v46 = vld [vmem:[%s18609_s5 + $0x3c0] sm:$0xff]  ;;  %v9653_v0 = vmax.f32 %v9651_v50, 0.0 }
 0x6b6   :  { %14115 = vmatprep.subr.bf16.mxu1 %v14652_v13  ;;  %v14140_v43 = vpack.c.bf16 %v9757_v54, %v9756_v46  ;;  %v14176_v54 = vpack.c.bf16 %v9937_v23, %v9936_v11 }
 0x6b7   :  { %v9666_v2 = vsel %vm8245_vm6, %v9665_v26, %v9653_v0  ;;  %v9941_v0 = vld [vmem:[%s18613_s9 + $0x28] sm:$0xff] }
 0x6b8   :  { %13406 = vmatmul.mubr.msk.f32.vlgmr.msra.gmra.mrb[208].mxu1 %vm2283_vm4, %v9464_v17  ;;  %v9751_v17 = vmax.f32 %v9747_v31, %v9749_v39  ;;  %v14179_v31 = vpack.c.bf16 %v9939_v57, %v9938_v38  ;;  %v9940_v39 = vld [vmem:[%s18613_s9 + $0x20] sm:$0xff] }
 0x6b9   :  { %14117 = vmatpush3.bf16.msra.mxu1 %v14116_v6  ;;  %13424 = vmatprep.mubr.msk.f32.mxu1 %vm14653_vm5, %v14654_v27  ;;  %v9759_v6 = vld [vmem:[%s18609_s5 + $0x3d8] sm:$0xff] }
 0x6ba   :  { %14118 = vmatprep.subr.bf16.mxu1 %v14652_v13  ;;  %v14143_v4 = vpack.c.bf16 %v9759_v6, %v9758_v37  ;;  %v9753_v10 = vmax.f32 %v9745_v19, %v9751_v17  ;;  %v9943_v37 = vld [vmem:[%s18613_s9 + $0x38] sm:$0xff] }
 0x6bc   :  { %v9755_v7 = vmax.f32 %v9753_v10, 0.0 }
 0x6bd   :  { %14120 = vmatpush3.bf16.msra.mxu1 %v14119_v20  ;;  %v9742_v20 = vld [vmem:[#allocation3 + $0x37] sm:$0x1] }
 0x6be   :  { %14121 = vmatprep.subr.bf16.mxu1 %v14652_v13  ;;  %v9744_v40 = vmax.f32 %v9740_v29, %v9742_v20  ;;  %v9766_v44 = vrot.slane %v9755_v7, 7 }
 0x6c1   :  { %14123 = vmatpush3.bf16.msra.mxu1 %v14122_v15  ;;  %v9750_v15 = vmax.f32 %v9746_v12, %v9748_v33 }
 0x6c2   :  { %14124 = vmatprep.subr.bf16.mxu1 %v14652_v13 }
 0x6c3   :  { %v9752_v35 = vmax.f32 %v9744_v40, %v9750_v15 }
 0x6c5   :  { %14126 = vmatpush3.bf16.msra.mxu1 %v14125_v30  ;;  %v9842_v30 = vld [vmem:[%s18611_s7] sm:$0xff]  ;;  %v9754_v56 = vmax.f32 %v9752_v35, 0.0 }
 0x6c6   :  { %14127 = vmatprep.subr.bf16.mxu1 %v14652_v13  ;;  %v14152_v51 = vpack.c.bf16 %v9843_v58, %v9842_v30 }
 0x6c7   :  { %v9767_v22 = vsel %vm8245_vm6, %v9766_v44, %v9754_v56 }
 0x6c8   :  { %13425 = vmatmul.mubr.msk.f32.vlgmr.msra.gmra.mrb[208].mxu1 %vm2283_vm4, %v9565_v45  ;;  %v9849_v45 = vld [vmem:[%s18611_s7 + $0x38] sm:$0xff] }
 0x6c9   :  { %14129 = vmatpush3.bf16.msra.mxu1 %v14128_v24  ;;  %13443 = vmatprep.mubr.msk.f32.mxu1 %vm14653_vm5, %v14654_v27  ;;  %v9847_v24 = vld [vmem:[%s18611_s7 + $0x28] sm:$0xff]  ;;  %v14161_v36 = vpack.c.bf16 %v9849_v45, %v9848_v3 }
 0x6ca   :  { %14130 = vmatprep.subr.bf16.mxu1 %v14652_v13  ;;  %v14158_v32 = vpack.c.bf16 %v9847_v24, %v9846_v41 }
 0x6cd   :  { %14132 = vmatpush3.bf16.msra.mxu1 %v14131_v60  ;;  %v9851_v60 = vld [vmem:[%s18611_s7 + $0x48] sm:$0xff] }
 0x6ce   :  { %14133 = vmatprep.subr.bf16.mxu1 %v14652_v13  ;;  %v14164_v63 = vpack.c.bf16 %v9851_v60, %v9850_v55 }
 0x6d1   :  { %14135 = vmatpush3.bf16.msra.mxu1 %v14134_v49  ;;  %v9856_v49 = vld [vmem:[%s18611_s7 + $0x70] sm:$0xff] }
 0x6d2   :  { %14136 = vmatprep.subr.bf16.mxu1 %v14652_v13  ;;  %v14173_v28 = vpack.c.bf16 %v9857_v59, %v9856_v49 }
 0x6d5   :  { %14138 = vmatpush3.bf16.msra.mxu1 %v14137_v47 }
 0x6d6   :  { %14139 = vmatprep.subr.bf16.mxu1 %v14652_v13 }
 0x6d8   :  { %13444 = vmatmul.mubr.msk.f32.vlgmr.msra.gmra.mrb[208].mxu1 %vm2283_vm4, %v9666_v2  ;;  %v10860_v2 = vld [vmem:[%s18612_s8] ss:$0 sm:$0xff]  ;;  %s14655_s8 = smov [#allocation4]  }
 0x6d9   :  { %14141 = vmatpush3.bf16.msra.mxu1 %v14140_v43  ;;  %13462 = vmatprep.mubr.msk.f32.mxu1 %vm14653_vm5, %v14654_v27  ;;  %v14182_v43 = vpack.c.bf16 %v9941_v0, %v9940_v39 }
 0x6da   :  { %14142 = vmatprep.subr.bf16.mxu1 %v14652_v13 }
 0x6dd   :  { %14144 = vmatpush3.bf16.msra.mxu1 %v14143_v4 }
 0x6de   :  { %14145 = vmatprep.subr.bf16.mxu1 %v14652_v13 }
 0x6e1   :  { %14147 = vmatpush3.bf16.msra.mxu1 %v14146_v52 }
 0x6e2   :  { %14148 = vmatprep.subr.bf16.mxu1 %v14652_v13 }
 0x6e5   :  { %14150 = vmatpush3.bf16.msra.mxu1 %v14149_v5 }
 0x6e6   :  { %14151 = vmatprep.subr.bf16.mxu1 %v14652_v13 }
 0x6e8   :  { %13463 = vmatmul.mubr.msk.f32.vlgmr.msra.gmra.mrb[208].mxu1 %vm2283_vm4, %v9767_v22 }
 0x6e9   :  { %14153 = vmatpush3.bf16.msra.mxu1 %v14152_v51  ;;  %13497 = vmatprep.mubr.msk.f32.mxu1 %vm14653_vm5, %v14654_v27 }
 0x6ea   :  { %14154 = vmatprep.subr.bf16.mxu1 %v14652_v13 }
 0x6ed   :  { %14156 = vmatpush3.bf16.msra.mxu1 %v14155_v1 }
 0x6ee   :  { %14157 = vmatprep.subr.bf16.mxu1 %v14652_v13 }
 0x6f1   :  { %14159 = vmatpush3.bf16.msra.mxu1 %v14158_v32 }
 0x6f2   :  { %14160 = vmatprep.subr.bf16.mxu1 %v14652_v13 }
 0x6f5   :  { %14162 = vmatpush3.bf16.msra.mxu1 %v14161_v36 }
 0x6f6   :  { %14163 = vmatprep.subr.bf16.mxu1 %v14652_v13 }
 0x6f9   :  { %14165 = vmatpush3.bf16.msra.mxu1 %v14164_v63 }
 0x6fa   :  { %14166 = vmatprep.subr.bf16.mxu1 %v14652_v13 }
 0x6fd   :  { %14168 = vmatpush3.bf16.msra.mxu1 %v14167_v53 }
 0x6fe   :  { %14169 = vmatprep.subr.bf16.mxu1 %v14652_v13 }
 0x701   :  { %14171 = vmatpush3.bf16.msra.mxu1 %v14170_v8 }
 0x702   :  { %14172 = vmatprep.subr.bf16.mxu1 %v14652_v13 }
 0x705   :  { %14174 = vmatpush3.bf16.msra.mxu1 %v14173_v28 }
 0x706   :  { %14175 = vmatprep.subr.bf16.mxu1 %v14652_v13 }
 0x7bb   :  { %v9836_v47 = vpop.f32.mrb[208].mxu1 }
 0x7bc   :  { %v14219_v50 = vadd.f32 %v10843_v21, %v9836_v47  ;;  %v13464_v46 = vpop.f32.mrb[209].mxu1 }
 0x7be   :  { %v9841_v26 = vmax.f32 %v14219_v50, 0.0 }
 0x7c0   :  { %13498 = vmatmul.mubr.f32.vlgmr.msra.gmra.mrb[210].mxu1 %v9841_v26 }
 0x7c1   :  { %14177 = vmatpush3.bf16.msra.mxu1 %v14176_v54  ;;  %13516 = vmatprep.mubr.msk.f32.mxu1 %vm14653_vm5, %v14654_v27  ;;  %v9942_v27 = vld [vmem:[%s18613_s9 + $0x30] sm:$0xff]  ;;  %s10045_s9 = sshll.u32 %s14655_s8, 4  ;;  %s10046_s9 = int_to_ptr.vmem [resolvable:$true] %s10045_s9 }
 0x7c2   :  { %14178 = vmatprep.subr.bf16.mxu1 %v14652_v13  ;;  %v14185_v6 = vpack.c.bf16 %v9943_v37, %v9942_v27  ;;  %p14632_p1 = scmp.lt.s32.totalorder %s10046_s9, %s10046_s9 }
 0x7c5   :  { %14180 = vmatpush3.bf16.msra.mxu1 %v14179_v31 }
 0x7c6   :  { %14181 = vmatprep.subr.bf16.mxu1 %v14652_v13 }
 0x7c9   :  { %14183 = vmatpush3.bf16.msra.mxu1 %v14182_v43 }
 0x7ca   :  { %14184 = vmatprep.subr.bf16.mxu1 %v14652_v13  ;;  %v10861_v13 = vld [vmem:[%s18614_s10] ss:$0 sm:$0xff]  ;;  %s14627_s10 = scalar_lea.vmem %s10046_s9, 32 }
 0x7cb   :  { %p14628_p0 = scmp.ne.s32.totalorder %s10046_s9, %s14627_s10  ;;  %p14633_p2 = scmp.lt.s32.totalorder %s14627_s10, %s14627_s10 }
 0x7cd   :  { %14186 = vmatpush3.bf16.msra.mxu1 %v14185_v6  ;;  %p14634_p3 = por %p14633_p2, %p14632_p1 }
 0x7cf   :  { %p14635_p4 = pnand %p14634_p3, %p14628_p0 }
 0x893   :  { %v9931_v19 = vpop.f32.mrb[210].mxu1 }
 0x894   :  { %v9932_v17 = vadd.f32 %v10860_v2, %v9931_v19  ;;  %v13499_v4 = vpop.f32.mrb[211].mxu1 }
 0x896   :  { %v9935_v29 = vmax.f32 %v9932_v17, 0.0 }
 0x898   :  { %13517 = vmatmul.mubr.msk.f32.vlgmr.msra.gmra.mrb[212].mxu1 %vm2283_vm4, %v9935_v29 }
 0x96b   :  { %v10020_v20 = vpop.f32.mrb[212].mxu1 }
 0x96c   :  { %v10021_v12 = vadd.f32 %v10861_v13, %v10020_v20  ;;  %v13518_v42 = vpop.f32.mrb[213].mxu1 }
 0x96e   :  { %v10025_v62 = vsel %vm10024_vm7, %v10021_v12, -inf }
 0x96f   :  { %10026 = vmax.xlane.f32.xlu0 %v10025_v62 }
 0x9fc   :  { %v10027_v33 = vpop.xlane.xlu0 %10026 }
 0x9fd   :  { %v10028_v10 = vsub.f32 %v10021_v12, %v10027_v33 }
 0x9ff   :  { %v10029_v52 = vmul.f32 1.442695, %v10028_v10 }
 0xa01   :  { %14623 = vpow2.f32 %v10029_v52 }
 0xa0b   :  { %v14624_v40 = vpop.eup %14623 }
 0xa0c   :  { %v10031_v15 = vsel %vm10024_vm7, %v14624_v40, 0.0 }
 0xa0d   :  { %10032 = vadd.xlane.f32.xlu0 %v10031_v15 }
 0xa9a   :  { %v10033_v48 = vpop.xlane.xlu0 %10032 }
 0xa9b   :  { %14625 = vlog2.f32 %v10033_v48 }
 0xaa5   :  { %v14626_v16 = vpop.eup %14625 }
 0xaa6   :  { %v10035_v7 = vmul.f32 0.6931472, %v14626_v16 }
 0xaa8   :  { %v10036_v5 = vadd.f32 %v10035_v7, %v10027_v33 }
 0xaaa   :  { %v10037_v35 = vsub.f32 %v10021_v12, %v10036_v5 }
 0xaac   :  { %10038 = vst.msk [vmem:[#allocation4] sm:$0x3] %vm10024_vm7, %v10037_v35 }
 0xaad   :  { %14638 = shalt.err (!%p14635_p4)
}
 0xaae   :  { %s14639_s5 = scalar_lea.hbm %s18615_s11, 32 }
 0xaaf   :  { %p14640_p5 = scmp.ne.s32.totalorder %s18615_s11, %s14639_s5  ;;  %p14643_p6 = scmp.lt.u32.totalorder %s14639_s5, %s18615_s11 }
 0xab1   :  { %p14645_p7 = pnand %p14643_p6, %p14640_p5 }
 0xab3   :  { %14648 = shalt.err (!%p14645_p7)
}
 0xab4   :  { %10048 = dma.vmem_to_hbm [thread:$0]  %s10046_s9, 32, %s18615_s11, [#allocation5]  }
 0xab5   :  { %14649 = dma.done.wait [#allocation5], 32  }
 0xab6   :  { %14650 = vsyncadd [#allocation5], 4294967264 }
 0xab7   :  { %10052 = vsyncpa [#allocation5], 1 }

</bundles_post_ra>
